<compile_context>
chip_gen: v6e
topology: v6e:2x2x1
jax: 0.10.0
libtpu: 0.0.40
codegen_flags: <defaults>
</compile_context>

<pallas_src>
import functools

import jax
import jax.numpy as jnp
from jax import lax
from jax.experimental import pallas as pl
from jax.experimental.pallas import tpu as pltpu

_BN_EPS = 1e-5


def _round_up(x, m):
    return (x + m - 1) // m * m


def _pick_band(h, w, max_m=1024):
    """Largest divisor of h such that the matmul M-tile band*w stays <= max_m."""
    best = 1
    for cand in range(1, h + 1):
        if h % cand == 0 and cand * w <= max(max_m, w):
            best = cand
    return best


def _tile_bytes(shape, dtype):
    """VMEM footprint of one buffer after (sublane, lane) tile padding."""
    itemsize = jnp.dtype(dtype).itemsize
    sublane = {4: 8, 2: 16, 1: 32}[itemsize]
    lead = 1
    for d in shape[:-2]:
        lead *= int(d)
    return (lead * _round_up(int(shape[-2]), sublane)
            * _round_up(int(shape[-1]), 128) * itemsize)


# ----------------- fused (conv3x3 + BN + ReLU) x 2 kernel ---------------------
def _vgg_block_kernel(x_ref, w1_ref, s1_ref, t1_ref, w2_ref, s2_ref, t2_ref,
                      o_ref, pad1, pad2, col1, col2, *, band):
    """One grid step = one image.  x_ref: (H, W, Cin) bf16; w*: (9*Cin, Cout)
    bf16; s*/t*: (1, C) f32 folded-BN scale/shift; o_ref: (H, W, Cout)."""
    H, W, cin = x_ref.shape
    cmid = w1_ref.shape[-1]
    cout = w2_ref.shape[-1]

    # One-time init: zero both padded slabs.  Their 1-pixel halo ring realizes
    # padding=1 for both convs and is never written again (every later store
    # only touches the interior), so this runs only on the first grid step.
    @pl.when(pl.program_id(0) == 0)
    def _init():
        pad1[...] = jnp.zeros_like(pad1)
        pad2[...] = jnp.zeros_like(pad2)

    # Stage this image into the interior of the first padded slab.
    pad1[pl.ds(1, H), pl.ds(1, W), :] = x_ref[...]

    s1 = s1_ref[...]
    t1 = t1_ref[...]
    s2 = s2_ref[...]
    t2 = t2_ref[...]

    def conv3x3_band(slab, col, w_ref, scale, shift, r0, c):
        # im2col: build the (band*W, 9*c) LHS in a VMEM scratch (bounds vreg
        # pressure at any H*W), then ONE K=9*c MXU matmul instead of nine
        # K=c accumulation passes.  All tap slices are static.
        for dy in range(3):
            for dx in range(3):
                patch = slab[pl.ds(r0 + dy, band), pl.ds(dx, W), :]
                col[:, pl.ds((dy * 3 + dx) * c, c)] = patch.reshape(band * W, c)
        acc = jnp.dot(col[...], w_ref[...], preferred_element_type=jnp.float32)
        return jnp.maximum(acc * scale + shift, 0.0)          # folded BN + ReLU

    # conv1 -> BN1 -> ReLU: written straight into the interior of the second
    # padded slab (the intermediate never round-trips through HBM).
    for r0 in range(0, H, band):
        h = conv3x3_band(pad1, col1, w1_ref, s1, t1, r0, cin)
        pad2[pl.ds(1 + r0, band), pl.ds(1, W), :] = (
            h.reshape(band, W, cmid).astype(pad2.dtype))

    # conv2 -> BN2 -> ReLU -> output block.
    # (Output block stays (H, W, Cout); at real VGG widths Cout >= 128 the
    # stores are already lane-dense, and an in-kernel (H*W,Cout)->(H,W*Cout)
    # relayout was judged too lowering-risky for the small-Cout case.)
    for r0 in range(0, H, band):
        y = conv3x3_band(pad2, col2, w2_ref, s2, t2, r0, cmid)
        o_ref[pl.ds(r0, band), :, :] = y.reshape(band, W, cout).astype(o_ref.dtype)


def vgg_block_conv_fused(x, w1, s1, t1, w2, s2, t2, *, out_dtype=jnp.float32):
    """x: (N, H, W, Cin) bf16; w1: (9*Cin, Cmid); w2: (9*Cmid, Cout) bf16;
    s*/t*: (1, C) f32.  Returns (N, H, W, Cout) out_dtype."""
    N, H, W, Cin = x.shape
    Cmid = w1.shape[-1]
    Cout = w2.shape[-1]
    band = _pick_band(H, W)

    # TODO(synk): for large images (e.g. 224x224x64 VGG stages) whole-image
    # blocks exceed v7x's 64 MiB VMEM; add a banded grid axis over H with a
    # 2-row halo DMA there.  At these shapes whole-image blocks are optimal.

    # Size the scoped-VMEM limit from the actual buffers (+3x headroom for
    # compiler-internal scratch) instead of a flat large cap.
    est = (2 * _tile_bytes((H, W, Cin), jnp.bfloat16)           # input block x2 (pipeline)
           + 2 * _tile_bytes((H, W, Cout), out_dtype)           # output block x2
           + 2 * (_tile_bytes((9 * Cin, Cmid), jnp.bfloat16)
                  + _tile_bytes((9 * Cmid, Cout), jnp.bfloat16))
           + 8 * _tile_bytes((1, max(Cmid, Cout)), jnp.float32)
           + _tile_bytes((H + 2, W + 2, Cin), jnp.bfloat16)
           + _tile_bytes((H + 2, W + 2, Cmid), jnp.bfloat16)
           + _tile_bytes((band * W, 9 * Cin), jnp.bfloat16)
           + _tile_bytes((band * W, 9 * Cmid), jnp.bfloat16))
    vmem_limit = int(min(64 * 2**20, max(16 * 2**20, 3 * est)))

    kernel = functools.partial(_vgg_block_kernel, band=band)
    return pl.pallas_call(
        kernel,
        out_shape=jax.ShapeDtypeStruct((N, H, W, Cout), out_dtype),
        grid_spec=pltpu.PrefetchScalarGridSpec(
            num_scalar_prefetch=0,
            grid=(N,),
            in_specs=[
                pl.BlockSpec((None, H, W, Cin), lambda n: (n, 0, 0, 0)),
                pl.BlockSpec((9 * Cin, Cmid), lambda n: (0, 0)),
                pl.BlockSpec((1, Cmid), lambda n: (0, 0)),
                pl.BlockSpec((1, Cmid), lambda n: (0, 0)),
                pl.BlockSpec((9 * Cmid, Cout), lambda n: (0, 0)),
                pl.BlockSpec((1, Cout), lambda n: (0, 0)),
                pl.BlockSpec((1, Cout), lambda n: (0, 0)),
            ],
            out_specs=pl.BlockSpec((None, H, W, Cout), lambda n: (n, 0, 0, 0)),
            scratch_shapes=[
                pltpu.VMEM((H + 2, W + 2, Cin), jnp.bfloat16),   # padded input slab
                pltpu.VMEM((H + 2, W + 2, Cmid), jnp.bfloat16),  # padded intermediate slab
                pltpu.VMEM((band * W, 9 * Cin), jnp.bfloat16),   # conv1 im2col LHS
                pltpu.VMEM((band * W, 9 * Cmid), jnp.bfloat16),  # conv2 im2col LHS
            ],
        ),
        compiler_params=pltpu.CompilerParams(
            # Batch axis stays "arbitrary": the halo zeros written at n == 0
            # are reused by every later grid step.
            # TODO(synk): on v7x, shard the batch across both TensorCores
            # (CORE_PARALLEL / pl.core_map) with per-core halo init.
            dimension_semantics=("arbitrary",),
            vmem_limit_bytes=vmem_limit),
    )(x, w1, s1, t1, w2, s2, t2)


# ------------------------------ parameters ------------------------------------
def _fold_bn(conv_bias, gamma, beta, mean, var, eps=_BN_EPS):
    scale = gamma / jnp.sqrt(var + eps)
    shift = beta + (conv_bias - mean) * scale
    return (scale.reshape(1, -1).astype(jnp.float32),
            shift.reshape(1, -1).astype(jnp.float32))


def init_params(key, in_ch, mid_ch, out_ch):
    ks = jax.random.split(key, 6)

    def conv_w(k, cin, cout):
        return (jax.random.normal(k, (3, 3, cin, cout), jnp.float32)
                * jnp.sqrt(2.0 / (9 * cin))).astype(jnp.bfloat16)

    def bn(k, c):
        k1, k2, k3, k4 = jax.random.split(k, 4)
        return dict(gamma=jax.random.uniform(k1, (c,), jnp.float32, 0.5, 1.5),
                    beta=0.1 * jax.random.normal(k2, (c,), jnp.float32),
                    mean=0.1 * jax.random.normal(k3, (c,), jnp.float32),
                    var=jax.random.uniform(k4, (c,), jnp.float32, 0.5, 1.5))

    return {
        "conv1_w": conv_w(ks[0], in_ch, mid_ch),
        "conv1_b": 0.1 * jax.random.normal(ks[1], (mid_ch,), jnp.float32),
        "bn1": bn(ks[2], mid_ch),
        "conv2_w": conv_w(ks[3], mid_ch, out_ch),
        "conv2_b": 0.1 * jax.random.normal(ks[4], (out_ch,), jnp.float32),
        "bn2": bn(ks[5], out_ch),
    }


# -------------------------------- forward -------------------------------------
def vgg_block_forward(params, x_nchw):
    # TODO(synk): BatchNorm is applied in eval mode (folded running statistics);
    # training-mode batch statistics / running-stat updates are not implemented.
    x = jnp.transpose(x_nchw, (0, 2, 3, 1)).astype(jnp.bfloat16)       # NCHW -> NHWC
    in_ch = x.shape[-1]
    mid_ch = params["conv1_w"].shape[-1]
    out_ch = params["conv2_w"].shape[-1]

    s1, t1 = _fold_bn(params["conv1_b"], params["bn1"]["gamma"], params["bn1"]["beta"],
                      params["bn1"]["mean"], params["bn1"]["var"])
    s2, t2 = _fold_bn(params["conv2_b"], params["bn2"]["gamma"], params["bn2"]["beta"],
                      params["bn2"]["mean"], params["bn2"]["var"])
    # (ky, kx, cin, cout) -> (9*cin, cout); row-major flatten matches the
    # dy-major / dx / cin ordering of the in-kernel im2col columns.
    w1 = params["conv1_w"].astype(jnp.bfloat16).reshape(9 * in_ch, mid_ch)
    w2 = params["conv2_w"].astype(jnp.bfloat16).reshape(9 * mid_ch, out_ch)

    y = vgg_block_conv_fused(x, w1, s1, t1, w2, s2, t2, out_dtype=jnp.float32)
    return jnp.transpose(y, (0, 3, 1, 2))                              # NHWC -> NCHW


def _reference_forward(params, x_nchw):
    # Pure-JAX reference mirroring the kernel's dtype handling (bf16 inputs and
    # weights, f32 accumulation, bf16 intermediate activation).
    def conv_bn_relu(x, w, bias, bn):
        y = lax.conv_general_dilated(
            x.astype(jnp.float32), w.astype(jnp.float32), (1, 1), "SAME",
            dimension_numbers=("NHWC", "HWIO", "NHWC"))
        y = y + bias.reshape(1, 1, 1, -1)
        y = (y - bn["mean"]) / jnp.sqrt(bn["var"] + _BN_EPS) * bn["gamma"] + bn["beta"]
        return jnp.maximum(y, 0.0)

    x = jnp.transpose(x_nchw, (0, 2, 3, 1)).astype(jnp.bfloat16)
    h = conv_bn_relu(x, params["conv1_w"], params["conv1_b"],
                     params["bn1"]).astype(jnp.bfloat16)
    y = conv_bn_relu(h, params["conv2_w"], params["conv2_b"], params["bn2"])
    return jnp.transpose(y, (0, 3, 1, 2)).astype(jnp.float32)


if __name__ == "__main__":
    N, IN_CH, MID_CH, OUT_CH, H, W = 2, 4, 32, 32, 16, 16

    key = jax.random.PRNGKey(0)
    kp, kx = jax.random.split(key)
    params = init_params(kp, IN_CH, MID_CH, OUT_CH)
    x = jax.random.normal(kx, (N, IN_CH, H, W), jnp.float32)

    fwd = jax.jit(vgg_block_forward)
    out = jax.block_until_ready(fwd(params, x))

    assert out.shape == (N, OUT_CH, H, W), out.shape
    assert bool(jnp.all(jnp.isfinite(out)))
    ref = _reference_forward(params, x)
    assert bool(jnp.allclose(out, ref, atol=5e-2, rtol=5e-2)), (
        float(jnp.max(jnp.abs(out - ref))))
    print("KERNEL_OK")
</pallas_src>

<mosaic_0001>
module attributes {stable_mosaic.version = 11 : i64} {
  func.func @_vgg_block_kernel(%arg0: i32, %arg1: memref<1x16x16x4xbf16, #tpu.memory_space<vmem>>, %arg2: memref<36x32xbf16, #tpu.memory_space<vmem>>, %arg3: memref<1x32xf32, #tpu.memory_space<vmem>>, %arg4: memref<1x32xf32, #tpu.memory_space<vmem>>, %arg5: memref<288x32xbf16, #tpu.memory_space<vmem>>, %arg6: memref<1x32xf32, #tpu.memory_space<vmem>>, %arg7: memref<1x32xf32, #tpu.memory_space<vmem>>, %arg8: memref<1x16x16x32xf32, #tpu.memory_space<vmem>>, %arg9: memref<18x18x4xbf16, #tpu.memory_space<vmem>>, %arg10: memref<18x18x32xbf16, #tpu.memory_space<vmem>>, %arg11: memref<256x36xbf16, #tpu.memory_space<vmem>>, %arg12: memref<256x288xbf16, #tpu.memory_space<vmem>>) attributes {dimension_semantics = [#tpu.dimension_semantics<arbitrary>], iteration_bounds = array<i64: 2>, scalar_prefetch = 0 : i64, scratch_operands = 4 : i64, tpu.core_type = #tpu.core_type<tc>, window_params = [{transform_indices = @transform_0, window_bounds = array<i64: 1, 16, 16, 4>}, {pipeline_mode = #tpu.pipeline_mode<synchronous>, transform_indices = @transform_1, window_bounds = array<i64: 36, 32>}, {pipeline_mode = #tpu.pipeline_mode<synchronous>, transform_indices = @transform_2, window_bounds = array<i64: 1, 32>}, {pipeline_mode = #tpu.pipeline_mode<synchronous>, transform_indices = @transform_3, window_bounds = array<i64: 1, 32>}, {pipeline_mode = #tpu.pipeline_mode<synchronous>, transform_indices = @transform_4, window_bounds = array<i64: 288, 32>}, {pipeline_mode = #tpu.pipeline_mode<synchronous>, transform_indices = @transform_5, window_bounds = array<i64: 1, 32>}, {pipeline_mode = #tpu.pipeline_mode<synchronous>, transform_indices = @transform_6, window_bounds = array<i64: 1, 32>}, {transform_indices = @transform_7, window_bounds = array<i64: 1, 16, 16, 32>}]} {
    %c0_i32 = arith.constant 0 : i32
    %0 = arith.cmpi eq, %arg0, %c0_i32 : i32
    %1 = arith.extui %0 : i1 to i32
    %c0_i32_0 = arith.constant 0 : i32
    %2 = arith.cmpi ne, %1, %c0_i32_0 : i32
    scf.if %2 {
      %cst_106 = arith.constant 0.000000e+00 : bf16
      %89 = vector.broadcast %cst_106 : bf16 to vector<18x18x4xbf16>
      %c0_107 = arith.constant 0 : index
      %c0_108 = arith.constant 0 : index
      %c0_109 = arith.constant 0 : index
      %90 = vector.load %arg9[%c0_107, %c0_108, %c0_109] : memref<18x18x4xbf16, #tpu.memory_space<vmem>>, vector<18x18x4xbf16>
      tpu.vector_store %arg9[%c0_107, %c0_108, %c0_109], %89 {strides = array<i32>} : memref<18x18x4xbf16, #tpu.memory_space<vmem>>, vector<18x18x4xbf16>,
      %cst_110 = arith.constant 0.000000e+00 : bf16
      %91 = vector.broadcast %cst_110 : bf16 to vector<18x18x32xbf16>
      %c0_111 = arith.constant 0 : index
      %c0_112 = arith.constant 0 : index
      %c0_113 = arith.constant 0 : index
      %92 = vector.load %arg10[%c0_111, %c0_112, %c0_113] : memref<18x18x32xbf16, #tpu.memory_space<vmem>>, vector<18x18x32xbf16>
      tpu.vector_store %arg10[%c0_111, %c0_112, %c0_113], %91 {strides = array<i32>} : memref<18x18x32xbf16, #tpu.memory_space<vmem>>, vector<18x18x32xbf16>,
    } else {
    }
    %c0 = arith.constant 0 : index
    %c0_1 = arith.constant 0 : index
    %c0_2 = arith.constant 0 : index
    %c0_3 = arith.constant 0 : index
    %3 = vector.load %arg1[%c0, %c0_1, %c0_2, %c0_3] : memref<1x16x16x4xbf16, #tpu.memory_space<vmem>>, vector<1x16x16x4xbf16>
    %4 = vector.shape_cast %3 : vector<1x16x16x4xbf16> to vector<16x16x4xbf16>
    %c1 = arith.constant 1 : index
    %c1_4 = arith.constant 1 : index
    %c0_5 = arith.constant 0 : index
    %5 = vector.load %arg9[%c1, %c1_4, %c0_5] : memref<18x18x4xbf16, #tpu.memory_space<vmem>>, vector<16x16x4xbf16>
    tpu.vector_store %arg9[%c1, %c1_4, %c0_5], %4 {strides = array<i32>} : memref<18x18x4xbf16, #tpu.memory_space<vmem>>, vector<16x16x4xbf16>,
    %c0_6 = arith.constant 0 : index
    %c0_7 = arith.constant 0 : index
    %6 = vector.load %arg3[%c0_6, %c0_7] : memref<1x32xf32, #tpu.memory_space<vmem>>, vector<1x32xf32>
    %c0_8 = arith.constant 0 : index
    %c0_9 = arith.constant 0 : index
    %7 = vector.load %arg4[%c0_8, %c0_9] : memref<1x32xf32, #tpu.memory_space<vmem>>, vector<1x32xf32>
    %c0_10 = arith.constant 0 : index
    %c0_11 = arith.constant 0 : index
    %8 = vector.load %arg6[%c0_10, %c0_11] : memref<1x32xf32, #tpu.memory_space<vmem>>, vector<1x32xf32>
    %c0_12 = arith.constant 0 : index
    %c0_13 = arith.constant 0 : index
    %9 = vector.load %arg7[%c0_12, %c0_13] : memref<1x32xf32, #tpu.memory_space<vmem>>, vector<1x32xf32>
    %c0_14 = arith.constant 0 : index
    %c0_15 = arith.constant 0 : index
    %c0_16 = arith.constant 0 : index
    %10 = vector.load %arg9[%c0_14, %c0_15, %c0_16] : memref<18x18x4xbf16, #tpu.memory_space<vmem>>, vector<16x16x4xbf16>
    %11 = vector.shape_cast %10 : vector<16x16x4xbf16> to vector<256x4xbf16>
    %c0_17 = arith.constant 0 : index
    %c0_18 = arith.constant 0 : index
    %12 = vector.load %arg11[%c0_17, %c0_18] : memref<256x36xbf16, #tpu.memory_space<vmem>>, vector<256x4xbf16>
    tpu.vector_store %arg11[%c0_17, %c0_18], %11 {strides = array<i32>} : memref<256x36xbf16, #tpu.memory_space<vmem>>, vector<256x4xbf16>,
    %c0_19 = arith.constant 0 : index
    %c1_20 = arith.constant 1 : index
    %c0_21 = arith.constant 0 : index
    %13 = vector.load %arg9[%c0_19, %c1_20, %c0_21] : memref<18x18x4xbf16, #tpu.memory_space<vmem>>, vector<16x16x4xbf16>
    %14 = vector.shape_cast %13 : vector<16x16x4xbf16> to vector<256x4xbf16>
    %c0_22 = arith.constant 0 : index
    %c4 = arith.constant 4 : index
    %15 = vector.load %arg11[%c0_22, %c4] : memref<256x36xbf16, #tpu.memory_space<vmem>>, vector<256x4xbf16>
    tpu.vector_store %arg11[%c0_22, %c4], %14 {strides = array<i32>} : memref<256x36xbf16, #tpu.memory_space<vmem>>, vector<256x4xbf16>,
    %c0_23 = arith.constant 0 : index
    %c2 = arith.constant 2 : index
    %c0_24 = arith.constant 0 : index
    %16 = vector.load %arg9[%c0_23, %c2, %c0_24] : memref<18x18x4xbf16, #tpu.memory_space<vmem>>, vector<16x16x4xbf16>
    %17 = vector.shape_cast %16 : vector<16x16x4xbf16> to vector<256x4xbf16>
    %c0_25 = arith.constant 0 : index
    %c8 = arith.constant 8 : index
    %18 = vector.load %arg11[%c0_25, %c8] : memref<256x36xbf16, #tpu.memory_space<vmem>>, vector<256x4xbf16>
    tpu.vector_store %arg11[%c0_25, %c8], %17 {strides = array<i32>} : memref<256x36xbf16, #tpu.memory_space<vmem>>, vector<256x4xbf16>,
    %c1_26 = arith.constant 1 : index
    %c0_27 = arith.constant 0 : index
    %c0_28 = arith.constant 0 : index
    %19 = vector.load %arg9[%c1_26, %c0_27, %c0_28] : memref<18x18x4xbf16, #tpu.memory_space<vmem>>, vector<16x16x4xbf16>
    %20 = vector.shape_cast %19 : vector<16x16x4xbf16> to vector<256x4xbf16>
    %c0_29 = arith.constant 0 : index
    %c12 = arith.constant 12 : index
    %21 = vector.load %arg11[%c0_29, %c12] : memref<256x36xbf16, #tpu.memory_space<vmem>>, vector<256x4xbf16>
    tpu.vector_store %arg11[%c0_29, %c12], %20 {strides = array<i32>} : memref<256x36xbf16, #tpu.memory_space<vmem>>, vector<256x4xbf16>,
    %c1_30 = arith.constant 1 : index
    %c1_31 = arith.constant 1 : index
    %c0_32 = arith.constant 0 : index
    %22 = vector.load %arg9[%c1_30, %c1_31, %c0_32] : memref<18x18x4xbf16, #tpu.memory_space<vmem>>, vector<16x16x4xbf16>
    %23 = vector.shape_cast %22 : vector<16x16x4xbf16> to vector<256x4xbf16>
    %c0_33 = arith.constant 0 : index
    %c16 = arith.constant 16 : index
    %24 = vector.load %arg11[%c0_33, %c16] : memref<256x36xbf16, #tpu.memory_space<vmem>>, vector<256x4xbf16>
    tpu.vector_store %arg11[%c0_33, %c16], %23 {strides = array<i32>} : memref<256x36xbf16, #tpu.memory_space<vmem>>, vector<256x4xbf16>,
    %c1_34 = arith.constant 1 : index
    %c2_35 = arith.constant 2 : index
    %c0_36 = arith.constant 0 : index
    %25 = vector.load %arg9[%c1_34, %c2_35, %c0_36] : memref<18x18x4xbf16, #tpu.memory_space<vmem>>, vector<16x16x4xbf16>
    %26 = vector.shape_cast %25 : vector<16x16x4xbf16> to vector<256x4xbf16>
    %c0_37 = arith.constant 0 : index
    %c20 = arith.constant 20 : index
    %27 = vector.load %arg11[%c0_37, %c20] : memref<256x36xbf16, #tpu.memory_space<vmem>>, vector<256x4xbf16>
    tpu.vector_store %arg11[%c0_37, %c20], %26 {strides = array<i32>} : memref<256x36xbf16, #tpu.memory_space<vmem>>, vector<256x4xbf16>,
    %c2_38 = arith.constant 2 : index
    %c0_39 = arith.constant 0 : index
    %c0_40 = arith.constant 0 : index
    %28 = vector.load %arg9[%c2_38, %c0_39, %c0_40] : memref<18x18x4xbf16, #tpu.memory_space<vmem>>, vector<16x16x4xbf16>
    %29 = vector.shape_cast %28 : vector<16x16x4xbf16> to vector<256x4xbf16>
    %c0_41 = arith.constant 0 : index
    %c24 = arith.constant 24 : index
    %30 = vector.load %arg11[%c0_41, %c24] : memref<256x36xbf16, #tpu.memory_space<vmem>>, vector<256x4xbf16>
    tpu.vector_store %arg11[%c0_41, %c24], %29 {strides = array<i32>} : memref<256x36xbf16, #tpu.memory_space<vmem>>, vector<256x4xbf16>,
    %c2_42 = arith.constant 2 : index
    %c1_43 = arith.constant 1 : index
    %c0_44 = arith.constant 0 : index
    %31 = vector.load %arg9[%c2_42, %c1_43, %c0_44] : memref<18x18x4xbf16, #tpu.memory_space<vmem>>, vector<16x16x4xbf16>
    %32 = vector.shape_cast %31 : vector<16x16x4xbf16> to vector<256x4xbf16>
    %c0_45 = arith.constant 0 : index
    %c28 = arith.constant 28 : index
    %33 = vector.load %arg11[%c0_45, %c28] : memref<256x36xbf16, #tpu.memory_space<vmem>>, vector<256x4xbf16>
    tpu.vector_store %arg11[%c0_45, %c28], %32 {strides = array<i32>} : memref<256x36xbf16, #tpu.memory_space<vmem>>, vector<256x4xbf16>,
    %c2_46 = arith.constant 2 : index
    %c2_47 = arith.constant 2 : index
    %c0_48 = arith.constant 0 : index
    %34 = vector.load %arg9[%c2_46, %c2_47, %c0_48] : memref<18x18x4xbf16, #tpu.memory_space<vmem>>, vector<16x16x4xbf16>
    %35 = vector.shape_cast %34 : vector<16x16x4xbf16> to vector<256x4xbf16>
    %c0_49 = arith.constant 0 : index
    %c32 = arith.constant 32 : index
    %36 = vector.load %arg11[%c0_49, %c32] : memref<256x36xbf16, #tpu.memory_space<vmem>>, vector<256x4xbf16>
    tpu.vector_store %arg11[%c0_49, %c32], %35 {strides = array<i32>} : memref<256x36xbf16, #tpu.memory_space<vmem>>, vector<256x4xbf16>,
    %c0_50 = arith.constant 0 : index
    %c0_51 = arith.constant 0 : index
    %37 = vector.load %arg11[%c0_50, %c0_51] : memref<256x36xbf16, #tpu.memory_space<vmem>>, vector<256x36xbf16>
    %c0_52 = arith.constant 0 : index
    %c0_53 = arith.constant 0 : index
    %38 = vector.load %arg2[%c0_52, %c0_53] : memref<36x32xbf16, #tpu.memory_space<vmem>>, vector<36x32xbf16>
    %cst = arith.constant dense<0.000000e+00> : vector<256x32xf32>
    %39 = tpu.matmul %37, %38, %cst {dimension_numbers = #tpu.dot_dimension_numbers<[1], [0], [0], [1], [0, 0, 1, 1], [], []>} : vector<256x36xbf16>, vector<36x32xbf16>, vector<256x32xf32> -> vector<256x32xf32>
    %40 = vector.broadcast %6 : vector<1x32xf32> to vector<256x32xf32>
    %41 = arith.mulf %39, %40 : vector<256x32xf32>
    %42 = vector.broadcast %7 : vector<1x32xf32> to vector<256x32xf32>
    %43 = arith.addf %41, %42 : vector<256x32xf32>
    %cst_54 = arith.constant 0.000000e+00 : f32
    %44 = vector.broadcast %cst_54 : f32 to vector<256x32xf32>
    %45 = arith.maximumf %43, %44 : vector<256x32xf32>
    %46 = vector.shape_cast %45 : vector<256x32xf32> to vector<16x16x32xf32>
    %47 = arith.truncf %46 : vector<16x16x32xf32> to vector<16x16x32xbf16>
    %c1_55 = arith.constant 1 : index
    %c1_56 = arith.constant 1 : index
    %c0_57 = arith.constant 0 : index
    %48 = vector.load %arg10[%c1_55, %c1_56, %c0_57] : memref<18x18x32xbf16, #tpu.memory_space<vmem>>, vector<16x16x32xbf16>
    tpu.vector_store %arg10[%c1_55, %c1_56, %c0_57], %47 {strides = array<i32>} : memref<18x18x32xbf16, #tpu.memory_space<vmem>>, vector<16x16x32xbf16>,
    %c0_58 = arith.constant 0 : index
    %c0_59 = arith.constant 0 : index
    %c0_60 = arith.constant 0 : index
    %49 = vector.load %arg10[%c0_58, %c0_59, %c0_60] : memref<18x18x32xbf16, #tpu.memory_space<vmem>>, vector<16x16x32xbf16>
    %50 = vector.shape_cast %49 : vector<16x16x32xbf16> to vector<256x32xbf16>
    %c0_61 = arith.constant 0 : index
    %c0_62 = arith.constant 0 : index
    %51 = vector.load %arg12[%c0_61, %c0_62] : memref<256x288xbf16, #tpu.memory_space<vmem>>, vector<256x32xbf16>
    tpu.vector_store %arg12[%c0_61, %c0_62], %50 {strides = array<i32>} : memref<256x288xbf16, #tpu.memory_space<vmem>>, vector<256x32xbf16>,
    %c0_63 = arith.constant 0 : index
    %c1_64 = arith.constant 1 : index
    %c0_65 = arith.constant 0 : index
    %52 = vector.load %arg10[%c0_63, %c1_64, %c0_65] : memref<18x18x32xbf16, #tpu.memory_space<vmem>>, vector<16x16x32xbf16>
    %53 = vector.shape_cast %52 : vector<16x16x32xbf16> to vector<256x32xbf16>
    %c0_66 = arith.constant 0 : index
    %c32_67 = arith.constant 32 : index
    %54 = vector.load %arg12[%c0_66, %c32_67] : memref<256x288xbf16, #tpu.memory_space<vmem>>, vector<256x32xbf16>
    tpu.vector_store %arg12[%c0_66, %c32_67], %53 {strides = array<i32>} : memref<256x288xbf16, #tpu.memory_space<vmem>>, vector<256x32xbf16>,
    %c0_68 = arith.constant 0 : index
    %c2_69 = arith.constant 2 : index
    %c0_70 = arith.constant 0 : index
    %55 = vector.load %arg10[%c0_68, %c2_69, %c0_70] : memref<18x18x32xbf16, #tpu.memory_space<vmem>>, vector<16x16x32xbf16>
    %56 = vector.shape_cast %55 : vector<16x16x32xbf16> to vector<256x32xbf16>
    %c0_71 = arith.constant 0 : index
    %c64 = arith.constant 64 : index
    %57 = vector.load %arg12[%c0_71, %c64] : memref<256x288xbf16, #tpu.memory_space<vmem>>, vector<256x32xbf16>
    tpu.vector_store %arg12[%c0_71, %c64], %56 {strides = array<i32>} : memref<256x288xbf16, #tpu.memory_space<vmem>>, vector<256x32xbf16>,
    %c1_72 = arith.constant 1 : index
    %c0_73 = arith.constant 0 : index
    %c0_74 = arith.constant 0 : index
    %58 = vector.load %arg10[%c1_72, %c0_73, %c0_74] : memref<18x18x32xbf16, #tpu.memory_space<vmem>>, vector<16x16x32xbf16>
    %59 = vector.shape_cast %58 : vector<16x16x32xbf16> to vector<256x32xbf16>
    %c0_75 = arith.constant 0 : index
    %c96 = arith.constant 96 : index
    %60 = vector.load %arg12[%c0_75, %c96] : memref<256x288xbf16, #tpu.memory_space<vmem>>, vector<256x32xbf16>
    tpu.vector_store %arg12[%c0_75, %c96], %59 {strides = array<i32>} : memref<256x288xbf16, #tpu.memory_space<vmem>>, vector<256x32xbf16>,
    %c1_76 = arith.constant 1 : index
    %c1_77 = arith.constant 1 : index
    %c0_78 = arith.constant 0 : index
    %61 = vector.load %arg10[%c1_76, %c1_77, %c0_78] : memref<18x18x32xbf16, #tpu.memory_space<vmem>>, vector<16x16x32xbf16>
    %62 = vector.shape_cast %61 : vector<16x16x32xbf16> to vector<256x32xbf16>
    %c0_79 = arith.constant 0 : index
    %c128 = arith.constant 128 : index
    %63 = vector.load %arg12[%c0_79, %c128] : memref<256x288xbf16, #tpu.memory_space<vmem>>, vector<256x32xbf16>
    tpu.vector_store %arg12[%c0_79, %c128], %62 {strides = array<i32>} : memref<256x288xbf16, #tpu.memory_space<vmem>>, vector<256x32xbf16>,
    %c1_80 = arith.constant 1 : index
    %c2_81 = arith.constant 2 : index
    %c0_82 = arith.constant 0 : index
    %64 = vector.load %arg10[%c1_80, %c2_81, %c0_82] : memref<18x18x32xbf16, #tpu.memory_space<vmem>>, vector<16x16x32xbf16>
    %65 = vector.shape_cast %64 : vector<16x16x32xbf16> to vector<256x32xbf16>
    %c0_83 = arith.constant 0 : index
    %c160 = arith.constant 160 : index
    %66 = vector.load %arg12[%c0_83, %c160] : memref<256x288xbf16, #tpu.memory_space<vmem>>, vector<256x32xbf16>
    tpu.vector_store %arg12[%c0_83, %c160], %65 {strides = array<i32>} : memref<256x288xbf16, #tpu.memory_space<vmem>>, vector<256x32xbf16>,
    %c2_84 = arith.constant 2 : index
    %c0_85 = arith.constant 0 : index
    %c0_86 = arith.constant 0 : index
    %67 = vector.load %arg10[%c2_84, %c0_85, %c0_86] : memref<18x18x32xbf16, #tpu.memory_space<vmem>>, vector<16x16x32xbf16>
    %68 = vector.shape_cast %67 : vector<16x16x32xbf16> to vector<256x32xbf16>
    %c0_87 = arith.constant 0 : index
    %c192 = arith.constant 192 : index
    %69 = vector.load %arg12[%c0_87, %c192] : memref<256x288xbf16, #tpu.memory_space<vmem>>, vector<256x32xbf16>
    tpu.vector_store %arg12[%c0_87, %c192], %68 {strides = array<i32>} : memref<256x288xbf16, #tpu.memory_space<vmem>>, vector<256x32xbf16>,
    %c2_88 = arith.constant 2 : index
    %c1_89 = arith.constant 1 : index
    %c0_90 = arith.constant 0 : index
    %70 = vector.load %arg10[%c2_88, %c1_89, %c0_90] : memref<18x18x32xbf16, #tpu.memory_space<vmem>>, vector<16x16x32xbf16>
    %71 = vector.shape_cast %70 : vector<16x16x32xbf16> to vector<256x32xbf16>
    %c0_91 = arith.constant 0 : index
    %c224 = arith.constant 224 : index
    %72 = vector.load %arg12[%c0_91, %c224] : memref<256x288xbf16, #tpu.memory_space<vmem>>, vector<256x32xbf16>
    tpu.vector_store %arg12[%c0_91, %c224], %71 {strides = array<i32>} : memref<256x288xbf16, #tpu.memory_space<vmem>>, vector<256x32xbf16>,
    %c2_92 = arith.constant 2 : index
    %c2_93 = arith.constant 2 : index
    %c0_94 = arith.constant 0 : index
    %73 = vector.load %arg10[%c2_92, %c2_93, %c0_94] : memref<18x18x32xbf16, #tpu.memory_space<vmem>>, vector<16x16x32xbf16>
    %74 = vector.shape_cast %73 : vector<16x16x32xbf16> to vector<256x32xbf16>
    %c0_95 = arith.constant 0 : index
    %c256 = arith.constant 256 : index
    %75 = vector.load %arg12[%c0_95, %c256] : memref<256x288xbf16, #tpu.memory_space<vmem>>, vector<256x32xbf16>
    tpu.vector_store %arg12[%c0_95, %c256], %74 {strides = array<i32>} : memref<256x288xbf16, #tpu.memory_space<vmem>>, vector<256x32xbf16>,
    %c0_96 = arith.constant 0 : index
    %c0_97 = arith.constant 0 : index
    %76 = vector.load %arg12[%c0_96, %c0_97] : memref<256x288xbf16, #tpu.memory_space<vmem>>, vector<256x288xbf16>
    %c0_98 = arith.constant 0 : index
    %c0_99 = arith.constant 0 : index
    %77 = vector.load %arg5[%c0_98, %c0_99] : memref<288x32xbf16, #tpu.memory_space<vmem>>, vector<288x32xbf16>
    %cst_100 = arith.constant dense<0.000000e+00> : vector<256x32xf32>
    %78 = tpu.matmul %76, %77, %cst_100 {dimension_numbers = #tpu.dot_dimension_numbers<[1], [0], [0], [1], [0, 0, 1, 1], [], []>} : vector<256x288xbf16>, vector<288x32xbf16>, vector<256x32xf32> -> vector<256x32xf32>
    %79 = vector.broadcast %8 : vector<1x32xf32> to vector<256x32xf32>
    %80 = arith.mulf %78, %79 : vector<256x32xf32>
    %81 = vector.broadcast %9 : vector<1x32xf32> to vector<256x32xf32>
    %82 = arith.addf %80, %81 : vector<256x32xf32>
    %cst_101 = arith.constant 0.000000e+00 : f32
    %83 = vector.broadcast %cst_101 : f32 to vector<256x32xf32>
    %84 = arith.maximumf %82, %83 : vector<256x32xf32>
    %85 = vector.shape_cast %84 : vector<256x32xf32> to vector<16x16x32xf32>
    %c0_102 = arith.constant 0 : index
    %c0_103 = arith.constant 0 : index
    %c0_104 = arith.constant 0 : index
    %c0_105 = arith.constant 0 : index
    %86 = vector.load %arg8[%c0_102, %c0_103, %c0_104, %c0_105] : memref<1x16x16x32xf32, #tpu.memory_space<vmem>>, vector<1x16x16x32xf32>
    %87 = vector.shape_cast %86 : vector<1x16x16x32xf32> to vector<16x16x32xf32>
    %88 = vector.shape_cast %85 : vector<16x16x32xf32> to vector<1x16x16x32xf32>
    tpu.vector_store %arg8[%c0_102, %c0_103, %c0_104, %c0_105], %88 {strides = array<i32>} : memref<1x16x16x32xf32, #tpu.memory_space<vmem>>, vector<1x16x16x32xf32>,
    return
  }
  func.func @transform_0(%arg0: i32) -> (i32, i32, i32, i32) {
    %c0_i32 = arith.constant 0 : i32
    %c0_i32_0 = arith.constant 0 : i32
    %c0_i32_1 = arith.constant 0 : i32
    %c0_i32_2 = arith.constant 0 : i32
    return %arg0, %c0_i32, %c0_i32_0, %c0_i32_1 : i32, i32, i32, i32
  }
  func.func @transform_1(%arg0: i32) -> (i32, i32) {
    %c0_i32 = arith.constant 0 : i32
    %c0_i32_0 = arith.constant 0 : i32
    %c0_i32_1 = arith.constant 0 : i32
    return %c0_i32, %c0_i32_0 : i32, i32
  }
  func.func @transform_2(%arg0: i32) -> (i32, i32) {
    %c0_i32 = arith.constant 0 : i32
    %c0_i32_0 = arith.constant 0 : i32
    %c0_i32_1 = arith.constant 0 : i32
    return %c0_i32, %c0_i32_0 : i32, i32
  }
  func.func @transform_3(%arg0: i32) -> (i32, i32) {
    %c0_i32 = arith.constant 0 : i32
    %c0_i32_0 = arith.constant 0 : i32
    %c0_i32_1 = arith.constant 0 : i32
    return %c0_i32, %c0_i32_0 : i32, i32
  }
  func.func @transform_4(%arg0: i32) -> (i32, i32) {
    %c0_i32 = arith.constant 0 : i32
    %c0_i32_0 = arith.constant 0 : i32
    %c0_i32_1 = arith.constant 0 : i32
    return %c0_i32, %c0_i32_0 : i32, i32
  }
  func.func @transform_5(%arg0: i32) -> (i32, i32) {
    %c0_i32 = arith.constant 0 : i32
    %c0_i32_0 = arith.constant 0 : i32
    %c0_i32_1 = arith.constant 0 : i32
    return %c0_i32, %c0_i32_0 : i32, i32
  }
  func.func @transform_6(%arg0: i32) -> (i32, i32) {
    %c0_i32 = arith.constant 0 : i32
    %c0_i32_0 = arith.constant 0 : i32
    %c0_i32_1 = arith.constant 0 : i32
    return %c0_i32, %c0_i32_0 : i32, i32
  }
  func.func @transform_7(%arg0: i32) -> (i32, i32, i32, i32) {
    %c0_i32 = arith.constant 0 : i32
    %c0_i32_0 = arith.constant 0 : i32
    %c0_i32_1 = arith.constant 0 : i32
    %c0_i32_2 = arith.constant 0 : i32
    return %arg0, %c0_i32, %c0_i32_0, %c0_i32_1 : i32, i32, i32, i32
  }
}

</mosaic_0001>

<bundles_post_ra>
// kernel: vgg_block_forward.1
= control target key start
LH: loop header
LB: loop body
LE: loop exit
PB: predicated region body
PF: predicated region fallthrough
CT: control target
= control target key end

     0   :  { %12 = vsyncpa [#allocation7], 0  ;;  %s13565_s0 = inlined_call_operand.vmem [shape: bf16[2,16,16,4], index: 0, kind: input, shape index: {}]   ;;  %s13566_s1 = inlined_call_operand.vmem [shape: bf16[36,32], index: 1, kind: input, shape index: {}]   ;;  %s13567_s2 = inlined_call_operand.vmem [shape: f32[1,32], index: 2, kind: input, shape index: {}]   ;;  %s13568_s3 = inlined_call_operand.vmem [shape: f32[1,32], index: 3, kind: input, shape index: {}]   ;;  %s13569_s4 = inlined_call_operand.vmem [shape: bf16[288,32], index: 4, kind: input, shape index: {}]   ;;  %s13570_s5 = inlined_call_operand.vmem [shape: f32[1,32], index: 5, kind: input, shape index: {}]   ;;  %s13571_s6 = inlined_call_operand.vmem [shape: f32[1,32], index: 6, kind: input, shape index: {}]   ;;  %s13572_s7 = inlined_call_operand.hbm [shape: f32[2,16,16,32], index: 7, kind: output, shape index: {}]  }
   0x1   :  { %14 = vsyncpa [#allocation7 + $0x1], 0  ;;  %s9867_s24 = smov 0   ;;  %s9869_s25 = smov 0  }
   0x2   :  { %s9871_s26 = smov 0   ;;  %s9873_s27 = smov 0  }
   0x3 LB: > { %s9888_s28 = sadd.s32 4294967295, %s9812_s27   ;;  %s9058_s29 = sadd.s32 4294967294, %s9812_s27   ;;  %s9812_s27 = sphi %s9873_s27, %s13618_s27   ;;  %s9808_s26 = sphi %s9871_s26, %s13617_s26   ;;  %s9804_s25 = sphi %s9869_s25, %s13616_s25   ;;  %s9800_s24 = sphi %s9867_s24, %s13615_s24  }
   0x4   : > { %s9892_s30 = sadd.s32 1, %s9812_s27   ;;  %s179_s8 = sadd.s32 1, %s9808_s26 }
   0x5   : > { %s176_s9 = ssub.s32 %s9812_s27, %s9892_s30  ;;  %p189_p0 = scmp.ne.s32.totalorder %s9808_s26, %s9804_s25 }
   0x6   : > { %p177_p1 = scmp.eq.s32.totalorder %s176_s9, 0  ;;  %p190_p2 = scmp.eq.s32.totalorder %s9888_s28, 1 }
   0x7   : > { %p195_p3 = scmp.ne.s32.totalorder %s9804_s25, %s9800_s24  ;;  %p196_p4 = scmp.eq.s32.totalorder %s9058_s29, 1 }
   0x8   : > { %s9903_s10 = scalar_select %p177_p1, %s9808_s26, %s179_s8  }
   0x9   : > { %p9905_p5 = por %p190_p2, %p189_p0  ;;  %p9909_p6 = por %p196_p4, %p195_p3 }
   0xa   : > { %p9061_p7 = scmp.ge.s32.totalorder %s9812_s27, 1  ;;  %p240_p8 = scmp.lt.s32.totalorder %s9812_s27, 3 }
   0xc   : > { %p241_p9 = pnand %p9061_p7, %p240_p8 }
   0xd   : > { %s269_s13 = sand.u32 (!%p241_p9), 1, %s9804_s25   ;;  %p272_p10 = scmp.lt.s32.totalorder (!%p241_p9), %s9888_s28, 1 }
   0xe   : > { %244 = sbr.rel (%p241_p9) target bundleno = 1518 (0x5ee), region = 48  ;;  %s9062_s14 = sshll.u32 (!%p241_p9), %s269_s13, 8 }
   0xf   : > { %s9925_s20 = scalar_lea.vmem (!%p241_p9), [#allocation6], %s9062_s14  ;;  %p9065_p11 = scmp.ne.s32.totalorder (!%p241_p9), %s9888_s28, 0 }
  0x13   : > { %s273_s15 = scalar_select %p272_p10, %s9888_s28, 1 }
  0x14   : > { %281 = sbr.rel (%p9065_p11) target bundleno = 80 (0x50), region = 52 }
  0x15   : > { %s9320_s16 = sshll.u32 %s273_s15, 7 }
  0x16   : > { %s9923_s19 = scalar_lea.vmem %s13565_s0, %s9320_s16 }
  0x19   : > { %vm282_vm0 = vcmask 27648   ;;  %vm285_vm1 = vcmask 24576   ;;  %vm338_vm2 = vcmask 257024   ;;  %v9814_v0 = vmov 0  }
  0x1a   : > { %283 = vst.msk [vmem:[#allocation2] sm:$0xf] %vm282_vm0, %v9814_v0  ;;  %284 = vst.msk [vmem:[#allocation2 + $0x4] sm:$0xf] %vm282_vm0, %v9814_v0  ;;  %vm341_vm3 = vcmask 253952  }
  0x1b   : > { %287 = vst.msk [vmem:[#allocation2 + $0xc] sm:$0xf] %vm282_vm0, %v9814_v0  ;;  %288 = vst.msk [vmem:[#allocation2 + $0x10] sm:$0xf] %vm282_vm0, %v9814_v0 }
  0x1c   : > { %290 = vst.msk [vmem:[#allocation2 + $0x18] sm:$0xf] %vm282_vm0, %v9814_v0  ;;  %291 = vst.msk [vmem:[#allocation2 + $0x1c] sm:$0xf] %vm282_vm0, %v9814_v0 }
  0x1d   : > { %293 = vst.msk [vmem:[#allocation2 + $0x24] sm:$0xf] %vm282_vm0, %v9814_v0  ;;  %294 = vst.msk [vmem:[#allocation2 + $0x28] sm:$0xf] %vm282_vm0, %v9814_v0 }
  0x1e   : > { %296 = vst.msk [vmem:[#allocation2 + $0x30] sm:$0xf] %vm282_vm0, %v9814_v0  ;;  %297 = vst.msk [vmem:[#allocation2 + $0x34] sm:$0xf] %vm282_vm0, %v9814_v0 }
  0x1f   : > { %299 = vst.msk [vmem:[#allocation2 + $0x3c] sm:$0xf] %vm282_vm0, %v9814_v0  ;;  %300 = vst.msk [vmem:[#allocation2 + $0x40] sm:$0xf] %vm282_vm0, %v9814_v0 }
  0x20   : > { %302 = vst.msk [vmem:[#allocation2 + $0x48] sm:$0xf] %vm282_vm0, %v9814_v0  ;;  %303 = vst.msk [vmem:[#allocation2 + $0x4c] sm:$0xf] %vm282_vm0, %v9814_v0 }
  0x21   : > { %305 = vst.msk [vmem:[#allocation2 + $0x54] sm:$0xf] %vm282_vm0, %v9814_v0  ;;  %306 = vst.msk [vmem:[#allocation2 + $0x58] sm:$0xf] %vm282_vm0, %v9814_v0 }
  0x22   : > { %308 = vst.msk [vmem:[#allocation2 + $0x60] sm:$0xf] %vm282_vm0, %v9814_v0  ;;  %309 = vst.msk [vmem:[#allocation2 + $0x64] sm:$0xf] %vm282_vm0, %v9814_v0 }
  0x23   : > { %311 = vst.msk [vmem:[#allocation2 + $0x6c] sm:$0xf] %vm282_vm0, %v9814_v0  ;;  %312 = vst.msk [vmem:[#allocation2 + $0x70] sm:$0xf] %vm282_vm0, %v9814_v0 }
  0x24   : > { %314 = vst.msk [vmem:[#allocation2 + $0x78] sm:$0xf] %vm282_vm0, %v9814_v0  ;;  %315 = vst.msk [vmem:[#allocation2 + $0x7c] sm:$0xf] %vm282_vm0, %v9814_v0 }
  0x25   : > { %317 = vst.msk [vmem:[#allocation2 + $0x84] sm:$0xf] %vm282_vm0, %v9814_v0  ;;  %318 = vst.msk [vmem:[#allocation2 + $0x88] sm:$0xf] %vm282_vm0, %v9814_v0 }
  0x26   : > { %320 = vst.msk [vmem:[#allocation2 + $0x90] sm:$0xf] %vm282_vm0, %v9814_v0  ;;  %321 = vst.msk [vmem:[#allocation2 + $0x94] sm:$0xf] %vm282_vm0, %v9814_v0 }
  0x27   : > { %323 = vst.msk [vmem:[#allocation2 + $0x9c] sm:$0xf] %vm282_vm0, %v9814_v0  ;;  %324 = vst.msk [vmem:[#allocation2 + $0xa0] sm:$0xf] %vm282_vm0, %v9814_v0 }
  0x28   : > { %326 = vst.msk [vmem:[#allocation2 + $0xa8] sm:$0xf] %vm282_vm0, %v9814_v0  ;;  %327 = vst.msk [vmem:[#allocation2 + $0xac] sm:$0xf] %vm282_vm0, %v9814_v0 }
  0x29   : > { %329 = vst.msk [vmem:[#allocation2 + $0xb4] sm:$0xf] %vm282_vm0, %v9814_v0  ;;  %330 = vst.msk [vmem:[#allocation2 + $0xb8] sm:$0xf] %vm282_vm0, %v9814_v0 }
  0x2a   : > { %332 = vst.msk [vmem:[#allocation2 + $0xc0] sm:$0xf] %vm282_vm0, %v9814_v0  ;;  %333 = vst.msk [vmem:[#allocation2 + $0xc4] sm:$0xf] %vm282_vm0, %v9814_v0 }
  0x2b   : > { %335 = vst.msk [vmem:[#allocation2 + $0xcc] sm:$0xf] %vm282_vm0, %v9814_v0  ;;  %336 = vst.msk [vmem:[#allocation2 + $0xd0] sm:$0xf] %vm282_vm0, %v9814_v0 }
  0x2c   : > { %286 = vst.msk [vmem:[#allocation2 + $0x8] sm:$0x1] %vm285_vm1, %v9814_v0  ;;  %289 = vst.msk [vmem:[#allocation2 + $0x14] sm:$0x1] %vm285_vm1, %v9814_v0 }
  0x2d   : > { %292 = vst.msk [vmem:[#allocation2 + $0x20] sm:$0x1] %vm285_vm1, %v9814_v0  ;;  %295 = vst.msk [vmem:[#allocation2 + $0x2c] sm:$0x1] %vm285_vm1, %v9814_v0 }
  0x2e   : > { %298 = vst.msk [vmem:[#allocation2 + $0x38] sm:$0x1] %vm285_vm1, %v9814_v0  ;;  %301 = vst.msk [vmem:[#allocation2 + $0x44] sm:$0x1] %vm285_vm1, %v9814_v0 }
  0x2f   : > { %304 = vst.msk [vmem:[#allocation2 + $0x50] sm:$0x1] %vm285_vm1, %v9814_v0  ;;  %307 = vst.msk [vmem:[#allocation2 + $0x5c] sm:$0x1] %vm285_vm1, %v9814_v0 }
  0x30   : > { %310 = vst.msk [vmem:[#allocation2 + $0x68] sm:$0x1] %vm285_vm1, %v9814_v0  ;;  %313 = vst.msk [vmem:[#allocation2 + $0x74] sm:$0x1] %vm285_vm1, %v9814_v0 }
  0x31   : > { %316 = vst.msk [vmem:[#allocation2 + $0x80] sm:$0x1] %vm285_vm1, %v9814_v0  ;;  %319 = vst.msk [vmem:[#allocation2 + $0x8c] sm:$0x1] %vm285_vm1, %v9814_v0 }
  0x32   : > { %322 = vst.msk [vmem:[#allocation2 + $0x98] sm:$0x1] %vm285_vm1, %v9814_v0  ;;  %325 = vst.msk [vmem:[#allocation2 + $0xa4] sm:$0x1] %vm285_vm1, %v9814_v0 }
  0x33   : > { %328 = vst.msk [vmem:[#allocation2 + $0xb0] sm:$0x1] %vm285_vm1, %v9814_v0  ;;  %331 = vst.msk [vmem:[#allocation2 + $0xbc] sm:$0x1] %vm285_vm1, %v9814_v0 }
  0x34   : > { %334 = vst.msk [vmem:[#allocation2 + $0xc8] sm:$0x1] %vm285_vm1, %v9814_v0  ;;  %337 = vst.msk [vmem:[#allocation2 + $0xd4] sm:$0x1] %vm285_vm1, %v9814_v0 }
  0x35   : > { %339 = vst.msk [vmem:[#allocation3] sm:$0xf] %vm338_vm2, %v9814_v0  ;;  %340 = vst.msk [vmem:[#allocation3 + $0x4] sm:$0xf] %vm338_vm2, %v9814_v0 }
  0x36   : > { %343 = vst.msk [vmem:[#allocation3 + $0xc] sm:$0xf] %vm338_vm2, %v9814_v0  ;;  %344 = vst.msk [vmem:[#allocation3 + $0x10] sm:$0xf] %vm338_vm2, %v9814_v0 }
  0x37   : > { %346 = vst.msk [vmem:[#allocation3 + $0x18] sm:$0xf] %vm338_vm2, %v9814_v0  ;;  %347 = vst.msk [vmem:[#allocation3 + $0x1c] sm:$0xf] %vm338_vm2, %v9814_v0 }
  0x38   : > { %349 = vst.msk [vmem:[#allocation3 + $0x24] sm:$0xf] %vm338_vm2, %v9814_v0  ;;  %350 = vst.msk [vmem:[#allocation3 + $0x28] sm:$0xf] %vm338_vm2, %v9814_v0 }
  0x39   : > { %352 = vst.msk [vmem:[#allocation3 + $0x30] sm:$0xf] %vm338_vm2, %v9814_v0  ;;  %353 = vst.msk [vmem:[#allocation3 + $0x34] sm:$0xf] %vm338_vm2, %v9814_v0 }
  0x3a   : > { %355 = vst.msk [vmem:[#allocation3 + $0x3c] sm:$0xf] %vm338_vm2, %v9814_v0  ;;  %356 = vst.msk [vmem:[#allocation3 + $0x40] sm:$0xf] %vm338_vm2, %v9814_v0 }
  0x3b   : > { %358 = vst.msk [vmem:[#allocation3 + $0x48] sm:$0xf] %vm338_vm2, %v9814_v0  ;;  %359 = vst.msk [vmem:[#allocation3 + $0x4c] sm:$0xf] %vm338_vm2, %v9814_v0 }
  0x3c   : > { %361 = vst.msk [vmem:[#allocation3 + $0x54] sm:$0xf] %vm338_vm2, %v9814_v0  ;;  %362 = vst.msk [vmem:[#allocation3 + $0x58] sm:$0xf] %vm338_vm2, %v9814_v0 }
  0x3d   : > { %364 = vst.msk [vmem:[#allocation3 + $0x60] sm:$0xf] %vm338_vm2, %v9814_v0  ;;  %365 = vst.msk [vmem:[#allocation3 + $0x64] sm:$0xf] %vm338_vm2, %v9814_v0 }
  0x3e   : > { %367 = vst.msk [vmem:[#allocation3 + $0x6c] sm:$0xf] %vm338_vm2, %v9814_v0  ;;  %368 = vst.msk [vmem:[#allocation3 + $0x70] sm:$0xf] %vm338_vm2, %v9814_v0 }
  0x3f   : > { %370 = vst.msk [vmem:[#allocation3 + $0x78] sm:$0xf] %vm338_vm2, %v9814_v0  ;;  %371 = vst.msk [vmem:[#allocation3 + $0x7c] sm:$0xf] %vm338_vm2, %v9814_v0 }
  0x40   : > { %373 = vst.msk [vmem:[#allocation3 + $0x84] sm:$0xf] %vm338_vm2, %v9814_v0  ;;  %374 = vst.msk [vmem:[#allocation3 + $0x88] sm:$0xf] %vm338_vm2, %v9814_v0 }
  0x41   : > { %376 = vst.msk [vmem:[#allocation3 + $0x90] sm:$0xf] %vm338_vm2, %v9814_v0  ;;  %377 = vst.msk [vmem:[#allocation3 + $0x94] sm:$0xf] %vm338_vm2, %v9814_v0 }
  0x42   : > { %379 = vst.msk [vmem:[#allocation3 + $0x9c] sm:$0xf] %vm338_vm2, %v9814_v0  ;;  %380 = vst.msk [vmem:[#allocation3 + $0xa0] sm:$0xf] %vm338_vm2, %v9814_v0 }
  0x43   : > { %382 = vst.msk [vmem:[#allocation3 + $0xa8] sm:$0xf] %vm338_vm2, %v9814_v0  ;;  %383 = vst.msk [vmem:[#allocation3 + $0xac] sm:$0xf] %vm338_vm2, %v9814_v0 }
  0x44   : > { %385 = vst.msk [vmem:[#allocation3 + $0xb4] sm:$0xf] %vm338_vm2, %v9814_v0  ;;  %386 = vst.msk [vmem:[#allocation3 + $0xb8] sm:$0xf] %vm338_vm2, %v9814_v0 }
  0x45   : > { %388 = vst.msk [vmem:[#allocation3 + $0xc0] sm:$0xf] %vm338_vm2, %v9814_v0  ;;  %389 = vst.msk [vmem:[#allocation3 + $0xc4] sm:$0xf] %vm338_vm2, %v9814_v0 }
  0x46   : > { %391 = vst.msk [vmem:[#allocation3 + $0xcc] sm:$0xf] %vm338_vm2, %v9814_v0  ;;  %392 = vst.msk [vmem:[#allocation3 + $0xd0] sm:$0xf] %vm338_vm2, %v9814_v0 }
  0x47   : > { %342 = vst.msk [vmem:[#allocation3 + $0x8] sm:$0x1] %vm341_vm3, %v9814_v0  ;;  %345 = vst.msk [vmem:[#allocation3 + $0x14] sm:$0x1] %vm341_vm3, %v9814_v0 }
  0x48   : > { %348 = vst.msk [vmem:[#allocation3 + $0x20] sm:$0x1] %vm341_vm3, %v9814_v0  ;;  %351 = vst.msk [vmem:[#allocation3 + $0x2c] sm:$0x1] %vm341_vm3, %v9814_v0 }
  0x49   : > { %354 = vst.msk [vmem:[#allocation3 + $0x38] sm:$0x1] %vm341_vm3, %v9814_v0  ;;  %357 = vst.msk [vmem:[#allocation3 + $0x44] sm:$0x1] %vm341_vm3, %v9814_v0 }
  0x4a   : > { %360 = vst.msk [vmem:[#allocation3 + $0x50] sm:$0x1] %vm341_vm3, %v9814_v0  ;;  %363 = vst.msk [vmem:[#allocation3 + $0x5c] sm:$0x1] %vm341_vm3, %v9814_v0 }
  0x4b   : > { %366 = vst.msk [vmem:[#allocation3 + $0x68] sm:$0x1] %vm341_vm3, %v9814_v0  ;;  %369 = vst.msk [vmem:[#allocation3 + $0x74] sm:$0x1] %vm341_vm3, %v9814_v0 }
  0x4c   : > { %372 = vst.msk [vmem:[#allocation3 + $0x80] sm:$0x1] %vm341_vm3, %v9814_v0  ;;  %375 = vst.msk [vmem:[#allocation3 + $0x8c] sm:$0x1] %vm341_vm3, %v9814_v0 }
  0x4d   : > { %378 = vst.msk [vmem:[#allocation3 + $0x98] sm:$0x1] %vm341_vm3, %v9814_v0  ;;  %381 = vst.msk [vmem:[#allocation3 + $0xa4] sm:$0x1] %vm341_vm3, %v9814_v0 }
  0x4e   : > { %384 = vst.msk [vmem:[#allocation3 + $0xb0] sm:$0x1] %vm341_vm3, %v9814_v0  ;;  %387 = vst.msk [vmem:[#allocation3 + $0xbc] sm:$0x1] %vm341_vm3, %v9814_v0 }
  0x4f   : > { %390 = vst.msk [vmem:[#allocation3 + $0xc8] sm:$0x1] %vm341_vm3, %v9814_v0  ;;  %393 = vst.msk [vmem:[#allocation3 + $0xd4] sm:$0x1] %vm341_vm3, %v9814_v0 }
  0x50 PF: > { %v936_v1 = vld [vmem:[#allocation2] sm:$0xf]  ;;  %v937_v2 = vld [vmem:[#allocation2 + $0x4] sm:$0xf]  ;;  %vm984_vm4 = vsmask.f32 3328 }
  0x51   : > { %vm985_vm5 = vsmask.f32 7440  ;;  %v988_v3 = vshrl.u32 %v936_v1, 16  ;;  %v991_v4 = vshll.u32 %v936_v1, 16  ;;  %v997_v5 = vshll.u32 %v937_v2, 16  ;;  %s9815_s21 = smov 4  }
  0x52   : > { %v1001_v6 = vshrl.u32 %v937_v2, 16  ;;  %v394_v7 = vld [vmem:[%s9923_s19] sm:$0xf]  ;;  %v395_v8 = vld [vmem:[%s9923_s19 + $0x4] sm:$0xf]  ;;  %vm750_vm6 = vcmask 27648   ;;  %vm10148_vm9 = vmor %vm984_vm4, %vm985_vm5 }
  0x53   : > { %v990_v9 = vrot.slane %v988_v3, 4  ;;  %v993_v10 = vrot.slane %v991_v4, 5  ;;  %v999_v11 = vrot.slane %v997_v5, 5  ;;  %vm426_vm7 = vsmask.f32 256  ;;  %s9816_s22 = smov 8  }
  0x54   : > { %v1003_v12 = vrot.slane %v1001_v6, 4  ;;  %vm427_vm8 = vsmask.f32 4368  ;;  %v430_v13 = vshrl.u32 %v394_v7, 16  ;;  %v433_v14 = vshll.u32 %v394_v7, 16  ;;  %s9817_s23 = smov 12  }
  0x55   : > { %v994_v16 = vor.u32 %v993_v10, %v990_v9  ;;  %v438_v17 = vshrl.u32 %v395_v8, 16  ;;  %v441_v18 = vshll.u32 %v395_v8, 16  ;;  %vm751_vm10 = vsmask.f32 7938  ;;  %v753_v19 = vld [vmem:[#allocation2 + $0xc] sm:$0xf]  ;;  %vm10153_vm11 = vmor %vm426_vm7, %vm427_vm8 }
  0x56   : > { %v432_v21 = vrot.slane %v430_v13, 7  ;;  %v938_v22 = vld [vmem:[#allocation2 + $0x8] sm:$0x1]  ;;  %v1004_v23 = vor.u32 %v1003_v12, %v999_v11  ;;  %vm758_vm12 = vcmask 24576   ;;  %v760_v24 = vld [vmem:[#allocation2 + $0x14] sm:$0x1]  ;;  %vm10159_vm13 = vmand %vm750_vm6, %vm751_vm10 }
  0x57   : > { %v995_v25 = vrot.slane %v994_v16, 4  ;;  %v440_v26 = vrot.slane %v438_v17, 7  ;;  %v1007_v28 = vshll.u32 %v938_v22, 16  ;;  %v396_v29 = vld [vmem:[%s9923_s19 + $0x8] sm:$0xf]  ;;  %vm10165_vm14 = vmand %vm758_vm12, %vm426_vm7  ;;  %vm1596_vm15 = vcmask 1042432  }
  0x58   : > { %v435_v30 = vor.u32 %v433_v14, %v432_v21  ;;  %v436_v31 = vrot.slane %v432_v21, 4  ;;  %v1005_v32 = vrot.slane %v1004_v23, 4  ;;  %v397_v34 = vld [vmem:[%s9923_s19 + $0xc] sm:$0xf]  ;;  %v447_v35 = vshrl.u32 %v396_v29, 16  ;;  %s9818_s29 = smov 16  }
  0x59   : > { %v1000_v36 = vsel %vm10148_vm9, %v995_v25, %v999_v11  ;;  %v443_v37 = vor.u32 %v441_v18, %v440_v26  ;;  %v1009_v38 = vrot.slane %v1007_v28, 5  ;;  %v445_v39 = vrot.slane %v440_v26, 4  ;;  %v398_v44 = vld [vmem:[%s9923_s19 + $0x10] sm:$0xf]  ;;  %v763_v49 = vld [vmem:[#allocation2 + $0x18] sm:$0xf] }
  0x5a   : > { %1371 = vrot.lane.b32.xlu0 %v1000_v36, %s9815_s21  ;;  %v754_v40 = vsel %vm10159_vm13, %v435_v30, %v753_v19  ;;  %v449_v41 = vrot.slane %v447_v35, 7  ;;  %v450_v42 = vshll.u32 %v396_v29, 16  ;;  %v455_v43 = vshrl.u32 %v397_v34, 16  ;;  %v399_v50 = vld [vmem:[%s9923_s19 + $0x14] sm:$0xf]  ;;  %s9819_s8 = smov 20  }
  0x5b   : > { %v444_v45 = vsel %vm10153_vm11, %v436_v31, %v443_v37  ;;  %755 = vst [vmem:[#allocation2 + $0xc] sm:$0xf] %v754_v40  ;;  %v1010_v46 = vsel %vm10148_vm9, %v1005_v32, %v1009_v38  ;;  %v761_v47 = vsel %vm10165_vm14, %v445_v39, %v760_v24  ;;  %v458_v48 = vshll.u32 %v397_v34, 16  ;;  %v767_v54 = vld [vmem:[#allocation2 + $0x20] sm:$0x1]  ;;  %s9820_s9 = smov 24  }
  0x5c   : > { %757 = vst.msk [vmem:[#allocation2 + $0x10] sm:$0xf] %vm750_vm6, %v444_v45  ;;  %762 = vst [vmem:[#allocation2 + $0x14] sm:$0x1] %v761_v47  ;;  %v452_v51 = vor.u32 %v450_v42, %v449_v41  ;;  %v453_v52 = vrot.slane %v449_v41, 4  ;;  %v457_v53 = vrot.slane %v455_v43, 7 }
  0x5d   : > { %v464_v55 = vshrl.u32 %v398_v44, 16  ;;  %v467_v56 = vshll.u32 %v398_v44, 16  ;;  %v472_v57 = vshrl.u32 %v399_v50, 16  ;;  %v475_v58 = vshll.u32 %v399_v50, 16  ;;  %v400_v59 = vld [vmem:[%s9923_s19 + $0x18] sm:$0xf] }
  0x5e   : > { %1373 = vrot.lane.b32.xlu0 %v1010_v46, %s9815_s21  ;;  %v460_v60 = vor.u32 %v458_v48, %v457_v53  ;;  %v764_v61 = vsel %vm10159_vm13, %v452_v51, %v763_v49  ;;  %v462_v62 = vrot.slane %v457_v53, 4  ;;  %v401_v0 = vld [vmem:[%s9923_s19 + $0x1c] sm:$0xf]  ;;  %v770_v2 = vld [vmem:[#allocation2 + $0x24] sm:$0xf]  ;;  %v481_v3 = vshrl.u32 %v400_v59, 16 }
  0x5f   : > { %v466_v63 = vrot.slane %v464_v55, 7  ;;  %765 = vst [vmem:[#allocation2 + $0x18] sm:$0xf] %v764_v61  ;;  %v474_v1 = vrot.slane %v472_v57, 7  ;;  %v484_v4 = vshll.u32 %v400_v59, 16  ;;  %v489_v5 = vshrl.u32 %v401_v0, 16 }
  0x60   : > { %v461_v6 = vsel %vm10153_vm11, %v453_v52, %v460_v60  ;;  %v768_v7 = vsel %vm10165_vm14, %v462_v62, %v767_v54  ;;  %v774_v10 = vld [vmem:[#allocation2 + $0x2c] sm:$0x1]  ;;  %v10194_v11 = vld [vmem:[%s9923_s19 + $0x20] sm:$0xf]  ;;  %v483_v14 = vrot.slane %v481_v3, 7  ;;  %v492_v21 = vshll.u32 %v401_v0, 16 }
  0x61   : > { %v469_v8 = vor.u32 %v467_v56, %v466_v63  ;;  %v470_v9 = vrot.slane %v466_v63, 4  ;;  %766 = vst.msk [vmem:[#allocation2 + $0x1c] sm:$0xf] %vm750_vm6, %v461_v6  ;;  %769 = vst [vmem:[#allocation2 + $0x20] sm:$0x1] %v768_v7  ;;  %v477_v12 = vor.u32 %v475_v58, %v474_v1  ;;  %v479_v13 = vrot.slane %v474_v1, 4 }
  0x62   : > { %v491_v16 = vrot.slane %v489_v5, 7  ;;  %v777_v17 = vld [vmem:[#allocation2 + $0x30] sm:$0xf]  ;;  %v939_v18 = vld [vmem:[#allocation2 + $0xc] sm:$0xf]  ;;  %v498_v22 = vshrl.u32 %v10194_v11, 16  ;;  %v486_v35 = vor.u32 %v484_v4, %v483_v14 }
  0x63   : > { %v771_v19 = vsel %vm10159_vm13, %v469_v8, %v770_v2  ;;  %v501_v23 = vshll.u32 %v10194_v11, 16  ;;  %v940_v24 = vld [vmem:[#allocation2 + $0x10] sm:$0xf]  ;;  %v1012_v25 = vshrl.u32 %v939_v18, 16  ;;  %v1015_v26 = vshll.u32 %v939_v18, 16  ;;  %s9821_s16 = smov 28  }
  0x64   : > { %v941_v28 = vld [vmem:[#allocation2 + $0x14] sm:$0x1]  ;;  %v478_v29 = vsel %vm10153_vm11, %v470_v9, %v477_v12  ;;  %772 = vst [vmem:[#allocation2 + $0x24] sm:$0xf] %v771_v19  ;;  %v775_v30 = vsel %vm10165_vm14, %v479_v13, %v774_v10  ;;  %v1021_v31 = vshll.u32 %v940_v24, 16  ;;  %v1025_v32 = vshrl.u32 %v940_v24, 16 }
  0x65   : > { %v1031_v34 = vshll.u32 %v941_v28, 16  ;;  %773 = vst.msk [vmem:[#allocation2 + $0x28] sm:$0xf] %vm750_vm6, %v478_v29  ;;  %776 = vst [vmem:[#allocation2 + $0x2c] sm:$0x1] %v775_v30  ;;  %v1014_v36 = vrot.slane %v1012_v25, 4  ;;  %v494_v39 = vor.u32 %v492_v21, %v491_v16  ;;  %v778_v44 = vsel %vm10159_vm13, %v486_v35, %v777_v17 }
  0x66   : > { %v1017_v37 = vrot.slane %v1015_v26, 5  ;;  %v487_v38 = vrot.slane %v483_v14, 4  ;;  %v1023_v40 = vrot.slane %v1021_v31, 5  ;;  %v1027_v41 = vrot.slane %v1025_v32, 4  ;;  %v942_v43 = vld [vmem:[#allocation2 + $0x18] sm:$0xf] }
  0x67   : > { %v1033_v42 = vrot.slane %v1031_v34, 5  ;;  %v1036_v46 = vshrl.u32 %v942_v43, 16  ;;  %v1039_v47 = vshll.u32 %v942_v43, 16  ;;  %779 = vst [vmem:[#allocation2 + $0x30] sm:$0xf] %v778_v44  ;;  %v496_v53 = vrot.slane %v491_v16, 4 }
  0x68   : > { %v1018_v45 = vor.u32 %v1017_v37, %v1014_v36  ;;  %v495_v48 = vsel %vm10153_vm11, %v487_v38, %v494_v39  ;;  %v781_v49 = vld [vmem:[#allocation2 + $0x38] sm:$0x1]  ;;  %v1028_v50 = vor.u32 %v1027_v41, %v1023_v40  ;;  %v943_v51 = vld [vmem:[#allocation2 + $0x1c] sm:$0xf]  ;;  %v944_v52 = vld [vmem:[#allocation2 + $0x20] sm:$0x1] }
  0x69   : > { %780 = vst.msk [vmem:[#allocation2 + $0x34] sm:$0xf] %vm750_vm6, %v495_v48  ;;  %v10211_v54 = vrot.slane %v498_v22, 7  ;;  %v1038_v56 = vrot.slane %v1036_v46, 4  ;;  %v1041_v57 = vrot.slane %v1039_v47, 5  ;;  %v1045_v58 = vshll.u32 %v943_v51, 16 }
  0x6a   : > { %v1019_v55 = vrot.slane %v1018_v45, 4  ;;  %v1029_v59 = vrot.slane %v1028_v50, 4  ;;  %v1049_v60 = vshrl.u32 %v943_v51, 16  ;;  %v1055_v61 = vshll.u32 %v944_v52, 16  ;;  %v403_v34 = vld [vmem:[%s9923_s19 + $0x24] sm:$0xf] }
  0x6b   : > { %v945_v62 = vld [vmem:[#allocation2 + $0x24] sm:$0xf]  ;;  %v782_v63 = vsel %vm10165_vm14, %v496_v53, %v781_v49  ;;  %v1042_v1 = vor.u32 %v1041_v57, %v1038_v56  ;;  %v1047_v2 = vrot.slane %v1045_v58, 5  ;;  %v503_v21 = vor.u32 %v501_v23, %v10211_v54  ;;  %v784_v37 = vld [vmem:[#allocation2 + $0x3c] sm:$0xf]  ;;  %s9823_s15 = smov 64  }
  0x6c   : > { %v1024_v0 = vsel %vm10148_vm9, %v1019_v55, %v1023_v40  ;;  %v946_v3 = vld [vmem:[#allocation2 + $0x28] sm:$0xf]  ;;  %v1060_v4 = vshrl.u32 %v945_v62, 16  ;;  %v947_v5 = vld [vmem:[#allocation2 + $0x2c] sm:$0x1]  ;;  %v1034_v6 = vsel %vm10148_vm9, %v1029_v59, %v1033_v42  ;;  %v1051_v7 = vrot.slane %v1049_v60, 4 }
  0x6d   : > { %783 = vst [vmem:[#allocation2 + $0x38] sm:$0x1] %v782_v63  ;;  %1375 = vrot.lane.b32.xlu1 %v1024_v0, %s9815_s21  ;;  %v1057_v8 = vrot.slane %v1055_v61, 5  ;;  %v1063_v9 = vshll.u32 %v945_v62, 16  ;;  %v1043_v10 = vrot.slane %v1042_v1, 4  ;;  %v1069_v13 = vshll.u32 %v946_v3, 16 }
  0x6e   : > { %v1062_v12 = vrot.slane %v1060_v4, 4  ;;  %v1073_v14 = vshrl.u32 %v946_v3, 16  ;;  %v1052_v16 = vor.u32 %v1051_v7, %v1047_v2  ;;  %v1079_v18 = vshll.u32 %v947_v5, 16  ;;  %v948_v19 = vld [vmem:[#allocation2 + $0x30] sm:$0xf]  ;;  %s9824_s17 = smov 96  }
  0x6f   : > { %v1065_v17 = vrot.slane %v1063_v9, 5  ;;  %v1048_v22 = vsel %vm10148_vm9, %v1043_v10, %v1047_v2  ;;  %v1071_v24 = vrot.slane %v1069_v13, 5  ;;  %v1084_v28 = vshrl.u32 %v948_v19, 16  ;;  %v404_v47 = vld [vmem:[%s9923_s19 + $0x28] sm:$0xf] }
  0x70   : > { %v1075_v25 = vrot.slane %v1073_v14, 4  ;;  %v949_v26 = vld [vmem:[#allocation2 + $0x34] sm:$0xf]  ;;  %1379 = vrot.lane.b32.xlu0 %v1048_v22, %s9815_s21  ;;  %v1053_v29 = vrot.slane %v1052_v16, 4  ;;  %v1081_v31 = vrot.slane %v1079_v18, 5  ;;  %v1087_v32 = vshll.u32 %v948_v19, 16 }
  0x71   : > { %1377 = vrot.lane.b32.xlu1 %v1034_v6, %s9815_s21  ;;  %v1066_v30 = vor.u32 %v1065_v17, %v1062_v12  ;;  %v1086_v11 = vrot.slane %v1084_v28, 4  ;;  %v1093_v23 = vshll.u32 %v949_v26, 16  ;;  %v1097_v36 = vshrl.u32 %v949_v26, 16  ;;  %v405_v52 = vld [vmem:[%s9923_s19 + $0x2c] sm:$0xf] }
  0x72   : > { %v1076_v35 = vor.u32 %v1075_v25, %v1071_v24  ;;  %v1058_v38 = vsel %vm10148_vm9, %v1053_v29, %v1057_v8  ;;  %v1089_v40 = vrot.slane %v1087_v32, 5  ;;  %v504_v42 = vrot.slane %v10211_v54, 4  ;;  %v406_v53 = vld [vmem:[%s9923_s19 + $0x30] sm:$0xf]  ;;  %v788_v63 = vld [vmem:[#allocation2 + $0x44] sm:$0x1] }
  0x73   : > { %v1067_v39 = vrot.slane %v1066_v30, 4  ;;  %v1095_v44 = vrot.slane %v1093_v23, 5  ;;  %v1099_v45 = vrot.slane %v1097_v36, 4  ;;  %v506_v50 = vshrl.u32 %v403_v34, 16  ;;  %v791_v7 = vld [vmem:[#allocation2 + $0x48] sm:$0xf] }
  0x74   : > { %v950_v41 = vld [vmem:[#allocation2 + $0x38] sm:$0x1]  ;;  %v1077_v43 = vrot.slane %v1076_v35, 4  ;;  %v1090_v49 = vor.u32 %v1089_v40, %v1086_v11  ;;  %v509_v51 = vshll.u32 %v403_v34, 16  ;;  %v785_v57 = vsel %vm10159_vm13, %v503_v21, %v784_v37  ;;  %v407_v8 = vld [vmem:[%s9923_s19 + $0x34] sm:$0xf] }
  0x75   : > { %v1103_v46 = vshll.u32 %v950_v41, 16  ;;  %1381 = vrot.lane.b32.xlu1 %v1058_v38, %s9815_s21  ;;  %v1072_v48 = vsel %vm10148_vm9, %v1067_v39, %v1071_v24  ;;  %v1100_v55 = vor.u32 %v1099_v45, %v1095_v44  ;;  %v508_v59 = vrot.slane %v506_v50, 7  ;;  %786 = vst [vmem:[#allocation2 + $0x3c] sm:$0xf] %v785_v57  ;;  %v408_v14 = vld [vmem:[%s9923_s19 + $0x38] sm:$0xf] }
  0x76   : > { %1383 = vrot.lane.b32.xlu0 %v1072_v48, %s9815_s21  ;;  %v1082_v54 = vsel %vm10148_vm9, %v1077_v43, %v1081_v31  ;;  %v1091_v58 = vrot.slane %v1090_v49, 4  ;;  %v515_v60 = vshrl.u32 %v404_v47, 16  ;;  %v518_v61 = vshll.u32 %v404_v47, 16  ;;  %v795_v21 = vld [vmem:[#allocation2 + $0x50] sm:$0x1] }
  0x77   : > { %v1105_v56 = vrot.slane %v1103_v46, 5  ;;  %v1101_v62 = vrot.slane %v1100_v55, 4  ;;  %v523_v0 = vshrl.u32 %v405_v52, 16  ;;  %v526_v1 = vshll.u32 %v405_v52, 16  ;;  %v798_v22 = vld [vmem:[#allocation2 + $0x54] sm:$0xf] }
  0x78   : > { %v532_v2 = vshrl.u32 %v406_v53, 16  ;;  %v1096_v3 = vsel %vm10148_vm9, %v1091_v58, %v1095_v44  ;;  %v511_v4 = vor.u32 %v509_v51, %v508_v59  ;;  %v513_v5 = vrot.slane %v508_v59, 4  ;;  %v409_v29 = vld [vmem:[%s9923_s19 + $0x3c] sm:$0xf]  ;;  %v410_v35 = vld [vmem:[%s9923_s19 + $0x40] sm:$0xf] }
  0x79   : > { %1385 = vrot.lane.b32.xlu1 %v1082_v54, %s9815_s21  ;;  %v517_v6 = vrot.slane %v515_v60, 7  ;;  %v1106_v9 = vsel %vm10148_vm9, %v1101_v62, %v1105_v56  ;;  %v525_v10 = vrot.slane %v523_v0, 7  ;;  %v535_v13 = vshll.u32 %v406_v53, 16  ;;  %v10268_v46 = vld [vmem:[%s9923_s19 + $0x44] sm:$0xf] }
  0x7a   : > { %1387 = vrot.lane.b32.xlu0 %v1096_v3, %s9815_s21  ;;  %v534_v12 = vrot.slane %v532_v2, 7  ;;  %v512_v16 = vsel %vm10153_vm11, %v504_v42, %v511_v4  ;;  %v789_v17 = vsel %vm10165_vm14, %v513_v5, %v788_v63  ;;  %v540_v31 = vshrl.u32 %v407_v8, 16  ;;  %v802_v42 = vld [vmem:[#allocation2 + $0x5c] sm:$0x1]  ;;  %v805_v56 = vld [vmem:[#allocation2 + $0x60] sm:$0xf] }
  0x7b   : > { %v520_v18 = vor.u32 %v518_v61, %v517_v6  ;;  %v521_v19 = vrot.slane %v517_v6, 4  ;;  %787 = vst.msk [vmem:[#allocation2 + $0x40] sm:$0xf] %vm750_vm6, %v512_v16  ;;  %790 = vst [vmem:[#allocation2 + $0x44] sm:$0x1] %v789_v17  ;;  %v528_v24 = vor.u32 %v526_v1, %v525_v10  ;;  %v530_v25 = vrot.slane %v525_v10, 4 }
  0x7c   : > { %v537_v26 = vor.u32 %v535_v13, %v534_v12  ;;  %v538_v28 = vrot.slane %v534_v12, 4  ;;  %v543_v32 = vshll.u32 %v407_v8, 16  ;;  %v549_v34 = vshrl.u32 %v408_v14, 16  ;;  %v951_v11 = vld [vmem:[#allocation2 + $0x3c] sm:$0xf] }
  0x7d   : > { %1389 = vrot.lane.b32.xlu1 %v1106_v9, %s9815_s21  ;;  %v792_v30 = vsel %vm10159_vm13, %v520_v18, %v791_v7  ;;  %v529_v23 = vsel %vm10153_vm11, %v521_v19, %v528_v24  ;;  %v796_v36 = vsel %vm10165_vm14, %v530_v25, %v795_v21  ;;  %v552_v38 = vshll.u32 %v408_v14, 16  ;;  %v809_v8 = vld [vmem:[#allocation2 + $0x68] sm:$0x1] }
  0x7e   : > { %793 = vst [vmem:[#allocation2 + $0x48] sm:$0xf] %v792_v30  ;;  %v799_v37 = vsel %vm10159_vm13, %v537_v26, %v798_v22  ;;  %v1108_v39 = vshrl.u32 %v951_v11, 16  ;;  %v1111_v40 = vshll.u32 %v951_v11, 16  ;;  %794 = vst.msk [vmem:[#allocation2 + $0x4c] sm:$0xf] %vm750_vm6, %v529_v23 }
  0x7f   : > { %797 = vst [vmem:[#allocation2 + $0x50] sm:$0x1] %v796_v36  ;;  %v542_v41 = vrot.slane %v540_v31, 7  ;;  %800 = vst [vmem:[#allocation2 + $0x54] sm:$0xf] %v799_v37  ;;  %v551_v43 = vrot.slane %v549_v34, 7 }
  0x80   : > { %v557_v44 = vshrl.u32 %v409_v29, 16  ;;  %v560_v45 = vshll.u32 %v409_v29, 16  ;;  %v566_v47 = vshrl.u32 %v410_v35, 16  ;;  %v569_v48 = vshll.u32 %v410_v35, 16 }
  0x81   : > { %v1110_v49 = vrot.slane %v1108_v39, 4  ;;  %v1113_v50 = vrot.slane %v1111_v40, 5  ;;  %v545_v51 = vor.u32 %v543_v32, %v542_v41  ;;  %v547_v52 = vrot.slane %v542_v41, 4 }
  0x82   : > { %v554_v53 = vor.u32 %v552_v38, %v551_v43  ;;  %v555_v54 = vrot.slane %v551_v43, 4  ;;  %v559_v55 = vrot.slane %v557_v44, 7  ;;  %v10270_v57 = vrot.slane %v566_v47, 7  ;;  %v952_v58 = vld [vmem:[#allocation2 + $0x40] sm:$0xf] }
  0x83   : > { %v1114_v59 = vor.u32 %v1113_v50, %v1110_v49  ;;  %v953_v60 = vld [vmem:[#allocation2 + $0x44] sm:$0x1]  ;;  %v546_v61 = vsel %vm10153_vm11, %v538_v28, %v545_v51  ;;  %v803_v62 = vsel %vm10165_vm14, %v547_v52, %v802_v42  ;;  %v574_v63 = vshrl.u32 %v10268_v46, 16 }
  0x84   : > { %v1117_v0 = vshll.u32 %v952_v58, 16  ;;  %v1121_v1 = vshrl.u32 %v952_v58, 16  ;;  %v1127_v2 = vshll.u32 %v953_v60, 16  ;;  %801 = vst.msk [vmem:[#allocation2 + $0x58] sm:$0xf] %vm750_vm6, %v546_v61  ;;  %v562_v3 = vor.u32 %v560_v45, %v559_v55 }
  0x85   : > { %804 = vst [vmem:[#allocation2 + $0x5c] sm:$0x1] %v803_v62  ;;  %v1115_v4 = vrot.slane %v1114_v59, 4  ;;  %v954_v5 = vld [vmem:[#allocation2 + $0x48] sm:$0xf]  ;;  %v806_v6 = vsel %vm10159_vm13, %v554_v53, %v805_v56  ;;  %v564_v7 = vrot.slane %v559_v55, 4  ;;  %v10281_v9 = vor.u32 %v569_v48, %v10270_v57 }
  0x86   : > { %v1119_v10 = vrot.slane %v1117_v0, 5  ;;  %v1123_v12 = vrot.slane %v1121_v1, 4  ;;  %v1129_v13 = vrot.slane %v1127_v2, 5  ;;  %v955_v14 = vld [vmem:[#allocation2 + $0x4c] sm:$0xf]  ;;  %v1132_v16 = vshrl.u32 %v954_v5, 16 }
  0x87   : > { %807 = vst [vmem:[#allocation2 + $0x60] sm:$0xf] %v806_v6  ;;  %v1135_v17 = vshll.u32 %v954_v5, 16  ;;  %v1141_v18 = vshll.u32 %v955_v14, 16  ;;  %v1145_v19 = vshrl.u32 %v955_v14, 16  ;;  %v563_v22 = vsel %vm10153_vm11, %v555_v54, %v562_v3 }
  0x88   : > { %v956_v21 = vld [vmem:[#allocation2 + $0x50] sm:$0x1]  ;;  %v1120_v24 = vsel %vm10148_vm9, %v1115_v4, %v1119_v10  ;;  %v1124_v25 = vor.u32 %v1123_v12, %v1119_v10  ;;  %v1134_v26 = vrot.slane %v1132_v16, 4  ;;  %v957_v29 = vld [vmem:[#allocation2 + $0x54] sm:$0xf]  ;;  %v810_v36 = vsel %vm10165_vm14, %v564_v7, %v809_v8 }
  0x89   : > { %v1151_v28 = vshll.u32 %v956_v21, 16  ;;  %808 = vst.msk [vmem:[#allocation2 + $0x64] sm:$0xf] %vm750_vm6, %v563_v22  ;;  %1391 = vrot.lane.b32.xlu0 %v1120_v24, %s9815_s21  ;;  %v1137_v30 = vrot.slane %v1135_v17, 5  ;;  %v1143_v31 = vrot.slane %v1141_v18, 5  ;;  %v1147_v32 = vrot.slane %v1145_v19, 4 }
  0x8a   : > { %v1156_v34 = vshrl.u32 %v957_v29, 16  ;;  %v1125_v35 = vrot.slane %v1124_v25, 4  ;;  %v1159_v23 = vshll.u32 %v957_v29, 16  ;;  %811 = vst [vmem:[#allocation2 + $0x68] sm:$0x1] %v810_v36  ;;  %v572_v42 = vrot.slane %v10270_v57, 4 }
  0x8b   : > { %v1153_v11 = vrot.slane %v1151_v28, 5  ;;  %v1138_v37 = vor.u32 %v1137_v30, %v1134_v26  ;;  %v1148_v38 = vor.u32 %v1147_v32, %v1143_v31  ;;  %v958_v39 = vld [vmem:[#allocation2 + $0x58] sm:$0xf]  ;;  %v576_v52 = vrot.slane %v574_v63, 7  ;;  %v812_v58 = vld [vmem:[#allocation2 + $0x6c] sm:$0xf] }
  0x8c   : > { %v1158_v40 = vrot.slane %v1156_v34, 4  ;;  %v959_v41 = vld [vmem:[#allocation2 + $0x5c] sm:$0x1]  ;;  %v1130_v43 = vsel %vm10148_vm9, %v1125_v35, %v1129_v13  ;;  %v1161_v44 = vrot.slane %v1159_v23, 5  ;;  %v1165_v45 = vshll.u32 %v958_v39, 16 }
  0x8d   : > { %v1169_v47 = vshrl.u32 %v958_v39, 16  ;;  %1393 = vrot.lane.b32.xlu1 %v1130_v43, %s9815_s21  ;;  %v1139_v48 = vrot.slane %v1138_v37, 4  ;;  %v1149_v49 = vrot.slane %v1148_v38, 4  ;;  %v1175_v50 = vshll.u32 %v959_v41, 16  ;;  %v816_v3 = vld [vmem:[#allocation2 + $0x74] sm:$0x1] }
  0x8e   : > { %v960_v51 = vld [vmem:[#allocation2 + $0x60] sm:$0xf]  ;;  %v1162_v53 = vor.u32 %v1161_v44, %v1158_v40  ;;  %v1167_v54 = vrot.slane %v1165_v45, 5  ;;  %v577_v6 = vshll.u32 %v10268_v46, 16  ;;  %v813_v7 = vsel %vm10159_vm13, %v10281_v9, %v812_v58  ;;  %v412_v8 = vld [vmem:[%s9923_s19 + $0x48] sm:$0xf] }
  0x8f   : > { %v1171_v55 = vrot.slane %v1169_v47, 4  ;;  %v1180_v56 = vshrl.u32 %v960_v51, 16  ;;  %v1144_v57 = vsel %vm10148_vm9, %v1139_v48, %v1143_v31  ;;  %v1154_v59 = vsel %vm10148_vm9, %v1149_v49, %v1153_v11  ;;  %814 = vst [vmem:[#allocation2 + $0x6c] sm:$0xf] %v813_v7  ;;  %v413_v22 = vld [vmem:[%s9923_s19 + $0x4c] sm:$0xf] }
  0x90   : > { %v1177_v60 = vrot.slane %v1175_v50, 5  ;;  %v961_v61 = vld [vmem:[#allocation2 + $0x64] sm:$0xf]  ;;  %v1183_v62 = vshll.u32 %v960_v51, 16  ;;  %1395 = vrot.lane.b32.xlu0 %v1144_v57, %s9815_s21  ;;  %v1163_v0 = vrot.slane %v1162_v53, 4  ;;  %v581_v16 = vrot.slane %v576_v52, 4 }
  0x91   : > { %v1172_v1 = vor.u32 %v1171_v55, %v1167_v54  ;;  %v1182_v63 = vrot.slane %v1180_v56, 4  ;;  %v1189_v2 = vshll.u32 %v961_v61, 16  ;;  %1397 = vrot.lane.b32.xlu1 %v1154_v59, %s9815_s21  ;;  %v1193_v5 = vshrl.u32 %v961_v61, 16  ;;  %v962_v14 = vld [vmem:[#allocation2 + $0x68] sm:$0x1] }
  0x92   : > { %v1185_v4 = vrot.slane %v1183_v62, 5  ;;  %v1168_v10 = vsel %vm10148_vm9, %v1163_v0, %v1167_v54  ;;  %v1199_v19 = vshll.u32 %v962_v14, 16  ;;  %v579_v21 = vor.u32 %v577_v6, %v576_v52  ;;  %v414_v46 = vld [vmem:[%s9923_s19 + $0x50] sm:$0xf]  ;;  %v415_v28 = vld [vmem:[%s9923_s19 + $0x54] sm:$0xf] }
  0x93   : > { %v1173_v12 = vrot.slane %v1172_v1, 4  ;;  %v1191_v13 = vrot.slane %v1189_v2, 5  ;;  %v1195_v18 = vrot.slane %v1193_v5, 4  ;;  %v817_v24 = vsel %vm10165_vm14, %v581_v16, %v816_v3  ;;  %v416_v36 = vld [vmem:[%s9923_s19 + $0x58] sm:$0xf] }
  0x94   : > { %v1186_v17 = vor.u32 %v1185_v4, %v1182_v63  ;;  %1399 = vrot.lane.b32.xlu0 %v1168_v10, %s9815_s21  ;;  %v583_v25 = vshrl.u32 %v412_v8, 16  ;;  %v586_v26 = vshll.u32 %v412_v8, 16  ;;  %v1201_v31 = vrot.slane %v1199_v19, 5  ;;  %818 = vst [vmem:[#allocation2 + $0x74] sm:$0x1] %v817_v24 }
  0x95   : > { %v1178_v9 = vsel %vm10148_vm9, %v1173_v12, %v1177_v60  ;;  %v1196_v30 = vor.u32 %v1195_v18, %v1191_v13  ;;  %v580_v32 = vsel %vm10153_vm11, %v572_v42, %v579_v21  ;;  %v591_v35 = vshrl.u32 %v413_v22, 16  ;;  %v819_v39 = vld [vmem:[#allocation2 + $0x78] sm:$0xf]  ;;  %v823_v56 = vld [vmem:[#allocation2 + $0x80] sm:$0x1] }
  0x96   : > { %1401 = vrot.lane.b32.xlu1 %v1178_v9, %s9815_s21  ;;  %v1187_v29 = vrot.slane %v1186_v17, 4  ;;  %815 = vst.msk [vmem:[#allocation2 + $0x70] sm:$0xf] %vm750_vm6, %v580_v32  ;;  %v585_v34 = vrot.slane %v583_v25, 7  ;;  %v594_v11 = vshll.u32 %v413_v22, 16  ;;  %v600_v23 = vshrl.u32 %v414_v46, 16 }
  0x97   : > { %v1197_v38 = vrot.slane %v1196_v30, 4  ;;  %v603_v40 = vshll.u32 %v414_v46, 16  ;;  %v608_v41 = vshrl.u32 %v415_v28, 16  ;;  %v593_v42 = vrot.slane %v591_v35, 7  ;;  %v963_v48 = vld [vmem:[#allocation2 + $0x6c] sm:$0xf] }
  0x98   : > { %v1192_v37 = vsel %vm10148_vm9, %v1187_v29, %v1191_v13  ;;  %v588_v43 = vor.u32 %v586_v26, %v585_v34  ;;  %v589_v44 = vrot.slane %v585_v34, 4  ;;  %v602_v45 = vrot.slane %v600_v23, 7  ;;  %v826_v58 = vld [vmem:[#allocation2 + $0x84] sm:$0xf]  ;;  %v830_v62 = vld [vmem:[#allocation2 + $0x8c] sm:$0x1] }
  0x99   : > { %1403 = vrot.lane.b32.xlu0 %v1192_v37, %s9815_s21  ;;  %v1202_v47 = vsel %vm10148_vm9, %v1197_v38, %v1201_v31  ;;  %v610_v49 = vrot.slane %v608_v41, 7  ;;  %v611_v50 = vshll.u32 %v415_v28, 16  ;;  %v617_v51 = vshrl.u32 %v416_v36, 16  ;;  %v417_v0 = vld [vmem:[%s9923_s19 + $0x5c] sm:$0xf] }
  0x9a   : > { %1405 = vrot.lane.b32.xlu1 %v1202_v47, %s9815_s21  ;;  %v1204_v52 = vshrl.u32 %v963_v48, 16  ;;  %v1207_v53 = vshll.u32 %v963_v48, 16  ;;  %v596_v54 = vor.u32 %v594_v11, %v593_v42  ;;  %v820_v55 = vsel %vm10159_vm13, %v588_v43, %v819_v39  ;;  %v10343_v17 = vld [vmem:[%s9923_s19 + $0x60] sm:$0xf]  ;;  %v10346_v46 = vld [vmem:[%s9923_s19 + $0x64] sm:$0xf] }
  0x9b   : > { %821 = vst [vmem:[#allocation2 + $0x78] sm:$0xf] %v820_v55  ;;  %v598_v57 = vrot.slane %v593_v42, 4  ;;  %v605_v59 = vor.u32 %v603_v40, %v602_v45  ;;  %v606_v60 = vrot.slane %v602_v45, 4  ;;  %v613_v61 = vor.u32 %v611_v50, %v610_v49  ;;  %v965_v2 = vld [vmem:[#allocation2 + $0x74] sm:$0x1] }
  0x9c   : > { %v1206_v1 = vrot.slane %v1204_v52, 4  ;;  %v1209_v63 = vrot.slane %v1207_v53, 5  ;;  %v597_v3 = vsel %vm10153_vm11, %v589_v44, %v596_v54  ;;  %v615_v4 = vrot.slane %v610_v49, 4  ;;  %v833_v28 = vld [vmem:[#allocation2 + $0x90] sm:$0xf] }
  0x9d   : > { %v964_v5 = vld [vmem:[#allocation2 + $0x70] sm:$0xf]  ;;  %v1223_v6 = vshll.u32 %v965_v2, 16  ;;  %822 = vst.msk [vmem:[#allocation2 + $0x7c] sm:$0xf] %vm750_vm6, %v597_v3  ;;  %v824_v7 = vsel %vm10165_vm14, %v598_v57, %v823_v56  ;;  %v614_v8 = vsel %vm10153_vm11, %v606_v60, %v613_v61  ;;  %v827_v10 = vsel %vm10159_vm13, %v605_v59, %v826_v58 }
  0x9e   : > { %v1210_v12 = vor.u32 %v1209_v63, %v1206_v1  ;;  %v1213_v13 = vshll.u32 %v964_v5, 16  ;;  %v1217_v14 = vshrl.u32 %v964_v5, 16  ;;  %825 = vst [vmem:[#allocation2 + $0x80] sm:$0x1] %v824_v7  ;;  %828 = vst [vmem:[#allocation2 + $0x84] sm:$0xf] %v827_v10  ;;  %v831_v16 = vsel %vm10165_vm14, %v615_v4, %v830_v62 }
  0x9f   : > { %829 = vst.msk [vmem:[#allocation2 + $0x88] sm:$0xf] %vm750_vm6, %v614_v8  ;;  %v1225_v18 = vrot.slane %v1223_v6, 5  ;;  %832 = vst [vmem:[#allocation2 + $0x8c] sm:$0x1] %v831_v16  ;;  %v619_v19 = vrot.slane %v617_v51, 7 }
  0xa0   : > { %v620_v21 = vshll.u32 %v416_v36, 16  ;;  %v625_v22 = vshrl.u32 %v417_v0, 16  ;;  %v1211_v9 = vrot.slane %v1210_v12, 4  ;;  %v1215_v24 = vrot.slane %v1213_v13, 5  ;;  %v837_v41 = vld [vmem:[#allocation2 + $0x98] sm:$0x1] }
  0xa1   : > { %v1219_v25 = vrot.slane %v1217_v14, 4  ;;  %v628_v26 = vshll.u32 %v417_v0, 16  ;;  %v623_v30 = vrot.slane %v619_v19, 4  ;;  %v634_v32 = vshrl.u32 %v10343_v17, 16  ;;  %v840_v14 = vld [vmem:[#allocation2 + $0x9c] sm:$0xf] }
  0xa2   : > { %v622_v29 = vor.u32 %v620_v21, %v619_v19  ;;  %v627_v31 = vrot.slane %v625_v22, 7  ;;  %v1216_v34 = vsel %vm10148_vm9, %v1211_v9, %v1215_v24  ;;  %v966_v11 = vld [vmem:[#allocation2 + $0x78] sm:$0xf]  ;;  %v637_v23 = vshll.u32 %v10343_v17, 16 }
  0xa3   : > { %v1220_v35 = vor.u32 %v1219_v25, %v1215_v24  ;;  %v642_v36 = vshrl.u32 %v10346_v46, 16  ;;  %1407 = vrot.lane.b32.xlu0 %v1216_v34, %s9815_s21  ;;  %v1228_v37 = vshrl.u32 %v966_v11, 16  ;;  %v1231_v38 = vshll.u32 %v966_v11, 16 }
  0xa4   : > { %v630_v39 = vor.u32 %v628_v26, %v627_v31  ;;  %v834_v40 = vsel %vm10159_vm13, %v622_v29, %v833_v28  ;;  %v967_v44 = vld [vmem:[#allocation2 + $0x7c] sm:$0xf]  ;;  %v632_v42 = vrot.slane %v627_v31, 4  ;;  %v10356_v45 = vrot.slane %v634_v32, 7  ;;  %v844_v26 = vld [vmem:[#allocation2 + $0xa4] sm:$0x1] }
  0xa5   : > { %v1221_v43 = vrot.slane %v1220_v35, 4  ;;  %835 = vst [vmem:[#allocation2 + $0x90] sm:$0xf] %v834_v40  ;;  %v644_v47 = vrot.slane %v642_v36, 7  ;;  %v1230_v48 = vrot.slane %v1228_v37, 4  ;;  %v1233_v49 = vrot.slane %v1231_v38, 5 }
  0xa6   : > { %v1237_v50 = vshll.u32 %v967_v44, 16  ;;  %v1241_v51 = vshrl.u32 %v967_v44, 16  ;;  %v968_v52 = vld [vmem:[#allocation2 + $0x80] sm:$0x1]  ;;  %v969_v55 = vld [vmem:[#allocation2 + $0x84] sm:$0xf]  ;;  %v631_v58 = vsel %vm10153_vm11, %v623_v30, %v630_v39  ;;  %v838_v57 = vsel %vm10165_vm14, %v632_v42, %v837_v41 }
  0xa7   : > { %v1226_v53 = vsel %vm10148_vm9, %v1221_v43, %v1225_v18  ;;  %v1247_v54 = vshll.u32 %v968_v52, 16  ;;  %v970_v56 = vld [vmem:[#allocation2 + $0x88] sm:$0xf]  ;;  %v1234_v59 = vor.u32 %v1233_v49, %v1230_v48  ;;  %v1252_v62 = vshrl.u32 %v969_v55, 16  ;;  %v971_v0 = vld [vmem:[#allocation2 + $0x8c] sm:$0x1] }
  0xa8   : > { %1409 = vrot.lane.b32.xlu1 %v1226_v53, %s9815_s21  ;;  %v1239_v60 = vrot.slane %v1237_v50, 5  ;;  %v1243_v61 = vrot.slane %v1241_v51, 4  ;;  %836 = vst.msk [vmem:[#allocation2 + $0x94] sm:$0xf] %vm750_vm6, %v631_v58  ;;  %839 = vst [vmem:[#allocation2 + $0x98] sm:$0x1] %v838_v57  ;;  %v639_v13 = vor.u32 %v637_v23, %v10356_v45 }
  0xa9   : > { %v1249_v1 = vrot.slane %v1247_v54, 5  ;;  %v1255_v63 = vshll.u32 %v969_v55, 16  ;;  %v1261_v2 = vshll.u32 %v970_v56, 16  ;;  %v1265_v3 = vshrl.u32 %v970_v56, 16  ;;  %v420_v32 = vld [vmem:[%s9923_s19 + $0x68] sm:$0xf] }
  0xaa   : > { %v1235_v4 = vrot.slane %v1234_v59, 4  ;;  %v1244_v5 = vor.u32 %v1243_v61, %v1239_v60  ;;  %v1254_v6 = vrot.slane %v1252_v62, 4  ;;  %v1271_v7 = vshll.u32 %v971_v0, 16  ;;  %v421_v41 = vld [vmem:[%s9923_s19 + $0x6c] sm:$0xf] }
  0xab   : > { %v1257_v8 = vrot.slane %v1255_v63, 5  ;;  %v1263_v10 = vrot.slane %v1261_v2, 5  ;;  %v1267_v12 = vrot.slane %v1265_v3, 4  ;;  %v640_v21 = vrot.slane %v10356_v45, 4  ;;  %v422_v48 = vld [vmem:[%s9923_s19 + $0x70] sm:$0xf] }
  0xac   : > { %v1240_v16 = vsel %vm10148_vm9, %v1235_v4, %v1239_v60  ;;  %v1245_v17 = vrot.slane %v1244_v5, 4  ;;  %v1273_v18 = vrot.slane %v1271_v7, 5  ;;  %v972_v19 = vld [vmem:[#allocation2 + $0x90] sm:$0xf]  ;;  %v645_v29 = vshll.u32 %v10346_v46, 16 }
  0xad   : > { %1411 = vrot.lane.b32.xlu0 %v1240_v16, %s9815_s21  ;;  %v1258_v22 = vor.u32 %v1257_v8, %v1254_v6  ;;  %v1268_v9 = vor.u32 %v1267_v12, %v1263_v10  ;;  %v1276_v24 = vshrl.u32 %v972_v19, 16  ;;  %v1279_v25 = vshll.u32 %v972_v19, 16  ;;  %v423_v52 = vld [vmem:[%s9923_s19 + $0x74] sm:$0xf]  ;;  %v847_v60 = vld [vmem:[#allocation2 + $0xa8] sm:$0xf] }
  0xae   : > { %v1250_v28 = vsel %vm10148_vm9, %v1245_v17, %v1249_v1  ;;  %v841_v30 = vsel %vm10159_vm13, %v639_v13, %v840_v14  ;;  %v649_v31 = vrot.slane %v644_v47, 4  ;;  %v647_v46 = vor.u32 %v645_v29, %v644_v47  ;;  %v851_v1 = vld [vmem:[#allocation2 + $0xb0] sm:$0x1]  ;;  %v854_v14 = vld [vmem:[#allocation2 + $0xb4] sm:$0xf] }
  0xaf   : > { %1413 = vrot.lane.b32.xlu1 %v1250_v28, %s9815_s21  ;;  %v1259_v34 = vrot.slane %v1258_v22, 4  ;;  %v1269_v35 = vrot.slane %v1268_v9, 4  ;;  %v973_v11 = vld [vmem:[#allocation2 + $0x94] sm:$0xf]  ;;  %v1278_v23 = vrot.slane %v1276_v24, 4  ;;  %v1281_v36 = vrot.slane %v1279_v25, 5 }
  0xb0   : > { %842 = vst [vmem:[#allocation2 + $0x9c] sm:$0xf] %v841_v30  ;;  %v1285_v37 = vshll.u32 %v973_v11, 16  ;;  %v1289_v38 = vshrl.u32 %v973_v11, 16  ;;  %v974_v39 = vld [vmem:[#allocation2 + $0x98] sm:$0x1]  ;;  %v845_v40 = vsel %vm10165_vm14, %v649_v31, %v844_v26  ;;  %v648_v47 = vsel %vm10153_vm11, %v640_v21, %v647_v46 }
  0xb1   : > { %v1264_v43 = vsel %vm10148_vm9, %v1259_v34, %v1263_v10  ;;  %v1274_v44 = vsel %vm10148_vm9, %v1269_v35, %v1273_v18  ;;  %v1282_v42 = vor.u32 %v1281_v36, %v1278_v23  ;;  %v1295_v45 = vshll.u32 %v974_v39, 16  ;;  %846 = vst [vmem:[#allocation2 + $0xa4] sm:$0x1] %v845_v40  ;;  %843 = vst.msk [vmem:[#allocation2 + $0xa0] sm:$0xf] %vm750_vm6, %v648_v47 }
  0xb2   : > { %1415 = vrot.lane.b32.xlu0 %v1264_v43, %s9815_s21  ;;  %v1287_v49 = vrot.slane %v1285_v37, 5  ;;  %v1291_v50 = vrot.slane %v1289_v38, 4  ;;  %v651_v51 = vshrl.u32 %v420_v32, 16  ;;  %v654_v55 = vshll.u32 %v420_v32, 16  ;;  %v858_v31 = vld [vmem:[#allocation2 + $0xbc] sm:$0x1] }
  0xb3   : > { %1417 = vrot.lane.b32.xlu1 %v1274_v44, %s9815_s21  ;;  %v1283_v53 = vrot.slane %v1282_v42, 4  ;;  %v1297_v54 = vrot.slane %v1295_v45, 5  ;;  %v659_v56 = vshrl.u32 %v421_v41, 16  ;;  %v662_v59 = vshll.u32 %v421_v41, 16  ;;  %v872_v23 = vld [vmem:[#allocation2] sm:$0xf] }
  0xb4   : > { %v1292_v58 = vor.u32 %v1291_v50, %v1287_v49  ;;  %v653_v57 = vrot.slane %v651_v51, 7  ;;  %v668_v61 = vshrl.u32 %v422_v48, 16  ;;  %v671_v63 = vshll.u32 %v422_v48, 16  ;;  %904 = vst.msk [vmem:[#allocation4] sm:$0xf] %vm750_vm6, %v872_v23 }
  0xb5   : > { %v1288_v62 = vsel %vm10148_vm9, %v1283_v53, %v1287_v49  ;;  %v661_v0 = vrot.slane %v659_v56, 7  ;;  %v676_v2 = vshrl.u32 %v423_v52, 16  ;;  %v679_v29 = vshll.u32 %v423_v52, 16  ;;  %v874_v38 = vld [vmem:[#allocation2 + $0xc] sm:$0xf] }
  0xb6   : > { %1419 = vrot.lane.b32.xlu0 %v1288_v62, %s9815_s21  ;;  %v1293_v3 = vrot.slane %v1292_v58, 4  ;;  %v656_v5 = vor.u32 %v654_v55, %v653_v57  ;;  %v657_v6 = vrot.slane %v653_v57, 4  ;;  %v670_v7 = vrot.slane %v668_v61, 7  ;;  %906 = vst.msk [vmem:[#allocation4 + $0x8] sm:$0xf] %vm750_vm6, %v874_v38 }
  0xb7   : > { %v975_v4 = vld [vmem:[#allocation2 + $0x9c] sm:$0xf]  ;;  %v664_v12 = vor.u32 %v662_v59, %v661_v0  ;;  %v666_v13 = vrot.slane %v661_v0, 4  ;;  %v678_v28 = vrot.slane %v676_v2, 7  ;;  %v873_v48 = vld [vmem:[#allocation2 + $0x4] sm:$0xf] }
  0xb8   : > { %v1300_v8 = vshrl.u32 %v975_v4, 16  ;;  %v1303_v10 = vshll.u32 %v975_v4, 16  ;;  %v1298_v16 = vsel %vm10148_vm9, %v1293_v3, %v1297_v54  ;;  %v977_v17 = vld [vmem:[#allocation2 + $0xa4] sm:$0x1]  ;;  %v848_v18 = vsel %vm10159_vm13, %v656_v5, %v847_v60  ;;  %v976_v25 = vld [vmem:[#allocation2 + $0xa0] sm:$0xf] }
  0xb9   : > { %v673_v19 = vor.u32 %v671_v63, %v670_v7  ;;  %1421 = vrot.lane.b32.xlu1 %v1298_v16, %s9815_s21  ;;  %v665_v9 = vsel %vm10153_vm11, %v657_v6, %v664_v12  ;;  %849 = vst [vmem:[#allocation2 + $0xa8] sm:$0xf] %v848_v18  ;;  %v674_v24 = vrot.slane %v670_v7, 4  ;;  %v852_v26 = vsel %vm10165_vm14, %v666_v13, %v851_v1  ;;  %v875_v49 = vld [vmem:[#allocation2 + $0x10] sm:$0xf] }
  0xba   : > { %v1302_v21 = vrot.slane %v1300_v8, 4  ;;  %v1305_v22 = vrot.slane %v1303_v10, 5  ;;  %850 = vst.msk [vmem:[#allocation2 + $0xac] sm:$0xf] %vm750_vm6, %v665_v9  ;;  %v1309_v34 = vshll.u32 %v976_v25, 16  ;;  %v1313_v35 = vshrl.u32 %v976_v25, 16 }
  0xbb   : > { %v855_v30 = vsel %vm10159_vm13, %v673_v19, %v854_v14  ;;  %v1319_v11 = vshll.u32 %v977_v17, 16  ;;  %853 = vst [vmem:[#allocation2 + $0xb0] sm:$0x1] %v852_v26  ;;  %v681_v36 = vor.u32 %v679_v29, %v678_v28  ;;  %v683_v37 = vrot.slane %v678_v28, 4  ;;  %905 = vst.msk [vmem:[#allocation4 + $0x4] sm:$0xf] %vm750_vm6, %v873_v48 }
  0xbc   : > { %v1306_v32 = vor.u32 %v1305_v22, %v1302_v21  ;;  %856 = vst [vmem:[#allocation2 + $0xb4] sm:$0xf] %v855_v30  ;;  %v1311_v46 = vrot.slane %v1309_v34, 5  ;;  %v1315_v40 = vrot.slane %v1313_v35, 4  ;;  %907 = vst.msk [vmem:[#allocation4 + $0xc] sm:$0xf] %vm750_vm6, %v875_v49 }
  0xbd   : > { %v682_v41 = vsel %vm10153_vm11, %v674_v24, %v681_v36  ;;  %v859_v43 = vsel %vm10165_vm14, %v683_v37, %v858_v31  ;;  %v1321_v45 = vrot.slane %v1319_v11, 5  ;;  %v1501_v4 = vld [vmem:[#allocation2 + $0x4] sm:$0xf]  ;;  %v876_v17 = vld [vmem:[#allocation2 + $0x18] sm:$0xf]  ;;  %vm1597_vm0 = vcmask 1046532  }
  0xbe   : > { %v1307_v39 = vrot.slane %v1306_v32, 4  ;;  %v1316_v42 = vor.u32 %v1315_v40, %v1311_v46  ;;  %857 = vst.msk [vmem:[#allocation2 + $0xb8] sm:$0xf] %vm750_vm6, %v682_v41  ;;  %860 = vst [vmem:[#allocation2 + $0xbc] sm:$0x1] %v859_v43  ;;  %v1601_v26 = vrot.slane %v1501_v4, 5 }
  0xbf   : > { %v1500_v21 = vld [vmem:[#allocation2] sm:$0xe]  ;;  %908 = vst.msk [vmem:[#allocation4 + $0x10] sm:$0xf] %vm750_vm6, %v876_v17  ;;  %v877_v22 = vld [vmem:[#allocation2 + $0x1c] sm:$0xf]  ;;  %vm10435_vm1 = vmor %vm1596_vm15, %vm1597_vm0 }
  0xc0   : > { %v1312_v44 = vsel %vm10148_vm9, %v1307_v39, %v1311_v46  ;;  %v978_v50 = vld [vmem:[#allocation2 + $0xa8] sm:$0xf]  ;;  %v1317_v47 = vrot.slane %v1316_v42, 4  ;;  %909 = vst.msk [vmem:[#allocation4 + $0x14] sm:$0xf] %vm750_vm6, %v877_v22  ;;  %v9066_v11 = vrot.slane %v1500_v21, 9 }
  0xc1   : > { %1423 = vrot.lane.b32.xlu0 %v1312_v44, %s9815_s21  ;;  %v979_v51 = vld [vmem:[#allocation2 + $0xac] sm:$0xf]  ;;  %v1324_v52 = vshrl.u32 %v978_v50, 16  ;;  %v1327_v53 = vshll.u32 %v978_v50, 16  ;;  %v1502_v28 = vld [vmem:[#allocation2 + $0x8] sm:$0x1] }
  0xc2   : > { %v1333_v54 = vshll.u32 %v979_v51, 16  ;;  %v1337_v55 = vshrl.u32 %v979_v51, 16  ;;  %v980_v56 = vld [vmem:[#allocation2 + $0xb0] sm:$0x1]  ;;  %v1322_v57 = vsel %vm10148_vm9, %v1317_v47, %v1321_v45  ;;  %v878_v32 = vld [vmem:[#allocation2 + $0x24] sm:$0xf]  ;;  %v1602_v48 = vsel %vm10435_vm1, %v9066_v11, %v1601_v26 }
  0xc3   : > { %v981_v58 = vld [vmem:[#allocation2 + $0xb4] sm:$0xf]  ;;  %v1326_v59 = vrot.slane %v1324_v52, 4  ;;  %v1329_v60 = vrot.slane %v1327_v53, 5  ;;  %v1343_v61 = vshll.u32 %v980_v56, 16  ;;  %1425 = vrot.lane.b32.xlu1 %v1322_v57, %s9815_s21  ;;  %v1603_v46 = vrot.slane %v1601_v26, 4 }
  0xc4   : > { %v1335_v62 = vrot.slane %v1333_v54, 5  ;;  %v1339_v0 = vrot.slane %v1337_v55, 4  ;;  %v1348_v1 = vshrl.u32 %v981_v58, 16  ;;  %v1351_v63 = vshll.u32 %v981_v58, 16  ;;  %v1504_v31 = vld [vmem:[#allocation2 + $0x10] sm:$0xf] }
  0xc5   : > { %v1330_v2 = vor.u32 %v1329_v60, %v1326_v59  ;;  %v1345_v3 = vrot.slane %v1343_v61, 5  ;;  %v982_v6 = vld [vmem:[#allocation2 + $0xb8] sm:$0xf]  ;;  %v983_v10 = vld [vmem:[#allocation2 + $0xbc] sm:$0x1]  ;;  %v1604_v40 = vrot.slane %v1502_v28, 5 }
  0xc6   : > { %v1340_v5 = vor.u32 %v1339_v0, %v1335_v62  ;;  %v1350_v7 = vrot.slane %v1348_v1, 4  ;;  %v1353_v8 = vrot.slane %v1351_v63, 5  ;;  %v1357_v13 = vshll.u32 %v982_v6, 16  ;;  %910 = vst.msk [vmem:[#allocation4 + $0x18] sm:$0xf] %vm750_vm6, %v878_v32 }
  0xc7   : > { %v1331_v12 = vrot.slane %v1330_v2, 4  ;;  %v1361_v14 = vshrl.u32 %v982_v6, 16  ;;  %v1367_v16 = vshll.u32 %v983_v10, 16  ;;  %v879_v23 = vld [vmem:[#allocation2 + $0x28] sm:$0xf]  ;;  %v1608_v41 = vrot.slane %v1504_v31, 5 }
  0xc8   : > { %v1341_v18 = vrot.slane %v1340_v5, 4  ;;  %v1354_v19 = vor.u32 %v1353_v8, %v1350_v7  ;;  %v1359_v24 = vrot.slane %v1357_v13, 5  ;;  %v1503_v38 = vld [vmem:[#allocation2 + $0xc] sm:$0xe]  ;;  %911 = vst.msk [vmem:[#allocation4 + $0x1c] sm:$0xf] %vm750_vm6, %v879_v23  ;;  %v1605_v52 = vsel %vm10435_vm1, %v1603_v46, %v1604_v40 }
  0xc9   : > { %v1336_v9 = vsel %vm10148_vm9, %v1331_v12, %v1335_v62  ;;  %v1363_v25 = vrot.slane %v1361_v14, 4  ;;  %v1369_v35 = vrot.slane %v1367_v16, 5  ;;  %v1507_v43 = vld [vmem:[#allocation2 + $0x1c] sm:$0xf]  ;;  %v1505_v44 = vld [vmem:[#allocation2 + $0x14] sm:$0x1] }
  0xca   : > { %1427 = vrot.lane.b32.xlu0 %v1336_v9, %s9815_s21  ;;  %v1346_v29 = vsel %vm10148_vm9, %v1341_v18, %v1345_v3  ;;  %v1355_v30 = vrot.slane %v1354_v19, 4  ;;  %v880_v42 = vld [vmem:[#allocation2 + $0x30] sm:$0xf]  ;;  %v9067_v49 = vrot.slane %v1503_v38, 9  ;;  %v881_v50 = vld [vmem:[#allocation2 + $0x34] sm:$0xf] }
  0xcb   : > { %1429 = vrot.lane.b32.xlu1 %v1346_v29, %s9815_s21  ;;  %v1364_v34 = vor.u32 %v1363_v25, %v1359_v24  ;;  %912 = vst.msk [vmem:[#allocation4 + $0x20] sm:$0xf] %vm750_vm6, %v880_v42  ;;  %v1506_v47 = vld [vmem:[#allocation2 + $0x18] sm:$0xe]  ;;  %v1615_v51 = vrot.slane %v1507_v43, 5  ;;  %v1610_v53 = vrot.slane %v1608_v41, 4 }
  0xcc   : > { %v1360_v36 = vsel %vm10148_vm9, %v1355_v30, %v1359_v24  ;;  %913 = vst.msk [vmem:[#allocation4 + $0x24] sm:$0xf] %vm750_vm6, %v881_v50  ;;  %v1611_v54 = vrot.slane %v1505_v44, 5  ;;  %v1508_v55 = vld [vmem:[#allocation2 + $0x20] sm:$0x1]  ;;  %v1372_v56 = vpop.permute.xlu0 %1371  ;;  %v1609_v60 = vsel %vm10435_vm1, %v9067_v49, %v1608_v41  ;;  %v9068_v61 = vrot.slane %v1506_v47, 9 }
  0xcd   : > { %v1365_v39 = vrot.slane %v1364_v34, 4  ;;  %v882_v58 = vld [vmem:[#allocation2 + $0x3c] sm:$0xf]  ;;  %v1510_v57 = vld [vmem:[#allocation2 + $0x28] sm:$0xf]  ;;  %v1617_v62 = vrot.slane %v1615_v51, 4 }
  0xce   : > { %1431 = vrot.lane.b32.xlu0 %v1360_v36, %s9815_s21  ;;  %914 = vst.msk [vmem:[#allocation4 + $0x28] sm:$0xf] %vm750_vm6, %v882_v58  ;;  %v883_v59 = vld [vmem:[#allocation2 + $0x40] sm:$0xf]  ;;  %v1618_v0 = vrot.slane %v1508_v55, 5  ;;  %v1612_v2 = vsel %vm10435_vm1, %v1610_v53, %v1611_v54  ;;  %v1622_v3 = vrot.slane %v1510_v57, 5  ;;  %v1616_v7 = vsel %vm10435_vm1, %v9068_v61, %v1615_v51 }
  0xcf   : > { %v1370_v45 = vsel %vm10148_vm9, %v1365_v39, %v1369_v35  ;;  %915 = vst.msk [vmem:[#allocation4 + $0x2c] sm:$0xf] %vm750_vm6, %v883_v59  ;;  %v1509_v1 = vld [vmem:[#allocation2 + $0x24] sm:$0xe]  ;;  %v884_v63 = vld [vmem:[#allocation2 + $0x48] sm:$0xf] }
  0xd0   : > { %1433 = vrot.lane.b32.xlu1 %v1370_v45, %s9815_s21  ;;  %916 = vst.msk [vmem:[#allocation4 + $0x30] sm:$0xf] %vm750_vm6, %v884_v63  ;;  %v885_v4 = vld [vmem:[#allocation2 + $0x4c] sm:$0xf]  ;;  %v1513_v6 = vld [vmem:[#allocation2 + $0x34] sm:$0xf]  ;;  %v1374_v10 = vpop.permute.xlu0 %1373  ;;  %v1619_v13 = vsel %vm10435_vm1, %v1617_v62, %v1618_v0 }
  0xd1   : > { %v1511_v5 = vld [vmem:[#allocation2 + $0x2c] sm:$0x1]  ;;  %917 = vst.msk [vmem:[#allocation4 + $0x34] sm:$0xf] %vm750_vm6, %v885_v4  ;;  %v9069_v8 = vrot.slane %v1509_v1, 9  ;;  %v1624_v17 = vrot.slane %v1622_v3, 4 }
  0xd2   : > { %1711 = vrot.lane.b32.xlu0 %v1602_v48, %s9816_s22  ;;  %v886_v12 = vld [vmem:[#allocation2 + $0x54] sm:$0xf]  ;;  %v1512_v14 = vld [vmem:[#allocation2 + $0x30] sm:$0xe]  ;;  %v887_v16 = vld [vmem:[#allocation2 + $0x58] sm:$0xf] }
  0xd3   : > { %918 = vst.msk [vmem:[#allocation4 + $0x38] sm:$0xf] %vm750_vm6, %v886_v12  ;;  %v1625_v18 = vrot.slane %v1511_v5, 5  ;;  %v1629_v19 = vrot.slane %v1513_v6, 5  ;;  %vm1467_vm2 = vcmask 60448   ;;  %v1623_v24 = vsel %vm10435_vm1, %v9069_v8, %v1622_v3  ;;  %s8996_s21 = sshll.u32 %s9925_s20, 4  ;;  %s13518_s21 = int_to_ptr.vmem [resolvable:$true] %s8996_s21 }
  0xd4   : > { %1713 = vrot.lane.b32.xlu1 %v1605_v52, %s9816_s22  ;;  %919 = vst.msk [vmem:[#allocation4 + $0x3c] sm:$0xf] %vm750_vm6, %v887_v16  ;;  %v1514_v21 = vld [vmem:[#allocation2 + $0x38] sm:$0x1]  ;;  %v1516_v22 = vld [vmem:[#allocation2 + $0x40] sm:$0xf] }
  0xd5   : > { %1468 = vst.msk [vmem:[#allocation4] sm:$0xf] %vm1467_vm2, %v1372_v56  ;;  %1469 = vst.msk [vmem:[#allocation4 + $0x4] sm:$0xf] %vm1467_vm2, %v1374_v10  ;;  %v888_v9 = vld [vmem:[#allocation2 + $0x60] sm:$0xf]  ;;  %v1626_v30 = vsel %vm10435_vm1, %v1624_v17, %v1625_v18 }
  0xd6   : > { %1715 = vrot.lane.b32.xlu0 %v1609_v60, %s9816_s22  ;;  %v9070_v25 = vrot.slane %v1512_v14, 9  ;;  %920 = vst.msk [vmem:[#allocation4 + $0x40] sm:$0xf] %vm750_vm6, %v888_v9  ;;  %v889_v26 = vld [vmem:[#allocation2 + $0x64] sm:$0xf]  ;;  %v1631_v31 = vrot.slane %v1629_v19, 4 }
  0xd7   : > { %v1515_v28 = vld [vmem:[#allocation2 + $0x3c] sm:$0xe]  ;;  %v1517_v29 = vld [vmem:[#allocation2 + $0x44] sm:$0x1]  ;;  %921 = vst.msk [vmem:[#allocation4 + $0x44] sm:$0xf] %vm750_vm6, %v889_v26 }
  0xd8   : > { %1717 = vrot.lane.b32.xlu1 %v1612_v2, %s9816_s22  ;;  %v1632_v32 = vrot.slane %v1514_v21, 5  ;;  %v1636_v34 = vrot.slane %v1516_v22, 5  ;;  %v890_v35 = vld [vmem:[#allocation2 + $0x6c] sm:$0xf]  ;;  %v891_v23 = vld [vmem:[#allocation2 + $0x70] sm:$0xf]  ;;  %v1630_v36 = vsel %vm10435_vm1, %v9070_v25, %v1629_v19 }
  0xd9   : > { %v1519_v11 = vld [vmem:[#allocation2 + $0x4c] sm:$0xf]  ;;  %922 = vst.msk [vmem:[#allocation4 + $0x48] sm:$0xf] %vm750_vm6, %v890_v35  ;;  %v9071_v38 = vrot.slane %v1515_v28, 9  ;;  %v1639_v40 = vrot.slane %v1517_v29, 5 }
  0xda   : > { %1719 = vrot.lane.b32.xlu0 %v1616_v7, %s9816_s22  ;;  %v1518_v39 = vld [vmem:[#allocation2 + $0x48] sm:$0xe]  ;;  %923 = vst.msk [vmem:[#allocation4 + $0x4c] sm:$0xf] %vm750_vm6, %v891_v23  ;;  %v892_v46 = vld [vmem:[#allocation2 + $0x78] sm:$0xf]  ;;  %v1633_v42 = vsel %vm10435_vm1, %v1631_v31, %v1632_v32 }
  0xdb   : > { %v1520_v41 = vld [vmem:[#allocation2 + $0x50] sm:$0x1]  ;;  %924 = vst.msk [vmem:[#allocation4 + $0x50] sm:$0xf] %vm750_vm6, %v892_v46  ;;  %v893_v44 = vld [vmem:[#allocation2 + $0x7c] sm:$0xf]  ;;  %v1637_v53 = vsel %vm10435_vm1, %v9071_v38, %v1636_v34 }
  0xdc   : > { %1721 = vrot.lane.b32.xlu1 %v1619_v13, %s9816_s22  ;;  %v1638_v45 = vrot.slane %v1636_v34, 4  ;;  %v1643_v48 = vrot.slane %v1519_v11, 5  ;;  %925 = vst.msk [vmem:[#allocation4 + $0x54] sm:$0xf] %vm750_vm6, %v893_v44  ;;  %v894_v49 = vld [vmem:[#allocation2 + $0x84] sm:$0xf] }
  0xdd   : > { %v895_v50 = vld [vmem:[#allocation2 + $0x88] sm:$0xf]  ;;  %v1522_v47 = vld [vmem:[#allocation2 + $0x58] sm:$0xf]  ;;  %926 = vst.msk [vmem:[#allocation4 + $0x58] sm:$0xf] %vm750_vm6, %v894_v49 }
  0xde   : > { %1723 = vrot.lane.b32.xlu0 %v1623_v24, %s9816_s22  ;;  %927 = vst.msk [vmem:[#allocation4 + $0x5c] sm:$0xf] %vm750_vm6, %v895_v50  ;;  %v896_v51 = vld [vmem:[#allocation2 + $0x90] sm:$0xf]  ;;  %v897_v52 = vld [vmem:[#allocation2 + $0x94] sm:$0xf]  ;;  %v1640_v62 = vsel %vm10435_vm1, %v1638_v45, %v1639_v40 }
  0xdf   : > { %v1376_v43 = vpop.permute.xlu1 %1375  ;;  %v9072_v54 = vrot.slane %v1518_v39, 9  ;;  %v1521_v55 = vld [vmem:[#allocation2 + $0x54] sm:$0xe]  ;;  %928 = vst.msk [vmem:[#allocation4 + $0x60] sm:$0xf] %vm750_vm6, %v896_v51  ;;  %v1646_v58 = vrot.slane %v1520_v41, 5 }
  0xe0   : > { %1725 = vrot.lane.b32.xlu1 %v1626_v30, %s9816_s22  ;;  %1470 = vst.msk [vmem:[#allocation4 + $0x8] sm:$0xf] %vm1467_vm2, %v1376_v43  ;;  %v898_v56 = vld [vmem:[#allocation2 + $0x9c] sm:$0xf]  ;;  %v899_v61 = vld [vmem:[#allocation2 + $0xa0] sm:$0xf] }
  0xe1   : > { %929 = vst.msk [vmem:[#allocation4 + $0x64] sm:$0xf] %vm750_vm6, %v897_v52  ;;  %v1523_v57 = vld [vmem:[#allocation2 + $0x5c] sm:$0x1]  ;;  %930 = vst.msk [vmem:[#allocation4 + $0x68] sm:$0xf] %vm750_vm6, %v898_v56  ;;  %v1644_v6 = vsel %vm10435_vm1, %v9072_v54, %v1643_v48 }
  0xe2   : > { %1727 = vrot.lane.b32.xlu0 %v1630_v36, %s9816_s22  ;;  %v1380_v60 = vpop.permute.xlu0 %1379  ;;  %v1645_v0 = vrot.slane %v1643_v48, 4  ;;  %v1650_v1 = vrot.slane %v1522_v47, 5  ;;  %931 = vst.msk [vmem:[#allocation4 + $0x6c] sm:$0xf] %vm750_vm6, %v899_v61  ;;  %v900_v63 = vld [vmem:[#allocation2 + $0xa8] sm:$0xf] }
  0xe3   : > { %v1378_v59 = vpop.permute.xlu1 %1377  ;;  %1472 = vst.msk [vmem:[#allocation4 + $0x10] sm:$0xf] %vm1467_vm2, %v1380_v60  ;;  %v901_v2 = vld [vmem:[#allocation2 + $0xac] sm:$0xf]  ;;  %v1525_v3 = vld [vmem:[#allocation2 + $0x64] sm:$0xf] }
  0xe4   : > { %1729 = vrot.lane.b32.xlu1 %v1633_v42, %s9816_s22  ;;  %1471 = vst.msk [vmem:[#allocation4 + $0xc] sm:$0xf] %vm1467_vm2, %v1378_v59  ;;  %v902_v4 = vld [vmem:[#allocation2 + $0xb4] sm:$0xf]  ;;  %v903_v5 = vld [vmem:[#allocation2 + $0xb8] sm:$0xf]  ;;  %v1647_v14 = vsel %vm10435_vm1, %v1645_v0, %v1646_v58 }
  0xe5   : > { %932 = vst.msk [vmem:[#allocation4 + $0x70] sm:$0xf] %vm750_vm6, %v900_v63  ;;  %933 = vst.msk [vmem:[#allocation4 + $0x74] sm:$0xf] %vm750_vm6, %v901_v2  ;;  %v9073_v7 = vrot.slane %v1521_v55, 9  ;;  %v1653_v8 = vrot.slane %v1523_v57, 5 }
  0xe6   : > { %1731 = vrot.lane.b32.xlu0 %v1637_v53, %s9816_s22  ;;  %934 = vst.msk [vmem:[#allocation4 + $0x78] sm:$0xf] %vm750_vm6, %v902_v4  ;;  %935 = vst.msk [vmem:[#allocation4 + $0x7c] sm:$0xf] %vm750_vm6, %v903_v5  ;;  %v1524_v10 = vld [vmem:[#allocation2 + $0x60] sm:$0xe] }
  0xe7   : > { %v1526_v12 = vld [vmem:[#allocation2 + $0x68] sm:$0x1]  ;;  %v1382_v13 = vpop.permute.xlu1 %1381  ;;  %v1652_v16 = vrot.slane %v1650_v1, 4  ;;  %v1657_v17 = vrot.slane %v1525_v3, 5  ;;  %v424_v19 = vld [vmem:[%s9923_s19 + $0x78] sm:$0xf]  ;;  %v1651_v28 = vsel %vm10435_vm1, %v9073_v7, %v1650_v1 }
  0xe8   : > { %1733 = vrot.lane.b32.xlu1 %v1640_v62, %s9816_s22  ;;  %1473 = vst.msk [vmem:[#allocation4 + $0x14] sm:$0xf] %vm1467_vm2, %v1382_v13  ;;  %v1384_v18 = vpop.permute.xlu0 %1383  ;;  %v425_v21 = vld [vmem:[%s9923_s19 + $0x7c] sm:$0xf]  ;;  %v1528_v22 = vld [vmem:[#allocation2 + $0x70] sm:$0xf] }
  0xe9   : > { %1474 = vst.msk [vmem:[#allocation4 + $0x18] sm:$0xf] %vm1467_vm2, %v1384_v18  ;;  %v685_v9 = vshrl.u32 %v424_v19, 16  ;;  %v688_v24 = vshll.u32 %v424_v19, 16  ;;  %v693_v25 = vshrl.u32 %v425_v21, 16  ;;  %v696_v26 = vshll.u32 %v425_v21, 16 }
  0xea   : > { %1735 = vrot.lane.b32.xlu0 %v1644_v6, %s9816_s22  ;;  %v9074_v29 = vrot.slane %v1524_v10, 9  ;;  %v1527_v30 = vld [vmem:[#allocation2 + $0x6c] sm:$0xe]  ;;  %v1654_v35 = vsel %vm10435_vm1, %v1652_v16, %v1653_v8  ;;  %v1659_v11 = vrot.slane %v1657_v17, 4  ;;  %v1660_v23 = vrot.slane %v1526_v12, 5  ;;  %s9353_s19 = sshll.u32 %s9888_s28, 12 }
  0xeb   : > { %v1386_v31 = vpop.permute.xlu1 %1385  ;;  %v687_v32 = vrot.slane %v685_v9, 7  ;;  %v10521_v34 = vrot.slane %v693_v25, 7  ;;  %v1664_v36 = vrot.slane %v1528_v22, 5  ;;  %v861_v39 = vld [vmem:[#allocation2 + $0xc0] sm:$0xf]  ;;  %v9075_v45 = vrot.slane %v1527_v30, 9 }
  0xec   : > { %1737 = vrot.lane.b32.xlu1 %v1647_v14, %s9816_s22  ;;  %1475 = vst.msk [vmem:[#allocation4 + $0x1c] sm:$0xf] %vm1467_vm2, %v1386_v31  ;;  %v1388_v38 = vpop.permute.xlu0 %1387  ;;  %v1529_v46 = vld [vmem:[#allocation2 + $0x74] sm:$0x1]  ;;  %v1531_v40 = vld [vmem:[#allocation2 + $0x7c] sm:$0xf]  ;;  %v1658_v42 = vsel %vm10435_vm1, %v9074_v29, %v1657_v17  ;;  %v1661_v51 = vsel %vm10435_vm1, %v1659_v11, %v1660_v23 }
  0xed   : > { %1476 = vst.msk [vmem:[#allocation4 + $0x20] sm:$0xf] %vm1467_vm2, %v1388_v38  ;;  %v690_v41 = vor.u32 %v688_v24, %v687_v32  ;;  %v691_v43 = vrot.slane %v687_v32, 4  ;;  %v698_v44 = vor.u32 %v696_v26, %v10521_v34  ;;  %v1530_v48 = vld [vmem:[#allocation2 + $0x78] sm:$0xe]  ;;  %v1666_v52 = vrot.slane %v1664_v36, 4 }
  0xee   : > { %1739 = vrot.lane.b32.xlu0 %v1651_v28, %s9816_s22  ;;  %v1667_v53 = vrot.slane %v1529_v46, 5  ;;  %v1671_v54 = vrot.slane %v1531_v40, 5  ;;  %v1532_v55 = vld [vmem:[#allocation2 + $0x80] sm:$0x1]  ;;  %v1534_v56 = vld [vmem:[#allocation2 + $0x88] sm:$0xf]  ;;  %v1665_v27 = vsel %vm10435_vm1, %v9075_v45, %v1664_v36 }
  0xef   : > { %v1390_v49 = vpop.permute.xlu1 %1389  ;;  %v862_v50 = vsel %vm10159_vm13, %v690_v41, %v861_v39  ;;  %v699_v47 = vsel %vm10153_vm11, %v691_v43, %v698_v44  ;;  %v9076_v58 = vrot.slane %v1530_v48, 9  ;;  %v1533_v57 = vld [vmem:[#allocation2 + $0x84] sm:$0xe]  ;;  %v1674_v61 = vrot.slane %v1532_v55, 5  ;;  %v1535_v0 = vld [vmem:[#allocation2 + $0x8c] sm:$0x1] }
  0xf0   : > { %1741 = vrot.lane.b32.xlu1 %v1654_v35, %s9816_s22  ;;  %1477 = vst.msk [vmem:[#allocation4 + $0x24] sm:$0xf] %vm1467_vm2, %v1390_v49  ;;  %863 = vst [vmem:[#allocation2 + $0xc0] sm:$0xf] %v862_v50  ;;  %v1668_v59 = vsel %vm10435_vm1, %v1666_v52, %v1667_v53  ;;  %v1673_v60 = vrot.slane %v1671_v54, 4  ;;  %v1678_v62 = vrot.slane %v1534_v56, 5 }
  0xf1   : > { %864 = vst.msk [vmem:[#allocation2 + $0xc4] sm:$0xf] %vm750_vm6, %v699_v47  ;;  %v1537_v1 = vld [vmem:[#allocation2 + $0x94] sm:$0xf]  ;;  %v1672_v63 = vsel %vm10435_vm1, %v9076_v58, %v1671_v54  ;;  %v9077_v2 = vrot.slane %v1533_v57, 9  ;;  %v1681_v6 = vrot.slane %v1535_v0, 5 }
  0xf2   : > { %1743 = vrot.lane.b32.xlu0 %v1658_v42, %s9816_s22  ;;  %v1536_v3 = vld [vmem:[#allocation2 + $0x90] sm:$0xe]  ;;  %v1675_v4 = vsel %vm10435_vm1, %v1673_v60, %v1674_v61  ;;  %v1680_v5 = vrot.slane %v1678_v62, 4  ;;  %v1685_v7 = vrot.slane %v1537_v1, 5  ;;  %v1538_v8 = vld [vmem:[#allocation2 + $0x98] sm:$0x1] }
  0xf3   : > { %v1540_v10 = vld [vmem:[#allocation2 + $0xa0] sm:$0xf]  ;;  %v1679_v12 = vsel %vm10435_vm1, %v9077_v2, %v1678_v62  ;;  %v9078_v13 = vrot.slane %v1536_v3, 9  ;;  %v1539_v14 = vld [vmem:[#allocation2 + $0x9c] sm:$0xe]  ;;  %v1688_v19 = vrot.slane %v1538_v8, 5 }
  0xf4   : > { %1745 = vrot.lane.b32.xlu1 %v1661_v51, %s9816_s22  ;;  %v1682_v17 = vsel %vm10435_vm1, %v1680_v5, %v1681_v6  ;;  %v1687_v18 = vrot.slane %v1685_v7, 4  ;;  %v1692_v21 = vrot.slane %v1540_v10, 5  ;;  %v1541_v22 = vld [vmem:[#allocation2 + $0xa4] sm:$0x1]  ;;  %v1543_v9 = vld [vmem:[#allocation2 + $0xac] sm:$0xf] }
  0xf5   : > { %v1686_v24 = vsel %vm10435_vm1, %v9078_v13, %v1685_v7  ;;  %v9079_v25 = vrot.slane %v1539_v14, 9  ;;  %v1542_v26 = vld [vmem:[#allocation2 + $0xa8] sm:$0xe]  ;;  %v1695_v31 = vrot.slane %v1541_v22, 5  ;;  %v1699_v32 = vrot.slane %v1543_v9, 5  ;;  %s13524_s28 = scalar_lea.sflag [#allocation7], %s269_s13 }
  0xf6   : > { %1747 = vrot.lane.b32.xlu0 %v1665_v27, %s9816_s22  ;;  %v1689_v29 = vsel %vm10435_vm1, %v1687_v18, %v1688_v19  ;;  %v1694_v30 = vrot.slane %v1692_v21, 4  ;;  %v1544_v35 = vld [vmem:[#allocation2 + $0xb0] sm:$0x1]  ;;  %v1546_v11 = vld [vmem:[#allocation2 + $0xb8] sm:$0xf]  ;;  %v9080_v36 = vrot.slane %v1542_v26, 9 }
  0xf7   : > { %v1693_v23 = vsel %vm10435_vm1, %v9079_v25, %v1692_v21  ;;  %v1545_v39 = vld [vmem:[#allocation2 + $0xb4] sm:$0xe]  ;;  %v1701_v41 = vrot.slane %v1699_v32, 4  ;;  %v1702_v43 = vrot.slane %v1544_v35, 5  ;;  %v1706_v44 = vrot.slane %v1546_v11, 5  ;;  %s9752_s14 = scalar_lea.vmem %s13518_s21, 4096 }
  0xf8   : > { %1749 = vrot.lane.b32.xlu1 %v1668_v59, %s9816_s22  ;;  %v1696_v40 = vsel %vm10435_vm1, %v1694_v30, %v1695_v31  ;;  %v1547_v42 = vld [vmem:[#allocation2 + $0xbc] sm:$0x1]  ;;  %v1700_v45 = vsel %vm10435_vm1, %v9080_v36, %v1699_v32  ;;  %v9081_v48 = vrot.slane %v1545_v39, 9  ;;  %v1840_v27 = vld [vmem:[#allocation2 + $0xc] sm:$0xf]  ;;  %vm1807_vm3 = vcmask 93248   ;;  %p9753_p12 = scmp.ne.s32.totalorder %s13518_s21, %s9752_s14 }
  0xf9   : > { %v1703_v47 = vsel %vm10435_vm1, %v1701_v41, %v1702_v43  ;;  %v1708_v51 = vrot.slane %v1706_v44, 4  ;;  %v1709_v52 = vrot.slane %v1547_v42, 5  ;;  %v1841_v58 = vld [vmem:[#allocation2 + $0x10] sm:$0xf]  ;;  %v1842_v57 = vld [vmem:[#allocation2 + $0x18] sm:$0xf] }
  0xfa   : > { %1751 = vrot.lane.b32.xlu0 %v1672_v63, %s9816_s22  ;;  %v1707_v53 = vsel %vm10435_vm1, %v9081_v48, %v1706_v44  ;;  %v1843_v59 = vld [vmem:[#allocation2 + $0x1c] sm:$0xf]  ;;  %v1844_v61 = vld [vmem:[#allocation2 + $0x24] sm:$0xf]  ;;  %v1845_v62 = vld [vmem:[#allocation2 + $0x28] sm:$0xf]  ;;  %p9754_p13 = pnand %p9753_p12, %p9905_p5 }
  0xfb   : > { %v1392_v16 = vpop.permute.xlu0 %1391  ;;  %v1710_v55 = vsel %vm10435_vm1, %v1708_v51, %v1709_v52  ;;  %v1846_v1 = vld [vmem:[#allocation2 + $0x30] sm:$0xf]  ;;  %v1847_v63 = vld [vmem:[#allocation2 + $0x34] sm:$0xf]  ;;  %v1848_v2 = vld [vmem:[#allocation2 + $0x3c] sm:$0xf] }
  0xfc   : > { %1753 = vrot.lane.b32.xlu1 %v1675_v4, %s9816_s22  ;;  %1478 = vst.msk [vmem:[#allocation4 + $0x28] sm:$0xf] %vm1467_vm2, %v1392_v16  ;;  %v1849_v4 = vld [vmem:[#allocation2 + $0x40] sm:$0xf]  ;;  %v1850_v6 = vld [vmem:[#allocation2 + $0x48] sm:$0xf]  ;;  %p9755_p0 = pneg %p9754_p13 }
  0xfd   : > { %v1851_v8 = vld [vmem:[#allocation2 + $0x4c] sm:$0xf]  ;;  %v1853_v14 = vld [vmem:[#allocation2 + $0x58] sm:$0xf]  ;;  %v1854_v16 = vld [vmem:[#allocation2 + $0x60] sm:$0xf] }
  0xfe   : > { %1755 = vrot.lane.b32.xlu0 %v1679_v12, %s9816_s22  ;;  %v1852_v12 = vld [vmem:[#allocation2 + $0x54] sm:$0xf]  ;;  %v1855_v18 = vld [vmem:[#allocation2 + $0x64] sm:$0xf]  ;;  %v1856_v19 = vld [vmem:[#allocation2 + $0x6c] sm:$0xf] }
  0xff   : > { %v1394_v28 = vpop.permute.xlu1 %1393  ;;  %v1857_v21 = vld [vmem:[#allocation2 + $0x70] sm:$0xf]  ;;  %v1858_v9 = vld [vmem:[#allocation2 + $0x78] sm:$0xf]  ;;  %v1860_v26 = vld [vmem:[#allocation2 + $0x84] sm:$0xf] }
 0x100   : > { %1757 = vrot.lane.b32.xlu1 %v1682_v17, %s9816_s22  ;;  %1479 = vst.msk [vmem:[#allocation4 + $0x2c] sm:$0xf] %vm1467_vm2, %v1394_v28  ;;  %v1861_v28 = vld [vmem:[#allocation2 + $0x88] sm:$0xf]  ;;  %v2033_v31 = vld [vmem:[#allocation2 + $0xc] sm:$0xf] }
 0x101   : > { %v1863_v35 = vld [vmem:[#allocation2 + $0x94] sm:$0xf]  ;;  %v2034_v11 = vld [vmem:[#allocation2 + $0x10] sm:$0xf]  ;;  %v2082_v36 = vshrl.u32 %v2033_v31, 16  ;;  %vm4204_vm4 = vcmask 1041408  }
 0x102   : > { %1759 = vrot.lane.b32.xlu0 %v1686_v24, %s9816_s22  ;;  %v1396_v38 = vpop.permute.xlu0 %1395  ;;  %v1859_v24 = vld [vmem:[#allocation2 + $0x7c] sm:$0xf]  ;;  %v2091_v41 = vshll.u32 %v2034_v11, 16  ;;  %v2095_v43 = vshrl.u32 %v2034_v11, 16  ;;  %v1867_v52 = vld [vmem:[#allocation2 + $0xac] sm:$0xf] }
 0x103   : > { %1480 = vst.msk [vmem:[#allocation4 + $0x30] sm:$0xf] %vm1467_vm2, %v1396_v38  ;;  %v1398_v46 = vpop.permute.xlu1 %1397  ;;  %v2085_v38 = vshll.u32 %v2033_v31, 16  ;;  %v2037_v42 = vld [vmem:[#allocation2 + $0x1c] sm:$0xf]  ;;  %v2084_v48 = vrot.slane %v2082_v36, 4 }
 0x104   : > { %1761 = vrot.lane.b32.xlu1 %v1689_v29, %s9816_s22  ;;  %1481 = vst.msk [vmem:[#allocation4 + $0x34] sm:$0xf] %vm1467_vm2, %v1398_v46  ;;  %v1862_v29 = vld [vmem:[#allocation2 + $0x90] sm:$0xf]  ;;  %v2036_v46 = vld [vmem:[#allocation2 + $0x18] sm:$0xf] }
 0x105   : > { %v2596_v31 = vld [vmem:[#allocation2 + $0x14] sm:$0x1]  ;;  %v2597_v36 = vld [vmem:[#allocation2 + $0x18] sm:$0xe]  ;;  %vm2000_vm5 = vcmask 126048   ;;  %vm2561_vm6 = vcmask 158848  }
 0x106   : > { %1763 = vrot.lane.b32.xlu0 %v1693_v23, %s9816_s22  ;;  %v1400_v49 = vpop.permute.xlu0 %1399  ;;  %v1864_v23 = vld [vmem:[#allocation2 + $0x9c] sm:$0xf]  ;;  %vm2898_vm8 = vcmask 191648   ;;  %vm3092_vm12 = vcmask 224448   ;;  %vm3653_vm13 = vcmask 257248   ;;  %vm3990_vm15 = vcmask 290048  }
 0x107   : > { %1482 = vst.msk [vmem:[#allocation4 + $0x38] sm:$0xf] %vm1467_vm2, %v1400_v49  ;;  %v2087_v49 = vrot.slane %v2085_v38, 5  ;;  %v3125_v38 = vld [vmem:[#allocation2 + $0x18] sm:$0xf]  ;;  %vm4155_vm0 = vcmask 293888  }
 0x108   : > { %1765 = vrot.lane.b32.xlu1 %v1696_v40, %s9816_s22  ;;  %v1402_v50 = vpop.permute.xlu1 %1401  ;;  %v1865_v40 = vld [vmem:[#allocation2 + $0xa0] sm:$0xf] }
 0x109   : > { %1483 = vst.msk [vmem:[#allocation4 + $0x3c] sm:$0xf] %vm1467_vm2, %v1402_v50  ;;  %v2106_v50 = vshrl.u32 %v2036_v46, 16 }
 0x10a   : > { %1767 = vrot.lane.b32.xlu0 %v1700_v45, %s9816_s22  ;;  %v1866_v45 = vld [vmem:[#allocation2 + $0xa8] sm:$0xf] }
 0x10b   : > { %v1404_v54 = vpop.permute.xlu0 %1403 }
 0x10c   : > { %1769 = vrot.lane.b32.xlu1 %v1703_v47, %s9816_s22  ;;  %1484 = vst.msk [vmem:[#allocation4 + $0x40] sm:$0xf] %vm1467_vm2, %v1404_v54  ;;  %v1406_v56 = vpop.permute.xlu1 %1405  ;;  %v2109_v47 = vshll.u32 %v2036_v46, 16  ;;  %v2097_v54 = vrot.slane %v2095_v43, 4  ;;  %v2599_v43 = vld [vmem:[#allocation2 + $0x20] sm:$0x1] }
 0x10d   : > { %1485 = vst.msk [vmem:[#allocation4 + $0x44] sm:$0xf] %vm1467_vm2, %v1406_v56  ;;  %v2119_v56 = vshrl.u32 %v2037_v42, 16 }
 0x10e   : > { %1771 = vrot.lane.b32.xlu0 %v1707_v53, %s9816_s22  ;;  %v2093_v53 = vrot.slane %v2091_v41, 5 }
 0x110   : > { %1773 = vrot.lane.b32.xlu1 %v1710_v55, %s9816_s22  ;;  %v2115_v55 = vshll.u32 %v2037_v42, 16  ;;  %v3126_v42 = vld [vmem:[#allocation2 + $0x1c] sm:$0xf] }
 0x112   : > { %1904 = vrot.lane.b32.xlu0 %v1840_v27, %s9817_s23 }
 0x114   : > { %1906 = vrot.lane.b32.xlu1 %v1841_v58, %s9817_s23  ;;  %v2035_v58 = vld [vmem:[#allocation2 + $0x14] sm:$0x1] }
 0x115   : > { %v1408_v60 = vpop.permute.xlu0 %1407 }
 0x116   : > { %1908 = vrot.lane.b32.xlu0 %v1842_v57, %s9817_s23  ;;  %1486 = vst.msk [vmem:[#allocation4 + $0x48] sm:$0xf] %vm1467_vm2, %v1408_v60  ;;  %v1868_v57 = vld [vmem:[#allocation2 + $0xb4] sm:$0xf]  ;;  %v2108_v60 = vrot.slane %v2106_v50, 4  ;;  %v3177_v50 = vshll.u32 %v3125_v38, 16 }
 0x118   : > { %1910 = vrot.lane.b32.xlu1 %v1843_v59, %s9817_s23  ;;  %v2088_v59 = vor.u32 %v2087_v49, %v2084_v48  ;;  %v9083_v48 = vrot.slane %v2597_v36, 9  ;;  %v3174_v49 = vshrl.u32 %v3125_v38, 16  ;;  %v2040_v38 = vld [vmem:[#allocation2 + $0x28] sm:$0xf] }
 0x11a   : > { %1912 = vrot.lane.b32.xlu0 %v1844_v61, %s9817_s23  ;;  %v1410_v0 = vpop.permute.xlu1 %1409  ;;  %v2111_v61 = vrot.slane %v2109_v47, 5  ;;  %v3128_v47 = vld [vmem:[#allocation2 + $0x24] sm:$0xf] }
 0x11b   : > { %1487 = vst.msk [vmem:[#allocation4 + $0x4c] sm:$0xf] %vm1467_vm2, %v1410_v0  ;;  %v1869_v0 = vld [vmem:[#allocation2 + $0xb8] sm:$0xf] }
 0x11c   : > { %1914 = vrot.lane.b32.xlu1 %v1845_v62, %s9817_s23 }
 0x11e   : > { %1916 = vrot.lane.b32.xlu0 %v1846_v1, %s9817_s23  ;;  %v2098_v1 = vor.u32 %v2097_v54, %v2093_v53 }
 0x11f   : > { %v1412_v3 = vpop.permute.xlu0 %1411 }
 0x120   : > { %1918 = vrot.lane.b32.xlu1 %v1847_v63, %s9817_s23  ;;  %1488 = vst.msk [vmem:[#allocation4 + $0x50] sm:$0xf] %vm1467_vm2, %v1412_v3  ;;  %v2101_v63 = vshll.u32 %v2035_v58, 16  ;;  %v2121_v3 = vrot.slane %v2119_v56, 4  ;;  %v3187_v56 = vshrl.u32 %v3126_v42, 16 }
 0x121   : > { %v1414_v5 = vpop.permute.xlu1 %1413 }
 0x122   : > { %1920 = vrot.lane.b32.xlu0 %v1848_v2, %s9817_s23  ;;  %1489 = vst.msk [vmem:[#allocation4 + $0x54] sm:$0xf] %vm1467_vm2, %v1414_v5  ;;  %v2117_v2 = vrot.slane %v2115_v55, 5  ;;  %v2038_v5 = vld [vmem:[#allocation2 + $0x20] sm:$0x1]  ;;  %v3183_v55 = vshll.u32 %v3126_v42, 16 }
 0x124   : > { %1922 = vrot.lane.b32.xlu1 %v1849_v4, %s9817_s23  ;;  %v1416_v7 = vpop.permute.xlu0 %1415 }
 0x125   : > { %1490 = vst.msk [vmem:[#allocation4 + $0x58] sm:$0xf] %vm1467_vm2, %v1416_v7  ;;  %v1418_v10 = vpop.permute.xlu1 %1417  ;;  %v2089_v7 = vrot.slane %v2088_v59, 4  ;;  %v3201_v59 = vshll.u32 %v3128_v47, 16 }
 0x126   : > { %1924 = vrot.lane.b32.xlu0 %v1850_v6, %s9817_s23  ;;  %1491 = vst.msk [vmem:[#allocation4 + $0x5c] sm:$0xf] %vm1467_vm2, %v1418_v10  ;;  %v1870_v6 = vld [vmem:[#allocation2 + $0xc0] sm:$0xf] }
 0x128   : > { %1926 = vrot.lane.b32.xlu1 %v1851_v8, %s9817_s23  ;;  %v1420_v13 = vpop.permute.xlu0 %1419  ;;  %v2112_v8 = vor.u32 %v2111_v61, %v2108_v60  ;;  %v3176_v61 = vrot.slane %v3174_v49, 4  ;;  %v2042_v49 = vld [vmem:[#allocation2 + $0x30] sm:$0xf] }
 0x129   : > { %1492 = vst.msk [vmem:[#allocation4 + $0x60] sm:$0xf] %vm1467_vm2, %v1420_v13  ;;  %v2099_v13 = vrot.slane %v2098_v1, 4 }
 0x12a   : > { %1928 = vrot.lane.b32.xlu0 %v1852_v12, %s9817_s23  ;;  %v1871_v12 = vld [vmem:[#allocation2 + $0xc4] sm:$0xf] }
 0x12b   : > { %v1422_v17 = vpop.permute.xlu1 %1421 }
 0x12c   : > { %1930 = vrot.lane.b32.xlu1 %v1853_v14, %s9817_s23  ;;  %1493 = vst.msk [vmem:[#allocation4 + $0x64] sm:$0xf] %vm1467_vm2, %v1422_v17  ;;  %v2103_v14 = vrot.slane %v2101_v63, 5  ;;  %v2125_v17 = vshll.u32 %v2038_v5, 16 }
 0x12e   : > { %1932 = vrot.lane.b32.xlu0 %v1854_v16, %s9817_s23  ;;  %v2122_v16 = vor.u32 %v2121_v3, %v2117_v2  ;;  %v10673_v3 = vrot.slane %v3183_v55, 5 }
 0x130   : > { %1934 = vrot.lane.b32.xlu1 %v1855_v18, %s9817_s23 }
 0x132   : > { %1936 = vrot.lane.b32.xlu0 %v1856_v19, %s9817_s23  ;;  %v2595_v19 = vld [vmem:[#allocation2 + $0x10] sm:$0xf] }
 0x133   : > { %v1424_v22 = vpop.permute.xlu0 %1423 }
 0x134   : > { %1494 = vst.msk [vmem:[#allocation4 + $0x68] sm:$0xf] %vm1467_vm2, %v1424_v22  ;;  %1938 = vrot.lane.b32.xlu1 %v1857_v21, %s9817_s23  ;;  %v2094_v21 = vsel %vm10148_vm9, %v2089_v7, %v2093_v53  ;;  %v2113_v22 = vrot.slane %v2112_v8, 4  ;;  %v3203_v8 = vrot.slane %v3201_v59, 5 }
 0x135   : > { %v1426_v25 = vpop.permute.xlu1 %1425 }
 0x136   : > { %1940 = vrot.lane.b32.xlu0 %v1858_v9, %s9817_s23  ;;  %1495 = vst.msk [vmem:[#allocation4 + $0x6c] sm:$0xf] %vm1467_vm2, %v1426_v25  ;;  %v2104_v25 = vsel %vm10148_vm9, %v2099_v13, %v2103_v14 }
 0x138   : > { %1942 = vrot.lane.b32.xlu1 %v1859_v24, %s9817_s23  ;;  %v2594_v24 = vld [vmem:[#allocation2 + $0xc] sm:$0xe] }
 0x139   : > { %v9082_v11 = vrot.slane %v2594_v24, 9  ;;  %v2934_v24 = vld [vmem:[#allocation2 + $0x24] sm:$0xf] }
 0x13a   : > { %1944 = vrot.lane.b32.xlu0 %v1860_v26, %s9817_s23  ;;  %v2123_v26 = vrot.slane %v2122_v16, 4 }
 0x13c   : > { %1946 = vrot.lane.b32.xlu1 %v1861_v28, %s9817_s23  ;;  %v1428_v30 = vpop.permute.xlu0 %1427  ;;  %v2127_v28 = vrot.slane %v2125_v17, 5  ;;  %v2933_v17 = vld [vmem:[#allocation2 + $0x1c] sm:$0xf] }
 0x13d   : > { %1496 = vst.msk [vmem:[#allocation4 + $0x70] sm:$0xf] %vm1467_vm2, %v1428_v30  ;;  %v1430_v32 = vpop.permute.xlu1 %1429 }
 0x13e   : > { %1497 = vst.msk [vmem:[#allocation4 + $0x74] sm:$0xf] %vm1467_vm2, %v1430_v32  ;;  %1948 = vrot.lane.b32.xlu0 %v1862_v29, %s9817_s23  ;;  %v2692_v29 = vrot.slane %v2595_v19, 5  ;;  %v2598_v32 = vld [vmem:[#allocation2 + $0x1c] sm:$0xf] }
 0x13f   : > { %v2699_v41 = vrot.slane %v2598_v32, 5 }
 0x140   : > { %1950 = vrot.lane.b32.xlu1 %v1863_v35, %s9817_s23  ;;  %v1432_v39 = vpop.permute.xlu0 %1431  ;;  %v2118_v35 = vsel %vm10148_vm9, %v2113_v22, %v2117_v2  ;;  %v2694_v46 = vrot.slane %v2692_v29, 4 }
 0x141   : > { %1498 = vst.msk [vmem:[#allocation4 + $0x78] sm:$0xf] %vm1467_vm2, %v1432_v39  ;;  %v2128_v39 = vsel %vm10148_vm9, %v2123_v26, %v2127_v28  ;;  %v2701_v54 = vrot.slane %v2699_v41, 4  ;;  %v2700_v60 = vsel %vm10435_vm1, %v9083_v48, %v2699_v41 }
 0x142   : > { %v1434_v44 = vpop.permute.xlu1 %1433  ;;  %1952 = vrot.lane.b32.xlu0 %v1864_v23, %s9817_s23 }
 0x143   : > { %1499 = vst.msk [vmem:[#allocation4 + $0x7c] sm:$0xf] %vm1467_vm2, %v1434_v44 }
 0x144   : > { %1954 = vrot.lane.b32.xlu1 %v1865_v40, %s9817_s23  ;;  %v1712_v51 = vpop.permute.xlu0 %1711  ;;  %v2695_v40 = vrot.slane %v2596_v31, 5  ;;  %v2935_v31 = vld [vmem:[#allocation2 + $0x28] sm:$0xf] }
 0x145   : > { %1808 = vst.msk [vmem:[#allocation4] sm:$0xf] %vm1807_vm3, %v1712_v51 }
 0x146   : > { %v1714_v27 = vpop.permute.xlu1 %1713  ;;  %1956 = vrot.lane.b32.xlu0 %v1866_v45, %s9817_s23  ;;  %v2693_v45 = vsel %vm10435_vm1, %v9082_v11, %v2692_v29  ;;  %v2696_v53 = vsel %vm10435_vm1, %v2694_v46, %v2695_v40  ;;  %v3687_v11 = vld [vmem:[#allocation2 + $0x1c] sm:$0xf]  ;;  %v3686_v40 = vld [vmem:[#allocation2 + $0x18] sm:$0xe] }
 0x147   : > { %1809 = vst.msk [vmem:[#allocation4 + $0x4] sm:$0xf] %vm1807_vm3, %v1714_v27  ;;  %v3129_v27 = vld [vmem:[#allocation2 + $0x28] sm:$0xf]  ;;  %v3784_v48 = vrot.slane %v3687_v11, 5 }
 0x148   : > { %1958 = vrot.lane.b32.xlu1 %v1867_v52, %s9817_s23  ;;  %v1716_v62 = vpop.permute.xlu0 %1715  ;;  %v2702_v52 = vrot.slane %v2599_v43, 5  ;;  %v3207_v1 = vshll.u32 %v3129_v27, 16  ;;  %v3211_v63 = vshrl.u32 %v3129_v27, 16  ;;  %v9098_v27 = vrot.slane %v3686_v40, 9 }
 0x149   : > { %1810 = vst.msk [vmem:[#allocation4 + $0x8] sm:$0xf] %vm1807_vm3, %v1716_v62  ;;  %v3179_v62 = vrot.slane %v3177_v50, 5 }
 0x14a   : > { %v1718_v4 = vpop.permute.xlu1 %1717  ;;  %1960 = vrot.lane.b32.xlu0 %v1868_v57, %s9817_s23  ;;  %v3198_v57 = vshrl.u32 %v3128_v47, 16  ;;  %v2703_v2 = vsel %vm10435_vm1, %v2701_v54, %v2702_v52  ;;  %v10678_v14 = vrot.slane %v3207_v1, 5  ;;  %v3213_v16 = vrot.slane %v3211_v63, 4  ;;  %v3690_v52 = vld [vmem:[#allocation2 + $0x28] sm:$0xf] }
 0x14b   : > { %1811 = vst.msk [vmem:[#allocation4 + $0xc] sm:$0xf] %vm1807_vm3, %v1718_v4  ;;  %v3189_v4 = vrot.slane %v3187_v56, 4  ;;  %v2143_v54 = vshrl.u32 %v2040_v38, 16  ;;  %v3786_v63 = vrot.slane %v3784_v48, 4 }
 0x14c   : > { %1962 = vrot.lane.b32.xlu1 %v1869_v0, %s9817_s23  ;;  %v1720_v10 = vpop.permute.xlu0 %1719  ;;  %v3200_v7 = vrot.slane %v3198_v57, 4  ;;  %v3214_v28 = vor.u32 %v3213_v16, %v10678_v14  ;;  %v9646_v57 = vld [vmem:[%s13566_s1 + $0x8] sm:$0xff]   ;;  %v9647_v16 = vld [vmem:[%s13566_s1] sm:$0xff]  }
 0x14d   : > { %1812 = vst.msk [vmem:[#allocation4 + $0x10] sm:$0xf] %vm1807_vm3, %v1720_v10  ;;  %v2932_v10 = vld [vmem:[#allocation2 + $0x18] sm:$0xf] }
 0x14e   : > { %v1722_v18 = vpop.permute.xlu1 %1721  ;;  %1964 = vrot.lane.b32.xlu0 %v1870_v6, %s9817_s23  ;;  %v3127_v6 = vld [vmem:[#allocation2 + $0x20] sm:$0x1]  ;;  %v3215_v42 = vrot.slane %v3214_v28, 4 }
 0x14f   : > { %1813 = vst.msk [vmem:[#allocation4 + $0x14] sm:$0xf] %vm1807_vm3, %v1722_v18  ;;  %v3190_v18 = vor.u32 %v3189_v4, %v10673_v3  ;;  %v3193_v19 = vshll.u32 %v3127_v6, 16  ;;  %v3791_v4 = vrot.slane %v3690_v52, 5 }
 0x150   : > { %1966 = vrot.lane.b32.xlu1 %v1871_v12, %s9817_s23  ;;  %v1724_v9 = vpop.permute.xlu0 %1723  ;;  %v3180_v12 = vor.u32 %v3179_v62, %v3176_v61  ;;  %v2154_v61 = vshrl.u32 %v2042_v49, 16  ;;  %v2157_v62 = vshll.u32 %v2042_v49, 16  ;;  %s9822_s23 = smov 32   ;;  %v2600_v49 = vld [vmem:[#allocation2 + $0x24] sm:$0xe] }
 0x151   : > { %1814 = vst.msk [vmem:[#allocation4 + $0x18] sm:$0xf] %vm1807_vm3, %v1724_v9  ;;  %v3204_v9 = vor.u32 %v3203_v8, %v3200_v7  ;;  %v3191_v32 = vrot.slane %v3190_v18, 4  ;;  %v2145_v7 = vrot.slane %v2143_v54, 4  ;;  %v2602_v54 = vld [vmem:[#allocation2 + $0x2c] sm:$0x1] }
 0x152   : > { %v1726_v30 = vpop.permute.xlu1 %1725  ;;  %2465 = vrot.lane.b32.xlu0 %v2094_v21, %s9818_s29  ;;  %v3130_v21 = vld [vmem:[#allocation2 + $0x2c] sm:$0x1] }
 0x153   : > { %1815 = vst.msk [vmem:[#allocation4 + $0x1c] sm:$0xf] %vm1807_vm3, %v1726_v30  ;;  %v3217_v29 = vshll.u32 %v3130_v21, 16  ;;  %v2039_v30 = vld [vmem:[#allocation2 + $0x24] sm:$0xf]  ;;  %v3205_v36 = vrot.slane %v3204_v9, 4 }
 0x154   : > { %2467 = vrot.lane.b32.xlu1 %v2104_v25, %s9818_s29  ;;  %v1728_v23 = vpop.permute.xlu0 %1727  ;;  %v3181_v25 = vrot.slane %v3180_v12, 4  ;;  %v2130_v41 = vshrl.u32 %v2039_v30, 16  ;;  %v2133_v43 = vshll.u32 %v2039_v30, 16  ;;  %v2159_v21 = vrot.slane %v2157_v62, 5 }
 0x155   : > { %1816 = vst.msk [vmem:[#allocation4 + $0x20] sm:$0xf] %vm1807_vm3, %v1728_v23  ;;  %v3210_v56 = vsel %vm10148_vm9, %v3205_v36, %v10678_v14  ;;  %v2041_v14 = vld [vmem:[#allocation2 + $0x2c] sm:$0x1]  ;;  %v2709_v62 = vrot.slane %v2602_v54, 5 }
 0x156   : > { %v1730_v44 = vpop.permute.xlu1 %1729  ;;  %2469 = vrot.lane.b32.xlu0 %v2118_v35, %s9818_s29  ;;  %v3195_v35 = vrot.slane %v3193_v19, 5  ;;  %v3186_v46 = vsel %vm10148_vm9, %v3181_v25, %v10673_v3  ;;  %v2132_v59 = vrot.slane %v2130_v41, 4  ;;  %v3689_v3 = vld [vmem:[#allocation2 + $0x24] sm:$0xe]  ;;  %v2156_v19 = vrot.slane %v2154_v61, 4 }
 0x157   : > { %1817 = vst.msk [vmem:[#allocation4 + $0x24] sm:$0xf] %vm1807_vm3, %v1730_v44  ;;  %v2149_v28 = vshll.u32 %v2041_v14, 16  ;;  %v2939_v54 = vld [vmem:[#allocation2 + $0x40] sm:$0xf] }
 0x158   : > { %2471 = vrot.lane.b32.xlu1 %v2128_v39, %s9818_s29  ;;  %v1732_v51 = vpop.permute.xlu0 %1731  ;;  %v9645_v39 = vld [vmem:[%s13566_s1 + $0x10] ss:$0 sps:$4 sm:$0x33]   ;;  %v3196_v47 = vsel %vm10148_vm9, %v3191_v32, %v3195_v35  ;;  %v2044_v32 = vld [vmem:[#allocation2 + $0x38] sm:$0x1] }
 0x159   : > { %1818 = vst.msk [vmem:[#allocation4 + $0x28] sm:$0xf] %vm1807_vm3, %v1732_v51  ;;  %9593 = vmatprep.subr.msk.bf16.mxu0 %vm4204_vm4, %v9645_v39  ;;  %v4206_v50 = vsel %vm4204_vm4, %v9645_v39, 0  ;;  %v3688_v51 = vld [vmem:[#allocation2 + $0x20] sm:$0x1]  ;;  %v2173_v41 = vshll.u32 %v2044_v32, 16 }
 0x15a   : > { %v1734_v58 = vpop.permute.xlu1 %1733  ;;  %2802 = vrot.lane.b32.xlu0 %v2693_v45, %s9819_s8  ;;  %v3219_v45 = vrot.slane %v3217_v29, 5  ;;  %9504 = vmatpush3.bf16.msra.mxu0 %v4206_v50  ;;  %vm5940_vm4 = vcmask 781824  }
 0x15b   : > { %1819 = vst.msk [vmem:[#allocation4 + $0x2c] sm:$0xf] %vm1807_vm3, %v1734_v58  ;;  %v2043_v58 = vld [vmem:[#allocation2 + $0x34] sm:$0xf]  ;;  %9505 = vmatprep.subr.bf16.mxu0 %v9646_v57 }
 0x15c   : > { %2804 = vrot.lane.b32.xlu1 %v2696_v53, %s9819_s8  ;;  %v1736_v0 = vpop.permute.xlu0 %1735  ;;  %v2139_v53 = vshll.u32 %v2040_v38, 16  ;;  %v3220_v1 = vsel %vm10148_vm9, %v3215_v42, %v3219_v45  ;;  %v2163_v8 = vshll.u32 %v2043_v58, 16 }
 0x15d   : > { %1820 = vst.msk [vmem:[#allocation4 + $0x30] sm:$0xf] %vm1807_vm3, %v1736_v0 }
 0x15e   : > { %v1738_v5 = vpop.permute.xlu1 %1737  ;;  %2806 = vrot.lane.b32.xlu0 %v2700_v60, %s9819_s8  ;;  %v2135_v60 = vrot.slane %v2133_v43, 5  ;;  %v2141_v6 = vrot.slane %v2139_v53, 5  ;;  %9506 = vmatpush3.bf16.msra.mxu0 %v9646_v57  ;;  %v2165_v29 = vrot.slane %v2163_v8, 5  ;;  %v2603_v57 = vld [vmem:[#allocation2 + $0x30] sm:$0xe] }
 0x15f   : > { %1821 = vst.msk [vmem:[#allocation4 + $0x34] sm:$0xf] %vm1807_vm3, %v1738_v5  ;;  %v3691_v5 = vld [vmem:[#allocation2 + $0x2c] sm:$0x1]  ;;  %9507 = vmatprep.subr.bf16.mxu0 %v9647_v16 }
 0x160   : > { %2808 = vrot.lane.b32.xlu1 %v2703_v2, %s9819_s8  ;;  %v1740_v13 = vpop.permute.xlu0 %1739  ;;  %v3787_v2 = vrot.slane %v3688_v51, 5  ;;  %v2136_v18 = vor.u32 %v2135_v60, %v2132_v59  ;;  %v3794_v25 = vrot.slane %v3691_v5, 5  ;;  %v2175_v51 = vrot.slane %v2173_v41, 5  ;;  %v3131_v59 = vld [vmem:[#allocation2 + $0x30] sm:$0xf] }
 0x161   : > { %1822 = vst.msk [vmem:[#allocation4 + $0x38] sm:$0xf] %vm1807_vm3, %v1740_v13  ;;  %v3785_v13 = vsel %vm10435_vm1, %v9098_v27, %v3784_v48  ;;  %v9084_v27 = vrot.slane %v2600_v49, 9  ;;  %v3222_v5 = vshrl.u32 %v3131_v59, 16  ;;  %v2937_v41 = vld [vmem:[#allocation2 + $0x34] sm:$0xf] }
 0x162   : > { %v1742_v22 = vpop.permute.xlu1 %1741  ;;  %2996 = vrot.lane.b32.xlu0 %v2932_v10, %s9820_s9  ;;  %v2167_v10 = vshrl.u32 %v2043_v58, 16  ;;  %v3788_v9 = vsel %vm10435_vm1, %v3786_v63, %v3787_v2  ;;  %9508 = vmatpush3.bf16.msra.mxu0 %v9647_v16  ;;  %v2137_v11 = vrot.slane %v2136_v18, 4  ;;  %v3132_v2 = vld [vmem:[#allocation2 + $0x34] sm:$0xf]  ;;  %v2938_v49 = vld [vmem:[#allocation2 + $0x3c] sm:$0xf] }
 0x163   : > { %1823 = vst.msk [vmem:[#allocation4 + $0x3c] sm:$0xf] %vm1807_vm3, %v1742_v22  ;;  %v3231_v14 = vshll.u32 %v3132_v2, 16  ;;  %v3235_v16 = vshrl.u32 %v3132_v2, 16 }
 0x164   : > { %2998 = vrot.lane.b32.xlu1 %v2933_v17, %s9820_s9  ;;  %v1744_v26 = vpop.permute.xlu0 %1743  ;;  %v9099_v17 = vrot.slane %v3689_v3, 9  ;;  %v2169_v30 = vrot.slane %v2167_v10, 4  ;;  %v2142_v42 = vsel %vm10148_vm9, %v2137_v11, %v2141_v6 }
 0x165   : > { %1824 = vst.msk [vmem:[#allocation4 + $0x40] sm:$0xf] %vm1807_vm3, %v1744_v26  ;;  %v2146_v26 = vor.u32 %v2145_v7, %v2141_v6  ;;  %v3225_v6 = vshll.u32 %v3131_v59, 16  ;;  %v3134_v7 = vld [vmem:[#allocation2 + $0x3c] sm:$0xf] }
 0x166   : > { %v1746_v23 = vpop.permute.xlu1 %1745  ;;  %3000 = vrot.lane.b32.xlu0 %v2934_v24, %s9820_s9  ;;  %v3793_v24 = vrot.slane %v3791_v4, 4  ;;  %v3792_v35 = vsel %vm10435_vm1, %v9099_v17, %v3791_v4  ;;  %v2170_v40 = vor.u32 %v2169_v30, %v2165_v29  ;;  %v9085_v4 = vrot.slane %v2603_v57, 9  ;;  %v3135_v17 = vld [vmem:[#allocation2 + $0x40] sm:$0xf] }
 0x167   : > { %1825 = vst.msk [vmem:[#allocation4 + $0x44] sm:$0xf] %vm1807_vm3, %v1746_v23  ;;  %v2160_v23 = vor.u32 %v2159_v21, %v2156_v19  ;;  %v2147_v39 = vrot.slane %v2146_v26, 4  ;;  %v3246_v19 = vshrl.u32 %v3134_v7, 16  ;;  %v3249_v21 = vshll.u32 %v3134_v7, 16 }
 0x168   : > { %3002 = vrot.lane.b32.xlu1 %v2935_v31, %s9820_s9  ;;  %v1748_v44 = vpop.permute.xlu0 %1747  ;;  %v3795_v38 = vsel %vm10435_vm1, %v3793_v24, %v3794_v25  ;;  %v3227_v24 = vrot.slane %v3225_v6, 5  ;;  %v3255_v26 = vshll.u32 %v3135_v17, 16  ;;  %v3233_v30 = vrot.slane %v3231_v14, 5  ;;  %v2046_v59 = vld [vmem:[#allocation2 + $0x40] sm:$0xf] }
 0x169   : > { %1826 = vst.msk [vmem:[#allocation4 + $0x48] sm:$0xf] %vm1807_vm3, %v1748_v44  ;;  %v2601_v44 = vld [vmem:[#allocation2 + $0x28] sm:$0xf]  ;;  %v2161_v45 = vrot.slane %v2160_v23, 4  ;;  %v3248_v11 = vrot.slane %v3246_v19, 4 }
 0x16a   : > { %v1750_v55 = vpop.permute.xlu1 %1749  ;;  %3557 = vrot.lane.b32.xlu0 %v3186_v46, %s9821_s16  ;;  %v2151_v46 = vrot.slane %v2149_v28, 5  ;;  %v2706_v52 = vrot.slane %v2601_v44, 5  ;;  %v3259_v28 = vshrl.u32 %v3135_v17, 16  ;;  %v3251_v23 = vrot.slane %v3249_v21, 5  ;;  %v3694_v6 = vld [vmem:[#allocation2 + $0x38] sm:$0x1] }
 0x16b   : > { %1827 = vst.msk [vmem:[#allocation4 + $0x4c] sm:$0xf] %vm1807_vm3, %v1750_v55  ;;  %v2604_v55 = vld [vmem:[#allocation2 + $0x34] sm:$0xf]  ;;  %v3696_v7 = vld [vmem:[#allocation2 + $0x40] sm:$0xf] }
 0x16c   : > { %3559 = vrot.lane.b32.xlu1 %v3196_v47, %s9821_s16  ;;  %v1752_v0 = vpop.permute.xlu0 %1751  ;;  %v2152_v50 = vsel %vm10148_vm9, %v2147_v39, %v2151_v46  ;;  %v2171_v47 = vrot.slane %v2170_v40, 4  ;;  %v2708_v61 = vrot.slane %v2706_v52, 4  ;;  %v2707_v3 = vsel %vm10435_vm1, %v9084_v27, %v2706_v52  ;;  %v3693_v27 = vld [vmem:[#allocation2 + $0x34] sm:$0xf] }
 0x16d   : > { %1828 = vst.msk [vmem:[#allocation4 + $0x50] sm:$0xf] %vm1807_vm3, %v1752_v0  ;;  %v2713_v0 = vrot.slane %v2604_v55, 5  ;;  %v10765_v46 = vrot.slane %v3255_v26, 5  ;;  %v3261_v40 = vrot.slane %v3259_v28, 4  ;;  %v3805_v28 = vrot.slane %v3696_v7, 5 }
 0x16e   : > { %v1754_v12 = vpop.permute.xlu1 %1753  ;;  %3561 = vrot.lane.b32.xlu0 %v3210_v56, %s9821_s16  ;;  %v2166_v56 = vsel %vm10148_vm9, %v2161_v45, %v2165_v29  ;;  %v2176_v60 = vsel %vm10148_vm9, %v2171_v47, %v2175_v51  ;;  %v3695_v26 = vld [vmem:[#allocation2 + $0x3c] sm:$0xe] }
 0x16f   : > { %1829 = vst.msk [vmem:[#allocation4 + $0x54] sm:$0xf] %vm1807_vm3, %v1754_v12  ;;  %v2710_v12 = vsel %vm10435_vm1, %v2708_v61, %v2709_v62  ;;  %v3262_v51 = vor.u32 %v3261_v40, %v10765_v46  ;;  %v3692_v61 = vld [vmem:[#allocation2 + $0x30] sm:$0xe] }
 0x170   : > { %3563 = vrot.lane.b32.xlu1 %v3220_v1, %s9821_s16  ;;  %v1756_v22 = vpop.permute.xlu0 %1755  ;;  %v2605_v1 = vld [vmem:[#allocation2 + $0x38] sm:$0x1]  ;;  %v9100_v14 = vrot.slane %v3692_v61, 9 }
 0x171   : > { %1830 = vst.msk [vmem:[#allocation4 + $0x58] sm:$0xf] %vm1807_vm3, %v1756_v22  ;;  %v2716_v10 = vrot.slane %v2605_v1, 5  ;;  %v2714_v22 = vsel %vm10435_vm1, %v9085_v4, %v2713_v0  ;;  %v2048_v4 = vld [vmem:[#allocation2 + $0x48] sm:$0xf] }
 0x172   : > { %v1758_v31 = vpop.permute.xlu1 %1757  ;;  %3894 = vrot.lane.b32.xlu0 %v3785_v13, %s9822_s23  ;;  %v2715_v13 = vrot.slane %v2713_v0, 4  ;;  %v2202_v19 = vshrl.u32 %v2048_v4, 16  ;;  %v2205_v21 = vshll.u32 %v2048_v4, 16 }
 0x173   : > { %1831 = vst.msk [vmem:[#allocation4 + $0x5c] sm:$0xf] %vm1807_vm3, %v1758_v31  ;;  %v3237_v31 = vrot.slane %v3235_v16, 4  ;;  %v2049_v16 = vld [vmem:[#allocation2 + $0x4c] sm:$0xf] }
 0x174   : > { %3896 = vrot.lane.b32.xlu1 %v3788_v9, %s9822_s23  ;;  %v1760_v36 = vpop.permute.xlu0 %1759  ;;  %v3224_v9 = vrot.slane %v3222_v5, 4  ;;  %v2717_v29 = vsel %vm10435_vm1, %v2715_v13, %v2716_v10  ;;  %v2191_v10 = vshrl.u32 %v2046_v59, 16  ;;  %v2207_v40 = vrot.slane %v2205_v21, 5 }
 0x175   : > { %1832 = vst.msk [vmem:[#allocation4 + $0x60] sm:$0xf] %vm1807_vm3, %v1760_v36  ;;  %v2936_v36 = vld [vmem:[#allocation2 + $0x30] sm:$0xf] }
 0x176   : > { %v1762_v43 = vpop.permute.xlu1 %1761  ;;  %3898 = vrot.lane.b32.xlu0 %v3792_v35, %s9822_s23  ;;  %v3133_v35 = vld [vmem:[#allocation2 + $0x38] sm:$0x1] }
 0x177   : > { %1833 = vst.msk [vmem:[#allocation4 + $0x64] sm:$0xf] %vm1807_vm3, %v1762_v43  ;;  %v3238_v43 = vor.u32 %v3237_v31, %v3233_v30  ;;  %v3241_v44 = vshll.u32 %v3133_v35, 16  ;;  %v2193_v31 = vrot.slane %v2191_v10, 4  ;;  %v2215_v35 = vshrl.u32 %v2049_v16, 16 }
 0x178   : > { %3900 = vrot.lane.b32.xlu1 %v3795_v38, %s9822_s23  ;;  %v1764_v48 = vpop.permute.xlu0 %1763  ;;  %v3228_v38 = vor.u32 %v3227_v24, %v3224_v9 }
 0x179   : > { %1834 = vst.msk [vmem:[#allocation4 + $0x68] sm:$0xf] %vm1807_vm3, %v1764_v48  ;;  %v3252_v48 = vor.u32 %v3251_v23, %v3248_v11  ;;  %v3239_v55 = vrot.slane %v3238_v43, 4 }
 0x17a   : > { %v1766_v53 = vpop.permute.xlu1 %1765  ;;  %2473 = vrot.lane.b32.xlu0 %v2142_v42, %s9818_s29  ;;  %v3136_v42 = vld [vmem:[#allocation2 + $0x44] sm:$0x1] }
 0x17b   : > { %1835 = vst.msk [vmem:[#allocation4 + $0x6c] sm:$0xf] %vm1807_vm3, %v1766_v53  ;;  %v3265_v52 = vshll.u32 %v3136_v42, 16  ;;  %v2045_v53 = vld [vmem:[#allocation2 + $0x3c] sm:$0xf]  ;;  %v3253_v57 = vrot.slane %v3252_v48, 4 }
 0x17c   : > { %2475 = vrot.lane.b32.xlu1 %v2152_v50, %s9818_s29  ;;  %v1768_v58 = vpop.permute.xlu0 %1767  ;;  %v3229_v50 = vrot.slane %v3228_v38, 4  ;;  %v2178_v62 = vshrl.u32 %v2045_v53, 16  ;;  %v2181_v0 = vshll.u32 %v2045_v53, 16  ;;  %v9101_v38 = vrot.slane %v3695_v26, 9 }
 0x17d   : > { %1836 = vst.msk [vmem:[#allocation4 + $0x70] sm:$0xf] %vm1807_vm3, %v1768_v58  ;;  %v3267_v2 = vrot.slane %v3265_v52, 5  ;;  %v3258_v13 = vsel %vm10148_vm9, %v3253_v57, %v10765_v46  ;;  %v2204_v46 = vrot.slane %v2202_v19, 4 }
 0x17e   : > { %v1770_v63 = vpop.permute.xlu1 %1769  ;;  %2477 = vrot.lane.b32.xlu0 %v2166_v56, %s9818_s29  ;;  %v3243_v56 = vrot.slane %v3241_v44, 5  ;;  %v2180_v17 = vrot.slane %v2178_v62, 4  ;;  %v3807_v44 = vrot.slane %v3805_v28, 4  ;;  %v3806_v52 = vsel %vm10435_vm1, %v9101_v38, %v3805_v28  ;;  %v3141_v38 = vld [vmem:[#allocation2 + $0x58] sm:$0xf] }
 0x17f   : > { %1837 = vst.msk [vmem:[#allocation4 + $0x74] sm:$0xf] %vm1807_vm3, %v1770_v63  ;;  %v3263_v63 = vrot.slane %v3262_v51, 4  ;;  %v2050_v51 = vld [vmem:[#allocation2 + $0x50] sm:$0x1] }
 0x180   : > { %2479 = vrot.lane.b32.xlu1 %v2176_v60, %s9818_s29  ;;  %v1772_v8 = vpop.permute.xlu0 %1771  ;;  %v3234_v60 = vsel %vm10148_vm9, %v3229_v50, %v3233_v30  ;;  %v3244_v5 = vsel %vm10148_vm9, %v3239_v55, %v3243_v56  ;;  %v2217_v50 = vrot.slane %v2215_v35, 4 }
 0x181   : > { %1838 = vst.msk [vmem:[#allocation4 + $0x78] sm:$0xf] %vm1807_vm3, %v1772_v8  ;;  %v2187_v8 = vshll.u32 %v2046_v59, 16  ;;  %v3268_v9 = vsel %vm10148_vm9, %v3263_v63, %v3267_v2  ;;  %v2221_v59 = vshll.u32 %v2050_v51, 16  ;;  %v2606_v63 = vld [vmem:[#allocation2 + $0x3c] sm:$0xe] }
 0x182   : > { %v1774_v18 = vpop.permute.xlu1 %1773  ;;  %2810 = vrot.lane.b32.xlu0 %v2707_v3, %s9819_s8  ;;  %v3798_v3 = vrot.slane %v3693_v27, 5 }
 0x183   : > { %1839 = vst.msk [vmem:[#allocation4 + $0x7c] sm:$0xf] %vm1807_vm3, %v1774_v18  ;;  %v2183_v18 = vrot.slane %v2181_v0, 5  ;;  %v2189_v30 = vrot.slane %v2187_v8, 5  ;;  %v2610_v8 = vld [vmem:[#allocation2 + $0x4c] sm:$0xf] }
 0x184   : > { %2812 = vrot.lane.b32.xlu1 %v2710_v12, %s9819_s8  ;;  %v1905_v25 = vpop.permute.xlu0 %1904  ;;  %v3800_v24 = vrot.slane %v3798_v3, 4  ;;  %v3799_v23 = vsel %vm10435_vm1, %v9100_v14, %v3798_v3  ;;  %v2727_v21 = vrot.slane %v2610_v8, 5  ;;  %vm4901_vm3 = vcmask 253952  }
 0x185   : > { %2001 = vst.msk [vmem:[#allocation4] sm:$0xf] %vm2000_vm5, %v1905_v25  ;;  %v3801_v25 = vrot.slane %v3694_v6, 5  ;;  %v2608_v6 = vld [vmem:[#allocation2 + $0x44] sm:$0x1] }
 0x186   : > { %v1907_v32 = vpop.permute.xlu1 %1906  ;;  %2814 = vrot.lane.b32.xlu0 %v2714_v22, %s9819_s8  ;;  %v2729_v35 = vrot.slane %v2727_v21, 4 }
 0x187   : > { %2002 = vst.msk [vmem:[#allocation4 + $0x4] sm:$0xf] %vm2000_vm5, %v1907_v32  ;;  %v2211_v32 = vshll.u32 %v2049_v16, 16  ;;  %v3802_v43 = vsel %vm10435_vm1, %v3800_v24, %v3801_v25  ;;  %v2723_v16 = vrot.slane %v2608_v6, 5  ;;  %v3138_v24 = vld [vmem:[#allocation2 + $0x4c] sm:$0xf] }
 0x188   : > { %2816 = vrot.lane.b32.xlu1 %v2717_v29, %s9819_s8  ;;  %v1909_v39 = vpop.permute.xlu0 %1908  ;;  %v3697_v29 = vld [vmem:[#allocation2 + $0x44] sm:$0x1]  ;;  %v2051_v6 = vld [vmem:[#allocation2 + $0x54] sm:$0xf] }
 0x189   : > { %2003 = vst.msk [vmem:[#allocation4 + $0x8] sm:$0xf] %vm2000_vm5, %v1909_v39  ;;  %v2184_v39 = vor.u32 %v2183_v18, %v2180_v17  ;;  %v3808_v42 = vrot.slane %v3697_v29, 5  ;;  %v2609_v17 = vld [vmem:[#allocation2 + $0x48] sm:$0xe] }
 0x18a   : > { %v1911_v45 = vpop.permute.xlu1 %1910  ;;  %3004 = vrot.lane.b32.xlu0 %v2936_v36, %s9820_s9  ;;  %v2047_v36 = vld [vmem:[#allocation2 + $0x44] sm:$0x1]  ;;  %v3137_v18 = vld [vmem:[#allocation2 + $0x48] sm:$0xf]  ;;  %v9087_v26 = vrot.slane %v2609_v17, 9 }
 0x18b   : > { %2004 = vst.msk [vmem:[#allocation4 + $0xc] sm:$0xf] %vm2000_vm5, %v1911_v45  ;;  %v2194_v45 = vor.u32 %v2193_v31, %v2189_v30  ;;  %v2197_v48 = vshll.u32 %v2047_v36, 16  ;;  %v2185_v53 = vrot.slane %v2184_v39, 4  ;;  %v3809_v56 = vsel %vm10435_vm1, %v3807_v44, %v3808_v42 }
 0x18c   : > { %3006 = vrot.lane.b32.xlu1 %v2937_v41, %s9820_s9  ;;  %v1913_v47 = vpop.permute.xlu0 %1912  ;;  %v3270_v28 = vshrl.u32 %v3137_v18, 16  ;;  %v3273_v29 = vshll.u32 %v3137_v18, 16  ;;  %v3283_v36 = vshrl.u32 %v3138_v24, 16  ;;  %v3698_v18 = vld [vmem:[#allocation2 + $0x48] sm:$0xe] }
 0x18d   : > { %2005 = vst.msk [vmem:[#allocation4 + $0x10] sm:$0xf] %vm2000_vm5, %v1913_v47  ;;  %v2195_v27 = vrot.slane %v2194_v45, 4  ;;  %v2190_v62 = vsel %vm10148_vm9, %v2185_v53, %v2189_v30  ;;  %v3140_v30 = vld [vmem:[#allocation2 + $0x54] sm:$0xf]  ;;  %v3303_v45 = vshll.u32 %v3141_v38, 16 }
 0x18e   : > { %v1915_v58 = vpop.permute.xlu1 %1914  ;;  %3008 = vrot.lane.b32.xlu0 %v2938_v49, %s9820_s9  ;;  %v2213_v49 = vrot.slane %v2211_v32, 5  ;;  %v3275_v44 = vrot.slane %v3273_v29, 5  ;;  %v3700_v29 = vld [vmem:[#allocation2 + $0x50] sm:$0x1] }
 0x18f   : > { %2006 = vst.msk [vmem:[#allocation4 + $0x14] sm:$0xf] %vm2000_vm5, %v1915_v58  ;;  %v2199_v58 = vrot.slane %v2197_v48, 5  ;;  %v3307_v48 = vshrl.u32 %v3141_v38, 16 }
 0x190   : > { %3010 = vrot.lane.b32.xlu1 %v2939_v54, %s9820_s9  ;;  %v1917_v1 = vpop.permute.xlu0 %1916  ;;  %v2208_v54 = vor.u32 %v2207_v40, %v2204_v46  ;;  %v2218_v57 = vor.u32 %v2217_v50, %v2213_v49  ;;  %v3294_v46 = vshrl.u32 %v3140_v30, 16  ;;  %v3297_v40 = vshll.u32 %v3140_v30, 16  ;;  %v3702_v30 = vld [vmem:[#allocation2 + $0x58] sm:$0xf] }
 0x191   : > { %2007 = vst.msk [vmem:[#allocation4 + $0x18] sm:$0xf] %vm2000_vm5, %v1917_v1  ;;  %v2200_v3 = vsel %vm10148_vm9, %v2195_v27, %v2199_v58  ;;  %v10841_v58 = vrot.slane %v3303_v45, 5  ;;  %v3701_v45 = vld [vmem:[#allocation2 + $0x54] sm:$0xe] }
 0x192   : > { %v1919_v12 = vpop.permute.xlu1 %1918  ;;  %3565 = vrot.lane.b32.xlu0 %v3234_v60, %s9821_s16  ;;  %v2607_v60 = vld [vmem:[#allocation2 + $0x40] sm:$0xf]  ;;  %v2209_v0 = vrot.slane %v2208_v54, 4  ;;  %v2219_v4 = vrot.slane %v2218_v57, 4  ;;  %v3296_v53 = vrot.slane %v3294_v46, 4  ;;  %v3299_v54 = vrot.slane %v3297_v40, 5 }
 0x193   : > { %2008 = vst.msk [vmem:[#allocation4 + $0x1c] sm:$0xf] %vm2000_vm5, %v1919_v12  ;;  %v2720_v2 = vrot.slane %v2607_v60, 5  ;;  %v9086_v12 = vrot.slane %v2606_v63, 9  ;;  %v3309_v57 = vrot.slane %v3307_v48, 4  ;;  %v3819_v48 = vrot.slane %v3702_v30, 5 }
 0x194   : > { %3567 = vrot.lane.b32.xlu1 %v3244_v5, %s9821_s16  ;;  %v1921_v22 = vpop.permute.xlu0 %1920  ;;  %v2223_v5 = vrot.slane %v2221_v59, 5  ;;  %v2214_v10 = vsel %vm10148_vm9, %v2209_v0, %v2213_v49  ;;  %v2941_v59 = vld [vmem:[#allocation2 + $0x4c] sm:$0xf]  ;;  %v2942_v63 = vld [vmem:[#allocation2 + $0x54] sm:$0xf] }
 0x195   : > { %2009 = vst.msk [vmem:[#allocation4 + $0x20] sm:$0xf] %vm2000_vm5, %v1921_v22  ;;  %v2722_v14 = vrot.slane %v2720_v2, 4  ;;  %v2721_v25 = vsel %vm10435_vm1, %v9086_v12, %v2720_v2  ;;  %v3699_v12 = vld [vmem:[#allocation2 + $0x4c] sm:$0xf] }
 0x196   : > { %v1923_v11 = vpop.permute.xlu1 %1922  ;;  %3569 = vrot.lane.b32.xlu0 %v3258_v13, %s9821_s16  ;;  %v2224_v19 = vsel %vm10148_vm9, %v2219_v4, %v2223_v5  ;;  %v3310_v4 = vor.u32 %v3309_v57, %v10841_v58 }
 0x197   : > { %2010 = vst.msk [vmem:[#allocation4 + $0x24] sm:$0xf] %vm2000_vm5, %v1923_v11  ;;  %v2724_v32 = vsel %vm10435_vm1, %v2722_v14, %v2723_v16  ;;  %v2052_v16 = vld [vmem:[#allocation2 + $0x58] sm:$0xf] }
 0x198   : > { %3571 = vrot.lane.b32.xlu1 %v3268_v9, %s9821_s16  ;;  %v1925_v41 = vpop.permute.xlu0 %1924  ;;  %v2611_v9 = vld [vmem:[#allocation2 + $0x50] sm:$0x1] }
 0x199   : > { %2011 = vst.msk [vmem:[#allocation4 + $0x28] sm:$0xf] %vm2000_vm5, %v1925_v41  ;;  %v2730_v11 = vrot.slane %v2611_v9, 5  ;;  %v2728_v41 = vsel %vm10435_vm1, %v9087_v26, %v2727_v21  ;;  %v2229_v21 = vshll.u32 %v2051_v6, 16  ;;  %v3311_v9 = vrot.slane %v3310_v4, 4 }
 0x19a   : > { %v1927_v47 = vpop.permute.xlu1 %1926  ;;  %3902 = vrot.lane.b32.xlu0 %v3799_v23, %s9822_s23  ;;  %v3279_v23 = vshll.u32 %v3138_v24, 16  ;;  %v2054_v26 = vld [vmem:[#allocation2 + $0x60] sm:$0xf]  ;;  %v2056_v4 = vld [vmem:[#allocation2 + $0x68] sm:$0x1] }
 0x19b   : > { %2012 = vst.msk [vmem:[#allocation4 + $0x2c] sm:$0xf] %vm2000_vm5, %v1927_v47  ;;  %v2731_v49 = vsel %vm10435_vm1, %v2729_v35, %v2730_v11  ;;  %v3285_v47 = vrot.slane %v3283_v36, 4  ;;  %v2055_v36 = vld [vmem:[#allocation2 + $0x64] sm:$0xf]  ;;  %v2250_v46 = vshrl.u32 %v2054_v26, 16 }
 0x19c   : > { %3904 = vrot.lane.b32.xlu1 %v3802_v43, %s9822_s23  ;;  %v1929_v55 = vpop.permute.xlu0 %1928  ;;  %v3272_v43 = vrot.slane %v3270_v28, 4  ;;  %v3281_v50 = vrot.slane %v3279_v23, 5  ;;  %v9102_v23 = vrot.slane %v3698_v18, 9  ;;  %v2253_v40 = vshll.u32 %v2054_v26, 16 }
 0x19d   : > { %2013 = vst.msk [vmem:[#allocation4 + $0x30] sm:$0xf] %vm2000_vm5, %v1929_v55  ;;  %v2940_v55 = vld [vmem:[#allocation2 + $0x48] sm:$0xf] }
 0x19e   : > { %v1931_v61 = vpop.permute.xlu1 %1930  ;;  %3906 = vrot.lane.b32.xlu0 %v3806_v52, %s9822_s23  ;;  %v3139_v52 = vld [vmem:[#allocation2 + $0x50] sm:$0x1]  ;;  %v3286_v60 = vor.u32 %v3285_v47, %v3281_v50  ;;  %v2255_v57 = vrot.slane %v2253_v40, 5 }
 0x19f   : > { %2014 = vst.msk [vmem:[#allocation4 + $0x34] sm:$0xf] %vm2000_vm5, %v1931_v61  ;;  %v3289_v61 = vshll.u32 %v3139_v52, 16  ;;  %v2263_v52 = vshrl.u32 %v2055_v36, 16 }
 0x1a0   : > { %3908 = vrot.lane.b32.xlu1 %v3809_v56, %s9822_s23  ;;  %v1933_v1 = vpop.permute.xlu0 %1932  ;;  %v3276_v56 = vor.u32 %v3275_v44, %v3272_v43  ;;  %v3287_v8 = vrot.slane %v3286_v60, 4 }
 0x1a1   : > { %2015 = vst.msk [vmem:[#allocation4 + $0x38] sm:$0xf] %vm2000_vm5, %v1933_v1  ;;  %v3300_v1 = vor.u32 %v3299_v54, %v3296_v53 }
 0x1a2   : > { %v1935_v7 = vpop.permute.xlu1 %1934  ;;  %2481 = vrot.lane.b32.xlu0 %v2190_v62, %s9818_s29  ;;  %v3142_v62 = vld [vmem:[#allocation2 + $0x5c] sm:$0x1]  ;;  %v3277_v2 = vrot.slane %v3276_v56, 4  ;;  %v9103_v56 = vrot.slane %v3701_v45, 9 }
 0x1a3   : > { %2016 = vst.msk [vmem:[#allocation4 + $0x3c] sm:$0xf] %vm2000_vm5, %v1935_v7  ;;  %v3313_v5 = vshll.u32 %v3142_v62, 16  ;;  %v2943_v7 = vld [vmem:[#allocation2 + $0x58] sm:$0xf]  ;;  %v3301_v14 = vrot.slane %v3300_v1, 4 }
 0x1a4   : > { %2483 = vrot.lane.b32.xlu1 %v2200_v3, %s9818_s29  ;;  %v1937_v13 = vpop.permute.xlu0 %1936  ;;  %v3282_v17 = vsel %vm10148_vm9, %v3277_v2, %v3281_v50  ;;  %v2265_v2 = vrot.slane %v2263_v52, 4 }
 0x1a5   : > { %2017 = vst.msk [vmem:[#allocation4 + $0x40] sm:$0xf] %vm2000_vm5, %v1937_v13  ;;  %v3315_v24 = vrot.slane %v3313_v5, 5  ;;  %v3306_v11 = vsel %vm10148_vm9, %v3301_v14, %v10841_v58  ;;  %v2252_v58 = vrot.slane %v2250_v46, 4  ;;  %v3820_v5 = vsel %vm10435_vm1, %v9103_v56, %v3819_v48  ;;  %v3147_v56 = vld [vmem:[#allocation2 + $0x70] sm:$0xf] }
 0x1a6   : > { %v1939_v22 = vpop.permute.xlu1 %1938  ;;  %2485 = vrot.lane.b32.xlu0 %v2214_v10, %s9818_s29  ;;  %v3291_v10 = vrot.slane %v3289_v61, 5  ;;  %v3821_v61 = vrot.slane %v3819_v48, 4 }
 0x1a7   : > { %2018 = vst.msk [vmem:[#allocation4 + $0x44] sm:$0xf] %vm2000_vm5, %v1939_v22  ;;  %v3316_v43 = vsel %vm10148_vm9, %v3311_v9, %v3315_v24  ;;  %v2612_v9 = vld [vmem:[#allocation2 + $0x54] sm:$0xe] }
 0x1a8   : > { %2487 = vrot.lane.b32.xlu1 %v2224_v19, %s9818_s29  ;;  %v1941_v31 = vpop.permute.xlu0 %1940  ;;  %v2226_v19 = vshrl.u32 %v2051_v6, 16  ;;  %v3292_v28 = vsel %vm10148_vm9, %v3287_v8, %v3291_v10 }
 0x1a9   : > { %2019 = vst.msk [vmem:[#allocation4 + $0x48] sm:$0xf] %vm2000_vm5, %v1941_v31  ;;  %v2235_v31 = vshll.u32 %v2052_v16, 16 }
 0x1aa   : > { %v1943_v39 = vpop.permute.xlu1 %1942  ;;  %2818 = vrot.lane.b32.xlu0 %v2721_v25, %s9819_s8  ;;  %v3812_v25 = vrot.slane %v3699_v12, 5  ;;  %v2228_v38 = vrot.slane %v2226_v19, 4 }
 0x1ab   : > { %2020 = vst.msk [vmem:[#allocation4 + $0x4c] sm:$0xf] %vm2000_vm5, %v1943_v39  ;;  %v2231_v39 = vrot.slane %v2229_v21, 5  ;;  %v2237_v50 = vrot.slane %v2235_v31, 5  ;;  %v2616_v31 = vld [vmem:[#allocation2 + $0x64] sm:$0xf] }
 0x1ac   : > { %2820 = vrot.lane.b32.xlu1 %v2724_v32, %s9819_s8  ;;  %v1945_v42 = vpop.permute.xlu0 %1944  ;;  %v2239_v32 = vshrl.u32 %v2052_v16, 16  ;;  %v3814_v44 = vrot.slane %v3812_v25, 4  ;;  %v3813_v54 = vsel %vm10435_vm1, %v9102_v23, %v3812_v25  ;;  %v2269_v16 = vshll.u32 %v2056_v4, 16 }
 0x1ad   : > { %2021 = vst.msk [vmem:[#allocation4 + $0x50] sm:$0xf] %vm2000_vm5, %v1945_v42  ;;  %v3815_v42 = vrot.slane %v3700_v29, 5  ;;  %v2614_v29 = vld [vmem:[#allocation2 + $0x5c] sm:$0x1]  ;;  %v2741_v40 = vrot.slane %v2616_v31, 5 }
 0x1ae   : > { %v1947_v51 = vpop.permute.xlu1 %1946  ;;  %2822 = vrot.lane.b32.xlu0 %v2728_v41, %s9819_s8  ;;  %v2241_v47 = vrot.slane %v2239_v32, 4 }
 0x1af   : > { %2022 = vst.msk [vmem:[#allocation4 + $0x54] sm:$0xf] %vm2000_vm5, %v1947_v51  ;;  %v2259_v51 = vshll.u32 %v2055_v36, 16  ;;  %v3816_v60 = vsel %vm10435_vm1, %v3814_v44, %v3815_v42  ;;  %v2737_v36 = vrot.slane %v2614_v29, 5  ;;  %v3144_v44 = vld [vmem:[#allocation2 + $0x64] sm:$0xf] }
 0x1b0   : > { %2824 = vrot.lane.b32.xlu1 %v2731_v49, %s9819_s8  ;;  %v1949_v27 = vpop.permute.xlu0 %1948  ;;  %v3703_v49 = vld [vmem:[#allocation2 + $0x5c] sm:$0x1]  ;;  %v2743_v52 = vrot.slane %v2741_v40, 4  ;;  %v2057_v29 = vld [vmem:[#allocation2 + $0x6c] sm:$0xf] }
 0x1b1   : > { %2023 = vst.msk [vmem:[#allocation4 + $0x58] sm:$0xf] %vm2000_vm5, %v1949_v27  ;;  %v2232_v27 = vor.u32 %v2231_v39, %v2228_v38  ;;  %v3822_v62 = vrot.slane %v3703_v49, 5  ;;  %v2615_v38 = vld [vmem:[#allocation2 + $0x60] sm:$0xe] }
 0x1b2   : > { %v1951_v0 = vpop.permute.xlu1 %1950  ;;  %3012 = vrot.lane.b32.xlu0 %v2940_v55, %s9820_s9  ;;  %v2053_v55 = vld [vmem:[#allocation2 + $0x5c] sm:$0x1]  ;;  %v3143_v39 = vld [vmem:[#allocation2 + $0x60] sm:$0xf]  ;;  %v9089_v45 = vrot.slane %v2615_v38, 9 }
 0x1b3   : > { %2024 = vst.msk [vmem:[#allocation4 + $0x5c] sm:$0xf] %vm2000_vm5, %v1951_v0  ;;  %v2242_v0 = vor.u32 %v2241_v47, %v2237_v50  ;;  %v2245_v1 = vshll.u32 %v2053_v55, 16  ;;  %v2233_v6 = vrot.slane %v2232_v27, 4  ;;  %v3823_v10 = vsel %vm10435_vm1, %v3821_v61, %v3822_v62 }
 0x1b4   : > { %3014 = vrot.lane.b32.xlu1 %v2941_v59, %s9820_s9  ;;  %v1953_v3 = vpop.permute.xlu0 %1952  ;;  %v3318_v48 = vshrl.u32 %v3143_v39, 16  ;;  %v3321_v49 = vshll.u32 %v3143_v39, 16  ;;  %v3331_v55 = vshrl.u32 %v3144_v44, 16  ;;  %v3704_v39 = vld [vmem:[#allocation2 + $0x60] sm:$0xe] }
 0x1b5   : > { %2025 = vst.msk [vmem:[#allocation4 + $0x60] sm:$0xf] %vm2000_vm5, %v1953_v3  ;;  %v2243_v12 = vrot.slane %v2242_v0, 4  ;;  %v2238_v19 = vsel %vm10148_vm9, %v2233_v6, %v2237_v50  ;;  %v3146_v50 = vld [vmem:[#allocation2 + $0x6c] sm:$0xf]  ;;  %v3351_v0 = vshll.u32 %v3147_v56, 16 }
 0x1b6   : > { %v1955_v13 = vpop.permute.xlu1 %1954  ;;  %3016 = vrot.lane.b32.xlu0 %v2942_v63, %s9820_s9  ;;  %v2261_v63 = vrot.slane %v2259_v51, 5  ;;  %v3323_v61 = vrot.slane %v3321_v49, 5  ;;  %v3706_v49 = vld [vmem:[#allocation2 + $0x68] sm:$0x1] }
 0x1b7   : > { %2026 = vst.msk [vmem:[#allocation4 + $0x64] sm:$0xf] %vm2000_vm5, %v1955_v13  ;;  %v2247_v13 = vrot.slane %v2245_v1, 5  ;;  %v3355_v1 = vshrl.u32 %v3147_v56, 16 }
 0x1b8   : > { %3018 = vrot.lane.b32.xlu1 %v2943_v7, %s9820_s9  ;;  %v1957_v22 = vpop.permute.xlu0 %1956  ;;  %v2256_v7 = vor.u32 %v2255_v57, %v2252_v58  ;;  %v2266_v14 = vor.u32 %v2265_v2, %v2261_v63  ;;  %v3342_v58 = vshrl.u32 %v3146_v50, 16  ;;  %v3345_v57 = vshll.u32 %v3146_v50, 16  ;;  %v3708_v50 = vld [vmem:[#allocation2 + $0x70] sm:$0xf] }
 0x1b9   : > { %2027 = vst.msk [vmem:[#allocation4 + $0x68] sm:$0xf] %vm2000_vm5, %v1957_v22  ;;  %v2248_v25 = vsel %vm10148_vm9, %v2243_v12, %v2247_v13  ;;  %v10917_v13 = vrot.slane %v3351_v0, 5  ;;  %v3707_v0 = vld [vmem:[#allocation2 + $0x6c] sm:$0xe] }
 0x1ba   : > { %v1959_v35 = vpop.permute.xlu1 %1958  ;;  %3573 = vrot.lane.b32.xlu0 %v3282_v17, %s9821_s16  ;;  %v2613_v17 = vld [vmem:[#allocation2 + $0x58] sm:$0xf]  ;;  %v2257_v21 = vrot.slane %v2256_v7, 4  ;;  %v2267_v26 = vrot.slane %v2266_v14, 4  ;;  %v3344_v6 = vrot.slane %v3342_v58, 4  ;;  %v3347_v7 = vrot.slane %v3345_v57, 5 }
 0x1bb   : > { %2028 = vst.msk [vmem:[#allocation4 + $0x6c] sm:$0xf] %vm2000_vm5, %v1959_v35  ;;  %v2734_v24 = vrot.slane %v2613_v17, 5  ;;  %v9088_v35 = vrot.slane %v2612_v9, 9  ;;  %v3357_v14 = vrot.slane %v3355_v1, 4  ;;  %v3833_v1 = vrot.slane %v3708_v50, 5 }
 0x1bc   : > { %3575 = vrot.lane.b32.xlu1 %v3292_v28, %s9821_s16  ;;  %v1961_v41 = vpop.permute.xlu0 %1960  ;;  %v2271_v28 = vrot.slane %v2269_v16, 5  ;;  %v2262_v32 = vsel %vm10148_vm9, %v2257_v21, %v2261_v63  ;;  %v2945_v16 = vld [vmem:[#allocation2 + $0x64] sm:$0xf]  ;;  %v2946_v9 = vld [vmem:[#allocation2 + $0x6c] sm:$0xf] }
 0x1bd   : > { %2029 = vst.msk [vmem:[#allocation4 + $0x70] sm:$0xf] %vm2000_vm5, %v1961_v41  ;;  %v2736_v23 = vrot.slane %v2734_v24, 4  ;;  %v2735_v42 = vsel %vm10435_vm1, %v9088_v35, %v2734_v24  ;;  %v3705_v35 = vld [vmem:[#allocation2 + $0x64] sm:$0xf] }
 0x1be   : > { %v1963_v53 = vpop.permute.xlu1 %1962  ;;  %3577 = vrot.lane.b32.xlu0 %v3306_v11, %s9821_s16  ;;  %v2272_v46 = vsel %vm10148_vm9, %v2267_v26, %v2271_v28  ;;  %v3358_v26 = vor.u32 %v3357_v14, %v10917_v13  ;;  %v2620_v50 = vld [vmem:[#allocation2 + $0x74] sm:$0x1] }
 0x1bf   : > { %2030 = vst.msk [vmem:[#allocation4 + $0x74] sm:$0xf] %vm2000_vm5, %v1963_v53  ;;  %v2738_v51 = vsel %vm10435_vm1, %v2736_v23, %v2737_v36  ;;  %v2058_v36 = vld [vmem:[#allocation2 + $0x70] sm:$0xf] }
 0x1c0   : > { %3579 = vrot.lane.b32.xlu1 %v3316_v43, %s9821_s16  ;;  %v1965_v59 = vpop.permute.xlu0 %1964  ;;  %v2617_v43 = vld [vmem:[#allocation2 + $0x68] sm:$0x1] }
 0x1c1   : > { %2031 = vst.msk [vmem:[#allocation4 + $0x78] sm:$0xf] %vm2000_vm5, %v1965_v59  ;;  %v2744_v53 = vrot.slane %v2617_v43, 5  ;;  %v2742_v59 = vsel %vm10435_vm1, %v9089_v45, %v2741_v40  ;;  %v2277_v40 = vshll.u32 %v2057_v29, 16  ;;  %v3359_v43 = vrot.slane %v3358_v26, 4 }
 0x1c2   : > { %v1967_v3 = vpop.permute.xlu1 %1966  ;;  %3910 = vrot.lane.b32.xlu0 %v3813_v54, %s9822_s23  ;;  %v3327_v54 = vshll.u32 %v3144_v44, 16  ;;  %v2060_v45 = vld [vmem:[#allocation2 + $0x78] sm:$0xf]  ;;  %v2062_v26 = vld [vmem:[#allocation2 + $0x80] sm:$0x1] }
 0x1c3   : > { %2032 = vst.msk [vmem:[#allocation4 + $0x7c] sm:$0xf] %vm2000_vm5, %v1967_v3  ;;  %v2745_v63 = vsel %vm10435_vm1, %v2743_v52, %v2744_v53  ;;  %v3333_v3 = vrot.slane %v3331_v55, 4  ;;  %v2061_v55 = vld [vmem:[#allocation2 + $0x7c] sm:$0xf]  ;;  %v2298_v58 = vshrl.u32 %v2060_v45, 16 }
 0x1c4   : > { %3912 = vrot.lane.b32.xlu1 %v3816_v60, %s9822_s23  ;;  %v2466_v8 = vpop.permute.xlu0 %2465  ;;  %v3320_v60 = vrot.slane %v3318_v48, 4  ;;  %v3329_v2 = vrot.slane %v3327_v54, 5  ;;  %v9104_v54 = vrot.slane %v3704_v39, 9  ;;  %v2301_v57 = vshll.u32 %v2060_v45, 16 }
 0x1c5   : > { %2562 = vst.msk [vmem:[#allocation4] sm:$0xf] %vm2561_vm6, %v2466_v8  ;;  %v2944_v8 = vld [vmem:[#allocation2 + $0x60] sm:$0xf]  ;;  %vm6133_vm5 = vcmask 1044224  }
 0x1c6   : > { %v2468_v18 = vpop.permute.xlu1 %2467  ;;  %3914 = vrot.lane.b32.xlu0 %v3820_v5, %s9822_s23  ;;  %v3145_v5 = vld [vmem:[#allocation2 + $0x68] sm:$0x1]  ;;  %v3334_v17 = vor.u32 %v3333_v3, %v3329_v2  ;;  %v2303_v14 = vrot.slane %v2301_v57, 5  ;;  %v3149_v57 = vld [vmem:[#allocation2 + $0x78] sm:$0xf] }
 0x1c7   : > { %2563 = vst.msk [vmem:[#allocation4 + $0x4] sm:$0xf] %vm2561_vm6, %v2468_v18  ;;  %v3337_v18 = vshll.u32 %v3145_v5, 16  ;;  %v2311_v5 = vshrl.u32 %v2061_v55, 16 }
 0x1c8   : > { %3916 = vrot.lane.b32.xlu1 %v3823_v10, %s9822_s23  ;;  %v2470_v22 = vpop.permute.xlu0 %2469  ;;  %v3324_v10 = vor.u32 %v3323_v61, %v3320_v60  ;;  %v3335_v31 = vrot.slane %v3334_v17, 4 }
 0x1c9   : > { %2564 = vst.msk [vmem:[#allocation4 + $0x8] sm:$0xf] %vm2561_vm6, %v2470_v22  ;;  %v3348_v22 = vor.u32 %v3347_v7, %v3344_v6 }
 0x1ca   : > { %v2472_v30 = vpop.permute.xlu1 %2471  ;;  %2489 = vrot.lane.b32.xlu0 %v2238_v19, %s9818_s29  ;;  %v3148_v19 = vld [vmem:[#allocation2 + $0x74] sm:$0x1]  ;;  %v3325_v24 = vrot.slane %v3324_v10, 4  ;;  %v9105_v10 = vrot.slane %v3707_v0, 9  ;;  %v3150_v0 = vld [vmem:[#allocation2 + $0x7c] sm:$0xf] }
 0x1cb   : > { %2565 = vst.msk [vmem:[#allocation4 + $0xc] sm:$0xf] %vm2561_vm6, %v2472_v30  ;;  %v3361_v28 = vshll.u32 %v3148_v19, 16  ;;  %v2947_v30 = vld [vmem:[#allocation2 + $0x70] sm:$0xf]  ;;  %v3349_v23 = vrot.slane %v3348_v22, 4 }
 0x1cc   : > { %v2803_v11 = vpop.permute.xlu0 %2802  ;;  %2491 = vrot.lane.b32.xlu1 %v2248_v25, %s9818_s29  ;;  %v3330_v38 = vsel %vm10148_vm9, %v3325_v24, %v3329_v2  ;;  %v2313_v24 = vrot.slane %v2311_v5, 4 }
 0x1cd   : > { %2899 = vst.msk [vmem:[#allocation4] sm:$0xf] %vm2898_vm8, %v2803_v11  ;;  %v3363_v44 = vrot.slane %v3361_v28, 5  ;;  %v3354_v53 = vsel %vm10148_vm9, %v3349_v23, %v10917_v13  ;;  %v2300_v13 = vrot.slane %v2298_v58, 4  ;;  %v3834_v28 = vsel %vm10435_vm1, %v9105_v10, %v3833_v1  ;;  %v2621_v58 = vld [vmem:[#allocation2 + $0x78] sm:$0xe] }
 0x1ce   : > { %v2805_v41 = vpop.permute.xlu1 %2804  ;;  %2493 = vrot.lane.b32.xlu0 %v2262_v32, %s9818_s29  ;;  %v3339_v32 = vrot.slane %v3337_v18, 5  ;;  %v3835_v18 = vrot.slane %v3833_v1, 4  ;;  %v3375_v10 = vshll.u32 %v3150_v0, 16 }
 0x1cf   : > { %2900 = vst.msk [vmem:[#allocation4 + $0x4] sm:$0xf] %vm2898_vm8, %v2805_v41  ;;  %v3364_v60 = vsel %vm10148_vm9, %v3359_v43, %v3363_v44  ;;  %v2618_v44 = vld [vmem:[#allocation2 + $0x6c] sm:$0xe] }
 0x1d0   : > { %v2807_v47 = vpop.permute.xlu0 %2806  ;;  %2495 = vrot.lane.b32.xlu1 %v2272_v46, %s9818_s29  ;;  %v2274_v46 = vshrl.u32 %v2057_v29, 16  ;;  %v3340_v48 = vsel %vm10148_vm9, %v3335_v31, %v3339_v32 }
 0x1d1   : > { %2901 = vst.msk [vmem:[#allocation4 + $0x8] sm:$0xf] %vm2898_vm8, %v2807_v47  ;;  %v2283_v47 = vshll.u32 %v2058_v36, 16 }
 0x1d2   : > { %v2809_v27 = vpop.permute.xlu1 %2808  ;;  %2826 = vrot.lane.b32.xlu0 %v2735_v42, %s9819_s8  ;;  %v3826_v42 = vrot.slane %v3705_v35, 5  ;;  %v2276_v56 = vrot.slane %v2274_v46, 4 }
 0x1d3   : > { %2902 = vst.msk [vmem:[#allocation4 + $0xc] sm:$0xf] %vm2898_vm8, %v2809_v27  ;;  %v2279_v27 = vrot.slane %v2277_v40, 5  ;;  %v2285_v2 = vrot.slane %v2283_v47, 5 }
 0x1d4   : > { %v2997_v62 = vpop.permute.xlu0 %2996  ;;  %2828 = vrot.lane.b32.xlu1 %v2738_v51, %s9819_s8  ;;  %v2287_v51 = vshrl.u32 %v2058_v36, 16  ;;  %v3828_v61 = vrot.slane %v3826_v42, 4  ;;  %v3827_v7 = vsel %vm10435_vm1, %v9104_v54, %v3826_v42  ;;  %v2317_v36 = vshll.u32 %v2062_v26, 16 }
 0x1d5   : > { %3093 = vst.msk [vmem:[#allocation4] sm:$0xf] %vm3092_vm12, %v2997_v62  ;;  %v3829_v62 = vrot.slane %v3706_v49, 5  ;;  %v9090_v54 = vrot.slane %v2618_v44, 9  ;;  %v3377_v26 = vrot.slane %v3375_v10, 5 }
 0x1d6   : > { %v2999_v4 = vpop.permute.xlu1 %2998  ;;  %2830 = vrot.lane.b32.xlu0 %v2742_v59, %s9819_s8  ;;  %v2289_v3 = vrot.slane %v2287_v51, 4  ;;  %v2319_v49 = vrot.slane %v2317_v36, 5 }
 0x1d7   : > { %3094 = vst.msk [vmem:[#allocation4 + $0x4] sm:$0xf] %vm3092_vm12, %v2999_v4  ;;  %v2307_v4 = vshll.u32 %v2061_v55, 16  ;;  %v3830_v17 = vsel %vm10435_vm1, %v3828_v61, %v3829_v62  ;;  %v2623_v62 = vld [vmem:[#allocation2 + $0x80] sm:$0x1] }
 0x1d8   : > { %v3001_v12 = vpop.permute.xlu0 %3000  ;;  %2832 = vrot.lane.b32.xlu1 %v2745_v63, %s9819_s8  ;;  %v3709_v63 = vld [vmem:[#allocation2 + $0x74] sm:$0x1] }
 0x1d9   : > { %3095 = vst.msk [vmem:[#allocation4 + $0x8] sm:$0xf] %vm3092_vm12, %v3001_v12  ;;  %v2280_v12 = vor.u32 %v2279_v27, %v2276_v56  ;;  %v3836_v19 = vrot.slane %v3709_v63, 5  ;;  %v2751_v27 = vrot.slane %v2620_v50, 5  ;;  %v9091_v63 = vrot.slane %v2621_v58, 9 }
 0x1da   : > { %v3003_v21 = vpop.permute.xlu1 %3002  ;;  %3020 = vrot.lane.b32.xlu0 %v2944_v8, %s9820_s9  ;;  %v2059_v8 = vld [vmem:[#allocation2 + $0x74] sm:$0x1] }
 0x1db   : > { %3096 = vst.msk [vmem:[#allocation4 + $0xc] sm:$0xf] %vm3092_vm12, %v3003_v21  ;;  %v2290_v21 = vor.u32 %v2289_v3, %v2285_v2  ;;  %v2293_v22 = vshll.u32 %v2059_v8, 16  ;;  %v2281_v29 = vrot.slane %v2280_v12, 4  ;;  %v3837_v32 = vsel %vm10435_vm1, %v3835_v18, %v3836_v19 }
 0x1dc   : > { %v3558_v25 = vpop.permute.xlu0 %3557  ;;  %3022 = vrot.lane.b32.xlu1 %v2945_v16, %s9820_s9  ;;  %v3369_v3 = vshll.u32 %v3149_v57, 16  ;;  %v2758_v8 = vrot.slane %v2623_v62, 5  ;;  %v3379_v12 = vshrl.u32 %v3150_v0, 16 }
 0x1dd   : > { %3654 = vst.msk [vmem:[#allocation4] sm:$0xf] %vm3653_vm13, %v3558_v25  ;;  %v2291_v35 = vrot.slane %v2290_v21, 4  ;;  %v2286_v40 = vsel %vm10148_vm9, %v2281_v29, %v2285_v2  ;;  %v3366_v2 = vshrl.u32 %v3149_v57, 16  ;;  %v3710_v57 = vld [vmem:[#allocation2 + $0x78] sm:$0xe] }
 0x1de   : > { %v3560_v11 = vpop.permute.xlu1 %3559  ;;  %3024 = vrot.lane.b32.xlu0 %v2946_v9, %s9820_s9  ;;  %v2309_v9 = vrot.slane %v2307_v4, 5  ;;  %v3152_v4 = vld [vmem:[#allocation2 + $0x84] sm:$0xf]  ;;  %v3371_v21 = vrot.slane %v3369_v3, 5  ;;  %v3712_v3 = vld [vmem:[#allocation2 + $0x80] sm:$0x1] }
 0x1df   : > { %3655 = vst.msk [vmem:[#allocation4 + $0x4] sm:$0xf] %vm3653_vm13, %v3560_v11  ;;  %v2295_v11 = vrot.slane %v2293_v22, 5  ;;  %v3368_v19 = vrot.slane %v3366_v2, 4  ;;  %v9106_v10 = vrot.slane %v3710_v57, 9  ;;  %v700_v57 = vrot.slane %v10521_v34, 4 }
 0x1e0   : > { %v3562_v41 = vpop.permute.xlu0 %3561  ;;  %3026 = vrot.lane.b32.xlu1 %v2947_v30, %s9820_s9  ;;  %v2304_v30 = vor.u32 %v2303_v14, %v2300_v13  ;;  %v2314_v23 = vor.u32 %v2313_v24, %v2309_v9  ;;  %v3153_v13 = vld [vmem:[#allocation2 + $0x88] sm:$0xf] }
 0x1e1   : > { %3656 = vst.msk [vmem:[#allocation4 + $0x8] sm:$0xf] %vm3653_vm13, %v3562_v41  ;;  %v2296_v45 = vsel %vm10148_vm9, %v2291_v35, %v2295_v11  ;;  %v3403_v24 = vshrl.u32 %v3153_v13, 16  ;;  %v2948_v35 = vld [vmem:[#allocation2 + $0x78] sm:$0xf]  ;;  %v3372_v11 = vor.u32 %v3371_v21, %v3368_v19 }
 0x1e2   : > { %v3564_v52 = vpop.permute.xlu1 %3563  ;;  %3581 = vrot.lane.b32.xlu0 %v3330_v38, %s9821_s16  ;;  %v2619_v38 = vld [vmem:[#allocation2 + $0x70] sm:$0xf]  ;;  %v2305_v41 = vrot.slane %v2304_v30, 4  ;;  %v3151_v30 = vld [vmem:[#allocation2 + $0x80] sm:$0x1] }
 0x1e3   : > { %3657 = vst.msk [vmem:[#allocation4 + $0xc] sm:$0xf] %vm3653_vm13, %v3564_v52  ;;  %v2748_v42 = vrot.slane %v2619_v38, 5  ;;  %v2622_v52 = vld [vmem:[#allocation2 + $0x7c] sm:$0xf]  ;;  %v3405_v38 = vrot.slane %v3403_v24, 4 }
 0x1e4   : > { %v3895_v59 = vpop.permute.xlu0 %3894  ;;  %3583 = vrot.lane.b32.xlu1 %v3340_v48, %s9821_s16  ;;  %v2315_v48 = vrot.slane %v2314_v23, 4 }
 0x1e5   : > { %3991 = vst.msk [vmem:[#allocation4] sm:$0xf] %vm3990_vm15, %v3895_v59  ;;  %v2750_v56 = vrot.slane %v2748_v42, 4  ;;  %v2749_v1 = vsel %vm10435_vm1, %v9090_v54, %v2748_v42  ;;  %v2950_v42 = vld [vmem:[#allocation2 + $0x84] sm:$0xf] }
 0x1e6   : > { %v3897_v6 = vpop.permute.xlu1 %3896  ;;  %3585 = vrot.lane.b32.xlu0 %v3354_v53, %s9821_s16  ;;  %v2310_v53 = vsel %vm10148_vm9, %v2305_v41, %v2309_v9  ;;  %v2320_v59 = vsel %vm10148_vm9, %v2315_v48, %v2319_v49  ;;  %v3399_v9 = vshll.u32 %v3153_v13, 16  ;;  %v3154_v41 = vld [vmem:[#allocation2 + $0x8c] sm:$0x1]  ;;  %v3711_v54 = vld [vmem:[#allocation2 + $0x7c] sm:$0xf] }
 0x1e7   : > { %3992 = vst.msk [vmem:[#allocation4 + $0x4] sm:$0xf] %vm3990_vm15, %v3897_v6  ;;  %v2752_v6 = vsel %vm10435_vm1, %v2750_v56, %v2751_v27  ;;  %v3409_v50 = vshll.u32 %v3154_v41, 16  ;;  %v2064_v27 = vld [vmem:[#allocation2 + $0x88] sm:$0xf] }
 0x1e8   : > { %v3899_v16 = vpop.permute.xlu0 %3898  ;;  %3587 = vrot.lane.b32.xlu1 %v3364_v60, %s9821_s16  ;;  %v2755_v60 = vrot.slane %v2622_v52, 5  ;;  %v10995_v36 = vrot.slane %v3399_v9, 5  ;;  %v3713_v9 = vld [vmem:[#allocation2 + $0x84] sm:$0xe] }
 0x1e9   : > { %3993 = vst.msk [vmem:[#allocation4 + $0x8] sm:$0xf] %vm3990_vm15, %v3899_v16  ;;  %v3390_v16 = vshrl.u32 %v3152_v4, 16  ;;  %v3411_v0 = vrot.slane %v3409_v50, 5 }
 0x1ea   : > { %v3901_v25 = vpop.permute.xlu1 %3900  ;;  %3918 = vrot.lane.b32.xlu0 %v3827_v7, %s9822_s23  ;;  %v2757_v7 = vrot.slane %v2755_v60, 4  ;;  %v2756_v18 = vsel %vm10435_vm1, %v9091_v63, %v2755_v60  ;;  %v3406_v49 = vor.u32 %v3405_v38, %v10995_v36  ;;  %v2066_v63 = vld [vmem:[#allocation2 + $0x90] sm:$0xf] }
 0x1eb   : > { %3994 = vst.msk [vmem:[#allocation4 + $0xc] sm:$0xf] %vm3990_vm15, %v3901_v25 }
 0x1ec   : > { %v2474_v31 = vpop.permute.xlu0 %2473  ;;  %3920 = vrot.lane.b32.xlu1 %v3830_v17, %s9822_s23  ;;  %v3393_v17 = vshll.u32 %v3152_v4, 16  ;;  %v2759_v25 = vsel %vm10435_vm1, %v2757_v7, %v2758_v8  ;;  %v3407_v62 = vrot.slane %v3406_v49, 4  ;;  %v3714_v4 = vld [vmem:[#allocation2 + $0x88] sm:$0xf]  ;;  %v2068_v49 = vld [vmem:[#allocation2 + $0x98] sm:$0x1] }
 0x1ed   : > { %2566 = vst.msk [vmem:[#allocation4 + $0x10] sm:$0xf] %vm2561_vm6, %v2474_v31  ;;  %v3392_v31 = vrot.slane %v3390_v16, 4  ;;  %v2346_v16 = vshrl.u32 %v2066_v63, 16  ;;  %v3847_v24 = vrot.slane %v3714_v4, 5 }
 0x1ee   : > { %v2476_v39 = vpop.permute.xlu1 %2475  ;;  %v9648_v46 = vld [vmem:[#allocation4] sm:$0xff]   ;;  %3922 = vrot.lane.b32.xlu0 %v3834_v28, %s9822_s23  ;;  %v3381_v28 = vrot.slane %v3379_v12, 4  ;;  %v3412_v19 = vsel %vm10148_vm9, %v3407_v62, %v3411_v0  ;;  %v2626_v4 = vld [vmem:[#allocation2 + $0x8c] sm:$0x1] }
 0x1ef   : > { %2567 = vst.msk [vmem:[#allocation4 + $0x14] sm:$0xf] %vm2561_vm6, %v2476_v39  ;;  %9509 = vmatprep.mubr.msk.bf16.mxu0 %vm4155_vm0, %v9648_v46  ;;  %v2949_v39 = vld [vmem:[#allocation2 + $0x7c] sm:$0xf]  ;;  %v2067_v12 = vld [vmem:[#allocation2 + $0x94] sm:$0xf] }
 0x1f0   : > { %v2478_v43 = vpop.permute.xlu0 %2477  ;;  %3924 = vrot.lane.b32.xlu1 %v3837_v32, %s9822_s23  ;;  %v3395_v32 = vrot.slane %v3393_v17, 5  ;;  %v3382_v46 = vor.u32 %v3381_v28, %v3377_v26  ;;  %v2349_v17 = vshll.u32 %v2066_v63, 16 }
 0x1f1   : > { %2568 = vst.msk [vmem:[#allocation4 + $0x18] sm:$0xf] %vm2561_vm6, %v2478_v43 }
 0x1f2   : > { %v2480_v47 = vpop.permute.xlu1 %2479  ;;  %v9649_v51 = vld [vmem:[#allocation4 + $0x8] sm:$0xff]   ;;  %2497 = vrot.lane.b32.xlu0 %v2286_v40, %s9818_s29  ;;  %v3385_v40 = vshll.u32 %v3151_v30, 16  ;;  %v3396_v44 = vor.u32 %v3395_v32, %v3392_v31  ;;  %v3383_v52 = vrot.slane %v3382_v46, 4  ;;  %v2359_v30 = vshrl.u32 %v2067_v12, 16 }
 0x1f3   : > { %2569 = vst.msk [vmem:[#allocation4 + $0x1c] sm:$0xf] %vm2561_vm6, %v2480_v47  ;;  %9510 = vmatmul.mubr.msk.bf16.vlgmr.msra.gmra.mxu0 %vm4155_vm0, %v9649_v51  ;;  %v2063_v47 = vld [vmem:[#allocation2 + $0x84] sm:$0xf]  ;;  %v2951_v51 = vld [vmem:[#allocation2 + $0x88] sm:$0xf] }
 0x1f4   : > { %v2811_v55 = vpop.permute.xlu0 %2810  ;;  %2499 = vrot.lane.b32.xlu1 %v2296_v45, %s9818_s29  ;;  %v3373_v45 = vrot.slane %v3372_v11, 4  ;;  %v3397_v56 = vrot.slane %v3396_v44, 4  ;;  %v2325_v60 = vshll.u32 %v2063_v47, 16  ;;  %v9107_v11 = vrot.slane %v3713_v9, 9  ;;  %v2629_v9 = vld [vmem:[#allocation2 + $0x98] sm:$0x1] }
 0x1f5   : > { %2903 = vst.msk [vmem:[#allocation4 + $0x10] sm:$0xf] %vm2898_vm8, %v2811_v55  ;;  %v2351_v38 = vrot.slane %v2349_v17, 5  ;;  %v2765_v17 = vrot.slane %v2626_v4, 5 }
 0x1f6   : > { %v2813_v61 = vpop.permute.xlu1 %2812  ;;  %2501 = vrot.lane.b32.xlu0 %v2310_v53, %s9818_s29  ;;  %v3387_v53 = vrot.slane %v3385_v40, 5  ;;  %v3378_v58 = vsel %vm10148_vm9, %v3373_v45, %v3377_v26  ;;  %v3402_v8 = vsel %vm10148_vm9, %v3397_v56, %v10995_v36  ;;  %v2348_v36 = vrot.slane %v2346_v16, 4 }
 0x1f7   : > { %2904 = vst.msk [vmem:[#allocation4 + $0x14] sm:$0xf] %vm2898_vm8, %v2813_v61  ;;  %v3849_v40 = vrot.slane %v3847_v24, 4  ;;  %v2361_v45 = vrot.slane %v2359_v30, 4  ;;  %v3848_v50 = vsel %vm10435_vm1, %v9107_v11, %v3847_v24  ;;  %v3156_v24 = vld [vmem:[#allocation2 + $0x94] sm:$0xf] }
 0x1f8   : > { %v2815_v5 = vpop.permute.xlu0 %2814  ;;  %2503 = vrot.lane.b32.xlu1 %v2320_v59, %s9818_s29  ;;  %v2322_v59 = vshrl.u32 %v2063_v47, 16  ;;  %v3388_v2 = vsel %vm10148_vm9, %v3383_v52, %v3387_v53  ;;  %v3158_v30 = vld [vmem:[#allocation2 + $0x9c] sm:$0xf]  ;;  %v2772_v11 = vrot.slane %v2629_v9, 5 }
 0x1f9   : > { %2905 = vst.msk [vmem:[#allocation4 + $0x18] sm:$0xf] %vm2898_vm8, %v2815_v5  ;;  %v2331_v5 = vshll.u32 %v2064_v27, 16 }
 0x1fa   : > { %v2817_v14 = vpop.permute.xlu1 %2816  ;;  %2834 = vrot.lane.b32.xlu0 %v2749_v1, %s9819_s8  ;;  %v3840_v1 = vrot.slane %v3711_v54, 5  ;;  %v2324_v13 = vrot.slane %v2322_v59, 4 }
 0x1fb   : > { %2906 = vst.msk [vmem:[#allocation4 + $0x1c] sm:$0xf] %vm2898_vm8, %v2817_v14  ;;  %v2327_v14 = vrot.slane %v2325_v60, 5  ;;  %v2333_v26 = vrot.slane %v2331_v5, 5  ;;  %v865_v5 = vld [vmem:[#allocation2 + $0xc8] sm:$0x1] }
 0x1fc   : > { %v3005_v22 = vpop.permute.xlu0 %3004  ;;  %2836 = vrot.lane.b32.xlu1 %v2752_v6, %s9819_s8  ;;  %v2335_v6 = vshrl.u32 %v2064_v27, 16  ;;  %v3842_v21 = vrot.slane %v3840_v1, 4  ;;  %v3841_v32 = vsel %vm10435_vm1, %v9106_v10, %v3840_v1  ;;  %v2365_v27 = vshll.u32 %v2068_v49, 16  ;;  %v2624_v1 = vld [vmem:[#allocation2 + $0x84] sm:$0xe] }
 0x1fd   : > { %3097 = vst.msk [vmem:[#allocation4 + $0x10] sm:$0xf] %vm3092_vm12, %v3005_v22  ;;  %v3843_v22 = vrot.slane %v3712_v3, 5  ;;  %v866_v10 = vsel %vm10165_vm14, %v700_v57, %v865_v5  ;;  %v2069_v5 = vld [vmem:[#allocation2 + $0x9c] sm:$0xf]  ;;  %vm4894_vm14 = vcmask 257024  }
 0x1fe   : > { %v3007_v29 = vpop.permute.xlu1 %3006  ;;  %2838 = vrot.lane.b32.xlu0 %v2756_v18, %s9819_s8  ;;  %v2337_v28 = vrot.slane %v2335_v6, 4  ;;  %v2367_v3 = vrot.slane %v2365_v27, 5  ;;  %867 = vst [vmem:[#allocation2 + $0xc8] sm:$0x1] %v866_v10  ;;  %v3717_v10 = vld [vmem:[#allocation2 + $0x94] sm:$0xf]  ;;  %vm11320_vm2 = vmand %vm4894_vm14, %vm751_vm10 }
 0x1ff   : > { %3098 = vst.msk [vmem:[#allocation4 + $0x14] sm:$0xf] %vm3092_vm12, %v3007_v29  ;;  %v2355_v29 = vshll.u32 %v2067_v12, 16  ;;  %v3844_v46 = vsel %vm10435_vm1, %v3842_v21, %v3843_v22  ;;  %v3854_v9 = vrot.slane %v3717_v10, 5  ;;  %vm11330_vm10 = vmand %vm4901_vm3, %vm426_vm7  ;;  %vm5603_vm7 = vcmask 519424  }
 0x200   : > { %v3009_v23 = vpop.permute.xlu0 %3008  ;;  %2840 = vrot.lane.b32.xlu1 %v2759_v25, %s9819_s8  ;;  %v3715_v25 = vld [vmem:[#allocation2 + $0x8c] sm:$0x1] }
 0x201   : > { %3099 = vst.msk [vmem:[#allocation4 + $0x18] sm:$0xf] %vm3092_vm12, %v3009_v23  ;;  %v2328_v23 = vor.u32 %v2327_v14, %v2324_v13  ;;  %v3850_v41 = vrot.slane %v3715_v25, 5  ;;  %v9092_v13 = vrot.slane %v2624_v1, 9 }
 0x202   : > { %v3011_v43 = vpop.permute.xlu1 %3010  ;;  %3028 = vrot.lane.b32.xlu0 %v2948_v35, %s9820_s9  ;;  %v2065_v35 = vld [vmem:[#allocation2 + $0x8c] sm:$0x1] }
 0x203   : > { %3100 = vst.msk [vmem:[#allocation4 + $0x1c] sm:$0xf] %vm3092_vm12, %v3011_v43  ;;  %v2338_v43 = vor.u32 %v2337_v28, %v2333_v26  ;;  %v2341_v44 = vshll.u32 %v2065_v35, 16  ;;  %v2329_v47 = vrot.slane %v2328_v23, 4  ;;  %v3851_v53 = vsel %vm10435_vm1, %v3849_v40, %v3850_v41 }
 0x204   : > { %v3566_v48 = vpop.permute.xlu0 %3565  ;;  %3030 = vrot.lane.b32.xlu1 %v2949_v39, %s9820_s9  ;;  %v3423_v23 = vshll.u32 %v3156_v24, 16  ;;  %v3441_v40 = vshll.u32 %v3158_v30, 16 }
 0x205   : > { %3658 = vst.msk [vmem:[#allocation4 + $0x10] sm:$0xf] %vm3653_vm13, %v3566_v48  ;;  %v2339_v54 = vrot.slane %v2338_v43, 4 }
 0x206   : > { %v3568_v55 = vpop.permute.xlu1 %3567  ;;  %3032 = vrot.lane.b32.xlu0 %v2950_v42, %s9820_s9  ;;  %v2357_v42 = vrot.slane %v2355_v29, 5 }
 0x207   : > { %3659 = vst.msk [vmem:[#allocation4 + $0x14] sm:$0xf] %vm3653_vm13, %v3568_v55  ;;  %v2343_v55 = vrot.slane %v2341_v44, 5 }
 0x208   : > { %v3570_v61 = vpop.permute.xlu0 %3569  ;;  %3034 = vrot.lane.b32.xlu1 %v2951_v51, %s9820_s9  ;;  %v2352_v51 = vor.u32 %v2351_v38, %v2348_v36  ;;  %v2362_v56 = vor.u32 %v2361_v45, %v2357_v42  ;;  %v3427_v36 = vshrl.u32 %v3156_v24, 16  ;;  %v3159_v38 = vld [vmem:[#allocation2 + $0xa0] sm:$0xf]  ;;  %v2072_v24 = vld [vmem:[#allocation2 + $0xa8] sm:$0xf] }
 0x209   : > { %3660 = vst.msk [vmem:[#allocation4 + $0x18] sm:$0xf] %vm3653_vm13, %v3570_v61  ;;  %v2334_v61 = vsel %vm10148_vm9, %v2329_v47, %v2333_v26  ;;  %v2344_v34 = vsel %vm10148_vm9, %v2339_v54, %v2343_v55  ;;  %v3447_v45 = vshll.u32 %v3159_v38, 16  ;;  %v3443_v54 = vrot.slane %v3441_v40, 5  ;;  %v2952_v55 = vld [vmem:[#allocation2 + $0x90] sm:$0xf] }
 0x20a   : > { %v3572_v7 = vpop.permute.xlu1 %3571  ;;  %3589 = vrot.lane.b32.xlu0 %v3378_v58, %s9821_s16  ;;  %v2625_v58 = vld [vmem:[#allocation2 + $0x88] sm:$0xf]  ;;  %v2353_v62 = vrot.slane %v2352_v51, 4  ;;  %v3429_v47 = vrot.slane %v3427_v36, 4 }
 0x20b   : > { %3661 = vst.msk [vmem:[#allocation4 + $0x1c] sm:$0xf] %vm3653_vm13, %v3572_v7  ;;  %v2762_v63 = vrot.slane %v2625_v58, 5  ;;  %v11076_v58 = vrot.slane %v3447_v45, 5  ;;  %v3721_v45 = vld [vmem:[#allocation2 + $0xa4] sm:$0x1] }
 0x20c   : > { %v3903_v18 = vpop.permute.xlu0 %3902  ;;  %3591 = vrot.lane.b32.xlu1 %v3388_v2, %s9821_s16  ;;  %v2363_v2 = vrot.slane %v2362_v56, 4  ;;  %v2358_v12 = vsel %vm10148_vm9, %v2353_v62, %v2357_v42  ;;  %v3160_v62 = vld [vmem:[#allocation2 + $0xa4] sm:$0x1] }
 0x20d   : > { %3995 = vst.msk [vmem:[#allocation4 + $0x10] sm:$0xf] %vm3990_vm15, %v3903_v18  ;;  %v2764_v16 = vrot.slane %v2762_v63, 4  ;;  %v2627_v18 = vld [vmem:[#allocation2 + $0x90] sm:$0xe]  ;;  %v2763_v25 = vsel %vm10435_vm1, %v9092_v13, %v2762_v63  ;;  %v3457_v4 = vshll.u32 %v3160_v62, 16 }
 0x20e   : > { %v3905_v31 = vpop.permute.xlu1 %3904  ;;  %3593 = vrot.lane.b32.xlu0 %v3402_v8, %s9821_s16  ;;  %v2628_v8 = vld [vmem:[#allocation2 + $0x94] sm:$0xf]  ;;  %v2368_v33 = vsel %vm10148_vm9, %v2363_v2, %v2367_v3  ;;  %v9093_v26 = vrot.slane %v2627_v18, 9  ;;  %v2954_v63 = vld [vmem:[#allocation2 + $0x9c] sm:$0xf]  ;;  %v2370_v18 = vshrl.u32 %v2069_v5, 16 }
 0x20f   : > { %3996 = vst.msk [vmem:[#allocation4 + $0x14] sm:$0xf] %vm3990_vm15, %v3905_v31  ;;  %v2769_v21 = vrot.slane %v2628_v8, 5 }
 0x210   : > { %v3907_v39 = vpop.permute.xlu0 %3906  ;;  %3595 = vrot.lane.b32.xlu1 %v3412_v19, %s9821_s16  ;;  %v3155_v19 = vld [vmem:[#allocation2 + $0x90] sm:$0xf] }
 0x211   : > { %3997 = vst.msk [vmem:[#allocation4 + $0x18] sm:$0xf] %vm3990_vm15, %v3907_v39  ;;  %v3414_v28 = vshrl.u32 %v3155_v19, 16  ;;  %v3417_v29 = vshll.u32 %v3155_v19, 16  ;;  %v2771_v35 = vrot.slane %v2769_v21, 4  ;;  %v2770_v41 = vsel %vm10435_vm1, %v9093_v26, %v2769_v21 }
 0x212   : > { %v3909_v48 = vpop.permute.xlu1 %3908  ;;  %3926 = vrot.lane.b32.xlu0 %v3841_v32, %s9822_s23  ;;  %v2766_v32 = vsel %vm10435_vm1, %v2764_v16, %v2765_v17  ;;  %v3716_v17 = vld [vmem:[#allocation2 + $0x90] sm:$0xe]  ;;  %v2373_v19 = vshll.u32 %v2069_v5, 16  ;;  %v3718_v26 = vld [vmem:[#allocation2 + $0x98] sm:$0x1] }
 0x213   : > { %3998 = vst.msk [vmem:[#allocation4 + $0x1c] sm:$0xf] %vm3990_vm15, %v3909_v48  ;;  %v3416_v43 = vrot.slane %v3414_v28, 4  ;;  %v3419_v44 = vrot.slane %v3417_v29, 5  ;;  %v3451_v48 = vshrl.u32 %v3159_v38, 16  ;;  %v2773_v49 = vsel %vm10435_vm1, %v2771_v35, %v2772_v11 }
 0x214   : > { %v2482_v52 = vpop.permute.xlu0 %2481  ;;  %3928 = vrot.lane.b32.xlu1 %v3844_v46, %s9822_s23  ;;  %v3438_v46 = vshrl.u32 %v3158_v30, 16  ;;  %v3720_v28 = vld [vmem:[#allocation2 + $0xa0] sm:$0xf]  ;;  %v9108_v35 = vrot.slane %v3716_v17, 9  ;;  %v2073_v11 = vld [vmem:[#allocation2 + $0xac] sm:$0xf] }
 0x215   : > { %2570 = vst.msk [vmem:[#allocation4 + $0x20] sm:$0xf] %vm2561_vm6, %v2482_v52  ;;  %v3157_v52 = vld [vmem:[#allocation2 + $0x98] sm:$0x1]  ;;  %v3420_v56 = vor.u32 %v3419_v44, %v3416_v43  ;;  %v3453_v57 = vrot.slane %v3451_v48, 4  ;;  %v2375_v36 = vrot.slane %v2373_v19, 5 }
 0x216   : > { %v2484_v59 = vpop.permute.xlu1 %2483  ;;  %v9650_v60 = vld [vmem:[#allocation4 + $0x10] sm:$0xff]   ;;  %3930 = vrot.lane.b32.xlu0 %v3848_v50, %s9822_s23  ;;  %v3425_v50 = vrot.slane %v3423_v23, 5  ;;  %v2372_v23 = vrot.slane %v2370_v18, 4  ;;  %v2394_v38 = vshrl.u32 %v2072_v24, 16  ;;  %v3857_v43 = vrot.slane %v3718_v26, 5 }
 0x217   : > { %2571 = vst.msk [vmem:[#allocation4 + $0x24] sm:$0xf] %vm2561_vm6, %v2484_v59  ;;  %9513 = vmatprep.mubr.msk.bf16.mxu0 %vm4155_vm0, %v9650_v60  ;;  %v2953_v59 = vld [vmem:[#allocation2 + $0x94] sm:$0xf]  ;;  %v3454_v3 = vor.u32 %v3453_v57, %v11076_v58  ;;  %v3719_v44 = vld [vmem:[#allocation2 + $0x9c] sm:$0xe] }
 0x218   : > { %v2486_v0 = vpop.permute.xlu0 %2485  ;;  %3932 = vrot.lane.b32.xlu1 %v3851_v53, %s9822_s23  ;;  %v3440_v53 = vrot.slane %v3438_v46, 4  ;;  %v3430_v60 = vor.u32 %v3429_v47, %v3425_v50  ;;  %v2407_v47 = vshrl.u32 %v2073_v11, 16 }
 0x219   : > { %2572 = vst.msk [vmem:[#allocation4 + $0x28] sm:$0xf] %vm2561_vm6, %v2486_v0  ;;  %v3455_v21 = vrot.slane %v3454_v3, 4 }
 0x21a   : > { %v2488_v6 = vpop.permute.xlu1 %2487  ;;  %v9651_v7 = vld [vmem:[#allocation4 + $0x18] sm:$0xff]   ;;  %2505 = vrot.lane.b32.xlu0 %v2334_v61, %s9818_s29  ;;  %v3433_v61 = vshll.u32 %v3157_v52, 16  ;;  %v3444_v1 = vor.u32 %v3443_v54, %v3440_v53  ;;  %v3855_v52 = vsel %vm10435_vm1, %v9108_v35, %v3854_v9  ;;  %v2071_v53 = vld [vmem:[#allocation2 + $0xa4] sm:$0x1]  ;;  %v9109_v54 = vrot.slane %v3719_v44, 9 }
 0x21b   : > { %2573 = vst.msk [vmem:[#allocation4 + $0x2c] sm:$0xf] %vm2561_vm6, %v2488_v6  ;;  %9514 = vmatmul.mubr.msk.bf16.gmra.mxu0 %vm4155_vm0, %v9651_v7  ;;  %v2955_v6 = vld [vmem:[#allocation2 + $0xa0] sm:$0xf]  ;;  %v3431_v7 = vrot.slane %v3430_v60, 4  ;;  %v3864_v60 = vrot.slane %v3721_v45, 5 }
 0x21c   : > { %v2819_v14 = vpop.permute.xlu0 %2818  ;;  %2507 = vrot.lane.b32.xlu1 %v2344_v34, %s9818_s29  ;;  %v3421_v34 = vrot.slane %v3420_v56, 4  ;;  %v3435_v8 = vrot.slane %v3433_v61, 5  ;;  %v3445_v13 = vrot.slane %v3444_v1, 4  ;;  %v2396_v56 = vrot.slane %v2394_v38, 4 }
 0x21d   : > { %2907 = vst.msk [vmem:[#allocation4 + $0x20] sm:$0xf] %vm2898_vm8, %v2819_v14  ;;  %v2070_v14 = vld [vmem:[#allocation2 + $0xa0] sm:$0xf]  ;;  %v2389_v62 = vshll.u32 %v2071_v53, 16  ;;  %v2409_v1 = vrot.slane %v2407_v47, 4 }
 0x21e   : > { %v2821_v22 = vpop.permute.xlu1 %2820  ;;  %2509 = vrot.lane.b32.xlu0 %v2358_v12, %s9818_s29  ;;  %v3426_v16 = vsel %vm10148_vm9, %v3421_v34, %v3425_v50  ;;  %v2379_v29 = vshll.u32 %v2070_v14, 16  ;;  %v2383_v30 = vshrl.u32 %v2070_v14, 16  ;;  %v2403_v50 = vshll.u32 %v2073_v11, 16  ;;  %v2074_v34 = vld [vmem:[#allocation2 + $0xb0] sm:$0x1] }
 0x21f   : > { %2908 = vst.msk [vmem:[#allocation4 + $0x24] sm:$0xf] %vm2898_vm8, %v2821_v22  ;;  %v3459_v22 = vrot.slane %v3457_v4, 5 }
 0x220   : > { %v2823_v31 = vpop.permute.xlu0 %2822  ;;  %2511 = vrot.lane.b32.xlu1 %v2368_v33, %s9818_s29  ;;  %v2381_v48 = vrot.slane %v2379_v29, 5  ;;  %v2634_v29 = vld [vmem:[#allocation2 + $0xac] sm:$0xf] }
 0x221   : > { %2909 = vst.msk [vmem:[#allocation4 + $0x28] sm:$0xf] %vm2898_vm8, %v2823_v31  ;;  %v3460_v40 = vsel %vm10148_vm9, %v3455_v21, %v3459_v22 }
 0x222   : > { %v2825_v39 = vpop.permute.xlu1 %2824  ;;  %2842 = vrot.lane.b32.xlu0 %v2763_v25, %s9819_s8  ;;  %v3436_v25 = vsel %vm10148_vm9, %v3431_v7, %v3435_v8  ;;  %v2391_v8 = vrot.slane %v2389_v62, 5 }
 0x223   : > { %2910 = vst.msk [vmem:[#allocation4 + $0x2c] sm:$0xf] %vm2898_vm8, %v2825_v39  ;;  %v2397_v39 = vshll.u32 %v2072_v24, 16 }
 0x224   : > { %v3013_v42 = vpop.permute.xlu0 %3012  ;;  %2844 = vrot.lane.b32.xlu1 %v2766_v32, %s9819_s8  ;;  %v3450_v32 = vsel %vm10148_vm9, %v3445_v13, %v11076_v58  ;;  %v2631_v13 = vld [vmem:[#allocation2 + $0xa0] sm:$0xf] }
 0x225   : > { %3101 = vst.msk [vmem:[#allocation4 + $0x20] sm:$0xf] %vm3092_vm12, %v3013_v42  ;;  %v3861_v42 = vrot.slane %v3720_v28, 5  ;;  %v2776_v21 = vrot.slane %v2631_v13, 5 }
 0x226   : > { %v3015_v51 = vpop.permute.xlu1 %3014  ;;  %2846 = vrot.lane.b32.xlu0 %v2770_v41, %s9819_s8  ;;  %v3856_v41 = vrot.slane %v3854_v9, 4 }
 0x227   : > { %3102 = vst.msk [vmem:[#allocation4 + $0x24] sm:$0xf] %vm3092_vm12, %v3015_v51  ;;  %v2778_v35 = vrot.slane %v2776_v21, 4 }
 0x228   : > { %v3017_v27 = vpop.permute.xlu0 %3016  ;;  %2848 = vrot.lane.b32.xlu1 %v2773_v49, %s9819_s8  ;;  %v2385_v49 = vrot.slane %v2383_v30, 4  ;;  %v3858_v57 = vsel %vm10435_vm1, %v3856_v41, %v3857_v43  ;;  %v3162_v41 = vld [vmem:[#allocation2 + $0xac] sm:$0xf] }
 0x229   : > { %3103 = vst.msk [vmem:[#allocation4 + $0x28] sm:$0xf] %vm3092_vm12, %v3017_v27  ;;  %v2399_v27 = vrot.slane %v2397_v39, 5  ;;  %v2783_v39 = vrot.slane %v2634_v29, 5  ;;  %v3475_v53 = vshrl.u32 %v3162_v41, 16 }
 0x22a   : > { %v3019_v0 = vpop.permute.xlu1 %3018  ;;  %3036 = vrot.lane.b32.xlu0 %v2952_v55, %s9820_s9  ;;  %v2376_v55 = vor.u32 %v2375_v36, %v2372_v23  ;;  %v2386_v61 = vor.u32 %v2385_v49, %v2381_v48  ;;  %v2633_v23 = vld [vmem:[#allocation2 + $0xa8] sm:$0xe]  ;;  %v3723_v29 = vld [vmem:[#allocation2 + $0xac] sm:$0xf] }
 0x22b   : > { %3104 = vst.msk [vmem:[#allocation4 + $0x2c] sm:$0xf] %vm3092_vm12, %v3019_v0  ;;  %v2405_v0 = vrot.slane %v2403_v50, 5  ;;  %v2400_v4 = vor.u32 %v2399_v27, %v2396_v56  ;;  %v3161_v36 = vld [vmem:[#allocation2 + $0xa8] sm:$0xf]  ;;  %v9095_v44 = vrot.slane %v2633_v23, 9 }
 0x22c   : > { %v3574_v2 = vpop.permute.xlu0 %3573  ;;  %3038 = vrot.lane.b32.xlu1 %v2953_v59, %s9820_s9  ;;  %v3863_v59 = vrot.slane %v3861_v42, 4  ;;  %v2377_v3 = vrot.slane %v2376_v55, 4  ;;  %v2387_v7 = vrot.slane %v2386_v61, 4  ;;  %v3465_v45 = vshll.u32 %v3161_v36, 16 }
 0x22d   : > { %3662 = vst.msk [vmem:[#allocation4 + $0x20] sm:$0xf] %vm3653_vm13, %v3574_v2  ;;  %v3862_v2 = vsel %vm10435_vm1, %v9109_v54, %v3861_v42  ;;  %v2410_v10 = vor.u32 %v2409_v1, %v2405_v0  ;;  %v2401_v18 = vrot.slane %v2400_v4, 4  ;;  %v3462_v42 = vshrl.u32 %v3161_v36, 16  ;;  %v3165_v54 = vld [vmem:[#allocation2 + $0xb8] sm:$0xf] }
 0x22e   : > { %v3576_v12 = vpop.permute.xlu1 %3575  ;;  %3040 = vrot.lane.b32.xlu0 %v2954_v63, %s9820_s9  ;;  %v2382_v17 = vsel %vm10148_vm9, %v2377_v3, %v2381_v48  ;;  %v2392_v22 = vsel %vm10148_vm9, %v2387_v7, %v2391_v8  ;;  %v3164_v48 = vld [vmem:[#allocation2 + $0xb4] sm:$0xf]  ;;  %v2785_v47 = vrot.slane %v2783_v39, 4  ;;  %v3495_v61 = vshll.u32 %v3165_v54, 16 }
 0x22f   : > { %3663 = vst.msk [vmem:[#allocation4 + $0x24] sm:$0xf] %vm3653_vm13, %v3576_v12  ;;  %v2413_v12 = vshll.u32 %v2074_v34, 16  ;;  %v2411_v9 = vrot.slane %v2410_v10, 4  ;;  %v2406_v30 = vsel %vm10148_vm9, %v2401_v18, %v2405_v0  ;;  %v3486_v56 = vshrl.u32 %v3164_v48, 16 }
 0x230   : > { %v3578_v33 = vpop.permute.xlu0 %3577  ;;  %3042 = vrot.lane.b32.xlu1 %v2955_v6, %s9820_s9  ;;  %v3865_v6 = vsel %vm10435_vm1, %v3863_v59, %v3864_v60  ;;  %v3489_v27 = vshll.u32 %v3164_v48, 16  ;;  %v3467_v59 = vrot.slane %v3465_v45, 5  ;;  %v3499_v62 = vshrl.u32 %v3165_v54, 16 }
 0x231   : > { %3664 = vst.msk [vmem:[#allocation4 + $0x28] sm:$0xf] %vm3653_vm13, %v3578_v33  ;;  %v2630_v33 = vld [vmem:[#allocation2 + $0x9c] sm:$0xe]  ;;  %v2415_v24 = vrot.slane %v2413_v12, 5  ;;  %v3488_v3 = vrot.slane %v3486_v56, 4 }
 0x232   : > { %v3580_v31 = vpop.permute.xlu1 %3579  ;;  %3597 = vrot.lane.b32.xlu0 %v3426_v16, %s9821_s16  ;;  %v3491_v4 = vrot.slane %v3489_v27, 5  ;;  %v11154_v8 = vrot.slane %v3495_v61, 5  ;;  %v3501_v10 = vrot.slane %v3499_v62, 4  ;;  %v2957_v12 = vld [vmem:[#allocation2 + $0xac] sm:$0xf] }
 0x233   : > { %3665 = vst.msk [vmem:[#allocation4 + $0x2c] sm:$0xf] %vm3653_vm13, %v3580_v31  ;;  %v9094_v31 = vrot.slane %v2630_v33, 9  ;;  %v2416_v38 = vsel %vm10148_vm9, %v2411_v9, %v2415_v24  ;;  %v2075_v24 = vld [vmem:[#allocation2 + $0xb4] sm:$0xf] }
 0x234   : > { %v3911_v46 = vpop.permute.xlu0 %3910  ;;  %3599 = vrot.lane.b32.xlu1 %v3436_v25, %s9821_s16  ;;  %v2632_v25 = vld [vmem:[#allocation2 + $0xa4] sm:$0x1]  ;;  %v3492_v18 = vor.u32 %v3491_v4, %v3488_v3  ;;  %v2418_v23 = vshrl.u32 %v2075_v24, 16  ;;  %v2421_v36 = vshll.u32 %v2075_v24, 16  ;;  %v3727_v61 = vld [vmem:[#allocation2 + $0xbc] sm:$0x1] }
 0x235   : > { %3999 = vst.msk [vmem:[#allocation4 + $0x20] sm:$0xf] %vm3990_vm15, %v3911_v46  ;;  %v2779_v11 = vrot.slane %v2632_v25, 5  ;;  %v2777_v43 = vsel %vm10435_vm1, %v9094_v31, %v2776_v21  ;;  %v2959_v25 = vld [vmem:[#allocation2 + $0xb8] sm:$0xf] }
 0x236   : > { %v3913_v51 = vpop.permute.xlu1 %3912  ;;  %3601 = vrot.lane.b32.xlu0 %v3450_v32, %s9821_s16  ;;  %v3493_v31 = vrot.slane %v3492_v18, 4  ;;  %v2423_v54 = vrot.slane %v2421_v36, 5  ;;  %v2077_v3 = vld [vmem:[#allocation2 + $0xbc] sm:$0x1] }
 0x237   : > { %4000 = vst.msk [vmem:[#allocation4 + $0x24] sm:$0xf] %vm3990_vm15, %v3913_v51  ;;  %v2780_v50 = vsel %vm10435_vm1, %v2778_v35, %v2779_v11  ;;  %v3722_v11 = vld [vmem:[#allocation2 + $0xa8] sm:$0xe] }
 0x238   : > { %v3915_v58 = vpop.permute.xlu0 %3914  ;;  %3603 = vrot.lane.b32.xlu1 %v3460_v40, %s9821_s16  ;;  %v2635_v40 = vld [vmem:[#allocation2 + $0xb0] sm:$0x1] }
 0x239   : > { %4001 = vst.msk [vmem:[#allocation4 + $0x28] sm:$0xf] %vm3990_vm15, %v3915_v58  ;;  %v2786_v51 = vrot.slane %v2635_v40, 5  ;;  %v2784_v58 = vsel %vm10435_vm1, %v9095_v44, %v2783_v39  ;;  %v3868_v40 = vrot.slane %v3723_v29, 5  ;;  %v3724_v44 = vld [vmem:[#allocation2 + $0xb0] sm:$0x1] }
 0x23a   : > { %v3917_v63 = vpop.permute.xlu1 %3916  ;;  %3934 = vrot.lane.b32.xlu0 %v3855_v52, %s9822_s23  ;;  %v3471_v52 = vshll.u32 %v3162_v41, 16  ;;  %v2078_v41 = vld [vmem:[#allocation2 + $0xc0] sm:$0xf] }
 0x23b   : > { %4002 = vst.msk [vmem:[#allocation4 + $0x2c] sm:$0xf] %vm3990_vm15, %v3917_v63  ;;  %v2787_v0 = vsel %vm10435_vm1, %v2785_v47, %v2786_v51  ;;  %v3477_v63 = vrot.slane %v3475_v53, 4  ;;  %v9110_v47 = vrot.slane %v3722_v11, 9  ;;  %v2079_v51 = vld [vmem:[#allocation2 + $0xc4] sm:$0xf] }
 0x23c   : > { %v2490_v5 = vpop.permute.xlu0 %2489  ;;  %3936 = vrot.lane.b32.xlu1 %v3858_v57, %s9822_s23  ;;  %v3464_v57 = vrot.slane %v3462_v42, 4  ;;  %v3473_v1 = vrot.slane %v3471_v52, 5  ;;  %v3726_v42 = vld [vmem:[#allocation2 + $0xb8] sm:$0xf]  ;;  %v3725_v52 = vld [vmem:[#allocation2 + $0xb4] sm:$0xe] }
 0x23d   : > { %2574 = vst.msk [vmem:[#allocation4 + $0x30] sm:$0xf] %vm2561_vm6, %v2490_v5  ;;  %v2956_v5 = vld [vmem:[#allocation2 + $0xa8] sm:$0xf]  ;;  %v2420_v53 = vrot.slane %v2418_v23, 4  ;;  %v2445_v56 = vshll.u32 %v2078_v41, 16  ;;  %v3869_v4 = vsel %vm10435_vm1, %v9110_v47, %v3868_v40 }
 0x23e   : > { %v2492_v14 = vpop.permute.xlu1 %2491  ;;  %v9652_v16 = vld [vmem:[#allocation4 + $0x20] sm:$0xff]   ;;  %3938 = vrot.lane.b32.xlu0 %v3862_v2, %s9822_s23  ;;  %v3478_v13 = vor.u32 %v3477_v63, %v3473_v1  ;;  %v2455_v63 = vshrl.u32 %v2079_v51, 16 }
 0x23f   : > { %2575 = vst.msk [vmem:[#allocation4 + $0x34] sm:$0xf] %vm2561_vm6, %v2492_v14  ;;  %9517 = vmatprep.mubr.msk.bf16.mxu0 %vm4155_vm0, %v9652_v16  ;;  %v3163_v2 = vld [vmem:[#allocation2 + $0xb0] sm:$0x1]  ;;  %v3166_v16 = vld [vmem:[#allocation2 + $0xbc] sm:$0x1] }
 0x240   : > { %v2494_v19 = vpop.permute.xlu0 %2493  ;;  %3940 = vrot.lane.b32.xlu1 %v3865_v6, %s9822_s23  ;;  %v3468_v6 = vor.u32 %v3467_v59, %v3464_v57  ;;  %v3481_v14 = vshll.u32 %v3163_v2, 16  ;;  %v3505_v9 = vshll.u32 %v3166_v16, 16  ;;  %v3870_v57 = vrot.slane %v3868_v40, 4 }
 0x241   : > { %2576 = vst.msk [vmem:[#allocation4 + $0x38] sm:$0xf] %vm2561_vm6, %v2494_v19  ;;  %v2958_v19 = vld [vmem:[#allocation2 + $0xb4] sm:$0xf]  ;;  %v3871_v59 = vrot.slane %v3724_v44, 5  ;;  %v9111_v2 = vrot.slane %v3725_v52, 9 }
 0x242   : > { %v9653_v26 = vld [vmem:[#allocation4 + $0x28] sm:$0xff]   ;;  %v2496_v28 = vpop.permute.xlu1 %2495  ;;  %2513 = vrot.lane.b32.xlu0 %v2382_v17, %s9818_s29  ;;  %v3469_v33 = vrot.slane %v3468_v6, 4  ;;  %v2437_v16 = vshll.u32 %v2077_v3, 16  ;;  %v2457_v18 = vrot.slane %v2455_v63, 4  ;;  %v3167_v52 = vld [vmem:[#allocation2 + $0xc0] sm:$0xf] }
 0x243   : > { %2577 = vst.msk [vmem:[#allocation4 + $0x3c] sm:$0xf] %vm2561_vm6, %v2496_v28  ;;  %9518 = vmatmul.mubr.msk.bf16.gmra.mxu0 %vm4155_vm0, %v9653_v26  ;;  %v3479_v26 = vrot.slane %v3478_v13, 4  ;;  %v3483_v28 = vrot.slane %v3481_v14, 5  ;;  %v3878_v13 = vrot.slane %v3727_v61, 5  ;;  %v3513_v61 = vshll.u32 %v3167_v52, 16 }
 0x244   : > { %v2827_v32 = vpop.permute.xlu0 %2826  ;;  %2515 = vrot.lane.b32.xlu1 %v2392_v22, %s9818_s29  ;;  %v3502_v22 = vor.u32 %v3501_v10, %v11154_v8  ;;  %v3474_v35 = vsel %vm10148_vm9, %v3469_v33, %v3473_v1  ;;  %v2451_v1 = vshll.u32 %v2079_v51, 16  ;;  %v3872_v10 = vsel %vm10435_vm1, %v3870_v57, %v3871_v59  ;;  %v2080_v33 = vld [vmem:[#allocation2 + $0xc8] sm:$0x1]  ;;  %v3168_v57 = vld [vmem:[#allocation2 + $0xc4] sm:$0xf] }
 0x245   : > { %2911 = vst.msk [vmem:[#allocation4 + $0x30] sm:$0xf] %vm2898_vm8, %v2827_v32  ;;  %v2076_v32 = vld [vmem:[#allocation2 + $0xb8] sm:$0xf]  ;;  %v3170_v63 = vld [vmem:[#allocation2 + $0xcc] sm:$0xf] }
 0x246   : > { %v2829_v46 = vpop.permute.xlu1 %2828  ;;  %2517 = vrot.lane.b32.xlu0 %v2406_v30, %s9818_s29  ;;  %v3503_v39 = vrot.slane %v3502_v22, 4  ;;  %v2427_v45 = vshll.u32 %v2076_v32, 16  ;;  %v2431_v48 = vshrl.u32 %v2076_v32, 16  ;;  %v3523_v3 = vshrl.u32 %v3168_v57, 16 }
 0x247   : > { %2912 = vst.msk [vmem:[#allocation4 + $0x34] sm:$0xf] %vm2898_vm8, %v2829_v46  ;;  %v3507_v46 = vrot.slane %v3505_v9, 5 }
 0x248   : > { %v2831_v49 = vpop.permute.xlu0 %2830  ;;  %2519 = vrot.lane.b32.xlu1 %v2416_v38, %s9818_s29  ;;  %v2429_v62 = vrot.slane %v2427_v45, 5  ;;  %v2638_v45 = vld [vmem:[#allocation2 + $0xbc] sm:$0x1] }
 0x249   : > { %2913 = vst.msk [vmem:[#allocation4 + $0x38] sm:$0xf] %vm2898_vm8, %v2831_v49 }
 0x24a   : > { %v2833_v55 = vpop.permute.xlu1 %2832  ;;  %2850 = vrot.lane.b32.xlu0 %v2777_v43, %s9819_s8  ;;  %v3484_v43 = vsel %vm10148_vm9, %v3479_v26, %v3483_v28  ;;  %v2439_v28 = vrot.slane %v2437_v16, 5 }
 0x24b   : > { %2914 = vst.msk [vmem:[#allocation4 + $0x3c] sm:$0xf] %vm2898_vm8, %v2833_v55  ;;  %v2442_v55 = vshrl.u32 %v2078_v41, 16 }
 0x24c   : > { %v3021_v60 = vpop.permute.xlu0 %3020  ;;  %2852 = vrot.lane.b32.xlu1 %v2780_v50, %s9819_s8  ;;  %v3498_v50 = vsel %vm10148_vm9, %v3493_v31, %v11154_v8 }
 0x24d   : > { %3105 = vst.msk [vmem:[#allocation4 + $0x30] sm:$0xf] %vm3092_vm12, %v3021_v60  ;;  %v3875_v60 = vrot.slane %v3726_v42, 5  ;;  %v2444_v6 = vrot.slane %v2442_v55, 4  ;;  %v2793_v55 = vrot.slane %v2638_v45, 5 }
 0x24e   : > { %v3023_v34 = vpop.permute.xlu1 %3022  ;;  %2854 = vrot.lane.b32.xlu0 %v2784_v58, %s9819_s8  ;;  %v3508_v58 = vsel %vm10148_vm9, %v3503_v39, %v3507_v46  ;;  %v3729_v45 = vld [vmem:[#allocation2 + $0xc4] sm:$0xf] }
 0x24f   : > { %3106 = vst.msk [vmem:[#allocation4 + $0x34] sm:$0xf] %vm3092_vm12, %v3023_v34 }
 0x250   : > { %v3025_v7 = vpop.permute.xlu0 %3024  ;;  %2856 = vrot.lane.b32.xlu1 %v2787_v0, %s9819_s8  ;;  %v2433_v0 = vrot.slane %v2431_v48, 4 }
 0x251   : > { %3107 = vst.msk [vmem:[#allocation4 + $0x38] sm:$0xf] %vm3092_vm12, %v3025_v7  ;;  %v2447_v7 = vrot.slane %v2445_v56, 5  ;;  %v2641_v56 = vld [vmem:[#allocation2 + $0xc8] sm:$0x1] }
 0x252   : > { %v3027_v17 = vpop.permute.xlu1 %3026  ;;  %3044 = vrot.lane.b32.xlu0 %v2956_v5, %s9820_s9  ;;  %v2424_v5 = vor.u32 %v2423_v54, %v2420_v53  ;;  %v2434_v14 = vor.u32 %v2433_v0, %v2429_v62 }
 0x253   : > { %3108 = vst.msk [vmem:[#allocation4 + $0x3c] sm:$0xf] %vm3092_vm12, %v3027_v17  ;;  %v2453_v17 = vrot.slane %v2451_v1, 5  ;;  %v2448_v9 = vor.u32 %v2447_v7, %v2444_v6  ;;  %v2800_v1 = vrot.slane %v2641_v56, 5  ;;  %v3171_v6 = vld [vmem:[#allocation2 + $0xd0] sm:$0xf] }
 0x254   : > { %v3582_v21 = vpop.permute.xlu0 %3581  ;;  %3046 = vrot.lane.b32.xlu1 %v2957_v12, %s9820_s9  ;;  %v3877_v12 = vrot.slane %v3875_v60, 4  ;;  %v2425_v22 = vrot.slane %v2424_v5, 4  ;;  %v2435_v26 = vrot.slane %v2434_v14, 4  ;;  %v3730_v56 = vld [vmem:[#allocation2 + $0xc8] sm:$0x1] }
 0x255   : > { %3666 = vst.msk [vmem:[#allocation4 + $0x30] sm:$0xf] %vm3653_vm13, %v3582_v21  ;;  %v3876_v21 = vsel %vm10435_vm1, %v9111_v2, %v3875_v60  ;;  %v2458_v29 = vor.u32 %v2457_v18, %v2453_v17  ;;  %v2449_v23 = vrot.slane %v2448_v9, 4  ;;  %v3510_v60 = vshrl.u32 %v3167_v52, 16 }
 0x256   : > { %v3584_v30 = vpop.permute.xlu1 %3583  ;;  %3048 = vrot.lane.b32.xlu0 %v2958_v19, %s9820_s9  ;;  %v2430_v11 = vsel %vm10148_vm9, %v2425_v22, %v2429_v62  ;;  %v2440_v39 = vsel %vm10148_vm9, %v2435_v26, %v2439_v28  ;;  %v3519_v2 = vshll.u32 %v3168_v57, 16  ;;  %v3543_v18 = vshll.u32 %v3171_v6, 16  ;;  %v2960_v22 = vld [vmem:[#allocation2 + $0xc0] sm:$0xf]  ;;  %v2961_v28 = vld [vmem:[#allocation2 + $0xc4] sm:$0xf] }
 0x257   : > { %3667 = vst.msk [vmem:[#allocation4 + $0x34] sm:$0xf] %vm3653_vm13, %v3584_v30  ;;  %v2461_v30 = vshll.u32 %v2080_v33, 16  ;;  %v2459_v46 = vrot.slane %v2458_v29, 4  ;;  %v2454_v48 = vsel %vm10148_vm9, %v2449_v23, %v2453_v17  ;;  %v3512_v7 = vrot.slane %v3510_v60, 4 }
 0x258   : > { %v3586_v38 = vpop.permute.xlu0 %3585  ;;  %3050 = vrot.lane.b32.xlu1 %v2959_v25, %s9820_s9  ;;  %v3879_v25 = vsel %vm10435_vm1, %v3877_v12, %v3878_v13  ;;  %v3537_v12 = vshll.u32 %v3170_v63, 16  ;;  %v3521_v16 = vrot.slane %v3519_v2, 5  ;;  %v3525_v17 = vrot.slane %v3523_v3, 4  ;;  %v2962_v23 = vld [vmem:[#allocation2 + $0xcc] sm:$0xf] }
 0x259   : > { %3668 = vst.msk [vmem:[#allocation4 + $0x38] sm:$0xf] %vm3653_vm13, %v3586_v38  ;;  %v2636_v38 = vld [vmem:[#allocation2 + $0xb4] sm:$0xe]  ;;  %v2463_v40 = vrot.slane %v2461_v30, 5 }
 0x25a   : > { %v3588_v49 = vpop.permute.xlu1 %3587  ;;  %3605 = vrot.lane.b32.xlu0 %v3474_v35, %s9821_s16  ;;  %v2637_v35 = vld [vmem:[#allocation2 + $0xb8] sm:$0xf]  ;;  %v3526_v29 = vor.u32 %v3525_v17, %v3521_v16  ;;  %v3731_v60 = vld [vmem:[#allocation2 + $0xcc] sm:$0xe] }
 0x25b   : > { %3669 = vst.msk [vmem:[#allocation4 + $0x3c] sm:$0xf] %vm3653_vm13, %v3588_v49  ;;  %v2790_v41 = vrot.slane %v2637_v35, 5  ;;  %v9096_v49 = vrot.slane %v2636_v38, 9  ;;  %v2464_v53 = vsel %vm10148_vm9, %v2459_v46, %v2463_v40  ;;  %v2963_v46 = vld [vmem:[#allocation2 + $0xd0] sm:$0xf] }
 0x25c   : > { %v3919_v27 = vpop.permute.xlu0 %3918  ;;  %3607 = vrot.lane.b32.xlu1 %v3484_v43, %s9821_s16  ;;  %v2640_v43 = vld [vmem:[#allocation2 + $0xc4] sm:$0xf]  ;;  %v3527_v40 = vrot.slane %v3526_v29, 4  ;;  %v9113_v3 = vrot.slane %v3731_v60, 9 }
 0x25d   : > { %4003 = vst.msk [vmem:[#allocation4 + $0x30] sm:$0xf] %vm3990_vm15, %v3919_v27  ;;  %v2797_v51 = vrot.slane %v2640_v43, 5  ;;  %v2792_v54 = vrot.slane %v2790_v41, 4  ;;  %v2791_v59 = vsel %vm10435_vm1, %v9096_v49, %v2790_v41 }
 0x25e   : > { %v3921_v34 = vpop.permute.xlu1 %3920  ;;  %3609 = vrot.lane.b32.xlu0 %v3498_v50, %s9821_s16  ;;  %v2639_v50 = vld [vmem:[#allocation2 + $0xc0] sm:$0xe] }
 0x25f   : > { %4004 = vst.msk [vmem:[#allocation4 + $0x34] sm:$0xf] %vm3990_vm15, %v3921_v34  ;;  %v2799_v0 = vrot.slane %v2797_v51, 4  ;;  %v2794_v34 = vsel %vm10435_vm1, %v2792_v54, %v2793_v55  ;;  %v3882_v54 = vrot.slane %v3729_v45, 5 }
 0x260   : > { %v3923_v8 = vpop.permute.xlu0 %3922  ;;  %3611 = vrot.lane.b32.xlu1 %v3508_v58, %s9821_s16  ;;  %v9097_v58 = vrot.slane %v2639_v50, 9 }
 0x261   : > { %4005 = vst.msk [vmem:[#allocation4 + $0x38] sm:$0xf] %vm3990_vm15, %v3923_v8  ;;  %v3515_v8 = vrot.slane %v3513_v61, 5  ;;  %v2801_v14 = vsel %vm10435_vm1, %v2799_v0, %v2800_v1  ;;  %v3885_v0 = vrot.slane %v3730_v56, 5 }
 0x262   : > { %v3925_v19 = vpop.permute.xlu1 %3924  ;;  %3942 = vrot.lane.b32.xlu0 %v3869_v4, %s9822_s23  ;;  %v2798_v5 = vsel %vm10435_vm1, %v9097_v58, %v2797_v51 }
 0x263   : > { %4006 = vst.msk [vmem:[#allocation4 + $0x3c] sm:$0xf] %vm3990_vm15, %v3925_v19  ;;  %v3547_v19 = vshrl.u32 %v3171_v6, 16  ;;  %v3516_v9 = vor.u32 %v3515_v8, %v3512_v7 }
 0x264   : > { %v2498_v24 = vpop.permute.xlu0 %2497  ;;  %3944 = vrot.lane.b32.xlu1 %v3872_v10, %s9822_s23  ;;  %v3534_v10 = vshrl.u32 %v3170_v63, 16 }
 0x265   : > { %2578 = vst.msk [vmem:[#allocation4 + $0x40] sm:$0xf] %vm2561_vm6, %v2498_v24 }
 0x266   : > { %v9654_v31 = vld [vmem:[#allocation4 + $0x30] sm:$0xff]   ;;  %v2500_v32 = vpop.permute.xlu1 %2499  ;;  %3946 = vrot.lane.b32.xlu0 %v3876_v21, %s9822_s23  ;;  %v3169_v21 = vld [vmem:[#allocation2 + $0xc8] sm:$0x1]  ;;  %v3536_v24 = vrot.slane %v3534_v10, 4 }
 0x267   : > { %2579 = vst.msk [vmem:[#allocation4 + $0x44] sm:$0xf] %vm2561_vm6, %v2500_v32  ;;  %9521 = vmatprep.mubr.msk.bf16.mxu0 %vm4155_vm0, %v9654_v31  ;;  %v3529_v30 = vshll.u32 %v3169_v21, 16  ;;  %v3545_v31 = vrot.slane %v3543_v18, 5  ;;  %v3549_v32 = vrot.slane %v3547_v19, 4 }
 0x268   : > { %v2502_v36 = vpop.permute.xlu0 %2501  ;;  %3948 = vrot.lane.b32.xlu1 %v3879_v25, %s9822_s23  ;;  %v3539_v25 = vrot.slane %v3537_v12, 5 }
 0x269   : > { %2580 = vst.msk [vmem:[#allocation4 + $0x48] sm:$0xf] %vm2561_vm6, %v2502_v36  ;;  %v3517_v36 = vrot.slane %v3516_v9, 4  ;;  %v3531_v41 = vrot.slane %v3529_v30, 5  ;;  %v3550_v43 = vor.u32 %v3549_v32, %v3545_v31 }
 0x26a   : > { %v9655_v44 = vld [vmem:[#allocation4 + $0x38] sm:$0xff]   ;;  %v2504_v42 = vpop.permute.xlu1 %2503  ;;  %2521 = vrot.lane.b32.xlu0 %v2430_v11, %s9818_s29  ;;  %v3172_v11 = vld [vmem:[#allocation2 + $0xd4] sm:$0x1]  ;;  %v3540_v38 = vor.u32 %v3539_v25, %v3536_v24 }
 0x26b   : > { %2581 = vst.msk [vmem:[#allocation4 + $0x4c] sm:$0xf] %vm2561_vm6, %v2504_v42  ;;  %9522 = vmatmul.mubr.msk.bf16.gmra.mxu0 %vm4155_vm0, %v9655_v44  ;;  %v3553_v44 = vshll.u32 %v3172_v11, 16  ;;  %v3532_v51 = vsel %vm10148_vm9, %v3527_v40, %v3531_v41  ;;  %v3551_v52 = vrot.slane %v3550_v43, 4 }
 0x26c   : > { %v2835_v47 = vpop.permute.xlu0 %2834  ;;  %2523 = vrot.lane.b32.xlu1 %v2440_v39, %s9818_s29  ;;  %v3541_v49 = vrot.slane %v3540_v38, 4 }
 0x26d   : > { %2915 = vst.msk [vmem:[#allocation4 + $0x40] sm:$0xf] %vm2898_vm8, %v2835_v47  ;;  %v3728_v47 = vld [vmem:[#allocation2 + $0xc0] sm:$0xe] }
 0x26e   : > { %v2837_v27 = vpop.permute.xlu1 %2836  ;;  %2525 = vrot.lane.b32.xlu0 %v2454_v48, %s9818_s29  ;;  %v3522_v48 = vsel %vm10148_vm9, %v3517_v36, %v3521_v16  ;;  %v3546_v58 = vsel %vm10148_vm9, %v3541_v49, %v3545_v31  ;;  %v9112_v57 = vrot.slane %v3728_v47, 9  ;;  %v11294_v36 = vld [vmem:[%s13567_s2] ss:$0 sm:$0xff] }
 0x26f   : > { %2916 = vst.msk [vmem:[#allocation4 + $0x44] sm:$0xf] %vm2898_vm8, %v2837_v27  ;;  %v3732_v27 = vld [vmem:[#allocation2 + $0xd0] sm:$0xf] }
 0x270   : > { %v2839_v62 = vpop.permute.xlu0 %2838  ;;  %2527 = vrot.lane.b32.xlu1 %v2464_v53, %s9818_s29  ;;  %v3555_v53 = vrot.slane %v3553_v44, 5  ;;  %v3889_v1 = vrot.slane %v3732_v27, 5  ;;  %v3883_v2 = vsel %vm10435_vm1, %v9112_v57, %v3882_v54 }
 0x271   : > { %2917 = vst.msk [vmem:[#allocation4 + $0x48] sm:$0xf] %vm2898_vm8, %v2839_v62  ;;  %v3884_v62 = vrot.slane %v3882_v54, 4 }
 0x272   : > { %v2841_v4 = vpop.permute.xlu1 %2840  ;;  %2858 = vrot.lane.b32.xlu0 %v2791_v59, %s9819_s8  ;;  %v3556_v61 = vsel %vm10148_vm9, %v3551_v52, %v3555_v53  ;;  %v3891_v6 = vrot.slane %v3889_v1, 4  ;;  %v3890_v10 = vsel %vm10435_vm1, %v9113_v3, %v3889_v1 }
 0x273   : > { %2918 = vst.msk [vmem:[#allocation4 + $0x4c] sm:$0xf] %vm2898_vm8, %v2841_v4 }
 0x274   : > { %v3029_v13 = vpop.permute.xlu0 %3028  ;;  %2860 = vrot.lane.b32.xlu1 %v2794_v34, %s9819_s8  ;;  %v3733_v34 = vld [vmem:[#allocation2 + $0xd4] sm:$0x1] }
 0x275   : > { %3109 = vst.msk [vmem:[#allocation4 + $0x40] sm:$0xf] %vm3092_vm12, %v3029_v13  ;;  %v3892_v7 = vrot.slane %v3733_v34, 5 }
 0x276   : > { %v3031_v33 = vpop.permute.xlu1 %3030  ;;  %2862 = vrot.lane.b32.xlu0 %v2798_v5, %s9819_s8  ;;  %v3886_v5 = vsel %vm10435_vm1, %v3884_v62, %v3885_v0 }
 0x277   : > { %3110 = vst.msk [vmem:[#allocation4 + $0x44] sm:$0xf] %vm3092_vm12, %v3031_v33  ;;  %v3893_v13 = vsel %vm10435_vm1, %v3891_v6, %v3892_v7 }
 0x278   : > { %v3033_v26 = vpop.permute.xlu0 %3032  ;;  %2864 = vrot.lane.b32.xlu1 %v2801_v14, %s9819_s8 }
 0x279   : > { %3111 = vst.msk [vmem:[#allocation4 + $0x48] sm:$0xf] %vm3092_vm12, %v3033_v26 }
 0x27a   : > { %v3035_v35 = vpop.permute.xlu1 %3034  ;;  %3052 = vrot.lane.b32.xlu0 %v2960_v22, %s9820_s9 }
 0x27b   : > { %3112 = vst.msk [vmem:[#allocation4 + $0x4c] sm:$0xf] %vm3092_vm12, %v3035_v35 }
 0x27c   : > { %v3590_v39 = vpop.permute.xlu0 %3589  ;;  %3054 = vrot.lane.b32.xlu1 %v2961_v28, %s9820_s9 }
 0x27d   : > { %3670 = vst.msk [vmem:[#allocation4 + $0x40] sm:$0xf] %vm3653_vm13, %v3590_v39  ;;  %v11300_v39 = vld [vmem:[%s13568_s3] ss:$0 sm:$0xff] }
 0x27e   : > { %v3592_v42 = vpop.permute.xlu1 %3591  ;;  %3056 = vrot.lane.b32.xlu0 %v2962_v23, %s9820_s9 }
 0x27f   : > { %3671 = vst.msk [vmem:[#allocation4 + $0x44] sm:$0xf] %vm3653_vm13, %v3592_v42 }
 0x280   : > { %v3594_v50 = vpop.permute.xlu0 %3593  ;;  %3058 = vrot.lane.b32.xlu1 %v2963_v46, %s9820_s9  ;;  %s13516_s9 = scalar_lea.hbm %s13572_s7, %s9353_s19 }
 0x281   : > { %3672 = vst.msk [vmem:[#allocation4 + $0x48] sm:$0xf] %vm3653_vm13, %v3594_v50 }
 0x282   : > { %v3596_v55 = vpop.permute.xlu1 %3595  ;;  %3613 = vrot.lane.b32.xlu0 %v3522_v48, %s9821_s16 }
 0x283   : > { %3673 = vst.msk [vmem:[#allocation4 + $0x4c] sm:$0xf] %vm3653_vm13, %v3596_v55 }
 0x284   : > { %v3927_v59 = vpop.permute.xlu0 %3926  ;;  %3615 = vrot.lane.b32.xlu1 %v3532_v51, %s9821_s16 }
 0x285   : > { %4007 = vst.msk [vmem:[#allocation4 + $0x40] sm:$0xf] %vm3990_vm15, %v3927_v59 }
 0x286   : > { %v3929_v63 = vpop.permute.xlu1 %3928  ;;  %3617 = vrot.lane.b32.xlu0 %v3546_v58, %s9821_s16 }
 0x287   : > { %4008 = vst.msk [vmem:[#allocation4 + $0x44] sm:$0xf] %vm3990_vm15, %v3929_v63 }
 0x288   : > { %v3931_v4 = vpop.permute.xlu0 %3930  ;;  %3619 = vrot.lane.b32.xlu1 %v3556_v61, %s9821_s16  ;;  %s9825_s16 = smov [#allocation6]  }
 0x289   : > { %4009 = vst.msk [vmem:[#allocation4 + $0x48] sm:$0xf] %vm3990_vm15, %v3931_v4 }
 0x28a   : > { %v3933_v8 = vpop.permute.xlu1 %3932  ;;  %3950 = vrot.lane.b32.xlu0 %v3883_v2, %s9822_s23 }
 0x28b   : > { %4010 = vst.msk [vmem:[#allocation4 + $0x4c] sm:$0xf] %vm3990_vm15, %v3933_v8 }
 0x28c   : > { %v2506_v12 = vpop.permute.xlu0 %2505  ;;  %3952 = vrot.lane.b32.xlu1 %v3886_v5, %s9822_s23  ;;  %v4906_v5 = vld [vmem:[#allocation3 + $0x18] sm:$0xf] }
 0x28d   : > { %2582 = vst.msk [vmem:[#allocation4 + $0x50] sm:$0xf] %vm2561_vm6, %v2506_v12 }
 0x28e   : > { %v9656_v14 = vld [vmem:[#allocation4 + $0x40] sm:$0xff]   ;;  %v2508_v16 = vpop.permute.xlu1 %2507  ;;  %3954 = vrot.lane.b32.xlu0 %v3890_v10, %s9822_s23 }
 0x28f   : > { %2583 = vst.msk [vmem:[#allocation4 + $0x54] sm:$0xf] %vm2561_vm6, %v2508_v16  ;;  %9525 = vmatprep.mubr.msk.bf16.mxu0 %vm4155_vm0, %v9656_v14  ;;  %v4896_v14 = vld [vmem:[#allocation3 + $0xc] sm:$0xf] }
 0x290   : > { %v2510_v17 = vpop.permute.xlu0 %2509  ;;  %3956 = vrot.lane.b32.xlu1 %v3893_v13, %s9822_s23 }
 0x291   : > { %2584 = vst.msk [vmem:[#allocation4 + $0x58] sm:$0xf] %vm2561_vm6, %v2510_v17 }
 0x292   : > { %v9657_v18 = vld [vmem:[#allocation4 + $0x48] sm:$0xff]   ;;  %v2512_v19 = vpop.permute.xlu1 %2511 }
 0x293   : > { %2585 = vst.msk [vmem:[#allocation4 + $0x5c] sm:$0xf] %vm2561_vm6, %v2512_v19  ;;  %9526 = vmatmul.mubr.msk.bf16.gmra.mxu0 %vm4155_vm0, %v9657_v18 }
 0x294   : > { %v2843_v33 = vpop.permute.xlu0 %2842 }
 0x295   : > { %2919 = vst.msk [vmem:[#allocation4 + $0x50] sm:$0xf] %vm2898_vm8, %v2843_v33 }
 0x296   : > { %v2845_v21 = vpop.permute.xlu1 %2844 }
 0x297   : > { %2920 = vst.msk [vmem:[#allocation4 + $0x54] sm:$0xf] %vm2898_vm8, %v2845_v21 }
 0x298   : > { %v2847_v22 = vpop.permute.xlu0 %2846 }
 0x299   : > { %2921 = vst.msk [vmem:[#allocation4 + $0x58] sm:$0xf] %vm2898_vm8, %v2847_v22 }
 0x29a   : > { %v2849_v9 = vpop.permute.xlu1 %2848 }
 0x29b   : > { %2922 = vst.msk [vmem:[#allocation4 + $0x5c] sm:$0xf] %vm2898_vm8, %v2849_v9  ;;  %v4910_v9 = vld [vmem:[#allocation3 + $0x20] sm:$0x1] }
 0x29c   : > { %v3037_v24 = vpop.permute.xlu0 %3036 }
 0x29d   : > { %3113 = vst.msk [vmem:[#allocation4 + $0x50] sm:$0xf] %vm3092_vm12, %v3037_v24 }
 0x29e   : > { %v3039_v25 = vpop.permute.xlu1 %3038 }
 0x29f   : > { %3114 = vst.msk [vmem:[#allocation4 + $0x54] sm:$0xf] %vm3092_vm12, %v3039_v25 }
 0x2a0   : > { %v3041_v26 = vpop.permute.xlu0 %3040 }
 0x2a1   : > { %3115 = vst.msk [vmem:[#allocation4 + $0x58] sm:$0xf] %vm3092_vm12, %v3041_v26 }
 0x2a2   : > { %v3043_v28 = vpop.permute.xlu1 %3042 }
 0x2a3   : > { %3116 = vst.msk [vmem:[#allocation4 + $0x5c] sm:$0xf] %vm3092_vm12, %v3043_v28 }
 0x2a4   : > { %v3598_v29 = vpop.permute.xlu0 %3597 }
 0x2a5   : > { %3674 = vst.msk [vmem:[#allocation4 + $0x50] sm:$0xf] %vm3653_vm13, %v3598_v29 }
 0x2a6   : > { %v3600_v30 = vpop.permute.xlu1 %3599 }
 0x2a7   : > { %3675 = vst.msk [vmem:[#allocation4 + $0x54] sm:$0xf] %vm3653_vm13, %v3600_v30 }
 0x2a8   : > { %v3602_v31 = vpop.permute.xlu0 %3601 }
 0x2a9   : > { %3676 = vst.msk [vmem:[#allocation4 + $0x58] sm:$0xf] %vm3653_vm13, %v3602_v31 }
 0x2aa   : > { %v3604_v32 = vpop.permute.xlu1 %3603 }
 0x2ab   : > { %3677 = vst.msk [vmem:[#allocation4 + $0x5c] sm:$0xf] %vm3653_vm13, %v3604_v32 }
 0x2ac   : > { %v3935_v35 = vpop.permute.xlu0 %3934 }
 0x2ad   : > { %4011 = vst.msk [vmem:[#allocation4 + $0x50] sm:$0xf] %vm3990_vm15, %v3935_v35 }
 0x2ae   : > { %v3937_v11 = vpop.permute.xlu1 %3936 }
 0x2af   : > { %4012 = vst.msk [vmem:[#allocation4 + $0x54] sm:$0xf] %vm3990_vm15, %v3937_v11 }
 0x2b0   : > { %v3939_v23 = vpop.permute.xlu0 %3938 }
 0x2b1   : > { %4013 = vst.msk [vmem:[#allocation4 + $0x58] sm:$0xf] %vm3990_vm15, %v3939_v23 }
 0x2b2   : > { %v3941_v38 = vpop.permute.xlu1 %3940 }
 0x2b3   : > { %4014 = vst.msk [vmem:[#allocation4 + $0x5c] sm:$0xf] %vm3990_vm15, %v3941_v38  ;;  %v9511_v46 = vpop.f32.mrf.mxu0  ;;  %v4903_v38 = vld [vmem:[#allocation3 + $0x14] sm:$0x1] }
 0x2b4   : > { %v2514_v40 = vpop.permute.xlu0 %2513  ;;  %v4377_v41 = vmul.f32 %v9511_v46, %v11294_v36 }
 0x2b5   : > { %2586 = vst.msk [vmem:[#allocation4 + $0x60] sm:$0xf] %vm2561_vm6, %v2514_v40  ;;  %v4242_v43 = vpop.f32.mrf.mxu0 }
 0x2b6   : > { %v9658_v44 = vld [vmem:[#allocation4 + $0x50] sm:$0xff]   ;;  %v2516_v42 = vpop.permute.xlu1 %2515  ;;  %v4415_v45 = vadd.f32 %v11300_v39, %v4377_v41  ;;  %v4375_v48 = vmul.f32 %v11294_v36, %v4242_v43 }
 0x2b7   : > { %2587 = vst.msk [vmem:[#allocation4 + $0x64] sm:$0xf] %vm2561_vm6, %v2516_v42  ;;  %v9512_v49 = vpop.f32.mrf.mxu0  ;;  %9529 = vmatprep.mubr.msk.bf16.mxu0 %vm4155_vm0, %v9658_v44 }
 0x2b8   : > { %v2518_v50 = vpop.permute.xlu0 %2517  ;;  %v4447_v47 = vmax.f32 %v4415_v45, 0.0  ;;  %v4413_v51 = vadd.f32 %v11300_v39, %v4375_v48  ;;  %v4378_v52 = vmul.f32 %v9512_v49, %v11294_v36 }
 0x2b9   : > { %2588 = vst.msk [vmem:[#allocation4 + $0x68] sm:$0xf] %vm2561_vm6, %v2518_v50  ;;  %v4245_v53 = vpop.f32.mrf.mxu0 }
 0x2ba   : > { %v9659_v54 = vld [vmem:[#allocation4 + $0x58] sm:$0xff]   ;;  %v2520_v55 = vpop.permute.xlu1 %2519  ;;  %v9323_v56 = vpack.c.bf16 %v4447_v47, %v4447_v47  ;;  %v4445_v27 = vmax.f32 %v4413_v51, 0.0  ;;  %v4416_v58 = vadd.f32 %v11300_v39, %v4378_v52  ;;  %v4376_v57 = vmul.f32 %v11294_v36, %v4245_v53 }
 0x2bb   : > { %2589 = vst.msk [vmem:[#allocation4 + $0x6c] sm:$0xf] %vm2561_vm6, %v2520_v55  ;;  %9530 = vmatmul.mubr.msk.bf16.gmra.mxu0 %vm4155_vm0, %v9659_v54 }
 0x2bc   : > { %v2851_v59 = vpop.permute.xlu0 %2850  ;;  %v4591_v60 = vshrl.u32 %v9323_v56, 16  ;;  %v9321_v61 = vpack.c.bf16 %v4445_v27, %v4445_v27  ;;  %v4448_v62 = vmax.f32 %v4416_v58, 0.0  ;;  %v4414_v0 = vadd.f32 %v11300_v39, %v4376_v57 }
 0x2bd   : > { %2923 = vst.msk [vmem:[#allocation4 + $0x60] sm:$0xf] %vm2898_vm8, %v2851_v59  ;;  %v4594_v34 = vshll.u32 %v9323_v56, 16 }
 0x2be   : > { %v2853_v1 = vpop.permute.xlu1 %2852  ;;  %v4593_v63 = vrot.slane %v4591_v60, 7  ;;  %v4574_v2 = vshrl.u32 %v9321_v61, 16  ;;  %v9324_v3 = vpack.c.bf16 %v4448_v62, %v4448_v62  ;;  %v4446_v6 = vmax.f32 %v4414_v0, 0.0 }
 0x2bf   : > { %2924 = vst.msk [vmem:[#allocation4 + $0x64] sm:$0xf] %vm2898_vm8, %v2853_v1  ;;  %v4577_v12 = vshll.u32 %v9321_v61, 16 }
 0x2c0   : > { %v2855_v7 = vpop.permute.xlu0 %2854  ;;  %v4596_v8 = vor.u32 %v4594_v34, %v4593_v63  ;;  %v4576_v10 = vrot.slane %v4574_v2, 7  ;;  %v4599_v13 = vshrl.u32 %v9324_v3, 16  ;;  %v9322_v16 = vpack.c.bf16 %v4446_v6, %v4446_v6 }
 0x2c1   : > { %2925 = vst.msk [vmem:[#allocation4 + $0x68] sm:$0xf] %vm2898_vm8, %v2855_v7  ;;  %v4602_v21 = vshll.u32 %v9324_v3, 16  ;;  %v4597_v26 = vrot.slane %v4593_v63, 4 }
 0x2c2   : > { %v2857_v17 = vpop.permute.xlu1 %2856  ;;  %v4907_v18 = vsel %vm11320_vm2, %v4596_v8, %v4906_v5  ;;  %v4579_v19 = vor.u32 %v4577_v12, %v4576_v10  ;;  %v4601_v33 = vrot.slane %v4599_v13, 7  ;;  %v4582_v24 = vshrl.u32 %v9322_v16, 16 }
 0x2c3   : > { %2926 = vst.msk [vmem:[#allocation4 + $0x6c] sm:$0xf] %vm2898_vm8, %v2857_v17  ;;  %4908 = vst [vmem:[#allocation3 + $0x18] sm:$0xf] %v4907_v18  ;;  %v4585_v32 = vshll.u32 %v9322_v16, 16  ;;  %v4580_v46 = vrot.slane %v4576_v10, 4 }
 0x2c4   : > { %v3045_v25 = vpop.permute.xlu0 %3044  ;;  %v4897_v28 = vsel %vm11320_vm2, %v4579_v19, %v4896_v14  ;;  %v4604_v29 = vor.u32 %v4602_v21, %v4601_v33  ;;  %v4606_v30 = vrot.slane %v4601_v33, 4  ;;  %v4584_v31 = vrot.slane %v4582_v24, 7 }
 0x2c5   : > { %3117 = vst.msk [vmem:[#allocation4 + $0x60] sm:$0xf] %vm3092_vm12, %v3045_v25  ;;  %4898 = vst [vmem:[#allocation3 + $0xc] sm:$0xf] %v4897_v28 }
 0x2c6   : > { %v3047_v35 = vpop.permute.xlu1 %3046  ;;  %v4605_v11 = vsel %vm10153_vm11, %v4597_v26, %v4604_v29  ;;  %v4911_v23 = vsel %vm11330_vm10, %v4606_v30, %v4910_v9  ;;  %v4587_v40 = vor.u32 %v4585_v32, %v4584_v31  ;;  %v4589_v41 = vrot.slane %v4584_v31, 4 }
 0x2c7   : > { %3118 = vst.msk [vmem:[#allocation4 + $0x64] sm:$0xf] %vm3092_vm12, %v3047_v35  ;;  %4912 = vst [vmem:[#allocation3 + $0x20] sm:$0x1] %v4911_v23 }
 0x2c8   : > { %4909 = vst.msk [vmem:[#allocation3 + $0x1c] sm:$0xf] %vm4894_vm14, %v4605_v11  ;;  %v3049_v43 = vpop.permute.xlu0 %3048  ;;  %v4588_v44 = vsel %vm10153_vm11, %v4580_v46, %v4587_v40  ;;  %v4904_v42 = vsel %vm11330_vm10, %v4589_v41, %v4903_v38 }
 0x2c9   : > { %3119 = vst.msk [vmem:[#allocation4 + $0x68] sm:$0xf] %vm3092_vm12, %v3049_v43  ;;  %4905 = vst [vmem:[#allocation3 + $0x14] sm:$0x1] %v4904_v42 }
 0x2ca   : > { %v3051_v45 = vpop.permute.xlu1 %3050  ;;  %4900 = vst.msk [vmem:[#allocation3 + $0x10] sm:$0xf] %vm4894_vm14, %v4588_v44  ;;  %v6665_v0 = vld [vmem:[#allocation3 + $0x18] sm:$0xe] }
 0x2cb   : > { %3120 = vst.msk [vmem:[#allocation4 + $0x6c] sm:$0xf] %vm3092_vm12, %v3051_v45  ;;  %v9200_v10 = vrot.slane %v6665_v0, 9  ;;  %v6169_v17 = vld [vmem:[#allocation3 + $0x18] sm:$0xf] }
 0x2cc   : > { %v3606_v48 = vpop.permute.xlu0 %3605  ;;  %v5078_v49 = vld [vmem:[#allocation3 + $0xc] sm:$0xf]  ;;  %v5015_v18 = vld [vmem:[#allocation3 + $0x18] sm:$0xf]  ;;  %v6239_v30 = vshrl.u32 %v6169_v17, 16  ;;  %v6242_v23 = vshll.u32 %v6169_v17, 16 }
 0x2cd   : > { %3678 = vst.msk [vmem:[#allocation4 + $0x60] sm:$0xf] %vm3653_vm13, %v3606_v48  ;;  %v5148_v50 = vshrl.u32 %v5078_v49, 16  ;;  %v5151_v47 = vshll.u32 %v5078_v49, 16  ;;  %v5013_v52 = vld [vmem:[#allocation3 + $0xc] sm:$0xf] }
 0x2ce   : > { %v3608_v51 = vpop.permute.xlu1 %3607  ;;  %5045 = vst.msk [vmem:[#allocation5 + $0x18] sm:$0xf] %vm4894_vm14, %v5013_v52  ;;  %v5639_v12 = vld [vmem:[#allocation3 + $0xc] sm:$0xe]  ;;  %v6667_v14 = vld [vmem:[#allocation3 + $0x20] sm:$0x1] }
 0x2cf   : > { %3679 = vst.msk [vmem:[#allocation4 + $0x64] sm:$0xf] %vm3653_vm13, %v3608_v51  ;;  %v5150_v53 = vrot.slane %v5148_v50, 4  ;;  %v5153_v54 = vrot.slane %v5151_v47, 5  ;;  %v6666_v61 = vld [vmem:[#allocation3 + $0x1c] sm:$0xf] }
 0x2d0   : > { %v3610_v55 = vpop.permute.xlu0 %3609  ;;  %v5080_v58 = vld [vmem:[#allocation3 + $0x14] sm:$0x1]  ;;  %v6767_v3 = vrot.slane %v6666_v61, 5  ;;  %v6170_v21 = vld [vmem:[#allocation3 + $0x1c] sm:$0xf]  ;;  %v6770_v32 = vrot.slane %v6667_v14, 5 }
 0x2d1   : > { %3680 = vst.msk [vmem:[#allocation4 + $0x68] sm:$0xf] %vm3653_vm13, %v3610_v55  ;;  %v5079_v56 = vld [vmem:[#allocation3 + $0x10] sm:$0xf]  ;;  %v5154_v27 = vor.u32 %v5153_v54, %v5150_v53  ;;  %v5167_v2 = vshll.u32 %v5080_v58, 16  ;;  %v9184_v35 = vrot.slane %v5639_v12, 9 }
 0x2d2   : > { %v3612_v57 = vpop.permute.xlu1 %3611  ;;  %v5157_v59 = vshll.u32 %v5079_v56, 16  ;;  %v5161_v60 = vshrl.u32 %v5079_v56, 16  ;;  %v5014_v6 = vld [vmem:[#allocation3 + $0x10] sm:$0xf]  ;;  %5047 = vst.msk [vmem:[#allocation5 + $0x30] sm:$0xf] %vm4894_vm14, %v5015_v18  ;;  %v6768_v29 = vsel %vm10435_vm1, %v9200_v10, %v6767_v3 }
 0x2d3   : > { %3681 = vst.msk [vmem:[#allocation4 + $0x6c] sm:$0xf] %vm3653_vm13, %v3612_v57  ;;  %v5155_v62 = vrot.slane %v5154_v27, 4  ;;  %v5640_v13 = vld [vmem:[#allocation3 + $0x10] sm:$0xf]  ;;  %v5169_v33 = vrot.slane %v5167_v2, 5 }
 0x2d4   : > { %v3943_v1 = vpop.permute.xlu0 %3942  ;;  %v5159_v63 = vrot.slane %v5157_v59, 5  ;;  %v5163_v34 = vrot.slane %v5161_v60, 4  ;;  %5046 = vst.msk [vmem:[#allocation5 + $0x24] sm:$0xf] %vm4894_vm14, %v5014_v6  ;;  %v5016_v9 = vld [vmem:[#allocation3 + $0x1c] sm:$0xf] }
 0x2d5   : > { %4015 = vst.msk [vmem:[#allocation4 + $0x60] sm:$0xf] %vm3990_vm15, %v3943_v1  ;;  %v6769_v24 = vrot.slane %v6767_v3, 4  ;;  %v5741_v25 = vrot.slane %v5640_v13, 5  ;;  %v6248_v38 = vshll.u32 %v6170_v21, 16  ;;  %v6241_v41 = vrot.slane %v6239_v30, 4 }
 0x2d6   : > { %v3945_v5 = vpop.permute.xlu1 %3944  ;;  %v5160_v7 = vsel %vm10148_vm9, %v5155_v62, %v5159_v63  ;;  %v5164_v8 = vor.u32 %v5163_v34, %v5159_v63  ;;  %5048 = vst.msk [vmem:[#allocation5 + $0x3c] sm:$0xf] %vm4894_vm14, %v5016_v9  ;;  %v5641_v40 = vld [vmem:[#allocation3 + $0x14] sm:$0x1]  ;;  %v6252_v43 = vshrl.u32 %v6170_v21, 16  ;;  %v6244_v47 = vrot.slane %v6242_v23, 5 }
 0x2d7   : > { %4016 = vst.msk [vmem:[#allocation4 + $0x64] sm:$0xf] %vm3990_vm15, %v3945_v5  ;;  %5511 = vrot.lane.b32.xlu0 %v5160_v7, %s9822_s23  ;;  %v6171_v44 = vld [vmem:[#allocation3 + $0x20] sm:$0x1]  ;;  %v6771_v45 = vsel %vm10435_vm1, %v6769_v24, %v6770_v32  ;;  %v5743_v48 = vrot.slane %v5741_v25, 4  ;;  %v6250_v51 = vrot.slane %v6248_v38, 5  ;;  %v5742_v54 = vsel %vm10435_vm1, %v9184_v35, %v5741_v25 }
 0x2d8   : > { %v3947_v16 = vpop.permute.xlu0 %3946  ;;  %v5165_v19 = vrot.slane %v5164_v8, 4  ;;  %v6254_v55 = vrot.slane %v6252_v43, 4  ;;  %v5744_v27 = vrot.slane %v5641_v40, 5  ;;  %v6245_v57 = vor.u32 %v6244_v47, %v6241_v41  ;;  %v9664_v1 = vld [vmem:[%s13569_s4 + $0x78] sm:$0xff]   ;;  %v4920_v30 = vld [vmem:[#allocation3 + $0x30] sm:$0xf] }
 0x2d9   : > { %4017 = vst.msk [vmem:[#allocation4 + $0x68] sm:$0xf] %vm3990_vm15, %v3947_v16  ;;  %v6258_v59 = vshll.u32 %v6171_v44, 16  ;;  %v9665_v63 = vld [vmem:[%s13569_s4 + $0x38] sm:$0xff]   ;;  %9577 = vmatprep.subr.bf16.mxu1 %v9664_v1  ;;  %9373 = vmatprep.subr.bf16.mxu0 %v9664_v1 }
 0x2da   : > { %v3949_v26 = vpop.permute.xlu1 %3948  ;;  %v5170_v28 = vsel %vm10148_vm9, %v5165_v19, %v5169_v33  ;;  %v6255_v0 = vor.u32 %v6254_v55, %v6250_v51  ;;  %v5745_v2 = vsel %vm10435_vm1, %v5743_v48, %v5744_v27  ;;  %v6246_v6 = vrot.slane %v6245_v57, 4  ;;  %9585 = vmatpush3.bf16.msra.mxu1 %v9665_v63  ;;  %9374 = vmatpush3.bf16.msra.mxu0 %v9665_v63  ;;  %v4924_v48 = vld [vmem:[#allocation3 + $0x38] sm:$0x1] }
 0x2db   : > { %4018 = vst.msk [vmem:[#allocation4 + $0x6c] sm:$0xf] %vm3990_vm15, %v3949_v26  ;;  %5513 = vrot.lane.b32.xlu1 %v5170_v28, %s9822_s23  ;;  %6874 = vrot.lane.b32.xlu0 %v6768_v29, %s9822_s23  ;;  %v9515_v31 = vpop.f32.mrf.mxu0  ;;  %v6260_v17 = vrot.slane %v6258_v59, 5  ;;  %v9666_v27 = vld [vmem:[%s13569_s4 + $0x70] sm:$0xff]  }
 0x2dc   : > { %v2522_v11 = vpop.permute.xlu0 %2521  ;;  %v4381_v46 = vmul.f32 %v9515_v31, %v11294_v36  ;;  %v6251_v14 = vsel %vm10148_vm9, %v6246_v6, %v6250_v51  ;;  %v6256_v16 = vrot.slane %v6255_v0, 4  ;;  %9578 = vmatprep.subr.bf16.mxu1 %v9666_v27  ;;  %9375 = vmatprep.subr.bf16.mxu0 %v9666_v27  ;;  %v5081_v63 = vld [vmem:[#allocation3 + $0x18] sm:$0xf] }
 0x2dd   : > { %2590 = vst.msk [vmem:[#allocation4 + $0x70] sm:$0xf] %vm2561_vm6, %v2522_v11  ;;  %v4258_v42 = vpop.f32.mrf.mxu0  ;;  %v5172_v6 = vshrl.u32 %v5081_v63, 16 }
 0x2de   : > { %v9660_v49 = vld [vmem:[#allocation4 + $0x60] sm:$0xff]   ;;  %v2524_v50 = vpop.permute.xlu1 %2523  ;;  %v4419_v52 = vadd.f32 %v11300_v39, %v4381_v46  ;;  %v4379_v53 = vmul.f32 %v11294_v36, %v4258_v42  ;;  %6632 = vst.msk [vmem:[#allocation5 + $0x1c] sm:$0xf] %vm4894_vm14, %v6251_v14  ;;  %v6261_v24 = vsel %vm10148_vm9, %v6256_v16, %v6260_v17  ;;  %v4913_v46 = vld [vmem:[#allocation3 + $0x24] sm:$0xf] }
 0x2df   : > { %2591 = vst.msk [vmem:[#allocation4 + $0x74] sm:$0xf] %vm2561_vm6, %v2524_v50  ;;  %6876 = vrot.lane.b32.xlu1 %v6771_v45, %s9822_s23  ;;  %5848 = vrot.lane.b32.xlu0 %v5742_v54, %s9823_s15  ;;  %v9516_v56 = vpop.f32.mrf.mxu0 }
 0x2e0   : > { %v2526_v58 = vpop.permute.xlu0 %2525  ;;  %v4451_v60 = vmax.f32 %v4419_v52, 0.0  ;;  %v4417_v61 = vadd.f32 %v11300_v39, %v4379_v53  ;;  %v4382_v62 = vmul.f32 %v9516_v56, %v11294_v36  ;;  %9533 = vmatprep.mubr.msk.bf16.mxu0 %vm4155_vm0, %v9660_v49  ;;  %6633 = vst.msk [vmem:[#allocation5 + $0x28] sm:$0xf] %vm4894_vm14, %v6261_v24 }
 0x2e1   : > { %2592 = vst.msk [vmem:[#allocation4 + $0x78] sm:$0xf] %vm2561_vm6, %v2526_v58  ;;  %v4261_v34 = vpop.f32.mrf.mxu0  ;;  %v9667_v58 = vld [vmem:[%s13569_s4 + $0x30] sm:$0xff]  }
 0x2e2   : > { %v9661_v3 = vld [vmem:[#allocation4 + $0x68] sm:$0xff]   ;;  %v2528_v5 = vpop.permute.xlu1 %2527  ;;  %v9327_v7 = vpack.c.bf16 %v4451_v60, %v4451_v60  ;;  %v4449_v8 = vmax.f32 %v4417_v61, 0.0  ;;  %v4420_v10 = vadd.f32 %v11300_v39, %v4382_v62  ;;  %v4380_v12 = vmul.f32 %v11294_v36, %v4261_v34  ;;  %v4917_v60 = vld [vmem:[#allocation3 + $0x2c] sm:$0x1]  ;;  %9586 = vmatpush3.bf16.msra.mxu1 %v9667_v58  ;;  %9376 = vmatpush3.bf16.msra.mxu0 %v9667_v58 }
 0x2e3   : > { %2593 = vst.msk [vmem:[#allocation4 + $0x7c] sm:$0xf] %vm2561_vm6, %v2528_v5  ;;  %5850 = vrot.lane.b32.xlu1 %v5745_v2, %s9823_s15  ;;  %9534 = vmatmul.mubr.msk.bf16.gmra.mxu0 %vm4155_vm0, %v9661_v3  ;;  %v5082_v5 = vld [vmem:[#allocation3 + $0x1c] sm:$0xf] }
 0x2e4   : > { %v2859_v13 = vpop.permute.xlu0 %2858  ;;  %v4625_v18 = vshrl.u32 %v9327_v7, 16  ;;  %v9325_v19 = vpack.c.bf16 %v4449_v8, %v4449_v8  ;;  %v4452_v33 = vmax.f32 %v4420_v10, 0.0  ;;  %v4418_v21 = vadd.f32 %v11300_v39, %v4380_v12  ;;  %v9668_v10 = vld [vmem:[%s13569_s4 + $0x68] sm:$0xff]  }
 0x2e5   : > { %2927 = vst.msk [vmem:[#allocation4 + $0x70] sm:$0xf] %vm2898_vm8, %v2859_v13  ;;  %v4628_v26 = vshll.u32 %v9327_v7, 16  ;;  %v5175_v7 = vshll.u32 %v5081_v63, 16  ;;  %v5181_v17 = vshll.u32 %v5082_v5, 16  ;;  %9579 = vmatprep.subr.bf16.mxu1 %v9668_v10  ;;  %9377 = vmatprep.subr.bf16.mxu0 %v9668_v10 }
 0x2e6   : > { %v2861_v9 = vpop.permute.xlu1 %2860  ;;  %v4627_v25 = vrot.slane %v4625_v18, 7  ;;  %v4608_v28 = vshrl.u32 %v9325_v19, 16  ;;  %v9328_v29 = vpack.c.bf16 %v4452_v33, %v4452_v33  ;;  %v4450_v31 = vmax.f32 %v4418_v21, 0.0 }
 0x2e7   : > { %2928 = vst.msk [vmem:[#allocation4 + $0x74] sm:$0xf] %vm2898_vm8, %v2861_v9  ;;  %v4611_v23 = vshll.u32 %v9325_v19, 16  ;;  %v5185_v18 = vshrl.u32 %v5082_v5, 16  ;;  %v5174_v9 = vrot.slane %v5172_v6, 4  ;;  %v5177_v24 = vrot.slane %v5175_v7, 5 }
 0x2e8   : > { %v2863_v32 = vpop.permute.xlu0 %2862  ;;  %v4630_v35 = vor.u32 %v4628_v26, %v4627_v25  ;;  %v4610_v11 = vrot.slane %v4608_v28, 7  ;;  %v4633_v38 = vshrl.u32 %v9328_v29, 16  ;;  %v9326_v40 = vpack.c.bf16 %v4450_v31, %v4450_v31  ;;  %v5975_v26 = vld [vmem:[#allocation3 + $0x18] sm:$0xf] }
 0x2e9   : > { %2929 = vst.msk [vmem:[#allocation4 + $0x78] sm:$0xf] %vm2898_vm8, %v2863_v32  ;;  %v4636_v45 = vshll.u32 %v9328_v29, 16  ;;  %v4631_v47 = vrot.slane %v4627_v25, 4  ;;  %v5187_v31 = vrot.slane %v5185_v18, 4 }
 0x2ea   : > { %v2865_v41 = vpop.permute.xlu1 %2864  ;;  %v4921_v43 = vsel %vm11320_vm2, %v4630_v35, %v4920_v30  ;;  %v4613_v44 = vor.u32 %v4611_v23, %v4610_v11  ;;  %v4635_v42 = vrot.slane %v4633_v38, 7  ;;  %v4616_v49 = vshrl.u32 %v9326_v40, 16 }
 0x2eb   : > { %2930 = vst.msk [vmem:[#allocation4 + $0x7c] sm:$0xf] %vm2898_vm8, %v2865_v41  ;;  %4922 = vst [vmem:[#allocation3 + $0x30] sm:$0xf] %v4921_v43  ;;  %v4619_v55 = vshll.u32 %v9326_v40, 16  ;;  %v4614_v61 = vrot.slane %v4610_v11, 4  ;;  %v5178_v40 = vor.u32 %v5177_v24, %v5174_v9 }
 0x2ec   : > { %v3053_v50 = vpop.permute.xlu0 %3052  ;;  %v4914_v51 = vsel %vm11320_vm2, %v4613_v44, %v4913_v46  ;;  %v4638_v52 = vor.u32 %v4636_v45, %v4635_v42  ;;  %v4640_v53 = vrot.slane %v4635_v42, 4  ;;  %v4618_v54 = vrot.slane %v4616_v49, 7  ;;  %v5083_v43 = vld [vmem:[#allocation3 + $0x20] sm:$0x1]  ;;  %v5976_v44 = vld [vmem:[#allocation3 + $0x1c] sm:$0xf] }
 0x2ed   : > { %3121 = vst.msk [vmem:[#allocation4 + $0x70] sm:$0xf] %vm3092_vm12, %v3053_v50  ;;  %4915 = vst [vmem:[#allocation3 + $0x24] sm:$0xf] %v4914_v51  ;;  %v5183_v30 = vrot.slane %v5181_v17, 5  ;;  %v9669_v51 = vld [vmem:[%s13569_s4 + $0x28] sm:$0xff]  }
 0x2ee   : > { %v3055_v56 = vpop.permute.xlu1 %3054  ;;  %v4639_v57 = vsel %vm10153_vm11, %v4631_v47, %v4638_v52  ;;  %v4925_v59 = vsel %vm11330_vm10, %v4640_v53, %v4924_v48  ;;  %v4621_v62 = vor.u32 %v4619_v55, %v4618_v54  ;;  %v4623_v0 = vrot.slane %v4618_v54, 4  ;;  %v11446_v47 = vld [vmem:[#allocation3 + $0x1c] sm:$0xf]  ;;  %9587 = vmatpush3.bf16.msra.mxu1 %v9669_v51  ;;  %9378 = vmatpush3.bf16.msra.mxu0 %v9669_v51 }
 0x2ef   : > { %3122 = vst.msk [vmem:[#allocation4 + $0x74] sm:$0xf] %vm3092_vm12, %v3055_v56  ;;  %4926 = vst [vmem:[#allocation3 + $0x38] sm:$0x1] %v4925_v59  ;;  %v5188_v49 = vor.u32 %v5187_v31, %v5183_v30  ;;  %v5179_v53 = vrot.slane %v5178_v40, 4  ;;  %v5191_v55 = vshll.u32 %v5083_v43, 16 }
 0x2f0   : > { %4923 = vst.msk [vmem:[#allocation3 + $0x34] sm:$0xf] %vm4894_vm14, %v4639_v57  ;;  %v3057_v1 = vpop.permute.xlu0 %3056  ;;  %v4622_v34 = vsel %vm10153_vm11, %v4614_v61, %v4621_v62  ;;  %v4918_v2 = vsel %vm11330_vm10, %v4623_v0, %v4917_v60  ;;  %v5642_v57 = vld [vmem:[#allocation3 + $0x18] sm:$0xe]  ;;  %v5748_v62 = vrot.slane %v11446_v47, 5  ;;  %v9673_v43 = vld [vmem:[%s13569_s4 + $0x18] sm:$0xff]  }
 0x2f1   : > { %3123 = vst.msk [vmem:[#allocation4 + $0x78] sm:$0xf] %vm3092_vm12, %v3057_v1  ;;  %4919 = vst [vmem:[#allocation3 + $0x2c] sm:$0x1] %v4918_v2  ;;  %v5189_v61 = vrot.slane %v5188_v49, 4  ;;  %v5184_v5 = vsel %vm10148_vm9, %v5179_v53, %v5183_v30  ;;  %v9672_v30 = vld [vmem:[%s13569_s4 + $0x58] sm:$0xff]  }
 0x2f2   : > { %v3059_v3 = vpop.permute.xlu1 %3058  ;;  %4916 = vst.msk [vmem:[#allocation3 + $0x28] sm:$0xf] %vm4894_vm14, %v4622_v34  ;;  %v7197_v56 = vld [vmem:[#allocation3 + $0x30] sm:$0xf]  ;;  %v5644_v0 = vld [vmem:[#allocation3 + $0x20] sm:$0x1] }
 0x2f3   : > { %3124 = vst.msk [vmem:[#allocation4 + $0x7c] sm:$0xf] %vm3092_vm12, %v3059_v3  ;;  %v7288_v34 = vshrl.u32 %v7197_v56, 16  ;;  %v7291_v2 = vshll.u32 %v7197_v56, 16  ;;  %v9670_v3 = vld [vmem:[%s13569_s4 + $0x60] sm:$0xff]   ;;  %v5751_v9 = vrot.slane %v5644_v0, 5 }
 0x2f4   : > { %v3614_v8 = vpop.permute.xlu0 %3613  ;;  %v7001_v12 = vld [vmem:[#allocation3 + $0x24] sm:$0xf]  ;;  %9580 = vmatprep.subr.bf16.mxu1 %v9670_v3  ;;  %9379 = vmatprep.subr.bf16.mxu0 %v9670_v3  ;;  %v4934_v0 = vld [vmem:[#allocation3 + $0x48] sm:$0xf] }
 0x2f5   : > { %v7194_v13 = vld [vmem:[#allocation3 + $0x24] sm:$0xf]  ;;  %3682 = vst.msk [vmem:[#allocation4 + $0x70] sm:$0xf] %vm3653_vm13, %v3614_v8  ;;  %7067 = vrot.lane.b32.xlu0 %v7001_v12, %s9823_s15  ;;  %v5193_v8 = vrot.slane %v5191_v55, 5  ;;  %v9671_v12 = vld [vmem:[%s13569_s4 + $0x20] sm:$0xff]  }
 0x2f6   : > { %v7264_v14 = vshrl.u32 %v7194_v13, 16  ;;  %v7267_v16 = vshll.u32 %v7194_v13, 16  ;;  %v3616_v19 = vpop.permute.xlu1 %3615  ;;  %v6668_v63 = vld [vmem:[#allocation3 + $0x24] sm:$0xe]  ;;  %9588 = vmatpush3.bf16.msra.mxu1 %v9671_v12  ;;  %9380 = vmatpush3.bf16.msra.mxu0 %v9671_v12 }
 0x2f7   : > { %3683 = vst.msk [vmem:[#allocation4 + $0x74] sm:$0xf] %vm3653_vm13, %v3616_v19  ;;  %v7198_v17 = vld [vmem:[#allocation3 + $0x34] sm:$0xf]  ;;  %v5194_v19 = vsel %vm10148_vm9, %v5189_v61, %v5193_v8  ;;  %9581 = vmatprep.subr.bf16.mxu1 %v9672_v30  ;;  %9381 = vmatprep.subr.bf16.mxu0 %v9672_v30  ;;  %v7003_v8 = vld [vmem:[#allocation3 + $0x30] sm:$0xf] }
 0x2f8   : > { %v7266_v33 = vrot.slane %v7264_v14, 4  ;;  %v7269_v21 = vrot.slane %v7267_v16, 5  ;;  %v3618_v25 = vpop.permute.xlu0 %3617  ;;  %v7196_v11 = vld [vmem:[#allocation3 + $0x2c] sm:$0x1]  ;;  %v9185_v16 = vrot.slane %v5642_v57, 9  ;;  %v9676_v57 = vld [vmem:[%s13569_s4 + $0x48] sm:$0xff]  }
 0x2f9   : > { %3684 = vst.msk [vmem:[#allocation4 + $0x78] sm:$0xf] %vm3653_vm13, %v3618_v25  ;;  %6041 = vrot.lane.b32.xlu0 %v5975_v26, %s9824_s17  ;;  %v7002_v28 = vld [vmem:[#allocation3 + $0x28] sm:$0xf]  ;;  %v7283_v48 = vshll.u32 %v7196_v11, 16 }
 0x2fa   : > { %v7270_v29 = vor.u32 %v7269_v21, %v7266_v33  ;;  %v3620_v32 = vpop.permute.xlu1 %3619  ;;  %7069 = vrot.lane.b32.xlu1 %v7002_v28, %s9823_s15  ;;  %v7195_v35 = vld [vmem:[#allocation3 + $0x28] sm:$0xf]  ;;  %v6670_v14 = vld [vmem:[#allocation3 + $0x2c] sm:$0x1]  ;;  %v9201_v33 = vrot.slane %v6668_v63, 9  ;;  %v5750_v21 = vrot.slane %v5748_v62, 4  ;;  %9589 = vmatpush3.bf16.msra.mxu1 %v9673_v43 }
 0x2fb   : > { %3685 = vst.msk [vmem:[#allocation4 + $0x7c] sm:$0xf] %vm3653_vm13, %v3620_v32  ;;  %v7273_v38 = vshll.u32 %v7195_v35, 16  ;;  %v7277_v46 = vshrl.u32 %v7195_v35, 16  ;;  %v6669_v58 = vld [vmem:[#allocation3 + $0x28] sm:$0xf]  ;;  %9382 = vmatpush3.bf16.msra.mxu0 %v9673_v43 }
 0x2fc   : > { %v7271_v23 = vrot.slane %v7270_v29, 4  ;;  %v3951_v41 = vpop.permute.xlu0 %3950  ;;  %v7285_v60 = vrot.slane %v7283_v48, 5  ;;  %v6774_v10 = vrot.slane %v6669_v58, 5  ;;  %v11475_v28 = vrot.slane %v7288_v34, 4  ;;  %v11496_v49 = vld [vmem:[#allocation3 + $0x28] sm:$0xf] }
 0x2fd   : > { %4019 = vst.msk [vmem:[#allocation4 + $0x70] sm:$0xf] %vm3990_vm15, %v3951_v41  ;;  %v7275_v42 = vrot.slane %v7273_v38, 5  ;;  %v7279_v45 = vrot.slane %v7277_v46, 4  ;;  %v11477_v29 = vrot.slane %v7291_v2, 5  ;;  %v6777_v11 = vrot.slane %v6670_v14, 5 }
 0x2fe   : > { %v3953_v50 = vpop.permute.xlu1 %3952  ;;  %6043 = vrot.lane.b32.xlu1 %v5976_v44, %s9824_s17  ;;  %v6775_v31 = vsel %vm10435_vm1, %v9201_v33, %v6774_v10  ;;  %v6776_v35 = vrot.slane %v6774_v10, 4  ;;  %v5084_v41 = vld [vmem:[#allocation3 + $0x24] sm:$0xf]  ;;  %v7301_v48 = vshrl.u32 %v7198_v17, 16  ;;  %v5205_v2 = vshll.u32 %v11496_v49, 16  ;;  %v9677_v10 = vld [vmem:[%s13569_s4 + $0x8] sm:$0xff]  }
 0x2ff   : > { %4020 = vst.msk [vmem:[#allocation4 + $0x74] sm:$0xf] %vm3990_vm15, %v3953_v50  ;;  %v7276_v52 = vsel %vm10148_vm9, %v7271_v23, %v7275_v42  ;;  %v7280_v54 = vor.u32 %v7279_v45, %v7275_v42  ;;  %v7297_v23 = vshll.u32 %v7198_v17, 16  ;;  %v5749_v42 = vsel %vm10435_vm1, %v9185_v16, %v5748_v62  ;;  %v9678_v17 = vld [vmem:[%s13569_s4 + $0x40] sm:$0xff]   ;;  %v5977_v43 = vld [vmem:[#allocation3 + $0x24] sm:$0xf] }
 0x300   : > { %v3955_v27 = vpop.permute.xlu0 %3954  ;;  %7627 = vrot.lane.b32.xlu0 %v7276_v52, %s9824_s17  ;;  %v5752_v45 = vsel %vm10435_vm1, %v5750_v21, %v5751_v9  ;;  %v6778_v55 = vsel %vm10435_vm1, %v6776_v35, %v6777_v11  ;;  %v7294_v56 = vor.u32 %v11477_v29, %v11475_v28  ;;  %v5199_v58 = vshll.u32 %v5084_v41, 16  ;;  %v5017_v9 = vld [vmem:[#allocation3 + $0x24] sm:$0xf]  ;;  %v7004_v28 = vld [vmem:[#allocation3 + $0x34] sm:$0xf] }
 0x301   : > { %4021 = vst.msk [vmem:[#allocation4 + $0x78] sm:$0xf] %vm3990_vm15, %v3955_v27  ;;  %v7281_v59 = vrot.slane %v7280_v54, 4  ;;  %v9674_v54 = vld [vmem:[%s13569_s4 + $0x50] sm:$0xff]   ;;  %v5196_v27 = vshrl.u32 %v5084_v41, 16  ;;  %v11517_v63 = vrot.slane %v7297_v23, 5 }
 0x302   : > { %v3957_v1 = vpop.permute.xlu1 %3956  ;;  %v11519_v34 = vrot.slane %v7301_v48, 4  ;;  %9582 = vmatprep.subr.bf16.mxu1 %v9674_v54  ;;  %9383 = vmatprep.subr.bf16.mxu0 %v9674_v54  ;;  %v11529_v14 = vrot.slane %v5199_v58, 5  ;;  %v5209_v16 = vshrl.u32 %v11496_v49, 16  ;;  %v7295_v21 = vrot.slane %v7294_v56, 4  ;;  %v7199_v29 = vld [vmem:[#allocation3 + $0x38] sm:$0x1] }
 0x303   : > { %4022 = vst.msk [vmem:[#allocation4 + $0x7c] sm:$0xf] %vm3990_vm15, %v3957_v1  ;;  %v7286_v6 = vsel %vm10148_vm9, %v7281_v59, %v7285_v60  ;;  %v9519_v7 = vpop.f32.mrf.mxu0  ;;  %v4931_v54 = vld [vmem:[#allocation3 + $0x44] sm:$0x1] }
 0x304   : > { %5515 = vrot.lane.b32.xlu0 %v5184_v5, %s9822_s23  ;;  %7629 = vrot.lane.b32.xlu1 %v7286_v6, %s9824_s17  ;;  %v4385_v13 = vmul.f32 %v9519_v7, %v11294_v36  ;;  %v7304_v30 = vor.u32 %v11519_v34, %v11517_v63  ;;  %5049 = vst.msk [vmem:[#allocation5 + $0x48] sm:$0xf] %vm4894_vm14, %v5017_v9 }
 0x305   : > { %v4274_v18 = vpop.f32.mrf.mxu0 }
 0x306   : > { %v9662_v24 = vld [vmem:[#allocation4 + $0x70] sm:$0xff]   ;;  %v4423_v25 = vadd.f32 %v11300_v39, %v4385_v13  ;;  %v4383_v26 = vmul.f32 %v11294_v36, %v4274_v18  ;;  %v11527_v13 = vrot.slane %v5196_v27, 4  ;;  %v7300_v27 = vsel %vm10148_vm9, %v7295_v21, %v11517_v63  ;;  %v5645_v21 = vld [vmem:[#allocation3 + $0x24] sm:$0xe] }
 0x307   : > { %v9520_v32 = vpop.f32.mrf.mxu0  ;;  %9537 = vmatprep.mubr.msk.bf16.mxu0 %vm4155_vm0, %v9662_v24  ;;  %v7305_v58 = vrot.slane %v7304_v30, 4 }
 0x308   : > { %v4455_v38 = vmax.f32 %v4423_v25, 0.0  ;;  %v4421_v46 = vadd.f32 %v11300_v39, %v4383_v26  ;;  %5517 = vrot.lane.b32.xlu1 %v5194_v19, %s9822_s23  ;;  %6878 = vrot.lane.b32.xlu0 %v6775_v31, %s9822_s23  ;;  %v4386_v40 = vmul.f32 %v9520_v32, %v11294_v36  ;;  %v4938_v25 = vld [vmem:[#allocation3 + $0x50] sm:$0x1]  ;;  %v11542_v31 = vrot.slane %v5205_v2, 5 }
 0x309   : > { %v4277_v44 = vpop.f32.mrf.mxu0 }
 0x30a   : > { %v9663_v50 = vld [vmem:[#allocation4 + $0x78] sm:$0xff]   ;;  %v9331_v47 = vpack.c.bf16 %v4455_v38, %v4455_v38  ;;  %v4453_v51 = vmax.f32 %v4421_v46, 0.0  ;;  %v4424_v52 = vadd.f32 %v11300_v39, %v4386_v40  ;;  %v4384_v53 = vmul.f32 %v11294_v36, %v4277_v44  ;;  %v9675_v36 = vld [vmem:[%s13569_s4 + $0x10] sm:$0xff]   ;;  %v9679_v38 = vld [vmem:[%s13569_s4] sm:$0xff]  }
 0x30b   : > { %9538 = vmatmul.mubr.msk.bf16.gmra.mxu0 %vm4155_vm0, %v9663_v50  ;;  %9590 = vmatpush3.bf16.msra.mxu1 %v9675_v36  ;;  %v5018_v46 = vld [vmem:[#allocation3 + $0x28] sm:$0xf]  ;;  %v5202_v44 = vor.u32 %v11529_v14, %v11527_v13  ;;  %v7307_v50 = vshll.u32 %v7199_v29, 16  ;;  %v5088_v13 = vld [vmem:[#allocation3 + $0x34] sm:$0xf] }
 0x30c   : > { %v4659_v59 = vshrl.u32 %v9331_v47, 16  ;;  %v4662_v60 = vshll.u32 %v9331_v47, 16  ;;  %v9329_v61 = vpack.c.bf16 %v4453_v51, %v4453_v51  ;;  %v4456_v62 = vmax.f32 %v4424_v52, 0.0  ;;  %6880 = vrot.lane.b32.xlu1 %v6778_v55, %s9822_s23  ;;  %5852 = vrot.lane.b32.xlu0 %v5749_v42, %s9823_s15  ;;  %5050 = vst.msk [vmem:[#allocation5 + $0x54] sm:$0xf] %vm4894_vm14, %v5018_v46 }
 0x30d   : > { %v4422_v1 = vadd.f32 %v11300_v39, %v4384_v53  ;;  %9384 = vmatpush3.bf16.msra.mxu0 %v9675_v36  ;;  %v4927_v39 = vld [vmem:[#allocation3 + $0x3c] sm:$0xf]  ;;  %9583 = vmatprep.subr.bf16.mxu1 %v9676_v57  ;;  %v5211_v42 = vrot.slane %v5209_v16, 4  ;;  %v5019_v47 = vld [vmem:[#allocation3 + $0x30] sm:$0xf] }
 0x30e   : > { %v11522_v3 = vrot.slane %v4659_v59, 7  ;;  %v4642_v5 = vshrl.u32 %v9329_v61, 16  ;;  %v4645_v6 = vshll.u32 %v9329_v61, 16  ;;  %v9332_v7 = vpack.c.bf16 %v4456_v62, %v4456_v62  ;;  %9385 = vmatprep.subr.bf16.mxu0 %v9676_v57  ;;  %v5020_v51 = vld [vmem:[#allocation3 + $0x34] sm:$0xf] }
 0x30f   : > { %v4454_v12 = vmax.f32 %v4422_v1, 0.0  ;;  %9591 = vmatpush3.bf16.msra.mxu1 %v9677_v10  ;;  %5051 = vst.msk [vmem:[#allocation5 + $0x60] sm:$0xf] %vm4894_vm14, %v5019_v47  ;;  %5052 = vst.msk [vmem:[#allocation5 + $0x6c] sm:$0xf] %vm4894_vm14, %v5020_v51  ;;  %v5203_v62 = vrot.slane %v5202_v44, 4 }
 0x310   : > { %v4664_v18 = vor.u32 %v4662_v60, %v11522_v3  ;;  %v11536_v19 = vrot.slane %v4642_v5, 7  ;;  %v4667_v33 = vshrl.u32 %v9332_v7, 16  ;;  %5854 = vrot.lane.b32.xlu1 %v5752_v45, %s9823_s15  ;;  %7071 = vrot.lane.b32.xlu0 %v7003_v8, %s9823_s15  ;;  %v4670_v24 = vshll.u32 %v9332_v7, 16  ;;  %v5086_v36 = vld [vmem:[#allocation3 + $0x2c] sm:$0x1] }
 0x311   : > { %v9330_v26 = vpack.c.bf16 %v4454_v12, %v4454_v12  ;;  %v4665_v32 = vrot.slane %v11522_v3, 4  ;;  %9386 = vmatpush3.bf16.msra.mxu0 %v9677_v10  ;;  %9584 = vmatprep.subr.bf16.mxu1 %v9678_v17  ;;  %v6672_v57 = vld [vmem:[#allocation3 + $0x34] sm:$0xf]  ;;  %v5978_v61 = vld [vmem:[#allocation3 + $0x28] sm:$0xf]  ;;  %v7309_v1 = vrot.slane %v7307_v50, 5  ;;  %v5208_v10 = vsel %vm10148_vm9, %v5203_v62, %v11542_v31 }
 0x312   : > { %v4935_v35 = vsel %vm11320_vm2, %v4664_v18, %v4934_v0  ;;  %v4647_v11 = vor.u32 %v4645_v6, %v11536_v19  ;;  %v4669_v23 = vrot.slane %v4667_v33, 7  ;;  %9387 = vmatprep.subr.bf16.mxu0 %v9678_v17  ;;  %v4648_v52 = vrot.slane %v11536_v19, 4  ;;  %v6671_v3 = vld [vmem:[#allocation3 + $0x30] sm:$0xe]  ;;  %v6673_v7 = vld [vmem:[#allocation3 + $0x38] sm:$0x1] }
 0x313   : > { %4936 = vst [vmem:[#allocation3 + $0x48] sm:$0xf] %v4935_v35  ;;  %v4650_v40 = vshrl.u32 %v9330_v26, 16  ;;  %v4653_v41 = vshll.u32 %v9330_v26, 16  ;;  %9592 = vmatpush3.bf16.msra.mxu1 %v9679_v38  ;;  %v5212_v0 = vor.u32 %v5211_v42, %v11542_v31  ;;  %v5215_v2 = vshll.u32 %v5086_v36, 16 }
 0x314   : > { %v4928_v45 = vsel %vm11320_vm2, %v4647_v11, %v4927_v39  ;;  %v4672_v48 = vor.u32 %v4670_v24, %v4669_v23  ;;  %v4674_v49 = vrot.slane %v4669_v23, 4  ;;  %7073 = vrot.lane.b32.xlu1 %v7004_v28, %s9823_s15  ;;  %6045 = vrot.lane.b32.xlu0 %v5977_v43, %s9824_s17  ;;  %v6781_v5 = vrot.slane %v6672_v57, 5  ;;  %v5087_v6 = vld [vmem:[#allocation3 + $0x30] sm:$0xf]  ;;  %v5646_v12 = vld [vmem:[#allocation3 + $0x28] sm:$0xf] }
 0x315   : > { %4929 = vst [vmem:[#allocation3 + $0x3c] sm:$0xf] %v4928_v45  ;;  %v4652_v53 = vrot.slane %v4650_v40, 7  ;;  %9388 = vmatpush3.bf16.msra.mxu0 %v9679_v38  ;;  %v7310_v8 = vsel %vm10148_vm9, %v7305_v58, %v7309_v1  ;;  %v5213_v39 = vrot.slane %v5212_v0, 4  ;;  %v9202_v14 = vrot.slane %v6671_v3, 9 }
 0x316   : > { %v4673_v55 = vsel %vm10153_vm11, %v4665_v32, %v4672_v48  ;;  %v4939_v56 = vsel %vm11330_vm10, %v4674_v49, %v4938_v25  ;;  %v5220_v17 = vshrl.u32 %v5087_v6, 16  ;;  %v5223_v18 = vshll.u32 %v5087_v6, 16  ;;  %v5647_v38 = vld [vmem:[#allocation3 + $0x2c] sm:$0x1]  ;;  %v5649_v58 = vld [vmem:[#allocation3 + $0x34] sm:$0xf] }
 0x317   : > { %4937 = vst.msk [vmem:[#allocation3 + $0x4c] sm:$0xf] %vm4894_vm14, %v4673_v55  ;;  %4940 = vst [vmem:[#allocation3 + $0x50] sm:$0x1] %v4939_v56  ;;  %v4655_v59 = vor.u32 %v4653_v41, %v4652_v53  ;;  %v4657_v60 = vrot.slane %v4652_v53, 4  ;;  %v5217_v19 = vrot.slane %v5215_v2, 5  ;;  %v6782_v9 = vsel %vm10435_vm1, %v9202_v14, %v6781_v5 }
 0x318   : > { %7631 = vrot.lane.b32.xlu0 %v7300_v27, %s9824_s17  ;;  %6047 = vrot.lane.b32.xlu1 %v5978_v61, %s9824_s17  ;;  %v6783_v33 = vrot.slane %v6781_v5, 4  ;;  %v5755_v24 = vrot.slane %v5646_v12, 5  ;;  %v5229_v25 = vshll.u32 %v5088_v13, 16  ;;  %v5233_v26 = vshrl.u32 %v5088_v13, 16  ;;  %v5979_v57 = vld [vmem:[#allocation3 + $0x30] sm:$0xf] }
 0x319   : > { %v4656_v63 = vsel %vm10153_vm11, %v4648_v52, %v4655_v59  ;;  %v4932_v34 = vsel %vm11330_vm10, %v4657_v60, %v4931_v54  ;;  %v5218_v28 = vsel %vm10148_vm9, %v5213_v39, %v5217_v19  ;;  %v6784_v29 = vrot.slane %v6673_v7, 5  ;;  %v5089_v52 = vld [vmem:[#allocation3 + $0x38] sm:$0x1]  ;;  %v5648_v60 = vld [vmem:[#allocation3 + $0x30] sm:$0xe] }
 0x31a   : > { %4930 = vst.msk [vmem:[#allocation3 + $0x40] sm:$0xf] %vm4894_vm14, %v4656_v63  ;;  %4933 = vst [vmem:[#allocation3 + $0x44] sm:$0x1] %v4932_v34  ;;  %v9186_v32 = vrot.slane %v5645_v21, 9  ;;  %v5222_v35 = vrot.slane %v5220_v17, 4 }
 0x31b   : > { %v5225_v11 = vrot.slane %v5223_v18, 5  ;;  %v6785_v23 = vsel %vm10435_vm1, %v6783_v33, %v6784_v29  ;;  %v5757_v40 = vrot.slane %v5755_v24, 4  ;;  %v11595_v43 = vrot.slane %v5229_v25, 5  ;;  %v7203_v0 = vld [vmem:[#allocation3 + $0x48] sm:$0xf] }
 0x31c   : > { %7633 = vrot.lane.b32.xlu1 %v7310_v8, %s9824_s17  ;;  %5519 = vrot.lane.b32.xlu0 %v5208_v10, %s9822_s23  ;;  %v7200_v16 = vld [vmem:[#allocation3 + $0x3c] sm:$0xf]  ;;  %v5756_v46 = vsel %vm10435_vm1, %v9186_v32, %v5755_v24  ;;  %v5235_v44 = vrot.slane %v5233_v26, 4  ;;  %v5758_v50 = vrot.slane %v5647_v38, 5  ;;  %v5239_v59 = vshll.u32 %v5089_v52, 16 }
 0x31d   : > { %v7312_v30 = vshrl.u32 %v7200_v16, 16  ;;  %v7315_v31 = vshll.u32 %v7200_v16, 16  ;;  %v5226_v47 = vor.u32 %v5225_v11, %v5222_v35  ;;  %v7005_v53 = vld [vmem:[#allocation3 + $0x3c] sm:$0xf]  ;;  %v5762_v62 = vrot.slane %v5649_v58, 5 }
 0x31e   : > { %v5759_v51 = vsel %vm10435_vm1, %v5757_v40, %v5758_v50  ;;  %v5236_v27 = vor.u32 %v5235_v44, %v11595_v43  ;;  %v5650_v5 = vld [vmem:[#allocation3 + $0x38] sm:$0x1]  ;;  %v11611_v6 = vld [vmem:[%s13567_s2] ss:$0 sm:$0xff]  ;;  %v9187_v10 = vrot.slane %v5648_v60, 9  ;;  %v5241_v13 = vrot.slane %v5239_v59, 5 }
 0x31f   : > { %v7314_v42 = vrot.slane %v7312_v30, 4  ;;  %v7317_v45 = vrot.slane %v7315_v31, 5  ;;  %v5227_v36 = vrot.slane %v5226_v47, 4  ;;  %v7336_v14 = vshrl.u32 %v7203_v0, 16  ;;  %v11617_v17 = vld [vmem:[#allocation3 + $0x24] sm:$0xf] }
 0x320   : > { %5521 = vrot.lane.b32.xlu1 %v5218_v28, %s9822_s23  ;;  %6882 = vrot.lane.b32.xlu0 %v6782_v9, %s9822_s23  ;;  %v11604_v3 = vrot.slane %v5236_v27, 4  ;;  %v7339_v16 = vshll.u32 %v7203_v0, 16  ;;  %v11622_v18 = vld [vmem:[%s13568_s3] ss:$0 sm:$0xff]  ;;  %v11628_v21 = vsel %vm10435_vm1, %v9187_v10, %v5762_v62  ;;  %v5765_v9 = vrot.slane %v5650_v5, 5 }
 0x321   : > { %v7201_v41 = vld [vmem:[#allocation3 + $0x40] sm:$0xf]  ;;  %v7318_v54 = vor.u32 %v7317_v45, %v7314_v42  ;;  %v7202_v61 = vld [vmem:[#allocation3 + $0x44] sm:$0x1]  ;;  %v5232_v8 = vsel %vm10148_vm9, %v5227_v36, %v11595_v43  ;;  %v5980_v25 = vld [vmem:[#allocation3 + $0x34] sm:$0xf] }
 0x322   : > { %v7321_v48 = vshll.u32 %v7201_v41, 16  ;;  %v7325_v49 = vshrl.u32 %v7201_v41, 16  ;;  %v7006_v1 = vld [vmem:[#allocation3 + $0x40] sm:$0xf]  ;;  %v7331_v39 = vshll.u32 %v7202_v61, 16  ;;  %v5242_v29 = vsel %vm10148_vm9, %v11604_v3, %v5241_v13 }
 0x323   : > { %v7319_v63 = vrot.slane %v7318_v54, 4  ;;  %v5764_v30 = vrot.slane %v5762_v62, 4  ;;  %v6674_v11 = vld [vmem:[#allocation3 + $0x3c] sm:$0xe]  ;;  %v6263_v38 = vshrl.u32 %v11617_v17, 16  ;;  %v11640_v41 = vrot.slane %v7336_v14, 4 }
 0x324   : > { %6884 = vrot.lane.b32.xlu1 %v6785_v23, %s9822_s23  ;;  %5856 = vrot.lane.b32.xlu0 %v5756_v46, %s9823_s15  ;;  %v7323_v55 = vrot.slane %v7321_v48, 5  ;;  %v7327_v56 = vrot.slane %v7325_v49, 4  ;;  %v6675_v23 = vld [vmem:[#allocation3 + $0x40] sm:$0xf]  ;;  %v7333_v46 = vrot.slane %v7331_v39, 5  ;;  %v11642_v43 = vrot.slane %v7339_v16, 5 }
 0x325   : > { %v6266_v44 = vshll.u32 %v11617_v17, 16  ;;  %v11647_v50 = vld [vmem:[#allocation3 + $0x28] sm:$0xf]  ;;  %v6788_v52 = vrot.slane %v6675_v23, 5  ;;  %v6676_v58 = vld [vmem:[#allocation3 + $0x44] sm:$0x1] }
 0x326   : > { %v7328_v2 = vor.u32 %v7327_v56, %v7323_v55  ;;  %v7324_v24 = vsel %vm10148_vm9, %v7319_v63, %v7323_v55  ;;  %v7342_v59 = vor.u32 %v11642_v43, %v11640_v41  ;;  %v11660_v60 = vrot.slane %v6263_v38, 4  ;;  %v4941_v14 = vld [vmem:[#allocation3 + $0x54] sm:$0xf]  ;;  %v11706_v41 = vld [vmem:[#allocation3 + $0x20] sm:$0x1] }
 0x327   : > { %v6272_v61 = vshll.u32 %v11647_v50, 16  ;;  %v5092_v43 = vld [vmem:[#allocation3 + $0x44] sm:$0x1] }
 0x328   : > { %5858 = vrot.lane.b32.xlu1 %v5759_v51, %s9823_s15  ;;  %7075 = vrot.lane.b32.xlu0 %v7005_v53, %s9823_s15  ;;  %v7329_v26 = vrot.slane %v7328_v2, 4  ;;  %v9203_v51 = vrot.slane %v6674_v11, 9  ;;  %v11653_v53 = vsel %vm10435_vm1, %v5764_v30, %v5765_v9  ;;  %v4948_v2 = vld [vmem:[#allocation3 + $0x60] sm:$0xf]  ;;  %v4952_v30 = vld [vmem:[#allocation3 + $0x68] sm:$0x1] }
 0x32a   : > { %v7334_v47 = vsel %vm10148_vm9, %v7329_v26, %v7333_v46  ;;  %v6789_v3 = vsel %vm10435_vm1, %v9203_v51, %v6788_v52 }
 0x32b   : > { %v9523_v34 = vpop.f32.mrf.mxu0 }
 0x32c   : > { %6049 = vrot.lane.b32.xlu0 %v5979_v57, %s9824_s17  ;;  %7077 = vrot.lane.b32.xlu1 %v7006_v1, %s9823_s15  ;;  %v4389_v7 = vmul.f32 %v11611_v6, %v9523_v34  ;;  %v7204_v57 = vld [vmem:[#allocation3 + $0x4c] sm:$0xf]  ;;  %v5090_v34 = vld [vmem:[#allocation3 + $0x3c] sm:$0xf] }
 0x32d   : > { %v4290_v12 = vpop.f32.mrf.mxu0  ;;  %v7345_v13 = vshll.u32 %v7204_v57, 16  ;;  %v5244_v9 = vshrl.u32 %v5090_v34, 16  ;;  %v5247_v11 = vshll.u32 %v5090_v34, 16 }
 0x32e   : > { %v4427_v19 = vadd.f32 %v11622_v18, %v4389_v7  ;;  %v4387_v33 = vmul.f32 %v11611_v6, %v4290_v12  ;;  %v6790_v7 = vrot.slane %v6788_v52, 4 }
 0x32f   : > { %v9524_v28 = vpop.f32.mrf.mxu0 }
 0x330   : > { %7635 = vrot.lane.b32.xlu0 %v7324_v24, %s9824_s17  ;;  %6051 = vrot.lane.b32.xlu1 %v5980_v25, %s9824_s17  ;;  %v4459_v31 = vmax.f32 %v4427_v19, 0.0  ;;  %v4425_v32 = vadd.f32 %v11622_v18, %v4387_v33  ;;  %v4390_v35 = vmul.f32 %v11611_v6, %v9524_v28  ;;  %v7349_v33 = vshrl.u32 %v7204_v57, 16 }
 0x331   : > { %v4293_v40 = vpop.f32.mrf.mxu0 }
 0x332   : > { %v9335_v42 = vpack.c.bf16 %v4459_v31, %v4459_v31  ;;  %v4457_v45 = vmax.f32 %v4425_v32, 0.0  ;;  %v4428_v48 = vadd.f32 %v11622_v18, %v4390_v35  ;;  %v4388_v49 = vmul.f32 %v11611_v6, %v4293_v40  ;;  %v5091_v35 = vld [vmem:[#allocation3 + $0x40] sm:$0xf] }
 0x333   : > { %v7347_v40 = vrot.slane %v7345_v13, 5  ;;  %v5257_v57 = vshrl.u32 %v5091_v35, 16  ;;  %v5094_v13 = vld [vmem:[#allocation3 + $0x4c] sm:$0xf] }
 0x334   : > { %v4693_v54 = vshrl.u32 %v9335_v42, 16  ;;  %v4696_v55 = vshll.u32 %v9335_v42, 16  ;;  %5523 = vrot.lane.b32.xlu0 %v5232_v8, %s9822_s23  ;;  %7637 = vrot.lane.b32.xlu1 %v7334_v47, %s9824_s17  ;;  %v9333_v56 = vpack.c.bf16 %v4457_v45, %v4457_v45  ;;  %v4460_v27 = vmax.f32 %v4428_v48, 0.0  ;;  %v4945_v48 = vld [vmem:[#allocation3 + $0x5c] sm:$0x1] }
 0x335   : > { %v4426_v36 = vadd.f32 %v11622_v18, %v4388_v49  ;;  %v6791_v8 = vrot.slane %v6676_v58, 5  ;;  %v7351_v49 = vrot.slane %v7349_v33, 4  ;;  %v5246_v47 = vrot.slane %v5244_v9, 4 }
 0x336   : > { %v4695_v62 = vrot.slane %v4693_v54, 7  ;;  %v4676_v0 = vshrl.u32 %v9333_v56, 16  ;;  %v4679_v1 = vshll.u32 %v9333_v56, 16  ;;  %v9336_v63 = vpack.c.bf16 %v4460_v27, %v4460_v27  ;;  %v7007_v54 = vld [vmem:[#allocation3 + $0x48] sm:$0xf] }
 0x337   : > { %v4458_v5 = vmax.f32 %v4426_v36, 0.0  ;;  %v5253_v56 = vshll.u32 %v5091_v35, 16  ;;  %v6268_v27 = vrot.slane %v6266_v44, 5  ;;  %v5249_v36 = vrot.slane %v5247_v11, 5 }
 0x338   : > { %v4698_v10 = vor.u32 %v4696_v55, %v4695_v62  ;;  %v4678_v39 = vrot.slane %v4676_v0, 7  ;;  %v4701_v12 = vshrl.u32 %v9336_v63, 16  ;;  %5525 = vrot.lane.b32.xlu1 %v5242_v29, %s9822_s23  ;;  %6886 = vrot.lane.b32.xlu0 %v6789_v3, %s9822_s23  ;;  %v4704_v16 = vshll.u32 %v9336_v63, 16  ;;  %v7205_v55 = vld [vmem:[#allocation3 + $0x50] sm:$0x1] }
 0x339   : > { %v9334_v19 = vpack.c.bf16 %v4458_v5, %v4458_v5  ;;  %v4699_v24 = vrot.slane %v4695_v62, 4  ;;  %v6792_v29 = vsel %vm10435_vm1, %v6790_v7, %v6791_v8  ;;  %v5021_v62 = vld [vmem:[#allocation3 + $0x3c] sm:$0xf]  ;;  %v6269_v0 = vor.u32 %v6268_v27, %v11660_v60  ;;  %v11728_v27 = vld [vmem:[#allocation3 + $0x10] sm:$0xf] }
 0x33a   : > { %v4949_v25 = vsel %vm11320_vm2, %v4698_v10, %v4948_v2  ;;  %v4681_v26 = vor.u32 %v4679_v1, %v4678_v39  ;;  %v4703_v28 = vrot.slane %v4701_v12, 7  ;;  %v4682_v42 = vrot.slane %v4678_v39, 4  ;;  %5053 = vst.msk [vmem:[#allocation5 + $0x78] sm:$0xf] %vm4894_vm14, %v5021_v62  ;;  %v7008_v1 = vld [vmem:[#allocation3 + $0x4c] sm:$0xf] }
 0x33b   : > { %4950 = vst [vmem:[#allocation3 + $0x60] sm:$0xf] %v4949_v25  ;;  %v4684_v31 = vshrl.u32 %v9334_v19, 16  ;;  %v4687_v32 = vshll.u32 %v9334_v19, 16  ;;  %v7352_v63 = vor.u32 %v7351_v49, %v7347_v40  ;;  %v7355_v34 = vshll.u32 %v7205_v55, 16 }
 0x33c   : > { %v4942_v23 = vsel %vm11320_vm2, %v4681_v26, %v4941_v14  ;;  %v4706_v38 = vor.u32 %v4704_v16, %v4703_v28  ;;  %v4708_v46 = vrot.slane %v4703_v28, 4  ;;  %6888 = vrot.lane.b32.xlu1 %v6792_v29, %s9822_s23  ;;  %5860 = vrot.lane.b32.xlu0 %v11628_v21, %s9823_s15  ;;  %v11698_v60 = vrot.slane %v6272_v61, 5  ;;  %v5981_v2 = vld [vmem:[#allocation3 + $0x3c] sm:$0xf]  ;;  %v11700_v10 = vld [vmem:[#allocation3 + $0x18] sm:$0xe] }
 0x33d   : > { %4943 = vst [vmem:[#allocation3 + $0x54] sm:$0xf] %v4942_v23  ;;  %v4686_v45 = vrot.slane %v4684_v31, 7  ;;  %v5250_v3 = vor.u32 %v5249_v36, %v5246_v47  ;;  %v5255_v5 = vrot.slane %v5253_v56, 5  ;;  %v5259_v7 = vrot.slane %v5257_v57, 4 }
 0x33e   : > { %v4707_v51 = vsel %vm10153_vm11, %v4699_v24, %v4706_v38  ;;  %v4953_v52 = vsel %vm11330_vm10, %v4708_v46, %v4952_v30  ;;  %v6270_v8 = vrot.slane %v6269_v0, 4  ;;  %v11704_v39 = vld [vmem:[#allocation3 + $0x1c] sm:$0xf]  ;;  %v5093_v12 = vld [vmem:[#allocation3 + $0x48] sm:$0xf]  ;;  %v7353_v19 = vrot.slane %v7352_v63, 4 }
 0x33f   : > { %4951 = vst.msk [vmem:[#allocation3 + $0x64] sm:$0xf] %vm4894_vm14, %v4707_v51  ;;  %4954 = vst [vmem:[#allocation3 + $0x68] sm:$0x1] %v4953_v52  ;;  %v4689_v21 = vor.u32 %v4687_v32, %v4686_v45  ;;  %v4691_v58 = vrot.slane %v4686_v45, 4  ;;  %v7357_v33 = vrot.slane %v7355_v34, 5  ;;  %v5260_v24 = vor.u32 %v5259_v7, %v5255_v5 }
 0x340   : > { %5862 = vrot.lane.b32.xlu1 %v11653_v53, %s9823_s15  ;;  %7079 = vrot.lane.b32.xlu0 %v7007_v54, %s9823_s15  ;;  %v7343_v53 = vrot.slane %v7342_v59, 4  ;;  %v6678_v59 = vld [vmem:[#allocation3 + $0x4c] sm:$0xf]  ;;  %v6275_v14 = vsel %vm10148_vm9, %v6270_v8, %v11698_v60  ;;  %v5982_v16 = vld [vmem:[#allocation3 + $0x40] sm:$0xf]  ;;  %v5251_v9 = vrot.slane %v5250_v3, 4 }
 0x341   : > { %v4690_v17 = vsel %vm10153_vm11, %v4682_v42, %v4689_v21  ;;  %v4946_v44 = vsel %vm11330_vm10, %v4691_v58, %v4945_v48  ;;  %6634 = vst.msk [vmem:[#allocation5 + $0x34] sm:$0xf] %vm4894_vm14, %v6275_v14  ;;  %v9215_v25 = vrot.slane %v11700_v10, 9  ;;  %v5263_v26 = vshll.u32 %v5092_v43, 16  ;;  %v6677_v28 = vld [vmem:[#allocation3 + $0x48] sm:$0xe] }
 0x342   : > { %4944 = vst.msk [vmem:[#allocation3 + $0x58] sm:$0xf] %vm4894_vm14, %v4690_v17  ;;  %4947 = vst [vmem:[#allocation3 + $0x5c] sm:$0x1] %v4946_v44  ;;  %v7348_v61 = vsel %vm10148_vm9, %v7343_v53, %v7347_v40  ;;  %v6795_v30 = vrot.slane %v6678_v59, 5  ;;  %v5268_v29 = vshrl.u32 %v5093_v12, 16  ;;  %v7358_v45 = vsel %vm10148_vm9, %v7353_v19, %v7357_v33 }
 0x343   : > { %v5652_v32 = vld [vmem:[#allocation3 + $0x40] sm:$0xf]  ;;  %v5271_v35 = vshll.u32 %v5093_v12, 16  ;;  %v5277_v11 = vshll.u32 %v5094_v13, 16  ;;  %v5281_v23 = vshrl.u32 %v5094_v13, 16  ;;  %v13574_v38 = vrot.slane %v11704_v39, 5 }
 0x344   : > { %7081 = vrot.lane.b32.xlu1 %v7008_v1, %s9823_s15  ;;  %6053 = vrot.lane.b32.xlu0 %v5981_v2, %s9824_s17  ;;  %v6679_v40 = vld [vmem:[#allocation3 + $0x50] sm:$0x1]  ;;  %v11720_v42 = vld [vmem:[#allocation3 + $0xc] sm:$0xe]  ;;  %v5256_v48 = vsel %vm10148_vm9, %v5251_v9, %v5255_v5  ;;  %v5261_v49 = vrot.slane %v5260_v24, 4  ;;  %v9204_v47 = vrot.slane %v6677_v28, 9 }
 0x345   : > { %v5651_v51 = vld [vmem:[#allocation3 + $0x3c] sm:$0xe]  ;;  %v7206_v52 = vld [vmem:[#allocation3 + $0x54] sm:$0xf]  ;;  %v5265_v54 = vrot.slane %v5263_v26, 5  ;;  %v6797_v55 = vrot.slane %v6795_v30, 4 }
 0x346   : > { %v5769_v56 = vrot.slane %v5652_v32, 5  ;;  %v5653_v36 = vld [vmem:[#allocation3 + $0x44] sm:$0x1]  ;;  %v5270_v57 = vrot.slane %v5268_v29, 4  ;;  %v5273_v62 = vrot.slane %v5271_v35, 5  ;;  %v11730_v0 = vrot.slane %v5277_v11, 5 }
 0x347   : > { %v5283_v17 = vrot.slane %v5281_v23, 4  ;;  %v6798_v44 = vrot.slane %v6679_v40, 5  ;;  %v9188_v1 = vrot.slane %v5651_v51, 9  ;;  %v7360_v53 = vshrl.u32 %v7206_v52, 16  ;;  %v11734_v34 = vld [vmem:[#allocation3 + $0x18] sm:$0xf] }
 0x348   : > { %7639 = vrot.lane.b32.xlu0 %v7348_v61, %s9824_s17  ;;  %6055 = vrot.lane.b32.xlu1 %v5982_v16, %s9824_s17  ;;  %v7363_v63 = vshll.u32 %v7206_v52, 16  ;;  %v5266_v2 = vsel %vm10148_vm9, %v5261_v49, %v5265_v54  ;;  %v6796_v3 = vsel %vm10435_vm1, %v9204_v47, %v6795_v30  ;;  %v6276_v5 = vshrl.u32 %v11647_v50, 16  ;;  %v6174_v61 = vld [vmem:[#allocation3 + $0x2c] sm:$0x1]  ;;  %v11746_v33 = vld [vmem:[#allocation3 + $0x1c] sm:$0xf] }
 0x349   : > { %v5512_v31 = vpop.permute.xlu0 %5511  ;;  %v9199_v7 = vrot.slane %v11720_v42, 9  ;;  %v5771_v8 = vrot.slane %v5769_v56, 4  ;;  %v5772_v43 = vrot.slane %v5653_v36, 5  ;;  %v7207_v59 = vld [vmem:[#allocation3 + $0x58] sm:$0xf]  ;;  %v5274_v14 = vor.u32 %v5273_v62, %v5270_v57 }
 0x34a   : > { %5606 = vst.msk [vmem:[#allocation5 + $0x18] sm:$0xf] %vm5603_vm7, %v5512_v31  ;;  %v5284_v16 = vor.u32 %v5283_v17, %v11730_v0  ;;  %v6760_v19 = vrot.slane %v11728_v27, 5  ;;  %v7240_v50 = vshrl.u32 %v11734_v34, 16  ;;  %v6799_v9 = vsel %vm10435_vm1, %v6797_v55, %v6798_v44  ;;  %v5095_v30 = vld [vmem:[#allocation3 + $0x50] sm:$0x1] }
 0x34b   : > { %v5770_v24 = vsel %vm10435_vm1, %v9188_v1, %v5769_v56  ;;  %v7362_v26 = vrot.slane %v7360_v53, 4  ;;  %v7365_v28 = vrot.slane %v7363_v63, 5  ;;  %v7369_v31 = vshll.u32 %v7207_v59, 16  ;;  %v11755_v35 = vld [vmem:[#allocation3 + $0x48] sm:$0xe] }
 0x34c   : > { %7641 = vrot.lane.b32.xlu1 %v7358_v45, %s9824_s17  ;;  %5527 = vrot.lane.b32.xlu0 %v5256_v48, %s9822_s23  ;;  %v7373_v32 = vshrl.u32 %v7207_v59, 16  ;;  %v6282_v11 = vshll.u32 %v6174_v61, 16  ;;  %v6278_v23 = vrot.slane %v6276_v5, 4  ;;  %v5773_v40 = vsel %vm10435_vm1, %v5771_v8, %v5772_v43  ;;  %v11768_v56 = vld [vmem:[#allocation3 + $0x4c] sm:$0xf] }
 0x34d   : > { %v5514_v21 = vpop.permute.xlu1 %5513  ;;  %v6875_v58 = vpop.permute.xlu0 %6874  ;;  %v7243_v48 = vshll.u32 %v11734_v34, 16  ;;  %v7249_v49 = vshll.u32 %v11746_v33, 16  ;;  %v11764_v51 = vrot.slane %v5274_v14, 4  ;;  %v11766_v54 = vrot.slane %v5284_v16, 4  ;;  %v11775_v17 = vld [vmem:[#allocation3 + $0x50] sm:$0x1] }
 0x34e   : > { %5607 = vst.msk [vmem:[#allocation5 + $0x24] sm:$0xf] %vm5603_vm7, %v5514_v21  ;;  %6968 = vst.msk [vmem:[#allocation5 + $0x1c] sm:$0xf] %vm5603_vm7, %v6875_v58  ;;  %v5287_v55 = vshll.u32 %v5095_v30, 16  ;;  %v6279_v21 = vor.u32 %v6278_v23, %v11698_v60  ;;  %v7366_v58 = vor.u32 %v7365_v28, %v7362_v26  ;;  %v9189_v62 = vrot.slane %v11755_v35, 9 }
 0x34f   : > { %v11777_v44 = vld [vmem:[#allocation3 + $0x60] sm:$0xf]  ;;  %v7009_v1 = vld [vmem:[#allocation3 + $0x54] sm:$0xf]  ;;  %v7371_v53 = vrot.slane %v7369_v31, 5  ;;  %v7375_v63 = vrot.slane %v7373_v32, 4 }
 0x350   : > { %5529 = vrot.lane.b32.xlu1 %v5266_v2, %s9822_s23  ;;  %6890 = vrot.lane.b32.xlu0 %v6796_v3, %s9822_s23  ;;  %v6284_v3 = vrot.slane %v6282_v11, 5  ;;  %v6280_v5 = vrot.slane %v6279_v21, 4  ;;  %v7208_v60 = vld [vmem:[#allocation3 + $0x5c] sm:$0x1]  ;;  %v5776_v61 = vrot.slane %v11768_v56, 5  ;;  %v5779_v14 = vrot.slane %v11775_v17, 5 }
 0x351   : > { %v6877_v12 = vpop.permute.xlu1 %6876  ;;  %v5849_v13 = vpop.permute.xlu0 %5848  ;;  %v7384_v16 = vshrl.u32 %v11777_v44, 16  ;;  %v5983_v26 = vld [vmem:[#allocation3 + $0x48] sm:$0xf]  ;;  %v7367_v35 = vrot.slane %v7366_v58, 4  ;;  %v5280_v11 = vsel %vm10148_vm9, %v11764_v51, %v11730_v0  ;;  %v7376_v23 = vor.u32 %v7375_v63, %v7371_v53  ;;  %v4962_v58 = vld [vmem:[#allocation3 + $0x78] sm:$0xf] }
 0x352   : > { %6969 = vst.msk [vmem:[#allocation5 + $0x28] sm:$0xf] %vm5603_vm7, %v6877_v12  ;;  %v11784_v12 = vrot.slane %v5287_v55, 5  ;;  %v7850_v56 = vsel %vm10435_vm1, %v9215_v25, %v13574_v38  ;;  %v7011_v25 = vld [vmem:[#allocation3 + $0x60] sm:$0xf]  ;;  %v11899_v34 = vrot.slane %v6760_v19, 4 }
 0x353   : > { %5943 = vst.msk [vmem:[#allocation5 + $0x18] sm:$0xf] %vm5940_vm4, %v5849_v13  ;;  %v9527_v29 = vpop.f32.mrf.mxu0 }
 0x354   : > { %6892 = vrot.lane.b32.xlu1 %v6799_v9, %s9822_s23  ;;  %5864 = vrot.lane.b32.xlu0 %v5770_v24, %s9823_s15  ;;  %v4393_v45 = vmul.f32 %v11611_v6, %v9527_v29  ;;  %v6285_v9 = vsel %vm10148_vm9, %v6280_v5, %v6284_v3  ;;  %v5022_v24 = vld [vmem:[#allocation3 + $0x40] sm:$0xf]  ;;  %v7010_v29 = vld [vmem:[#allocation3 + $0x58] sm:$0xf]  ;;  %v5290_v0 = vsel %vm10148_vm9, %v11766_v54, %v11784_v12  ;;  %v6680_v5 = vld [vmem:[#allocation3 + $0x54] sm:$0xe] }
 0x355   : > { %v5851_v47 = vpop.permute.xlu1 %5850  ;;  %v4306_v52 = vpop.f32.mrf.mxu0  ;;  %6635 = vst.msk [vmem:[#allocation5 + $0x40] sm:$0xf] %vm4894_vm14, %v6285_v9  ;;  %5054 = vst.msk [vmem:[#allocation5 + $0x84] sm:$0xf] %vm4894_vm14, %v5022_v24  ;;  %v4955_v9 = vld [vmem:[#allocation3 + $0x6c] sm:$0xf] }
 0x356   : > { %5944 = vst.msk [vmem:[#allocation5 + $0x24] sm:$0xf] %vm5940_vm4, %v5851_v47  ;;  %v4431_v36 = vadd.f32 %v11622_v18, %v4393_v45  ;;  %v4391_v57 = vmul.f32 %v11611_v6, %v4306_v52  ;;  %v5023_v45 = vld [vmem:[#allocation3 + $0x48] sm:$0xf]  ;;  %v5097_v54 = vld [vmem:[#allocation3 + $0x58] sm:$0xf] }
 0x357   : > { %v9528_v2 = vpop.f32.mrf.mxu0  ;;  %5055 = vst.msk [vmem:[#allocation5 + $0x90] sm:$0xf] %vm4894_vm14, %v5023_v45  ;;  %7991 = vst.msk [vmem:[#allocation5 + $0x8] sm:$0xf] %vm4894_vm14, %v7850_v56 }
 0x358   : > { %5866 = vrot.lane.b32.xlu1 %v5773_v40, %s9823_s15  ;;  %7083 = vrot.lane.b32.xlu0 %v7009_v1, %s9823_s15  ;;  %v4463_v8 = vmax.f32 %v4431_v36, 0.0  ;;  %v4429_v43 = vadd.f32 %v11622_v18, %v4391_v57  ;;  %v4394_v59 = vmul.f32 %v11611_v6, %v9528_v2  ;;  %v7379_v40 = vshll.u32 %v7208_v60, 16  ;;  %v5024_v36 = vld [vmem:[#allocation3 + $0x4c] sm:$0xf] }
 0x359   : > { %v4309_v13 = vpop.f32.mrf.mxu0  ;;  %v11810_v57 = vsel %vm10435_vm1, %v9189_v62, %v5776_v61  ;;  %v7387_v1 = vshll.u32 %v11777_v44, 16  ;;  %5056 = vst.msk [vmem:[#allocation5 + $0x9c] sm:$0xf] %vm4894_vm14, %v5024_v36 }
 0x35a   : > { %v9339_v28 = vpack.c.bf16 %v4463_v8, %v4463_v8  ;;  %v4461_v30 = vmax.f32 %v4429_v43, 0.0  ;;  %v4432_v31 = vadd.f32 %v11622_v18, %v4394_v59  ;;  %v4392_v32 = vmul.f32 %v11611_v6, %v4309_v13  ;;  %v5984_v43 = vld [vmem:[#allocation3 + $0x4c] sm:$0xf] }
 0x35b   : > { %v7372_v8 = vsel %vm10148_vm9, %v7367_v35, %v7371_v53  ;;  %v7377_v59 = vrot.slane %v7376_v23, 4  ;;  %v7381_v13 = vrot.slane %v7379_v40, 5  ;;  %v11820_v53 = vld [vmem:[#allocation3 + $0x64] sm:$0xf]  ;;  %v11822_v35 = vrot.slane %v7387_v1, 5 }
 0x35c   : > { %6057 = vrot.lane.b32.xlu0 %v5983_v26, %s9824_s17  ;;  %7085 = vrot.lane.b32.xlu1 %v7010_v29, %s9823_s15  ;;  %v4727_v47 = vshrl.u32 %v9339_v28, 16  ;;  %v4730_v52 = vshll.u32 %v9339_v28, 16  ;;  %v9337_v55 = vpack.c.bf16 %v4461_v30, %v4461_v30  ;;  %v4464_v21 = vmax.f32 %v4432_v31, 0.0  ;;  %v6681_v26 = vld [vmem:[#allocation3 + $0x58] sm:$0xf] }
 0x35d   : > { %v4430_v51 = vadd.f32 %v11622_v18, %v4392_v32  ;;  %v11818_v30 = vrot.slane %v7384_v16, 4  ;;  %v9205_v31 = vrot.slane %v6680_v5, 9  ;;  %v7382_v16 = vsel %vm10148_vm9, %v7377_v59, %v7381_v13 }
 0x35e   : > { %v4729_v63 = vrot.slane %v4727_v47, 7  ;;  %v4710_v2 = vshrl.u32 %v9337_v55, 16  ;;  %v4713_v3 = vshll.u32 %v9337_v55, 16  ;;  %v9340_v60 = vpack.c.bf16 %v4464_v21, %v4464_v21  ;;  %v6175_v55 = vld [vmem:[#allocation3 + $0x30] sm:$0xf] }
 0x35f   : > { %v4462_v24 = vmax.f32 %v4430_v51, 0.0  ;;  %v6802_v21 = vrot.slane %v6681_v26, 5  ;;  %v6287_v59 = vshrl.u32 %v6175_v55, 16  ;;  %v6290_v26 = vshll.u32 %v6175_v55, 16 }
 0x360   : > { %7643 = vrot.lane.b32.xlu0 %v7372_v8, %s9824_s17  ;;  %6059 = vrot.lane.b32.xlu1 %v5984_v43, %s9824_s17  ;;  %v4732_v62 = vor.u32 %v4730_v52, %v4729_v63  ;;  %v4712_v44 = vrot.slane %v4710_v2, 7  ;;  %v4735_v28 = vshrl.u32 %v9340_v60, 16  ;;  %v4738_v32 = vshll.u32 %v9340_v60, 16  ;;  %v4966_v52 = vld [vmem:[#allocation3 + $0x80] sm:$0x1] }
 0x361   : > { %v9338_v29 = vpack.c.bf16 %v4462_v24, %v4462_v24  ;;  %v4733_v23 = vrot.slane %v4729_v63, 4  ;;  %v6682_v2 = vld [vmem:[#allocation3 + $0x5c] sm:$0x1]  ;;  %v7397_v8 = vshrl.u32 %v11820_v53, 16  ;;  %v6176_v43 = vld [vmem:[#allocation3 + $0x34] sm:$0xf] }
 0x362   : > { %v4963_v40 = vsel %vm11320_vm2, %v4732_v62, %v4962_v58  ;;  %v4715_v45 = vor.u32 %v4713_v3, %v4712_v44  ;;  %v4737_v47 = vrot.slane %v4735_v28, 7  ;;  %v7393_v3 = vshll.u32 %v11820_v53, 16  ;;  %v4959_v24 = vld [vmem:[#allocation3 + $0x74] sm:$0x1] }
 0x363   : > { %4964 = vst [vmem:[#allocation3 + $0x78] sm:$0xf] %v4963_v40  ;;  %v4718_v36 = vshrl.u32 %v9338_v29, 16  ;;  %v4721_v51 = vshll.u32 %v9338_v29, 16  ;;  %v4716_v5 = vrot.slane %v4712_v44, 4  ;;  %v6805_v62 = vrot.slane %v6682_v2, 5 }
 0x364   : > { %5531 = vrot.lane.b32.xlu0 %v5280_v11, %s9822_s23  ;;  %7645 = vrot.lane.b32.xlu1 %v7382_v16, %s9824_s17  ;;  %v4956_v1 = vsel %vm11320_vm2, %v4715_v45, %v4955_v9  ;;  %v4740_v58 = vor.u32 %v4738_v32, %v4737_v47  ;;  %v4742_v63 = vrot.slane %v4737_v47, 4  ;;  %v5096_v9 = vld [vmem:[#allocation3 + $0x54] sm:$0xf]  ;;  %v6803_v28 = vsel %vm10435_vm1, %v9205_v31, %v6802_v21  ;;  %v6177_v40 = vld [vmem:[#allocation3 + $0x38] sm:$0x1] }
 0x365   : > { %4957 = vst [vmem:[#allocation3 + $0x6c] sm:$0xf] %v4956_v1  ;;  %v4720_v60 = vrot.slane %v4718_v36, 7  ;;  %v6804_v53 = vrot.slane %v6802_v21, 4  ;;  %v6289_v31 = vrot.slane %v6287_v59, 4  ;;  %v6296_v45 = vshll.u32 %v6176_v43, 16 }
 0x366   : > { %v4741_v13 = vsel %vm10153_vm11, %v4733_v23, %v4740_v58  ;;  %v4967_v11 = vsel %vm11330_vm10, %v4742_v63, %v4966_v52  ;;  %v6292_v23 = vrot.slane %v6290_v26, 5  ;;  %v6300_v47 = vshrl.u32 %v6176_v43, 16  ;;  %v6178_v36 = vld [vmem:[#allocation3 + $0x3c] sm:$0xf] }
 0x367   : > { %4965 = vst.msk [vmem:[#allocation3 + $0x7c] sm:$0xf] %vm4894_vm14, %v4741_v13  ;;  %4968 = vst [vmem:[#allocation3 + $0x80] sm:$0x1] %v4967_v11  ;;  %v7068_v44 = vpop.permute.xlu0 %7067  ;;  %v4723_v32 = vor.u32 %v4721_v51, %v4720_v60  ;;  %v4725_v29 = vrot.slane %v4720_v60, 4  ;;  %v5292_v16 = vshrl.u32 %v5096_v9, 16  ;;  %v6806_v1 = vsel %vm10435_vm1, %v6804_v53, %v6805_v62 }
 0x368   : > { %5533 = vrot.lane.b32.xlu1 %v5290_v0, %s9822_s23  ;;  %6894 = vrot.lane.b32.xlu0 %v6803_v28, %s9822_s23  ;;  %7161 = vst.msk [vmem:[#allocation5 + $0x1c] sm:$0xf] %vm5940_vm4, %v7068_v44  ;;  %v5295_v21 = vshll.u32 %v5096_v9, 16  ;;  %v6293_v12 = vor.u32 %v6292_v23, %v6289_v31  ;;  %v6298_v0 = vrot.slane %v6296_v45, 5  ;;  %v6302_v51 = vrot.slane %v6300_v47, 4 }
 0x369   : > { %v4724_v52 = vsel %vm10153_vm11, %v4716_v5, %v4723_v32  ;;  %v4960_v55 = vsel %vm11330_vm10, %v4725_v29, %v4959_v24  ;;  %v6306_v2 = vshll.u32 %v6177_v40, 16  ;;  %v5778_v63 = vrot.slane %v5776_v61, 4  ;;  %v11866_v24 = vld [vmem:[#allocation3 + $0x14] sm:$0x1]  ;;  %v11892_v31 = vld [vmem:[#allocation3 + $0x40] sm:$0xf] }
 0x36a   : > { %4958 = vst.msk [vmem:[#allocation3 + $0x70] sm:$0xf] %vm4894_vm14, %v4724_v52  ;;  %4961 = vst [vmem:[#allocation3 + $0x74] sm:$0x1] %v4960_v55  ;;  %v7390_v5 = vor.u32 %v11822_v35, %v11818_v30  ;;  %v11860_v60 = vrot.slane %v7393_v3, 5  ;;  %v7399_v59 = vrot.slane %v7397_v8, 4  ;;  %v6303_v11 = vor.u32 %v6302_v51, %v6298_v0 }
 0x36b   : > { %v6042_v58 = vpop.permute.xlu0 %6041  ;;  %v6294_v13 = vrot.slane %v6293_v12, 4  ;;  %v5294_v61 = vrot.slane %v5292_v16, 4  ;;  %v5297_v30 = vrot.slane %v5295_v21, 5  ;;  %v6311_v35 = vshrl.u32 %v6178_v36, 16  ;;  %v7211_v3 = vld [vmem:[#allocation3 + $0x68] sm:$0x1] }
 0x36c   : > { %6896 = vrot.lane.b32.xlu1 %v6806_v1, %s9822_s23  ;;  %5868 = vrot.lane.b32.xlu0 %v11810_v57, %s9823_s15  ;;  %6136 = vst.msk [vmem:[#allocation5 + $0x18] sm:$0xf] %vm6133_vm5, %v6042_v58  ;;  %v7070_v43 = vpop.permute.xlu1 %7069  ;;  %v5301_v57 = vshll.u32 %v5097_v54, 16  ;;  %v5305_v8 = vshrl.u32 %v5097_v54, 16  ;;  %v6304_v9 = vrot.slane %v6303_v11, 4  ;;  %v6308_v26 = vrot.slane %v6306_v2, 5 }
 0x36d   : > { %7162 = vst.msk [vmem:[#allocation5 + $0x28] sm:$0xf] %vm5940_vm4, %v7070_v43  ;;  %v6299_v62 = vsel %vm10148_vm9, %v6294_v13, %v6298_v0  ;;  %v5780_v10 = vsel %vm10435_vm1, %v5778_v63, %v5779_v14  ;;  %v6763_v28 = vrot.slane %v11866_v24, 5  ;;  %v7242_v44 = vrot.slane %v7240_v50, 4  ;;  %v5098_v55 = vld [vmem:[#allocation3 + $0x5c] sm:$0x1] }
 0x36e   : > { %6636 = vst.msk [vmem:[#allocation5 + $0x4c] sm:$0xf] %vm4894_vm14, %v6299_v62  ;;  %v7245_v32 = vrot.slane %v7243_v48, 5  ;;  %v7391_v17 = vrot.slane %v7390_v5, 4  ;;  %v6309_v14 = vsel %vm10148_vm9, %v6304_v9, %v6308_v26  ;;  %v6313_v53 = vrot.slane %v6311_v35, 4 }
 0x36f   : > { %v6314_v40 = vshll.u32 %v6178_v36, 16  ;;  %v7400_v50 = vor.u32 %v7399_v59, %v11860_v60  ;;  %v7403_v23 = vshll.u32 %v7211_v3, 16  ;;  %6637 = vst.msk [vmem:[#allocation5 + $0x58] sm:$0xf] %vm4894_vm14, %v6309_v14  ;;  %v11903_v48 = vrot.slane %v7249_v49, 5 }
 0x370   : > { %5870 = vrot.lane.b32.xlu1 %v5780_v10, %s9823_s15  ;;  %7087 = vrot.lane.b32.xlu0 %v7011_v25, %s9823_s15  ;;  %v6044_v29 = vpop.permute.xlu1 %6043  ;;  %v5298_v47 = vor.u32 %v5297_v30, %v5294_v61  ;;  %v11905_v52 = vrot.slane %v5301_v57, 5  ;;  %v5307_v16 = vrot.slane %v5305_v8, 4  ;;  %v7012_v36 = vld [vmem:[#allocation3 + $0x64] sm:$0xf]  ;;  %v5985_v54 = vld [vmem:[#allocation3 + $0x54] sm:$0xf]  ;;  %v7396_v49 = vsel %vm10148_vm9, %v7391_v17, %v11860_v60 }
 0x371   : > { %6137 = vst.msk [vmem:[#allocation5 + $0x24] sm:$0xf] %vm6133_vm5, %v6044_v29  ;;  %v6316_v21 = vrot.slane %v6314_v40, 5  ;;  %v7253_v12 = vshrl.u32 %v11746_v33, 16  ;;  %v6320_v0 = vshll.u32 %v11892_v31, 16  ;;  %v7246_v1 = vor.u32 %v7245_v32, %v7242_v44 }
 0x372   : > { %v7628_v45 = vpop.permute.xlu0 %7627  ;;  %v5075_v51 = vld [vmem:[#allocation3] sm:$0xf]  ;;  %v5076_v2 = vld [vmem:[#allocation3 + $0x4] sm:$0xf]  ;;  %v7401_v5 = vrot.slane %v7400_v50, 4  ;;  %v7405_v43 = vrot.slane %v7403_v23, 5  ;;  %v5308_v30 = vor.u32 %v5307_v16, %v11905_v52 }
 0x373   : > { %7721 = vst.msk [vmem:[#allocation5 + $0x1c] sm:$0xf] %vm6133_vm5, %v7628_v45  ;;  %v6317_v58 = vor.u32 %v6316_v21, %v6313_v53  ;;  %v6180_v63 = vld [vmem:[#allocation3 + $0x44] sm:$0x1]  ;;  %v5311_v59 = vshll.u32 %v5098_v55, 16  ;;  %v6322_v33 = vrot.slane %v6320_v0, 5 }
 0x374   : > { %7089 = vrot.lane.b32.xlu1 %v7012_v36, %s9823_s15  ;;  %6061 = vrot.lane.b32.xlu0 %v5985_v54, %s9824_s17  ;;  %v6684_v13 = vld [vmem:[#allocation3 + $0x64] sm:$0xf]  ;;  %v5299_v61 = vrot.slane %v5298_v47, 4  ;;  %v6683_v57 = vld [vmem:[#allocation3 + $0x60] sm:$0xe]  ;;  %v6324_v3 = vshrl.u32 %v11892_v31, 16  ;;  %v7406_v17 = vsel %vm10148_vm9, %v7401_v5, %v7405_v43 }
 0x375   : > { %v6318_v35 = vrot.slane %v6317_v58, 4  ;;  %v5986_v60 = vld [vmem:[#allocation3 + $0x58] sm:$0xf]  ;;  %v5124_v8 = vshrl.u32 %v5075_v51, 16  ;;  %v5127_v62 = vshll.u32 %v5075_v51, 16  ;;  %v5133_v9 = vshll.u32 %v5076_v2, 16 }
 0x376   : > { %v5516_v11 = vpop.permute.xlu0 %5515  ;;  %v7630_v56 = vpop.permute.xlu1 %7629  ;;  %v5137_v26 = vshrl.u32 %v5076_v2, 16  ;;  %v11919_v10 = vld [vmem:[#allocation3 + $0x30] sm:$0xe]  ;;  %v6809_v25 = vrot.slane %v6684_v13, 5  ;;  %v11923_v44 = vrot.slane %v7246_v1, 4  ;;  %v11927_v29 = vrot.slane %v7253_v12, 4 }
 0x377   : > { %5608 = vst.msk [vmem:[#allocation5 + $0x30] sm:$0xf] %vm5603_vm7, %v5516_v11  ;;  %v6323_v32 = vsel %vm10148_vm9, %v6318_v35, %v6322_v33  ;;  %v5313_v14 = vrot.slane %v5311_v59, 5  ;;  %v6685_v53 = vld [vmem:[#allocation3 + $0x68] sm:$0x1]  ;;  %v6330_v31 = vshll.u32 %v6180_v63, 16  ;;  %v5304_v45 = vsel %vm10148_vm9, %v5299_v61, %v11905_v52 }
 0x378   : > { %7722 = vst.msk [vmem:[#allocation5 + $0x28] sm:$0xf] %vm6133_vm5, %v7630_v56  ;;  %7647 = vrot.lane.b32.xlu0 %v7396_v49, %s9824_s17  ;;  %6063 = vrot.lane.b32.xlu1 %v5986_v60, %s9824_s17  ;;  %v5657_v40 = vld [vmem:[#allocation3 + $0x54] sm:$0xe]  ;;  %v5309_v47 = vrot.slane %v5308_v30, 4  ;;  %v9206_v55 = vrot.slane %v6683_v57, 9  ;;  %v7256_v24 = vor.u32 %v11927_v29, %v11903_v48 }
 0x379   : > { %6638 = vst.msk [vmem:[#allocation5 + $0x64] sm:$0xf] %vm4894_vm14, %v6323_v32  ;;  %v5658_v16 = vld [vmem:[#allocation3 + $0x58] sm:$0xf]  ;;  %v6326_v21 = vrot.slane %v6324_v3, 4  ;;  %v5126_v36 = vrot.slane %v5124_v8, 4 }
 0x37a   : > { %v5518_v50 = vpop.permute.xlu1 %5517  ;;  %v6879_v23 = vpop.permute.xlu0 %6878  ;;  %v5129_v54 = vrot.slane %v5127_v62, 5  ;;  %v11937_v12 = vrot.slane %v5133_v9, 5  ;;  %v5139_v0 = vrot.slane %v5137_v26, 4  ;;  %v9217_v51 = vrot.slane %v11919_v10, 9  ;;  %v5077_v2 = vld [vmem:[#allocation3 + $0x8] sm:$0x1] }
 0x37b   : > { %5609 = vst.msk [vmem:[#allocation5 + $0x3c] sm:$0xf] %vm5603_vm7, %v5518_v50  ;;  %6970 = vst.msk [vmem:[#allocation5 + $0x34] sm:$0xf] %vm5603_vm7, %v6879_v23  ;;  %v9531_v49 = vpop.f32.mrf.mxu0  ;;  %v6811_v52 = vrot.slane %v6809_v25, 4  ;;  %v6327_v58 = vor.u32 %v6326_v21, %v6322_v33  ;;  %v6812_v63 = vrot.slane %v6685_v53, 5  ;;  %v6810_v30 = vsel %vm10435_vm1, %v9206_v55, %v6809_v25 }
 0x37c   : > { %7649 = vrot.lane.b32.xlu1 %v7406_v17, %s9824_s17  ;;  %5535 = vrot.lane.b32.xlu0 %v5304_v45, %s9822_s23  ;;  %v4397_v1 = vmul.f32 %v11611_v6, %v9531_v49  ;;  %v9190_v5 = vrot.slane %v5657_v40, 9  ;;  %v5783_v43 = vrot.slane %v5658_v16, 5  ;;  %v11943_v59 = vld [vmem:[#allocation3 + $0x5c] sm:$0x1]  ;;  %v6332_v11 = vrot.slane %v6330_v31, 5 }
 0x37d   : > { %v4322_v13 = vpop.f32.mrf.mxu0  ;;  %v9680_v57 = vld [vmem:[#allocation5 + $0x18] ss:$12 sps:$4 sm:$0xff]   ;;  %v6328_v8 = vrot.slane %v6327_v58, 4  ;;  %v5314_v33 = vsel %vm10148_vm9, %v5309_v47, %v5313_v14  ;;  %v5130_v62 = vor.u32 %v5129_v54, %v5126_v36  ;;  %v5140_v9 = vor.u32 %v5139_v0, %v11937_v12  ;;  %v11956_v25 = vld [vmem:[#allocation3 + $0x6c] sm:$0xf] }
 0x37e   : > { %v6881_v56 = vpop.permute.xlu1 %6880  ;;  %v5853_v61 = vpop.permute.xlu0 %5852  ;;  %v4435_v3 = vadd.f32 %v11622_v18, %v4397_v1  ;;  %v4395_v60 = vmul.f32 %v11611_v6, %v4322_v13  ;;  %v5143_v26 = vshll.u32 %v5077_v2, 16  ;;  %v11964_v14 = vld [vmem:[%s13567_s2] ss:$0 sm:$0xff]  ;;  %v6813_v31 = vsel %vm10435_vm1, %v6811_v52, %v6812_v63  ;;  %v11973_v47 = vld [vmem:[#allocation3 + $0x24] sm:$0xe] }
 0x37f   : > { %v9682_v35 = vld [vmem:[#allocation5 + $0x1c] ss:$12 sps:$4 sm:$0xff]   ;;  %6971 = vst.msk [vmem:[#allocation5 + $0x40] sm:$0xf] %vm5603_vm7, %v6881_v56  ;;  %v9532_v32 = vpop.f32.mrf.mxu0  ;;  %v6333_v53 = vsel %vm10148_vm9, %v6328_v8, %v6332_v11  ;;  %v5784_v50 = vsel %vm10435_vm1, %v9190_v5, %v5783_v43  ;;  %v5785_v23 = vrot.slane %v5783_v43, 4  ;;  %v11984_v52 = vrot.slane %v5130_v62, 4 }
 0x380   : > { %5945 = vst.msk [vmem:[#allocation5 + $0x30] sm:$0xf] %vm5940_vm4, %v5853_v61  ;;  %5537 = vrot.lane.b32.xlu1 %v5314_v33, %s9822_s23  ;;  %6898 = vrot.lane.b32.xlu0 %v6810_v30, %s9822_s23  ;;  %v4467_v6 = vmax.f32 %v4435_v3, 0.0  ;;  %v4433_v17 = vadd.f32 %v11622_v18, %v4395_v60  ;;  %v4398_v40 = vmul.f32 %v11964_v14, %v9532_v32  ;;  %v5786_v18 = vrot.slane %v11943_v59, 5  ;;  %v11978_v54 = vld [vmem:[%s13568_s3] ss:$0 sm:$0xff] }
 0x381   : > { %8560 = vmatprep.mubr.bf16.mxu1 %v9682_v35  ;;  %6639 = vst.msk [vmem:[#allocation5 + $0x70] sm:$0xf] %vm4894_vm14, %v6333_v53  ;;  %v4325_v45 = vpop.f32.mrf.mxu0  ;;  %v11986_v2 = vrot.slane %v5140_v9, 4  ;;  %v11988_v1 = vrot.slane %v5143_v26, 5  ;;  %v7408_v58 = vshrl.u32 %v11956_v25, 16  ;;  %v9216_v13 = vrot.slane %v11973_v47, 9 }
 0x382   : > { %8561 = vmatmul.mubr.bf16.vlgmr.msra.gmra.mxu1 %v9680_v57  ;;  %v5855_v55 = vpop.permute.xlu1 %5854  ;;  %v7072_v16 = vpop.permute.xlu0 %7071  ;;  %v9343_v21 = vpack.c.bf16 %v4467_v6, %v4467_v6  ;;  %v4465_v36 = vmax.f32 %v4433_v17, 0.0  ;;  %v4436_v0 = vadd.f32 %v11978_v54, %v4398_v40  ;;  %v4396_v49 = vmul.f32 %v11964_v14, %v4325_v45  ;;  %v11994_v11 = vld [vmem:[#allocation3 + $0x70] sm:$0xf]  ;;  %v5025_v62 = vld [vmem:[#allocation3 + $0x54] sm:$0xf] }
 0x383   : > { %5946 = vst.msk [vmem:[#allocation5 + $0x3c] sm:$0xf] %vm5940_vm4, %v5855_v55  ;;  %7163 = vst.msk [vmem:[#allocation5 + $0x34] sm:$0xf] %vm5940_vm4, %v7072_v16  ;;  %v7411_v56 = vshll.u32 %v11956_v25, 16  ;;  %v5787_v9 = vsel %vm10435_vm1, %v5785_v23, %v5786_v18  ;;  %v5136_v32 = vsel %vm10148_vm9, %v11984_v52, %v11937_v12  ;;  %v5146_v25 = vsel %vm10148_vm9, %v11986_v2, %v11988_v1 }
 0x384   : > { %6900 = vrot.lane.b32.xlu1 %v6813_v31, %s9822_s23  ;;  %5872 = vrot.lane.b32.xlu0 %v5784_v50, %s9823_s15  ;;  %v4761_v63 = vshrl.u32 %v9343_v21, 16  ;;  %v4764_v5 = vshll.u32 %v9343_v21, 16  ;;  %v9341_v43 = vpack.c.bf16 %v4465_v36, %v4465_v36  ;;  %v4468_v59 = vmax.f32 %v4436_v0, 0.0  ;;  %v4976_v61 = vld [vmem:[#allocation3 + $0x90] sm:$0xf] }
 0x385   : > { %v4434_v30 = vadd.f32 %v11978_v54, %v4396_v49  ;;  %v7013_v26 = vld [vmem:[#allocation3 + $0x6c] sm:$0xf]  ;;  %v4969_v6 = vld [vmem:[#allocation3 + $0x84] sm:$0xf]  ;;  %5057 = vst.msk [vmem:[#allocation5 + $0xa8] sm:$0xf] %vm4894_vm14, %v5025_v62  ;;  %v6761_v2 = vsel %vm10435_vm1, %v9199_v7, %v6760_v19 }
 0x386   : > { %v7074_v57 = vpop.permute.xlu1 %7073  ;;  %v6046_v35 = vpop.permute.xlu0 %6045  ;;  %v11998_v3 = vrot.slane %v4761_v63, 7  ;;  %v4744_v60 = vshrl.u32 %v9341_v43, 16  ;;  %v4747_v8 = vshll.u32 %v9341_v43, 16  ;;  %v9344_v33 = vpack.c.bf16 %v4468_v59, %v4468_v59  ;;  %v5026_v53 = vld [vmem:[#allocation3 + $0x58] sm:$0xf] }
 0x387   : > { %7164 = vst.msk [vmem:[#allocation5 + $0x40] sm:$0xf] %vm5940_vm4, %v7074_v57  ;;  %v4466_v17 = vmax.f32 %v4434_v30, 0.0  ;;  %v12015_v40 = vrot.slane %v7408_v58, 4  ;;  %v6181_v23 = vld [vmem:[#allocation3 + $0x48] sm:$0xf] }
 0x388   : > { %6138 = vst.msk [vmem:[#allocation5 + $0x30] sm:$0xf] %vm6133_vm5, %v6046_v35  ;;  %5874 = vrot.lane.b32.xlu1 %v5787_v9, %s9823_s15  ;;  %7091 = vrot.lane.b32.xlu0 %v7013_v26, %s9823_s15  ;;  %v4766_v31 = vor.u32 %v4764_v5, %v11998_v3  ;;  %v12018_v50 = vrot.slane %v4744_v60, 7  ;;  %v4769_v12 = vshrl.u32 %v9344_v33, 16  ;;  %v12021_v18 = vrot.slane %v7411_v56, 5 }
 0x389   : > { %5058 = vst.msk [vmem:[#allocation5 + $0xb4] sm:$0xf] %vm4894_vm14, %v5026_v53  ;;  %v7417_v45 = vshll.u32 %v11994_v11, 16  ;;  %v4772_v55 = vshll.u32 %v9344_v33, 16  ;;  %v4980_v16 = vld [vmem:[#allocation3 + $0x98] sm:$0x1]  ;;  %v9342_v21 = vpack.c.bf16 %v4466_v17, %v4466_v17 }
 0x38a   : > { %v12024_v36 = vld [vmem:[#allocation3 + $0x4c] sm:$0xf]  ;;  %v7632_v0 = vpop.permute.xlu0 %7631  ;;  %v6048_v49 = vpop.permute.xlu1 %6047  ;;  %v7014_v52 = vld [vmem:[#allocation3 + $0x70] sm:$0xf]  ;;  %v4767_v58 = vrot.slane %v11998_v3, 4  ;;  %v4977_v63 = vsel %vm11320_vm2, %v4766_v31, %v4976_v61  ;;  %v4749_v5 = vor.u32 %v4747_v8, %v12018_v50  ;;  %v4771_v43 = vrot.slane %v4769_v12, 7 }
 0x38b   : > { %v5011_v59 = vld [vmem:[#allocation3] sm:$0xf]  ;;  %7723 = vst.msk [vmem:[#allocation5 + $0x34] sm:$0xf] %vm6133_vm5, %v7632_v0  ;;  %6139 = vst.msk [vmem:[#allocation5 + $0x3c] sm:$0xf] %vm6133_vm5, %v6048_v49  ;;  %v7414_v9 = vor.u32 %v12021_v18, %v12015_v40 }
 0x38c   : > { %v7421_v56 = vshrl.u32 %v11994_v11, 16  ;;  %4978 = vst [vmem:[#allocation3 + $0x90] sm:$0xf] %v4977_v63  ;;  %v4752_v30 = vshrl.u32 %v9342_v21, 16  ;;  %v4755_v57 = vshll.u32 %v9342_v21, 16  ;;  %v6335_v35 = vshrl.u32 %v6181_v23, 16  ;;  %5507 = vrot.lane.b32.xlu0 %v5136_v32, %s9822_s23  ;;  %7093 = vrot.lane.b32.xlu1 %v7014_v52, %s9823_s15 }
 0x38d   : > { %5043 = vst.msk [vmem:[#allocation5] sm:$0xf] %vm4894_vm14, %v5011_v59  ;;  %v5012_v3 = vld [vmem:[#allocation3 + $0x4] sm:$0xf]  ;;  %v12034_v60 = vld [vmem:[#allocation3 + $0x34] sm:$0xf]  ;;  %v4970_v61 = vsel %vm11320_vm2, %v4749_v5, %v4969_v6  ;;  %v4774_v8 = vor.u32 %v4772_v55, %v4771_v43 }
 0x38e   : > { %v4776_v33 = vrot.slane %v4771_v43, 4  ;;  %v6338_v62 = vshll.u32 %v6181_v23, 16  ;;  %5044 = vst.msk [vmem:[#allocation5 + $0xc] sm:$0xf] %vm4894_vm14, %v5012_v3  ;;  %v12041_v11 = vld [vmem:[#allocation3 + $0x38] sm:$0x1]  ;;  %v7634_v31 = vpop.permute.xlu1 %7633  ;;  %v5520_v12 = vpop.permute.xlu0 %5519 }
 0x38f   : > { %v4750_v26 = vrot.slane %v12018_v50, 4  ;;  %4971 = vst [vmem:[#allocation3 + $0x84] sm:$0xf] %v4970_v61  ;;  %v4754_v17 = vrot.slane %v4752_v30, 7  ;;  %v6337_v32 = vrot.slane %v6335_v35, 4  ;;  %v4775_v6 = vsel %vm10153_vm11, %v4767_v58, %v4774_v8 }
 0x390   : > { %v12046_v53 = vld [vmem:[#allocation3 + $0x28] sm:$0xf]  ;;  %v4981_v23 = vsel %vm11330_vm10, %v4776_v33, %v4980_v16  ;;  %v4973_v55 = vld [vmem:[#allocation3 + $0x8c] sm:$0x1]  ;;  %v6340_v21 = vrot.slane %v6338_v62, 5  ;;  %v6344_v0 = vshll.u32 %v12024_v36, 16  ;;  %5509 = vrot.lane.b32.xlu1 %v5146_v25, %s9822_s23 }
 0x391   : > { %7724 = vst.msk [vmem:[#allocation5 + $0x40] sm:$0xf] %vm6133_vm5, %v7634_v31  ;;  %v5987_v40 = vld [vmem:[#allocation3 + $0x60] sm:$0xf]  ;;  %v12055_v50 = vrot.slane %v7417_v45, 5  ;;  %v7423_v18 = vrot.slane %v7421_v56, 4  ;;  %v4757_v49 = vor.u32 %v4755_v57, %v4754_v17 }
 0x392   : > { %5610 = vst.msk [vmem:[#allocation5 + $0x48] sm:$0xf] %vm5603_vm7, %v5520_v12  ;;  %4982 = vst [vmem:[#allocation3 + $0x98] sm:$0x1] %v4981_v23  ;;  %v4759_v52 = vrot.slane %v4754_v17, 4  ;;  %v13573_v58 = vrot.slane %v12034_v60, 5  ;;  %6065 = vrot.lane.b32.xlu0 %v5987_v40, %s9824_s17  ;;  %v6341_v63 = vor.u32 %v6340_v21, %v6337_v32  ;;  %v5522_v3 = vpop.permute.xlu1 %5521  ;;  %v6883_v61 = vpop.permute.xlu0 %6882 }
 0x393   : > { %4979 = vst.msk [vmem:[#allocation3 + $0x94] sm:$0xf] %vm4894_vm14, %v4775_v6  ;;  %v12059_v16 = vld [vmem:[#allocation3 + $0x2c] sm:$0x1]  ;;  %v7214_v45 = vld [vmem:[#allocation3 + $0x74] sm:$0x1]  ;;  %v4758_v56 = vsel %vm10153_vm11, %v4750_v26, %v4757_v49  ;;  %v7424_v27 = vor.u32 %v7423_v18, %v12055_v50 }
 0x394   : > { %v6348_v5 = vshrl.u32 %v12024_v36, 16  ;;  %v12069_v43 = vld [vmem:[#allocation3] sm:$0xe]  ;;  %v5637_v59 = vld [vmem:[#allocation3 + $0x4] sm:$0xf]  ;;  %v4974_v30 = vsel %vm11330_vm10, %v4759_v52, %v4973_v55  ;;  %v6342_v25 = vrot.slane %v6341_v63, 4  ;;  %v7864_v52 = vsel %vm10435_vm1, %v9217_v51, %v13573_v58 }
 0x395   : > { %v6183_v57 = vld [vmem:[#allocation3 + $0x50] sm:$0x1]  ;;  %v5099_v1 = vld [vmem:[#allocation3 + $0x60] sm:$0xf]  ;;  %4972 = vst.msk [vmem:[#allocation3 + $0x88] sm:$0xf] %vm4894_vm14, %v4758_v56 }
 0x396   : > { %4975 = vst [vmem:[#allocation3 + $0x8c] sm:$0x1] %v4974_v30  ;;  %v6346_v36 = vrot.slane %v6344_v0, 5  ;;  %v7856_v8 = vrot.slane %v12046_v53, 5  ;;  %5611 = vst.msk [vmem:[#allocation5 + $0x54] sm:$0xf] %vm5603_vm7, %v5522_v3  ;;  %6870 = vrot.lane.b32.xlu0 %v6761_v2, %s9822_s23  ;;  %v6885_v55 = vpop.permute.xlu1 %6884  ;;  %v5857_v21 = vpop.permute.xlu0 %5856 }
 0x397   : > { %6972 = vst.msk [vmem:[#allocation5 + $0x4c] sm:$0xf] %vm5603_vm7, %v6883_v61  ;;  %v5988_v33 = vld [vmem:[#allocation3 + $0x64] sm:$0xf]  ;;  %v7415_v62 = vrot.slane %v7414_v9, 4  ;;  %v7427_v42 = vshll.u32 %v7214_v45, 16 }
 0x398   : > { %v7859_v26 = vrot.slane %v12059_v16, 5  ;;  %6067 = vrot.lane.b32.xlu1 %v5988_v33, %s9824_s17  ;;  %v6347_v7 = vsel %vm10148_vm9, %v6342_v25, %v6346_v36  ;;  %v6350_v19 = vrot.slane %v6348_v5, 4  ;;  %v6354_v17 = vshll.u32 %v6183_v57, 16  ;;  %v12093_v31 = vld [vmem:[#allocation3 + $0x8] sm:$0x1] }
 0x399   : > { %v9183_v32 = vrot.slane %v12069_v43, 9  ;;  %v5734_v53 = vrot.slane %v5637_v59, 5  ;;  %v5316_v9 = vshrl.u32 %v5099_v1, 16  ;;  %v5319_v12 = vshll.u32 %v5099_v1, 16  ;;  %6640 = vst.msk [vmem:[#allocation5 + $0x7c] sm:$0xf] %vm4894_vm14, %v6347_v7 }
 0x39a   : > { %v12096_v6 = vld [vmem:[#allocation3 + $0x48] sm:$0xe]  ;;  %v12098_v23 = vld [vmem:[#allocation3 + $0x3c] sm:$0xe]  ;;  %v9683_v0 = vld [vmem:[#allocation5 + $0x34] ss:$12 sps:$4 sm:$0xff]   ;;  %v6351_v18 = vor.u32 %v6350_v19, %v6346_v36  ;;  %v7420_v63 = vsel %vm10148_vm9, %v7415_v62, %v12055_v50  ;;  %v6764_v5 = vsel %vm10435_vm1, %v11899_v34, %v6763_v28  ;;  %v7857_v2 = vsel %vm10435_vm1, %v9216_v13, %v7856_v8  ;;  %v5859_v1 = vpop.permute.xlu1 %5858  ;;  %v7076_v29 = vpop.permute.xlu0 %7075 }
 0x39b   : > { %v9685_v40 = vld [vmem:[#allocation5 + $0x30] ss:$12 sps:$4 sm:$0xff]   ;;  %v6356_v49 = vrot.slane %v6354_v17, 5  ;;  %v12106_v45 = vld [vmem:[#allocation3 + $0x4c] sm:$0xf]  ;;  %v7425_v10 = vrot.slane %v7424_v27, 4  ;;  %7651 = vrot.lane.b32.xlu0 %v7420_v63, %s9824_s17  ;;  %8568 = vmatprep.mubr.bf16.mxu1 %v9683_v0  ;;  %v5735_v57 = vsel %vm10435_vm1, %v9183_v32, %v5734_v53 }
 0x39c   : > { %6973 = vst.msk [vmem:[#allocation5 + $0x58] sm:$0xf] %vm5603_vm7, %v6885_v55  ;;  %v7429_v43 = vrot.slane %v7427_v42, 5  ;;  %v5100_v59 = vld [vmem:[#allocation3 + $0x64] sm:$0xf]  ;;  %v12119_v51 = vrot.slane %v7856_v8, 4  ;;  %6872 = vrot.lane.b32.xlu1 %v6764_v5, %s9822_s23  ;;  %8569 = vmatmul.mubr.bf16.gmra.mxu1 %v9685_v40 }
 0x39d   : > { %5947 = vst.msk [vmem:[#allocation5 + $0x48] sm:$0xf] %vm5940_vm4, %v5857_v21  ;;  %v12121_v56 = vld [vmem:[#allocation3 + $0x50] sm:$0x1]  ;;  %v12123_v30 = vld [vmem:[#allocation3 + $0x40] sm:$0xf] }
 0x39e   : > { %7995 = vst.msk [vmem:[#allocation5 + $0x38] sm:$0xf] %vm4894_vm14, %v7864_v52  ;;  %v6352_v50 = vrot.slane %v6351_v18, 4  ;;  %v12129_v28 = vld [vmem:[#allocation3 + $0x44] sm:$0x1]  ;;  %v5736_v3 = vrot.slane %v5734_v53, 4  ;;  %v7430_v47 = vsel %vm10148_vm9, %v7425_v10, %v7429_v43  ;;  %v7078_v52 = vpop.permute.xlu1 %7077 }
 0x39f   : > { %v12131_v34 = vld [vmem:[#allocation3 + $0x60] sm:$0xe]  ;;  %v5737_v61 = vrot.slane %v12093_v31, 5  ;;  %v5318_v25 = vrot.slane %v5316_v9, 4  ;;  %v5321_v36 = vrot.slane %v5319_v12, 5  ;;  %v5325_v33 = vshll.u32 %v5100_v59, 16  ;;  %5844 = vrot.lane.b32.xlu0 %v5735_v57, %s9823_s15 }
 0x3a0   : > { %v6357_v62 = vsel %vm10148_vm9, %v6352_v50, %v6356_v49  ;;  %v6184_v27 = vld [vmem:[#allocation3 + $0x54] sm:$0xf]  ;;  %7993 = vst.msk [vmem:[#allocation5 + $0x20] sm:$0xf] %vm4894_vm14, %v7857_v2  ;;  %v9219_v42 = vrot.slane %v12096_v6, 9  ;;  %v9218_v7 = vrot.slane %v12098_v23, 9  ;;  %7653 = vrot.lane.b32.xlu1 %v7430_v47, %s9824_s17  ;;  %v6050_v49 = vpop.permute.xlu0 %6049 }
 0x3a1   : > { %5948 = vst.msk [vmem:[#allocation5 + $0x54] sm:$0xf] %vm5940_vm4, %v5859_v1  ;;  %7165 = vst.msk [vmem:[#allocation5 + $0x4c] sm:$0xf] %vm5940_vm4, %v7076_v29  ;;  %v5329_v13 = vshrl.u32 %v5100_v59, 16  ;;  %v13576_v19 = vrot.slane %v12106_v45, 5  ;;  %v5738_v0 = vsel %vm10435_vm1, %v5736_v3, %v5737_v61  ;;  %v5322_v63 = vor.u32 %v5321_v36, %v5318_v25 }
 0x3a2   : > { %v7193_v8 = vld [vmem:[#allocation3 + $0x20] sm:$0x1]  ;;  %6641 = vst.msk [vmem:[#allocation5 + $0x88] sm:$0xf] %vm4894_vm14, %v6357_v62  ;;  %v7870_v32 = vrot.slane %v12123_v30, 5  ;;  %v6359_v40 = vshrl.u32 %v6184_v27, 16  ;;  %v7252_v29 = vsel %vm10148_vm9, %v11923_v44, %v11903_v48 }
 0x3a3   : > { %v6185_v31 = vld [vmem:[#allocation3 + $0x58] sm:$0xf]  ;;  %v12157_v12 = vld [vmem:[#allocation3 + $0x54] sm:$0xe]  ;;  %v12159_v55 = vld [vmem:[#allocation3 + $0x64] sm:$0xf]  ;;  %v9535_v53 = vpop.f32.mrf.mxu0 }
 0x3a4   : > { %v6999_v21 = vld [vmem:[#allocation3 + $0x18] sm:$0xf]  ;;  %v12163_v18 = vld [vmem:[#allocation3 + $0x68] sm:$0x1]  ;;  %v12165_v5 = vrot.slane %v5325_v33, 5  ;;  %v7259_v10 = vshll.u32 %v7193_v8, 16  ;;  %5846 = vrot.lane.b32.xlu1 %v5738_v0, %s9823_s15 }
 0x3a5   : > { %v5101_v43 = vld [vmem:[#allocation3 + $0x68] sm:$0x1]  ;;  %v12167_v59 = vld [vmem:[#allocation3 + $0x58] sm:$0xf]  ;;  %6140 = vst.msk [vmem:[#allocation5 + $0x48] sm:$0xf] %vm6133_vm5, %v6050_v49  ;;  %7063 = vrot.lane.b32.xlu0 %v6999_v21, %s9823_s15  ;;  %v6052_v49 = vpop.permute.xlu1 %6051 }
 0x3a6   : > { %7166 = vst.msk [vmem:[#allocation5 + $0x58] sm:$0xf] %vm5940_vm4, %v7078_v52  ;;  %v5331_v50 = vrot.slane %v5329_v13, 4  ;;  %v6361_v57 = vrot.slane %v6359_v40, 4  ;;  %v6362_v2 = vshll.u32 %v6184_v27, 16  ;;  %v6368_v3 = vshll.u32 %v6185_v31, 16  ;;  %v7636_v40 = vpop.permute.xlu0 %7635 }
 0x3a7   : > { %v9220_v61 = vrot.slane %v12157_v12, 9  ;;  %v12172_v1 = vld [vmem:[#allocation3 + $0x5c] sm:$0x1]  ;;  %v12180_v25 = vrot.slane %v7256_v24, 4  ;;  %v7891_v33 = vrot.slane %v12159_v55, 5  ;;  %v5335_v27 = vshll.u32 %v5101_v43, 16  ;;  %v4338_v24 = vpop.f32.mrf.mxu0 }
 0x3a8   : > { %v6186_v36 = vld [vmem:[#allocation3 + $0x5c] sm:$0x1]  ;;  %v5973_v62 = vld [vmem:[#allocation3 + $0xc] sm:$0xf]  ;;  %v6364_v13 = vrot.slane %v6362_v2, 5  ;;  %v6372_v8 = vshrl.u32 %v6185_v31, 16  ;;  %v5332_v31 = vor.u32 %v5331_v50, %v12165_v5 }
 0x3a9   : > { %v12183_v47 = vld [vmem:[#allocation3 + $0x6c] sm:$0xe]  ;;  %v13575_v0 = vrot.slane %v12167_v59, 5  ;;  %v12187_v52 = vrot.slane %v5322_v63, 4  ;;  %v12189_v48 = vrot.slane %v7259_v10, 5  ;;  %v6370_v17 = vrot.slane %v6368_v3, 5  ;;  %6037 = vrot.lane.b32.xlu0 %v5973_v62, %s9824_s17 }
 0x3aa   : > { %v12191_v44 = vld [vmem:[#allocation3 + $0x70] sm:$0xf]  ;;  %7725 = vst.msk [vmem:[#allocation5 + $0x4c] sm:$0xf] %vm6133_vm5, %v7636_v40  ;;  %6141 = vst.msk [vmem:[#allocation5 + $0x54] sm:$0xf] %vm6133_vm5, %v6052_v49  ;;  %v6365_v21 = vor.u32 %v6364_v13, %v6361_v57  ;;  %v4401_v40 = vmul.f32 %v11964_v14, %v9535_v53  ;;  %v5524_v35 = vpop.permute.xlu0 %5523 }
 0x3ab   : > { %v7000_v43 = vld [vmem:[#allocation3 + $0x1c] sm:$0xf]  ;;  %v12197_v2 = vld [vmem:[#allocation3 + $0x64] sm:$0xf]  ;;  %v7262_v63 = vsel %vm10148_vm9, %v12180_v25, %v12189_v48  ;;  %v9207_v10 = vrot.slane %v12183_v47, 9  ;;  %v6378_v49 = vshll.u32 %v6186_v36, 16  ;;  %v5328_v25 = vsel %vm10148_vm9, %v12187_v52, %v12165_v5  ;;  %v9536_v5 = vpop.f32.mrf.mxu0 }
 0x3ac   : > { %7065 = vrot.lane.b32.xlu1 %v7000_v43, %s9823_s15  ;;  %v12207_v50 = vrot.slane %v5335_v27, 5  ;;  %v6816_v57 = vrot.slane %v12191_v44, 5  ;;  %v6688_v3 = vld [vmem:[#allocation3 + $0x74] sm:$0x1]  ;;  %v6366_v13 = vrot.slane %v6365_v21, 4  ;;  %v6374_v62 = vrot.slane %v6372_v8, 4  ;;  %v7638_v43 = vpop.permute.xlu1 %7637 }
 0x3ad   : > { %v5660_v48 = vld [vmem:[#allocation3 + $0x60] sm:$0xe]  ;;  %v5790_v47 = vrot.slane %v12197_v2, 5  ;;  %v5662_v53 = vld [vmem:[#allocation3 + $0x68] sm:$0x1]  ;;  %v4439_v36 = vadd.f32 %v11978_v54, %v4401_v40  ;;  %v4399_v27 = vmul.f32 %v11964_v14, %v4338_v24  ;;  %v5333_v21 = vrot.slane %v5332_v31, 4  ;;  %7623 = vrot.lane.b32.xlu0 %v7252_v29, %s9824_s17 }
 0x3ae   : > { %5612 = vst.msk [vmem:[#allocation5 + $0x60] sm:$0xf] %vm5603_vm7, %v5524_v35  ;;  %v5974_v8 = vld [vmem:[#allocation3 + $0x10] sm:$0xf]  ;;  %v6371_v44 = vsel %vm10148_vm9, %v6366_v13, %v6370_v17  ;;  %v6380_v58 = vrot.slane %v6378_v49, 5  ;;  %v6375_v46 = vor.u32 %v6374_v62, %v6370_v17  ;;  %v6819_v52 = vrot.slane %v6688_v3, 5  ;;  %v4341_v17 = vpop.f32.mrf.mxu0  ;;  %v6887_v38 = vpop.permute.xlu0 %6886 }
 0x3af   : > { %7726 = vst.msk [vmem:[#allocation5 + $0x58] sm:$0xf] %vm6133_vm5, %v7638_v43  ;;  %v12223_v2 = vld [vmem:[#allocation3 + $0x78] sm:$0xf]  ;;  %v4471_v35 = vmax.f32 %v4439_v36, 0.0  ;;  %v4437_v24 = vadd.f32 %v11978_v54, %v4399_v27  ;;  %v4402_v31 = vmul.f32 %v11964_v14, %v9536_v5  ;;  %v6818_v40 = vrot.slane %v6816_v57, 4 }
 0x3b0   : > { %6039 = vrot.lane.b32.xlu1 %v5974_v8, %s9824_s17  ;;  %6642 = vst.msk [vmem:[#allocation5 + $0x94] sm:$0xf] %vm4894_vm14, %v6371_v44  ;;  %v9191_v43 = vrot.slane %v5660_v48, 9  ;;  %v5793_v13 = vrot.slane %v5662_v53, 5  ;;  %v6376_v49 = vrot.slane %v6375_v46, 4  ;;  %v5526_v62 = vpop.permute.xlu1 %5525  ;;  %v5792_v29 = vrot.slane %v5790_v47, 4 }
 0x3b1   : > { %v9347_v9 = vpack.c.bf16 %v4471_v35, %v4471_v35  ;;  %v4469_v8 = vmax.f32 %v4437_v24, 0.0  ;;  %v4440_v3 = vadd.f32 %v11978_v54, %v4402_v31  ;;  %v9703_v36 = vld [vmem:[%s13569_s4 + $0x88] sm:$0xff]   ;;  %5613 = vst.msk [vmem:[#allocation5 + $0x6c] sm:$0xf] %vm5603_vm7, %v5526_v62  ;;  %6974 = vst.msk [vmem:[#allocation5 + $0x64] sm:$0xf] %vm5603_vm7, %v6887_v38  ;;  %v5338_v46 = vsel %vm10148_vm9, %v5333_v21, %v12207_v50 }
 0x3b2   : > { %v6817_v48 = vsel %vm10435_vm1, %v9207_v10, %v6816_v57  ;;  %v7432_v53 = vshrl.u32 %v12223_v2, 16  ;;  %v6381_v27 = vsel %vm10148_vm9, %v6376_v49, %v6380_v58  ;;  %5539 = vrot.lane.b32.xlu0 %v5328_v25, %s9822_s23  ;;  %v12244_v44 = vld [vmem:[#allocation3 + $0x7c] sm:$0xf]  ;;  %v6820_v10 = vsel %vm10435_vm1, %v6818_v40, %v6819_v52  ;;  %v12252_v21 = vld [vmem:[#allocation3 + $0x6c] sm:$0xf]  ;;  %9541 = vmatprep.subr.bf16.mxu0 %v9703_v36 }
 0x3b3   : > { %v4795_v5 = vshrl.u32 %v9347_v9, 16  ;;  %v4798_v38 = vshll.u32 %v9347_v9, 16  ;;  %v9345_v35 = vpack.c.bf16 %v4469_v8, %v4469_v8  ;;  %6643 = vst.msk [vmem:[#allocation5 + $0xa0] sm:$0xf] %vm4894_vm14, %v6381_v27  ;;  %v4472_v50 = vmax.f32 %v4440_v3, 0.0  ;;  %v5861_v9 = vpop.permute.xlu0 %5860 }
 0x3b4   : > { %7625 = vrot.lane.b32.xlu1 %v7262_v63, %s9824_s17  ;;  %v5791_v57 = vsel %vm10435_vm1, %v9191_v43, %v5790_v47  ;;  %v7435_v58 = vshll.u32 %v12223_v2, 16  ;;  %v4990_v25 = vld [vmem:[#allocation3 + $0xa8] sm:$0xf]  ;;  %v4400_v63 = vmul.f32 %v11964_v14, %v4341_v17  ;;  %v6889_v24 = vpop.permute.xlu1 %6888  ;;  %v9688_v49 = vld [vmem:[#allocation5 + $0x48] ss:$12 sps:$4 sm:$0xff]   ;;  %v12257_v62 = vsel %vm10435_vm1, %v5792_v29, %v5793_v13 }
 0x3b5   : > { %v4797_v52 = vrot.slane %v4795_v5, 7  ;;  %v9348_v40 = vpack.c.bf16 %v4472_v50, %v4472_v50  ;;  %v7860_v47 = vsel %vm10435_vm1, %v12119_v51, %v7859_v26  ;;  %6975 = vst.msk [vmem:[#allocation5 + $0x70] sm:$0xf] %vm5603_vm7, %v6889_v24  ;;  %v7441_v14 = vshll.u32 %v12244_v44, 16  ;;  %v5027_v13 = vld [vmem:[#allocation3 + $0x60] sm:$0xf] }
 0x3b6   : > { %v9686_v31 = vld [vmem:[#allocation5 + $0x4c] ss:$12 sps:$4 sm:$0xff]   ;;  %5949 = vst.msk [vmem:[#allocation5 + $0x60] sm:$0xf] %vm5940_vm4, %v5861_v9  ;;  %v4778_v2 = vshrl.u32 %v9345_v35, 16  ;;  %v4781_v43 = vshll.u32 %v9345_v35, 16  ;;  %v4438_v17 = vadd.f32 %v11978_v54, %v4400_v63  ;;  %6902 = vrot.lane.b32.xlu0 %v6817_v48, %s9822_s23 }
 0x3b7   : > { %7994 = vst.msk [vmem:[#allocation5 + $0x2c] sm:$0xf] %vm4894_vm14, %v7860_v47  ;;  %v12271_v16 = vrot.slane %v7432_v53, 4  ;;  %v4800_v26 = vor.u32 %v4798_v38, %v4797_v52  ;;  %v4983_v51 = vld [vmem:[#allocation3 + $0x9c] sm:$0xf]  ;;  %v4803_v29 = vshrl.u32 %v9348_v40, 16  ;;  %8576 = vmatprep.mubr.bf16.mxu1 %v9686_v31  ;;  %v7080_v53 = vpop.permute.xlu0 %7079 }
 0x3b8   : > { %5541 = vrot.lane.b32.xlu1 %v5338_v46, %s9822_s23  ;;  %v4806_v8 = vshll.u32 %v9348_v40, 16  ;;  %5059 = vst.msk [vmem:[#allocation5 + $0xc0] sm:$0xf] %vm4894_vm14, %v5027_v13  ;;  %v5028_v3 = vld [vmem:[#allocation3 + $0x64] sm:$0xf]  ;;  %v7445_v36 = vshrl.u32 %v12244_v44, 16  ;;  %8577 = vmatmul.mubr.bf16.gmra.mxu1 %v9688_v49  ;;  %v5863_v48 = vpop.permute.xlu1 %5862 }
 0x3b9   : > { %v5103_v54 = vld [vmem:[#allocation3 + $0x70] sm:$0xf]  ;;  %v5340_v27 = vshrl.u32 %v12252_v21, 16  ;;  %v12276_v5 = vrot.slane %v4778_v2, 7  ;;  %v4470_v46 = vmax.f32 %v4438_v17, 0.0  ;;  %v5343_v38 = vshll.u32 %v12252_v21, 16 }
 0x3ba   : > { %5060 = vst.msk [vmem:[#allocation5 + $0xcc] sm:$0xf] %vm4894_vm14, %v5028_v3  ;;  %v4801_v35 = vrot.slane %v4797_v52, 4  ;;  %v4991_v50 = vsel %vm11320_vm2, %v4800_v26, %v4990_v25  ;;  %v4805_v63 = vrot.slane %v4803_v29, 7  ;;  %v4994_v24 = vld [vmem:[#allocation3 + $0xb0] sm:$0x1]  ;;  %5876 = vrot.lane.b32.xlu0 %v5791_v57, %s9823_s15 }
 0x3bb   : > { %5950 = vst.msk [vmem:[#allocation5 + $0x6c] sm:$0xf] %vm5940_vm4, %v5863_v48  ;;  %7167 = vst.msk [vmem:[#allocation5 + $0x64] sm:$0xf] %vm5940_vm4, %v7080_v53  ;;  %v7437_v44 = vrot.slane %v7435_v58, 5  ;;  %v12284_v9 = vrot.slane %v7441_v14, 5  ;;  %v4783_v31 = vor.u32 %v4781_v43, %v12276_v5  ;;  %v9346_v49 = vpack.c.bf16 %v4470_v46, %v4470_v46  ;;  %v6054_v29 = vpop.permute.xlu0 %6053 }
 0x3bc   : > { %4992 = vst [vmem:[#allocation3 + $0xa8] sm:$0xf] %v4991_v50  ;;  %v6187_v40 = vld [vmem:[#allocation3 + $0x60] sm:$0xf]  ;;  %6904 = vrot.lane.b32.xlu1 %v6820_v10, %s9822_s23  ;;  %v5349_v21 = vshll.u32 %v5103_v54, 16  ;;  %v5353_v25 = vshrl.u32 %v5103_v54, 16  ;;  %v4808_v52 = vor.u32 %v4806_v8, %v4805_v63  ;;  %v7082_v26 = vpop.permute.xlu1 %7081 }
 0x3bd   : > { %v4810_v47 = vrot.slane %v4805_v63, 4  ;;  %v7015_v2 = vld [vmem:[#allocation3 + $0x78] sm:$0xf]  ;;  %v12289_v17 = vld [vmem:[#allocation3 + $0x80] sm:$0x1]  ;;  %v12291_v13 = vrot.slane %v7445_v36, 4  ;;  %v4984_v58 = vsel %vm11320_vm2, %v4783_v31, %v4983_v51  ;;  %v7438_v51 = vor.u32 %v7437_v44, %v12271_v16 }
 0x3be   : > { %v4786_v14 = vshrl.u32 %v9346_v49, 16  ;;  %v4789_v43 = vshll.u32 %v9346_v49, 16  ;;  %v5342_v3 = vrot.slane %v5340_v27, 4  ;;  %v5345_v10 = vrot.slane %v5343_v38, 5  ;;  %4985 = vst [vmem:[#allocation3 + $0x9c] sm:$0xf] %v4984_v58  ;;  %7095 = vrot.lane.b32.xlu0 %v7015_v2, %s9823_s15 }
 0x3bf   : > { %v4809_v57 = vsel %vm10153_vm11, %v4801_v35, %v4808_v52  ;;  %v4995_v8 = vsel %vm11330_vm10, %v4810_v47, %v4994_v24  ;;  %v4987_v54 = vld [vmem:[#allocation3 + $0xa4] sm:$0x1]  ;;  %7168 = vst.msk [vmem:[#allocation5 + $0x70] sm:$0xf] %vm5940_vm4, %v7082_v26  ;;  %v4784_v36 = vrot.slane %v12276_v5, 4  ;;  %v6383_v48 = vshrl.u32 %v6187_v40, 16  ;;  %v7640_v47 = vpop.permute.xlu0 %7639 }
 0x3c0   : > { %v12299_v46 = vld [vmem:[#allocation3 + $0x64] sm:$0xf]  ;;  %6142 = vst.msk [vmem:[#allocation5 + $0x60] sm:$0xf] %vm6133_vm5, %v6054_v29  ;;  %4996 = vst [vmem:[#allocation3 + $0xb0] sm:$0x1] %v4995_v8  ;;  %5878 = vrot.lane.b32.xlu1 %v12257_v62, %s9823_s15  ;;  %v7448_v5 = vor.u32 %v12291_v13, %v12284_v9  ;;  %v6056_v2 = vpop.permute.xlu1 %6055 }
 0x3c1   : > { %4993 = vst.msk [vmem:[#allocation3 + $0xac] sm:$0xf] %vm4894_vm14, %v4809_v57  ;;  %v4788_v27 = vrot.slane %v4786_v14, 7  ;;  %v5029_v53 = vld [vmem:[#allocation3 + $0x6c] sm:$0xf]  ;;  %v7451_v35 = vshll.u32 %v12289_v17, 16  ;;  %v5346_v17 = vor.u32 %v5345_v10, %v5342_v3 }
 0x3c2   : > { %v12306_v38 = vld [vmem:[#allocation3 + $0x78] sm:$0xe]  ;;  %v12312_v50 = vrot.slane %v5349_v21, 5  ;;  %v5355_v16 = vrot.slane %v5353_v25, 4  ;;  %v6386_v63 = vshll.u32 %v6187_v40, 16  ;;  %v6385_v49 = vrot.slane %v6383_v48, 4 }
 0x3c3   : > { %5061 = vst.msk [vmem:[#allocation5 + $0xd8] sm:$0xf] %vm4894_vm14, %v5029_v53  ;;  %v5104_v24 = vld [vmem:[#allocation3 + $0x74] sm:$0x1]  ;;  %v4791_v44 = vor.u32 %v4789_v43, %v4788_v27  ;;  %v4793_v31 = vrot.slane %v4788_v27, 4  ;;  %v6392_v25 = vshll.u32 %v12299_v46, 16 }
 0x3c4   : > { %v12317_v52 = vld [vmem:[#allocation3 + $0x6c] sm:$0xe]  ;;  %v12319_v62 = vld [vmem:[#allocation3 + $0x7c] sm:$0xf]  ;;  %v6388_v21 = vrot.slane %v6386_v63, 5  ;;  %v7439_v14 = vrot.slane %v7438_v51, 4  ;;  %v5356_v3 = vor.u32 %v5355_v16, %v12312_v50  ;;  %v7642_v63 = vpop.permute.xlu1 %7641 }
 0x3c5   : > { %7727 = vst.msk [vmem:[#allocation5 + $0x64] sm:$0xf] %vm6133_vm5, %v7640_v47  ;;  %6143 = vst.msk [vmem:[#allocation5 + $0x6c] sm:$0xf] %vm6133_vm5, %v6056_v2  ;;  %v7016_v13 = vld [vmem:[#allocation3 + $0x7c] sm:$0xf]  ;;  %v4792_v43 = vsel %vm10153_vm11, %v4784_v36, %v4791_v44  ;;  %v4988_v26 = vsel %vm11330_vm10, %v4793_v31, %v4987_v54  ;;  %v5528_v44 = vpop.permute.xlu0 %5527 }
 0x3c6   : > { %v5989_v58 = vld [vmem:[#allocation3 + $0x6c] sm:$0xf]  ;;  %v12329_v29 = vld [vmem:[#allocation3 + $0x80] sm:$0x1]  ;;  %7097 = vrot.lane.b32.xlu1 %v7016_v13, %s9823_s15  ;;  %v5359_v10 = vshll.u32 %v5104_v24, 16  ;;  %v6389_v8 = vor.u32 %v6388_v21, %v6385_v49  ;;  %v6396_v51 = vshrl.u32 %v12299_v46, 16  ;;  %v7871_v46 = vsel %vm10435_vm1, %v9218_v7, %v7870_v32 }
 0x3c7   : > { %6069 = vrot.lane.b32.xlu0 %v5989_v58, %s9824_s17  ;;  %v12334_v57 = vld [vmem:[#allocation3 + $0x7c] sm:$0xf]  ;;  %4986 = vst.msk [vmem:[#allocation3 + $0xa0] sm:$0xf] %vm4894_vm14, %v4792_v43  ;;  %4989 = vst [vmem:[#allocation3 + $0xa4] sm:$0x1] %v4988_v26 }
 0x3c8   : > { %v12340_v27 = vld [vmem:[#allocation3 + $0x70] sm:$0xf]  ;;  %v7449_v48 = vrot.slane %v7448_v5, 4  ;;  %v7453_v53 = vrot.slane %v7451_v35, 5  ;;  %v5347_v16 = vrot.slane %v5346_v17, 4  ;;  %v6390_v24 = vrot.slane %v6389_v8, 4 }
 0x3c9   : > { %v6394_v31 = vrot.slane %v6392_v25, 5  ;;  %v6189_v47 = vld [vmem:[#allocation3 + $0x68] sm:$0x1]  ;;  %v12349_v2 = vld [vmem:[#allocation3 + $0x74] sm:$0x1]  ;;  %v7444_v35 = vsel %vm10148_vm9, %v7439_v14, %v12284_v9  ;;  %v6823_v21 = vrot.slane %v12334_v57, 5  ;;  %v5530_v57 = vpop.permute.xlu1 %5529  ;;  %v6891_v8 = vpop.permute.xlu0 %6890 }
 0x3ca   : > { %7728 = vst.msk [vmem:[#allocation5 + $0x70] sm:$0xf] %vm6133_vm5, %v7642_v63  ;;  %v5990_v5 = vld [vmem:[#allocation3 + $0x70] sm:$0xf]  ;;  %v6689_v17 = vld [vmem:[#allocation3 + $0x78] sm:$0xe]  ;;  %v7454_v63 = vsel %vm10148_vm9, %v7449_v48, %v7453_v53 }
 0x3cb   : > { %5614 = vst.msk [vmem:[#allocation5 + $0x78] sm:$0xf] %vm5603_vm7, %v5528_v44  ;;  %7655 = vrot.lane.b32.xlu0 %v7444_v35, %s9824_s17  ;;  %6071 = vrot.lane.b32.xlu1 %v5990_v5, %s9824_s17  ;;  %v5357_v23 = vrot.slane %v5356_v3, 4  ;;  %v5361_v7 = vrot.slane %v5359_v10, 5  ;;  %v6691_v25 = vld [vmem:[#allocation3 + $0x80] sm:$0x1]  ;;  %v6395_v13 = vsel %vm10148_vm9, %v6390_v24, %v6394_v31  ;;  %v5352_v3 = vsel %vm10148_vm9, %v5347_v16, %v12312_v50 }
 0x3cc   : > { %7997 = vst.msk [vmem:[#allocation5 + $0x50] sm:$0xf] %vm4894_vm14, %v7871_v46  ;;  %v6398_v58 = vrot.slane %v6396_v51, 4  ;;  %v7898_v43 = vrot.slane %v12340_v27, 5  ;;  %v5663_v9 = vld [vmem:[#allocation3 + $0x6c] sm:$0xe]  ;;  %v7878_v50 = vsel %vm10435_vm1, %v9219_v42, %v13576_v19 }
 0x3cd   : > { %v5664_v14 = vld [vmem:[#allocation3 + $0x70] sm:$0xf]  ;;  %6644 = vst.msk [vmem:[#allocation5 + $0xac] sm:$0xf] %vm4894_vm14, %v6395_v13  ;;  %v6402_v26 = vshll.u32 %v6189_v47, 16  ;;  %v9208_v10 = vrot.slane %v6689_v17, 9  ;;  %v5362_v53 = vsel %vm10148_vm9, %v5357_v23, %v5361_v7  ;;  %v7885_v7 = vsel %vm10435_vm1, %v9220_v61, %v13575_v0 }
 0x3ce   : > { %v12369_v44 = vld [vmem:[#allocation3 + $0x74] sm:$0x1]  ;;  %v7218_v51 = vld [vmem:[#allocation3 + $0x84] sm:$0xf]  ;;  %v6399_v24 = vor.u32 %v6398_v58, %v6394_v31  ;;  %5615 = vst.msk [vmem:[#allocation5 + $0x84] sm:$0xf] %vm5603_vm7, %v5530_v57  ;;  %v6893_v57 = vpop.permute.xlu1 %6892 }
 0x3cf   : > { %6976 = vst.msk [vmem:[#allocation5 + $0x7c] sm:$0xf] %vm5603_vm7, %v6891_v8  ;;  %v6825_v46 = vrot.slane %v6823_v21, 4  ;;  %v6826_v47 = vrot.slane %v6691_v25, 5  ;;  %v7219_v35 = vld [vmem:[#allocation3 + $0x88] sm:$0xf]  ;;  %7657 = vrot.lane.b32.xlu1 %v7454_v63, %s9824_s17  ;;  %5543 = vrot.lane.b32.xlu0 %v5352_v3, %s9822_s23  ;;  %v5865_v8 = vpop.permute.xlu0 %5864  ;;  %v6824_v63 = vsel %vm10435_vm1, %v9208_v10, %v6823_v21 }
 0x3d0   : > { %v6404_v5 = vrot.slane %v6402_v26, 5  ;;  %v6166_v13 = vld [vmem:[#allocation3 + $0xc] sm:$0xf]  ;;  %v9192_v16 = vrot.slane %v5663_v9, 9  ;;  %v5105_v31 = vld [vmem:[#allocation3 + $0x78] sm:$0xf] }
 0x3d1   : > { %v6400_v17 = vrot.slane %v6399_v24, 4  ;;  %7999 = vst.msk [vmem:[#allocation5 + $0x68] sm:$0xf] %vm4894_vm14, %v7878_v50  ;;  %v5797_v25 = vrot.slane %v5664_v14, 5  ;;  %v5800_v6 = vrot.slane %v12369_v44, 5  ;;  %v7456_v58 = vshrl.u32 %v7218_v51, 16 }
 0x3d2   : > { %v7459_v26 = vshll.u32 %v7218_v51, 16  ;;  %v6167_v42 = vld [vmem:[#allocation3 + $0x10] sm:$0xf]  ;;  %v9689_v3 = vld [vmem:[#allocation5 + $0x64] ss:$12 sps:$4 sm:$0xff]   ;;  %v7465_v48 = vshll.u32 %v7219_v35, 16  ;;  %v6827_v21 = vsel %vm10435_vm1, %v6825_v46, %v6826_v47 }
 0x3d3   : > { %v9691_v49 = vld [vmem:[#allocation5 + $0x60] ss:$12 sps:$4 sm:$0xff]   ;;  %v6405_v23 = vsel %vm10148_vm9, %v6400_v17, %v6404_v5  ;;  %6977 = vst.msk [vmem:[#allocation5 + $0x88] sm:$0xf] %vm5603_vm7, %v6893_v57  ;;  %v7469_v9 = vshrl.u32 %v7219_v35, 16  ;;  %v5364_v14 = vshrl.u32 %v5105_v31, 16  ;;  %5545 = vrot.lane.b32.xlu1 %v5362_v53, %s9822_s23  ;;  %6906 = vrot.lane.b32.xlu0 %v6824_v63, %s9822_s23  ;;  %v5798_v46 = vsel %vm10435_vm1, %v9192_v16, %v5797_v25  ;;  %v5867_v53 = vpop.permute.xlu1 %5866 }
 0x3d4   : > { %5951 = vst.msk [vmem:[#allocation5 + $0x78] sm:$0xf] %vm5940_vm4, %v5865_v8  ;;  %v5367_v10 = vshll.u32 %v5105_v31, 16  ;;  %v12401_v51 = vld [vmem:[#allocation3 + $0x14] sm:$0x1]  ;;  %v6215_v61 = vshrl.u32 %v6166_v13, 16  ;;  %8584 = vmatprep.mubr.bf16.mxu1 %v9689_v3  ;;  %v7084_v8 = vpop.permute.xlu0 %7083 }
 0x3d5   : > { %6645 = vst.msk [vmem:[#allocation5 + $0xb8] sm:$0xf] %vm4894_vm14, %v6405_v23  ;;  %8001 = vst.msk [vmem:[#allocation5 + $0x80] sm:$0xf] %vm4894_vm14, %v7885_v7  ;;  %v5106_v12 = vld [vmem:[#allocation3 + $0x7c] sm:$0xf]  ;;  %8585 = vmatmul.mubr.bf16.gmra.mxu1 %v9691_v49 }
 0x3d6   : > { %v6218_v24 = vshll.u32 %v6166_v13, 16  ;;  %v6224_v5 = vshll.u32 %v6167_v42, 16  ;;  %v6228_v50 = vshrl.u32 %v6167_v42, 16  ;;  %v12406_v17 = vld [vmem:[#allocation3 + $0x90] sm:$0xe]  ;;  %v5799_v47 = vrot.slane %v5797_v25, 4 }
 0x3d7   : > { %v7458_v35 = vrot.slane %v7456_v58, 4  ;;  %v7461_v31 = vrot.slane %v7459_v26, 5  ;;  %v12410_v57 = vld [vmem:[#allocation3 + $0x84] sm:$0xe]  ;;  %v12412_v63 = vrot.slane %v7465_v48, 5  ;;  %v6217_v23 = vrot.slane %v6215_v61, 4  ;;  %v9539_v26 = vpop.f32.mrf.mxu0  ;;  %6908 = vrot.lane.b32.xlu1 %v6827_v21, %s9822_s23  ;;  %5880 = vrot.lane.b32.xlu0 %v5798_v46, %s9823_s15  ;;  %v7086_v46 = vpop.permute.xlu1 %7085 }
 0x3d8   : > { %v6220_v13 = vrot.slane %v6218_v24, 5  ;;  %v6226_v7 = vrot.slane %v6224_v5, 5  ;;  %5952 = vst.msk [vmem:[#allocation5 + $0x84] sm:$0xf] %vm5940_vm4, %v5867_v53  ;;  %7169 = vst.msk [vmem:[#allocation5 + $0x7c] sm:$0xf] %vm5940_vm4, %v7084_v8 }
 0x3d9   : > { %v5366_v42 = vrot.slane %v5364_v14, 4  ;;  %v5369_v3 = vrot.slane %v5367_v10, 5  ;;  %v5373_v16 = vshll.u32 %v5106_v12, 16  ;;  %v7220_v25 = vld [vmem:[#allocation3 + $0x8c] sm:$0x1]  ;;  %v7471_v58 = vrot.slane %v7469_v9, 4  ;;  %v4354_v21 = vpop.f32.mrf.mxu0  ;;  %v6058_v10 = vpop.permute.xlu0 %6057 }
 0x3da   : > { %v5377_v49 = vshrl.u32 %v5106_v12, 16  ;;  %v6221_v48 = vor.u32 %v6220_v13, %v6217_v23  ;;  %v6230_v0 = vrot.slane %v6228_v50, 4  ;;  %v6234_v61 = vshll.u32 %v12401_v51, 16  ;;  %v12424_v14 = vld [vmem:[%s13567_s2] ss:$0 sm:$0xff] }
 0x3db   : > { %v7462_v53 = vor.u32 %v7461_v31, %v7458_v35  ;;  %v4405_v9 = vmul.f32 %v12424_v14, %v9539_v26  ;;  %v5801_v51 = vsel %vm10435_vm1, %v5799_v47, %v5800_v6  ;;  %v7475_v12 = vshll.u32 %v7220_v25, 16  ;;  %6144 = vst.msk [vmem:[#allocation5 + $0x78] sm:$0xf] %vm6133_vm5, %v6058_v10  ;;  %v7017_v35 = vld [vmem:[#allocation3 + $0x84] sm:$0xf]  ;;  %v9540_v10 = vpop.f32.mrf.mxu0 }
 0x3dc   : > { %v6222_v50 = vrot.slane %v6221_v48, 4  ;;  %v6231_v8 = vor.u32 %v6230_v0, %v6226_v7  ;;  %7170 = vst.msk [vmem:[#allocation5 + $0x88] sm:$0xf] %vm5940_vm4, %v7086_v46  ;;  %v5370_v31 = vor.u32 %v5369_v3, %v5366_v42  ;;  %v12433_v23 = vrot.slane %v5373_v16, 5  ;;  %v12439_v44 = vld [vmem:[%s13568_s3] ss:$0 sm:$0xff]  ;;  %5882 = vrot.lane.b32.xlu1 %v5801_v51, %s9823_s15  ;;  %7099 = vrot.lane.b32.xlu0 %v7017_v35, %s9823_s15  ;;  %v6060_v51 = vpop.permute.xlu1 %6059 }
 0x3dd   : > { %v7472_v13 = vor.u32 %v7471_v58, %v12412_v63  ;;  %v4443_v6 = vadd.f32 %v12439_v44, %v4405_v9  ;;  %v12444_v0 = vld [vmem:[#allocation3 + $0x80] sm:$0x1]  ;;  %v5379_v47 = vrot.slane %v5377_v49, 4  ;;  %v6236_v16 = vrot.slane %v6234_v61, 5  ;;  %v12448_v25 = vld [vmem:[#allocation3 + $0x94] sm:$0xf]  ;;  %v7644_v46 = vpop.permute.xlu0 %7643 }
 0x3de   : > { %v6227_v42 = vsel %vm10148_vm9, %v6222_v50, %v6226_v7  ;;  %v6232_v3 = vrot.slane %v6231_v8, 4  ;;  %v12450_v58 = vld [vmem:[#allocation3 + $0x98] sm:$0x1]  ;;  %v7463_v48 = vrot.slane %v7462_v53, 4  ;;  %v7018_v35 = vld [vmem:[#allocation3 + $0x88] sm:$0xf]  ;;  %v4403_v61 = vmul.f32 %v12424_v14, %v4354_v21 }
 0x3df   : > { %v5991_v26 = vld [vmem:[#allocation3 + $0x78] sm:$0xf]  ;;  %6630 = vst.msk [vmem:[#allocation5 + $0x4] sm:$0xf] %vm4894_vm14, %v6227_v42  ;;  %v4475_v9 = vmax.f32 %v4443_v6, 0.0  ;;  %v12453_v19 = vrot.slane %v7475_v12, 5  ;;  %v4406_v50 = vmul.f32 %v12424_v14, %v9540_v10  ;;  %v5380_v21 = vor.u32 %v5379_v47, %v12433_v23 }
 0x3e0   : > { %v12455_v49 = vld [vmem:[#allocation3 + $0x88] sm:$0xf]  ;;  %v6237_v7 = vsel %vm10148_vm9, %v6232_v3, %v6236_v16  ;;  %7729 = vst.msk [vmem:[#allocation5 + $0x7c] sm:$0xf] %vm6133_vm5, %v7644_v46  ;;  %6145 = vst.msk [vmem:[#allocation5 + $0x84] sm:$0xf] %vm6133_vm5, %v6060_v51  ;;  %6073 = vrot.lane.b32.xlu0 %v5991_v26, %s9824_s17  ;;  %7101 = vrot.lane.b32.xlu1 %v7018_v35, %s9823_s15  ;;  %v4441_v16 = vadd.f32 %v12439_v44, %v4403_v61  ;;  %v4357_v26 = vpop.f32.mrf.mxu0  ;;  %v7646_v47 = vpop.permute.xlu1 %7645 }
 0x3e1   : > { %v5371_v53 = vrot.slane %v5370_v31, 4  ;;  %v7473_v8 = vrot.slane %v7472_v13, 4  ;;  %6631 = vst.msk [vmem:[#allocation5 + $0x10] sm:$0xf] %vm4894_vm14, %v6237_v7  ;;  %v9351_v6 = vpack.c.bf16 %v4475_v9, %v4475_v9  ;;  %v5030_v12 = vld [vmem:[#allocation3 + $0x70] sm:$0xf]  ;;  %v4444_v10 = vadd.f32 %v12439_v44, %v4406_v50  ;;  %v5532_v7 = vpop.permute.xlu0 %5531 }
 0x3e2   : > { %v12468_v3 = vld [vmem:[#allocation3 + $0x84] sm:$0xe]  ;;  %5062 = vst.msk [vmem:[#allocation5 + $0xe4] sm:$0xf] %vm4894_vm14, %v5030_v12  ;;  %v5992_v31 = vld [vmem:[#allocation3 + $0x7c] sm:$0xf]  ;;  %v7468_v61 = vsel %vm10148_vm9, %v7463_v48, %v12412_v63 }
 0x3e3   : > { %v5383_v13 = vshll.u32 %v12444_v0, 16  ;;  %v6830_v9 = vrot.slane %v12455_v49, 5  ;;  %v4829_v46 = vshrl.u32 %v9351_v6, 16  ;;  %v4832_v51 = vshll.u32 %v9351_v6, 16  ;;  %v6694_v24 = vld [vmem:[#allocation3 + $0x8c] sm:$0x1] }
 0x3e4   : > { %v4473_v50 = vmax.f32 %v4441_v16, 0.0  ;;  %v4476_v42 = vmax.f32 %v4444_v10, 0.0  ;;  %5616 = vst.msk [vmem:[#allocation5 + $0x90] sm:$0xf] %vm5603_vm7, %v5532_v7  ;;  %v5376_v0 = vsel %vm10148_vm9, %v5371_v53, %v12433_v23  ;;  %v7478_v49 = vsel %vm10148_vm9, %v7473_v8, %v12453_v19  ;;  %v5666_v12 = vld [vmem:[#allocation3 + $0x78] sm:$0xe]  ;;  %7659 = vrot.lane.b32.xlu0 %v7468_v61, %s9824_s17  ;;  %6075 = vrot.lane.b32.xlu1 %v5992_v31, %s9824_s17  ;;  %v5534_v5 = vpop.permute.xlu1 %5533 }
 0x3e5   : > { %7730 = vst.msk [vmem:[#allocation5 + $0x88] sm:$0xf] %vm6133_vm5, %v7646_v47  ;;  %v9209_v6 = vrot.slane %v12468_v3, 9  ;;  %v5667_v35 = vld [vmem:[#allocation3 + $0x7c] sm:$0xf]  ;;  %v12488_v63 = vrot.slane %v4829_v46, 7  ;;  %v4404_v19 = vmul.f32 %v12424_v14, %v4357_v26  ;;  %v6895_v40 = vpop.permute.xlu0 %6894 }
 0x3e6   : > { %v5381_v48 = vrot.slane %v5380_v21, 4  ;;  %v12492_v16 = vld [vmem:[#allocation3 + $0x80] sm:$0x1]  ;;  %v12494_v10 = vld [vmem:[#allocation3 + $0x90] sm:$0xf]  ;;  %v9349_v53 = vpack.c.bf16 %v4473_v50, %v4473_v50  ;;  %v9352_v7 = vpack.c.bf16 %v4476_v42, %v4476_v42  ;;  %v5385_v8 = vrot.slane %v5383_v13, 5 }
 0x3e7   : > { %v5004_v23 = vld [vmem:[#allocation3 + $0xc0] sm:$0xf]  ;;  %v6832_v3 = vrot.slane %v6830_v9, 4  ;;  %v6833_v47 = vrot.slane %v6694_v24, 5  ;;  %v4834_v46 = vor.u32 %v4832_v51, %v12488_v63  ;;  %5617 = vst.msk [vmem:[#allocation5 + $0x9c] sm:$0xf] %vm5603_vm7, %v5534_v5  ;;  %v4442_v24 = vadd.f32 %v12439_v44, %v4404_v19 }
 0x3e8   : > { %v4812_v61 = vshrl.u32 %v9349_v53, 16  ;;  %v4815_v54 = vshll.u32 %v9349_v53, 16  ;;  %v4837_v31 = vshrl.u32 %v9352_v7, 16  ;;  %v4840_v21 = vshll.u32 %v9352_v7, 16  ;;  %6978 = vst.msk [vmem:[#allocation5 + $0x94] sm:$0xf] %vm5603_vm7, %v6895_v40  ;;  %5547 = vrot.lane.b32.xlu0 %v5376_v0, %s9822_s23  ;;  %7661 = vrot.lane.b32.xlu1 %v7478_v49, %s9824_s17  ;;  %v6897_v53 = vpop.permute.xlu1 %6896 }
 0x3e9   : > { %v9193_v36 = vrot.slane %v5666_v12, 9  ;;  %v5804_v50 = vrot.slane %v5667_v35, 5  ;;  %v5005_v14 = vsel %vm11320_vm2, %v4834_v46, %v5004_v23  ;;  %v4997_v42 = vld [vmem:[#allocation3 + $0xb4] sm:$0xf]  ;;  %v7480_v13 = vshrl.u32 %v12494_v10, 16  ;;  %v5869_v7 = vpop.permute.xlu0 %5868 }
 0x3ea   : > { %v4835_v51 = vrot.slane %v12488_v63, 4  ;;  %5006 = vst [vmem:[#allocation3 + $0xc0] sm:$0xf] %v5005_v14  ;;  %v12507_v5 = vrot.slane %v4812_v61, 7  ;;  %v4839_v40 = vrot.slane %v4837_v31, 7  ;;  %v5386_v12 = vsel %vm10148_vm9, %v5381_v48, %v5385_v8 }
 0x3eb   : > { %v5008_v26 = vld [vmem:[#allocation3 + $0xc8] sm:$0x1]  ;;  %v5031_v35 = vld [vmem:[#allocation3 + $0x78] sm:$0xf]  ;;  %v6831_v44 = vsel %vm10435_vm1, %v9209_v6, %v6830_v9  ;;  %v5807_v0 = vrot.slane %v12492_v16, 5  ;;  %v4474_v49 = vmax.f32 %v4442_v24, 0.0  ;;  %v6834_v61 = vsel %vm10435_vm1, %v6832_v3, %v6833_v47 }
 0x3ec   : > { %v12514_v23 = vld [vmem:[#allocation3 + $0x94] sm:$0xf]  ;;  %5063 = vst.msk [vmem:[#allocation5 + $0xf0] sm:$0xf] %vm4894_vm14, %v5031_v35  ;;  %v5032_v63 = vld [vmem:[#allocation3 + $0x7c] sm:$0xf]  ;;  %v4817_v8 = vor.u32 %v4815_v54, %v12507_v5  ;;  %v4842_v9 = vor.u32 %v4840_v21, %v4839_v40  ;;  %v5805_v6 = vsel %vm10435_vm1, %v9193_v36, %v5804_v50  ;;  %5549 = vrot.lane.b32.xlu1 %v5386_v12, %s9822_s23  ;;  %v5871_v12 = vpop.permute.xlu1 %5870 }
 0x3ed   : > { %v9692_v19 = vld [vmem:[#allocation5 + $0x7c] ss:$12 sps:$4 sm:$0xff]   ;;  %v9694_v46 = vld [vmem:[#allocation5 + $0x78] ss:$12 sps:$4 sm:$0xff]   ;;  %v7483_v48 = vshll.u32 %v12494_v10, 16  ;;  %v5806_v16 = vrot.slane %v5804_v50, 4  ;;  %v9350_v24 = vpack.c.bf16 %v4474_v49, %v4474_v49  ;;  %6910 = vrot.lane.b32.xlu0 %v6831_v44, %s9822_s23  ;;  %v7088_v44 = vpop.permute.xlu0 %7087 }
 0x3ee   : > { %5064 = vst.msk [vmem:[#allocation5 + $0xfc] sm:$0xf] %vm4894_vm14, %v5032_v63  ;;  %v5108_v31 = vld [vmem:[#allocation3 + $0x84] sm:$0xf]  ;;  %v4844_v14 = vrot.slane %v4839_v40, 4  ;;  %v12528_v54 = vrot.slane %v7480_v13, 4  ;;  %v4998_v3 = vsel %vm11320_vm2, %v4817_v8, %v4997_v42  ;;  %v4843_v47 = vsel %vm10153_vm11, %v4835_v51, %v4842_v9  ;;  %8592 = vmatprep.mubr.bf16.mxu1 %v9692_v19 }
 0x3ef   : > { %6979 = vst.msk [vmem:[#allocation5 + $0xa0] sm:$0xf] %vm5603_vm7, %v6897_v53  ;;  %v6190_v35 = vld [vmem:[#allocation3 + $0x6c] sm:$0xf]  ;;  %v7489_v10 = vshll.u32 %v12514_v23, 16  ;;  %v7493_v36 = vshrl.u32 %v12514_v23, 16  ;;  %8593 = vmatmul.mubr.bf16.gmra.mxu1 %v9694_v46  ;;  %v5808_v23 = vsel %vm10435_vm1, %v5806_v16, %v5807_v0 }
 0x3f0   : > { %5953 = vst.msk [vmem:[#allocation5 + $0x90] sm:$0xf] %vm5940_vm4, %v5869_v7  ;;  %v5109_v21 = vld [vmem:[#allocation3 + $0x88] sm:$0xf]  ;;  %4999 = vst [vmem:[#allocation3 + $0xb4] sm:$0xf] %v4998_v3  ;;  %v5009_v50 = vsel %vm11330_vm10, %v4844_v14, %v5008_v26  ;;  %6912 = vrot.lane.b32.xlu1 %v6834_v61, %s9822_s23 }
 0x3f1   : > { %5007 = vst.msk [vmem:[#allocation3 + $0xc4] sm:$0xf] %vm4894_vm14, %v4843_v47  ;;  %v4820_v13 = vshrl.u32 %v9350_v24, 16  ;;  %v4823_v40 = vshll.u32 %v9350_v24, 16  ;;  %v7485_v4 = vrot.slane %v7483_v48, 5  ;;  %v5388_v42 = vshrl.u32 %v5108_v31, 16  ;;  %5884 = vrot.lane.b32.xlu0 %v5805_v6, %s9823_s15  ;;  %v7090_v47 = vpop.permute.xlu1 %7089  ;;  %v6062_v0 = vpop.permute.xlu0 %6061 }
 0x3f2   : > { %v5391_v49 = vshll.u32 %v5108_v31, 16  ;;  %5010 = vst [vmem:[#allocation3 + $0xc8] sm:$0x1] %v5009_v50  ;;  %v6407_v51 = vshrl.u32 %v6190_v35, 16  ;;  %v6191_v63 = vld [vmem:[#allocation3 + $0x70] sm:$0xf] }
 0x3f3   : > { %5954 = vst.msk [vmem:[#allocation5 + $0x9c] sm:$0xf] %vm5940_vm4, %v5871_v12  ;;  %7171 = vst.msk [vmem:[#allocation5 + $0x94] sm:$0xf] %vm5940_vm4, %v7088_v44  ;;  %v4818_v26 = vrot.slane %v12507_v5, 4  ;;  %v4822_v53 = vrot.slane %v4820_v13, 7  ;;  %v7486_v5 = vor.u32 %v7485_v4, %v12528_v54 }
 0x3f4   : > { %v6410_v7 = vshll.u32 %v6190_v35, 16  ;;  %v12546_v19 = vrot.slane %v7489_v10, 5  ;;  %v5397_v46 = vshll.u32 %v5109_v21, 16  ;;  %v5401_v48 = vshrl.u32 %v5109_v21, 16  ;;  %v5001_v8 = vld [vmem:[#allocation3 + $0xbc] sm:$0x1]  ;;  %5886 = vrot.lane.b32.xlu1 %v5808_v23, %s9823_s15 }
 0x3f5   : > { %v6409_v9 = vrot.slane %v6407_v51, 4  ;;  %v4825_v31 = vor.u32 %v4823_v40, %v4822_v53  ;;  %v4827_v14 = vrot.slane %v4822_v53, 4  ;;  %v6416_v3 = vshll.u32 %v6191_v63, 16  ;;  %v7019_v16 = vld [vmem:[#allocation3 + $0x90] sm:$0xf]  ;;  %v7648_v23 = vpop.permute.xlu0 %7647 }
 0x3f6   : > { %v6412_v24 = vrot.slane %v6410_v7, 5  ;;  %v7495_v35 = vrot.slane %v7493_v36, 4  ;;  %v12549_v50 = vrot.slane %v5388_v42, 4  ;;  %v5393_v61 = vrot.slane %v5391_v49, 5  ;;  %7172 = vst.msk [vmem:[#allocation5 + $0xa0] sm:$0xf] %vm5940_vm4, %v7090_v47  ;;  %7103 = vrot.lane.b32.xlu0 %v7019_v16, %s9823_s15 }
 0x3f7   : > { %6146 = vst.msk [vmem:[#allocation5 + $0x90] sm:$0xf] %vm6133_vm5, %v6062_v0  ;;  %v7223_v6 = vld [vmem:[#allocation3 + $0x98] sm:$0x1]  ;;  %v5110_v10 = vld [vmem:[#allocation3 + $0x8c] sm:$0x1]  ;;  %v4826_v21 = vsel %vm10153_vm11, %v4818_v26, %v4825_v31  ;;  %v5002_v13 = vsel %vm11330_vm10, %v4827_v14, %v5001_v8  ;;  %v6064_v26 = vpop.permute.xlu1 %6063 }
 0x3f8   : > { %v6413_v40 = vor.u32 %v6412_v24, %v6409_v9  ;;  %v6420_v12 = vshrl.u32 %v6191_v63, 16  ;;  %v12557_v44 = vld [vmem:[#allocation3 + $0x88] sm:$0xf]  ;;  %v12561_v54 = vrot.slane %v5397_v46, 5  ;;  %v5403_v36 = vrot.slane %v5401_v48, 4 }
 0x3f9   : > { %5000 = vst.msk [vmem:[#allocation3 + $0xb8] sm:$0xf] %vm4894_vm14, %v4826_v21  ;;  %5003 = vst [vmem:[#allocation3 + $0xbc] sm:$0x1] %v5002_v13  ;;  %v6192_v4 = vld [vmem:[#allocation3 + $0x74] sm:$0x1]  ;;  %v7496_v46 = vor.u32 %v7495_v35, %v12546_v19  ;;  %v5394_v9 = vor.u32 %v5393_v61, %v12549_v50 }
 0x3fa   : > { %v13593_v20 = vrot.slane %v12131_v34, 9  ;;  %v12570_v42 = vld [vmem:[#allocation3 + $0x8c] sm:$0x1]  ;;  %v12572_v49 = vld [vmem:[#allocation3 + $0x94] sm:$0xf]  ;;  %v6414_v51 = vrot.slane %v6413_v40, 4  ;;  %v5404_v0 = vor.u32 %v5403_v36, %v12561_v54 }
 0x3fb   : > { %v6418_v63 = vrot.slane %v6416_v3, 5  ;;  %v7020_v53 = vld [vmem:[#allocation3 + $0x94] sm:$0xf]  ;;  %v7487_v7 = vrot.slane %v7486_v5, 4  ;;  %v7499_v48 = vshll.u32 %v7223_v6, 16  ;;  %v5407_v8 = vshll.u32 %v5110_v10, 16  ;;  %v7650_v36 = vpop.permute.xlu1 %7649 }
 0x3fc   : > { %v7892_v22 = vsel %vm10435_vm1, %v13593_v20, %v7891_v33  ;;  %7731 = vst.msk [vmem:[#allocation5 + $0x94] sm:$0xf] %vm6133_vm5, %v7648_v23  ;;  %6147 = vst.msk [vmem:[#allocation5 + $0x9c] sm:$0xf] %vm6133_vm5, %v6064_v26  ;;  %v5993_v34 = vld [vmem:[#allocation3 + $0x84] sm:$0xf]  ;;  %7105 = vrot.lane.b32.xlu1 %v7020_v53, %s9823_s15 }
 0x3fd   : > { %8003 = vst.msk [vmem:[#allocation5 + $0x98] sm:$0xf] %vm4894_vm14, %v7892_v22  ;;  %v6695_v31 = vld [vmem:[#allocation3 + $0x90] sm:$0xe]  ;;  %v6419_v14 = vsel %vm10148_vm9, %v6414_v51, %v6418_v63  ;;  %v6426_v24 = vshll.u32 %v6192_v4, 16  ;;  %v6422_v3 = vrot.slane %v6420_v12, 4  ;;  %6077 = vrot.lane.b32.xlu0 %v5993_v34, %s9824_s17  ;;  %v5536_v4 = vpop.permute.xlu0 %5535  ;;  %v7492_v20 = vsel %vm10148_vm9, %v7487_v7, %v12546_v19 }
 0x3fe   : > { %v7912_v47 = vrot.slane %v12557_v44, 5  ;;  %v6837_v16 = vrot.slane %v12572_v49, 5  ;;  %v6697_v5 = vld [vmem:[#allocation3 + $0x98] sm:$0x1]  ;;  %v12586_v35 = vld [vmem:[#allocation3 + $0x88] sm:$0xf] }
 0x3ff   : > { %6646 = vst.msk [vmem:[#allocation5 + $0xc4] sm:$0xf] %vm4894_vm14, %v6419_v14  ;;  %v7915_v50 = vrot.slane %v12570_v42, 5  ;;  %v12590_v61 = vld [vmem:[#allocation3 + $0xa8] sm:$0xe]  ;;  %v6428_v13 = vrot.slane %v6426_v24, 5  ;;  %v6423_v40 = vor.u32 %v6422_v3, %v6418_v63 }
 0x400   : > { %v12592_v6 = vld [vmem:[#allocation3 + $0x9c] sm:$0xe]  ;;  %v5994_v10 = vld [vmem:[#allocation3 + $0x88] sm:$0xf]  ;;  %v12594_v21 = vld [vmem:[#allocation3 + $0x84] sm:$0xe] }
 0x401   : > { %v12596_v12 = vld [vmem:[#allocation3 + $0xac] sm:$0xf]  ;;  %v7497_v22 = vrot.slane %v7496_v46, 4  ;;  %v7501_v49 = vrot.slane %v7499_v48, 5  ;;  %v13594_v51 = vrot.slane %v11704_v39, 5  ;;  %v5395_v26 = vrot.slane %v5394_v9, 4  ;;  %7663 = vrot.lane.b32.xlu0 %v7492_v20, %s9824_s17  ;;  %6079 = vrot.lane.b32.xlu1 %v5994_v10, %s9824_s17 }
 0x402   : > { %7732 = vst.msk [vmem:[#allocation5 + $0xa0] sm:$0xf] %vm6133_vm5, %v7650_v36  ;;  %v5409_v53 = vrot.slane %v5407_v8, 5  ;;  %v9210_v63 = vrot.slane %v6695_v31, 9  ;;  %v12605_v34 = vld [vmem:[#allocation3 + $0x9c] sm:$0xf] }
 0x403   : > { %v7851_v23 = vrot.slane %v13594_v51, 4  ;;  %5618 = vst.msk [vmem:[#allocation5 + $0xa8] sm:$0xf] %vm5603_vm7, %v5536_v4  ;;  %v6424_v14 = vrot.slane %v6423_v40, 4  ;;  %v12607_v24 = vld [vmem:[#allocation3 + $0xa0] sm:$0xf]  ;;  %v7502_v10 = vsel %vm10148_vm9, %v7497_v22, %v7501_v49  ;;  %v5400_v51 = vsel %vm10148_vm9, %v5395_v26, %v12561_v54 }
 0x404   : > { %v5405_v19 = vrot.slane %v5404_v0, 4  ;;  %v6839_v7 = vrot.slane %v6837_v16, 4  ;;  %v6840_v39 = vrot.slane %v6697_v5, 5  ;;  %v13595_v46 = vrot.slane %v11706_v41, 5  ;;  %v12618_v3 = vld [vmem:[#allocation3 + $0x8c] sm:$0x1]  ;;  %v5538_v5 = vpop.permute.xlu1 %5537  ;;  %v6899_v41 = vpop.permute.xlu0 %6898 }
 0x405   : > { %v9227_v8 = vrot.slane %v12590_v61, 9  ;;  %v9226_v9 = vrot.slane %v12592_v6, 9  ;;  %v5811_v31 = vrot.slane %v12586_v35, 5  ;;  %v6429_v40 = vsel %vm10148_vm9, %v6424_v14, %v6428_v13  ;;  %v12627_v4 = vld [vmem:[#allocation3 + $0xa0] sm:$0xf]  ;;  %7665 = vrot.lane.b32.xlu1 %v7502_v10, %s9824_s17  ;;  %5551 = vrot.lane.b32.xlu0 %v5400_v51, %s9822_s23 }
 0x406   : > { %v7853_v48 = vsel %vm10435_vm1, %v7851_v23, %v13595_v46  ;;  %v7933_v0 = vrot.slane %v12596_v12, 5  ;;  %v9194_v36 = vrot.slane %v12594_v21, 9  ;;  %6647 = vst.msk [vmem:[#allocation5 + $0xd0] sm:$0xf] %vm4894_vm14, %v6429_v40  ;;  %v13596_v35 = vrot.slane %v12034_v60, 5 }
 0x407   : > { %7992 = vst.msk [vmem:[#allocation5 + $0x14] sm:$0xf] %vm4894_vm14, %v7853_v48  ;;  %v7926_v13 = vrot.slane %v12607_v24, 5  ;;  %v6838_v21 = vsel %vm10435_vm1, %v9210_v63, %v6837_v16  ;;  %v7504_v22 = vshrl.u32 %v12605_v34, 16  ;;  %v6193_v49 = vld [vmem:[#allocation3 + $0x78] sm:$0xf]  ;;  %v5410_v60 = vsel %vm10148_vm9, %v5405_v19, %v5409_v53 }
 0x408   : > { %v7865_v20 = vrot.slane %v13596_v35, 4  ;;  %5619 = vst.msk [vmem:[#allocation5 + $0xb4] sm:$0xf] %vm5603_vm7, %v5538_v5  ;;  %6980 = vst.msk [vmem:[#allocation5 + $0xac] sm:$0xf] %vm5603_vm7, %v6899_v41  ;;  %v6841_v23 = vsel %vm10435_vm1, %v6839_v7, %v6840_v39  ;;  %v5814_v14 = vrot.slane %v12618_v3, 5  ;;  %v6901_v7 = vpop.permute.xlu1 %6900  ;;  %v5873_v39 = vpop.permute.xlu0 %5872  ;;  %v5812_v5 = vsel %vm10435_vm1, %v9194_v36, %v5811_v31 }
 0x409   : > { %v12648_v46 = vld [vmem:[#allocation3 + $0x90] sm:$0xf]  ;;  %v13597_v54 = vrot.slane %v12041_v11, 5  ;;  %v12654_v26 = vrot.slane %v5811_v31, 4  ;;  %v7507_v63 = vshll.u32 %v12605_v34, 16  ;;  %v7513_v48 = vshll.u32 %v12627_v4, 16  ;;  %5553 = vrot.lane.b32.xlu1 %v5410_v60, %s9822_s23  ;;  %6914 = vrot.lane.b32.xlu0 %v6838_v21, %s9822_s23 }
 0x40a   : > { %v7872_v53 = vrot.slane %v7870_v32, 4  ;;  %v12661_v19 = vld [vmem:[#allocation3 + $0x7c] sm:$0xf]  ;;  %v9695_v40 = vld [vmem:[#allocation5 + $0x94] ss:$12 sps:$4 sm:$0xff]   ;;  %v6431_v41 = vshrl.u32 %v6193_v49, 16 }
 0x40b   : > { %v7867_v16 = vsel %vm10435_vm1, %v7865_v20, %v13597_v54  ;;  %v9697_v11 = vld [vmem:[#allocation5 + $0x90] ss:$12 sps:$4 sm:$0xff]   ;;  %v13598_v34 = vrot.slane %v12317_v52, 9  ;;  %v13599_v30 = vrot.slane %v12319_v62, 5  ;;  %v13600_v32 = vrot.slane %v12306_v38, 9  ;;  %8600 = vmatprep.mubr.bf16.mxu1 %v9695_v40 }
 0x40c   : > { %7996 = vst.msk [vmem:[#allocation5 + $0x44] sm:$0xf] %vm4894_vm14, %v7867_v16  ;;  %v12679_v31 = vrot.slane %v7504_v22, 4  ;;  %v12681_v36 = vld [vmem:[#allocation3 + $0x94] sm:$0xf]  ;;  %v5412_v52 = vshrl.u32 %v12648_v46, 16  ;;  %8601 = vmatmul.mubr.bf16.gmra.mxu1 %v9697_v11  ;;  %v5815_v61 = vsel %vm10435_vm1, %v12654_v26, %v5814_v14 }
 0x40d   : > { %v7899_v10 = vsel %vm10435_vm1, %v13598_v34, %v7898_v43  ;;  %v7906_v35 = vsel %vm10435_vm1, %v13600_v32, %v13599_v30  ;;  %6981 = vst.msk [vmem:[#allocation5 + $0xb8] sm:$0xf] %vm5603_vm7, %v6901_v7  ;;  %v13601_v20 = vrot.slane %v12129_v28, 5  ;;  %v6434_v54 = vshll.u32 %v6193_v49, 16  ;;  %v7790_v38 = vld [vmem:[#allocation3 + $0xb4] sm:$0xe]  ;;  %v7092_v30 = vpop.permute.xlu0 %7091  ;;  %6916 = vrot.lane.b32.xlu1 %v6841_v23, %s9822_s23  ;;  %5888 = vrot.lane.b32.xlu0 %v5812_v5, %s9823_s15 }
 0x40e   : > { %5955 = vst.msk [vmem:[#allocation5 + $0xa8] sm:$0xf] %vm5940_vm4, %v5873_v39  ;;  %v6433_v22 = vrot.slane %v6431_v41, 4  ;;  %v6440_v16 = vshll.u32 %v12661_v19, 16  ;;  %v13602_v28 = vrot.slane %v12410_v57, 9  ;;  %v13604_v7 = vrot.slane %v12406_v17, 9  ;;  %v5875_v57 = vpop.permute.xlu1 %5874 }
 0x40f   : > { %v7874_v51 = vsel %vm10435_vm1, %v7872_v53, %v13601_v20  ;;  %8005 = vst.msk [vmem:[#allocation5 + $0xb0] sm:$0xf] %vm4894_vm14, %v7899_v10  ;;  %8007 = vst.msk [vmem:[#allocation5 + $0xc8] sm:$0xf] %vm4894_vm14, %v7906_v35  ;;  %v13603_v53 = vrot.slane %v12448_v25, 5  ;;  %v7517_v60 = vshrl.u32 %v12627_v4, 16  ;;  %v7934_v23 = vsel %vm10435_vm1, %v9227_v8, %v7933_v0 }
 0x410   : > { %7998 = vst.msk [vmem:[#allocation5 + $0x5c] sm:$0xf] %vm4894_vm14, %v7874_v51  ;;  %v7913_v49 = vsel %vm10435_vm1, %v13602_v28, %v7912_v47  ;;  %v5415_v39 = vshll.u32 %v12648_v46, 16  ;;  %v6436_v41 = vrot.slane %v6434_v54, 5  ;;  %v13605_v34 = vrot.slane %v12106_v45, 5 }
 0x411   : > { %v7920_v21 = vsel %vm10435_vm1, %v13604_v7, %v13603_v53  ;;  %8009 = vst.msk [vmem:[#allocation5 + $0xe0] sm:$0xf] %vm4894_vm14, %v7913_v49  ;;  %v12712_v17 = vrot.slane %v7507_v63, 5  ;;  %v12714_v32 = vrot.slane %v7513_v48, 5  ;;  %v5421_v40 = vshll.u32 %v12681_v36, 16  ;;  %v5508_v6 = vpop.permute.xlu0 %5507  ;;  %5890 = vrot.lane.b32.xlu1 %v5815_v61, %s9823_s15 }
 0x412   : > { %v7879_v10 = vrot.slane %v13605_v34, 4  ;;  %8011 = vst.msk [vmem:[#allocation5 + $0xf8] sm:$0xf] %vm4894_vm14, %v7920_v21  ;;  %v12717_v4 = vld [vmem:[#allocation3 + $0xb8] sm:$0xf]  ;;  %v6444_v46 = vshrl.u32 %v12661_v19, 16  ;;  %v6437_v11 = vor.u32 %v6436_v41, %v6433_v22 }
 0x413   : > { %5956 = vst.msk [vmem:[#allocation5 + $0xb4] sm:$0xf] %vm5940_vm4, %v5875_v57  ;;  %7173 = vst.msk [vmem:[#allocation5 + $0xac] sm:$0xf] %vm5940_vm4, %v7092_v30  ;;  %v12722_v45 = vrot.slane %v5412_v52, 4  ;;  %v9228_v35 = vrot.slane %v7790_v38, 9  ;;  %v7510_v8 = vor.u32 %v12712_v17, %v12679_v31 }
 0x414   : > { %v13606_v20 = vrot.slane %v12121_v56, 5  ;;  %v6195_v48 = vld [vmem:[#allocation3 + $0x80] sm:$0x1]  ;;  %v7793_v51 = vld [vmem:[#allocation3 + $0xc0] sm:$0xe]  ;;  %v5425_v19 = vshrl.u32 %v12681_v36, 16  ;;  %v7927_v56 = vsel %vm10435_vm1, %v9226_v9, %v7926_v13 }
 0x415   : > { %v6442_v54 = vrot.slane %v6440_v16, 5  ;;  %v5417_v5 = vrot.slane %v5415_v39, 5  ;;  %v7226_v52 = vld [vmem:[#allocation3 + $0xa4] sm:$0x1]  ;;  %v7519_v36 = vrot.slane %v7517_v60, 4  ;;  %v7940_v38 = vrot.slane %v12717_v4, 5  ;;  %v7094_v16 = vpop.permute.xlu1 %7093 }
 0x416   : > { %v7881_v63 = vsel %vm10435_vm1, %v7879_v10, %v13606_v20  ;;  %v6438_v22 = vrot.slane %v6437_v11, 4  ;;  %8013 = vst.msk [vmem:[#allocation5 + $0x110] sm:$0xf] %vm4894_vm14, %v7927_v56  ;;  %8015 = vst.msk [vmem:[#allocation5 + $0x128] sm:$0xf] %vm4894_vm14, %v7934_v23  ;;  %v6446_v49 = vrot.slane %v6444_v46, 4  ;;  %v6066_v46 = vpop.permute.xlu0 %6065 }
 0x417   : > { %8000 = vst.msk [vmem:[#allocation5 + $0x74] sm:$0xf] %vm4894_vm14, %v7881_v63  ;;  %v12754_v9 = vld [vmem:[#allocation3 + $0xc4] sm:$0xf]  ;;  %v12756_v28 = vld [vmem:[#allocation3 + $0x98] sm:$0x1]  ;;  %v7941_v26 = vsel %vm10435_vm1, %v9228_v35, %v7940_v38  ;;  %v5418_v34 = vor.u32 %v5417_v5, %v12722_v45  ;;  %v7520_v10 = vor.u32 %v7519_v36, %v12714_v32 }
 0x418   : > { %v6450_v53 = vshll.u32 %v6195_v48, 16  ;;  %5604 = vst.msk [vmem:[#allocation5] sm:$0xf] %vm5603_vm7, %v5508_v6  ;;  %v7021_v7 = vld [vmem:[#allocation3 + $0x9c] sm:$0xf]  ;;  %v9229_v21 = vrot.slane %v7793_v51, 9  ;;  %v6443_v14 = vsel %vm10148_vm9, %v6438_v22, %v6442_v54  ;;  %v6447_v60 = vor.u32 %v6446_v49, %v6442_v54 }
 0x419   : > { %7174 = vst.msk [vmem:[#allocation5 + $0xb8] sm:$0xf] %vm5940_vm4, %v7094_v16  ;;  %v12760_v3 = vrot.slane %v5421_v40, 5  ;;  %7107 = vrot.lane.b32.xlu0 %v7021_v7, %s9823_s15  ;;  %v5427_v31 = vrot.slane %v5425_v19, 4  ;;  %v5995_v41 = vld [vmem:[#allocation3 + $0x90] sm:$0xf]  ;;  %v5510_v35 = vpop.permute.xlu1 %5509 }
 0x41a   : > { %6648 = vst.msk [vmem:[#allocation5 + $0xdc] sm:$0xf] %vm4894_vm14, %v6443_v14  ;;  %v6452_v39 = vrot.slane %v6450_v53, 5  ;;  %8017 = vst.msk [vmem:[#allocation5 + $0x140] sm:$0xf] %vm4894_vm14, %v7941_v26  ;;  %v7523_v57 = vshll.u32 %v7226_v52, 16 }
 0x41b   : > { %v7947_v30 = vrot.slane %v12754_v9, 5  ;;  %v12775_v17 = vld [vmem:[#allocation3 + $0xa0] sm:$0xf]  ;;  %v12777_v40 = vld [vmem:[#allocation3 + $0xa8] sm:$0xf]  ;;  %v6448_v63 = vrot.slane %v6447_v60, 4 }
 0x41c   : > { %v7022_v11 = vld [vmem:[#allocation3 + $0xa0] sm:$0xf]  ;;  %v12779_v20 = vld [vmem:[#allocation3 + $0x9c] sm:$0xe]  ;;  %v13607_v48 = vrot.slane %v12167_v59, 5  ;;  %v7511_v45 = vrot.slane %v7510_v8, 4  ;;  %v5428_v59 = vor.u32 %v5427_v31, %v12760_v3 }
 0x41d   : > { %6148 = vst.msk [vmem:[#allocation5 + $0xa8] sm:$0xf] %vm6133_vm5, %v6066_v46  ;;  %v5431_v19 = vshll.u32 %v12756_v28, 16  ;;  %v7893_v54 = vrot.slane %v7891_v33, 4  ;;  %v7948_v56 = vsel %vm10435_vm1, %v9229_v21, %v7947_v30  ;;  %6081 = vrot.lane.b32.xlu0 %v5995_v41, %s9824_s17  ;;  %7109 = vrot.lane.b32.xlu1 %v7022_v11, %s9823_s15  ;;  %v6844_v23 = vrot.slane %v12775_v17, 5  ;;  %v6068_v28 = vpop.permute.xlu1 %6067 }
 0x41e   : > { %v7886_v51 = vrot.slane %v13607_v48, 4  ;;  %5605 = vst.msk [vmem:[#allocation5 + $0xc] sm:$0xf] %vm5603_vm7, %v5510_v35  ;;  %v6453_v5 = vsel %vm10148_vm9, %v6448_v63, %v6452_v39  ;;  %v13608_v52 = vrot.slane %v12172_v1, 5  ;;  %v5996_v33 = vld [vmem:[#allocation3 + $0x94] sm:$0xf]  ;;  %v6871_v1 = vpop.permute.xlu0 %6870  ;;  %v7516_v60 = vsel %vm10148_vm9, %v7511_v45, %v12714_v32 }
 0x41f   : > { %8019 = vst.msk [vmem:[#allocation5 + $0x158] sm:$0xf] %vm4894_vm14, %v7948_v56  ;;  %v5419_v36 = vrot.slane %v5418_v34, 4  ;;  %v7521_v22 = vrot.slane %v7520_v10, 4  ;;  %v7525_v6 = vrot.slane %v7523_v57, 5  ;;  %v13609_v16 = vrot.slane %v12163_v18, 5 }
 0x420   : > { %v7888_v55 = vsel %vm10435_vm1, %v7886_v51, %v13608_v52  ;;  %6649 = vst.msk [vmem:[#allocation5 + $0xe8] sm:$0xf] %vm4894_vm14, %v6453_v5  ;;  %v5033_v8 = vld [vmem:[#allocation3 + $0x84] sm:$0xf]  ;;  %v12811_v53 = vld [vmem:[#allocation3 + $0x90] sm:$0xe] }
 0x421   : > { %8002 = vst.msk [vmem:[#allocation5 + $0x8c] sm:$0xf] %vm4894_vm14, %v7888_v55  ;;  %v7895_v61 = vsel %vm10435_vm1, %v7893_v54, %v13609_v16  ;;  %v12809_v49 = vld [vmem:[#allocation3 + $0xa4] sm:$0x1]  ;;  %v12813_v7 = vld [vmem:[#allocation3 + $0x94] sm:$0xf]  ;;  %7667 = vrot.lane.b32.xlu0 %v7516_v60, %s9824_s17  ;;  %6083 = vrot.lane.b32.xlu1 %v5996_v33, %s9824_s17  ;;  %v5424_v11 = vsel %vm10148_vm9, %v5419_v36, %v12760_v3  ;;  %v6873_v45 = vpop.permute.xlu1 %6872 }
 0x422   : > { %v7528_v21 = vshrl.u32 %v12777_v40, 16  ;;  %v7531_v14 = vshll.u32 %v12777_v40, 16  ;;  %8004 = vst.msk [vmem:[#allocation5 + $0xa4] sm:$0xf] %vm4894_vm14, %v7895_v61  ;;  %v7900_v18 = vrot.slane %v7898_v43, 4  ;;  %v13610_v26 = vrot.slane %v12319_v62, 5  ;;  %v7652_v51 = vpop.permute.xlu0 %7651 }
 0x423   : > { %5065 = vst.msk [vmem:[#allocation5 + $0x108] sm:$0xf] %vm4894_vm14, %v5033_v8  ;;  %v5433_v39 = vrot.slane %v5431_v19, 5  ;;  %v9211_v41 = vrot.slane %v12779_v20, 9  ;;  %v6196_v34 = vld [vmem:[#allocation3 + $0x84] sm:$0xf]  ;;  %v7526_v20 = vsel %vm10148_vm9, %v7521_v22, %v7525_v6 }
 0x424   : > { %v7907_v31 = vrot.slane %v13610_v26, 4  ;;  %6966 = vst.msk [vmem:[#allocation5 + $0x4] sm:$0xf] %vm5603_vm7, %v6871_v1  ;;  %v12829_v10 = vld [vmem:[#allocation3 + $0xb0] sm:$0x1]  ;;  %v5429_v62 = vrot.slane %v5428_v59, 4 }
 0x425   : > { %6149 = vst.msk [vmem:[#allocation5 + $0xb4] sm:$0xf] %vm6133_vm5, %v6068_v28  ;;  %v12831_v27 = vld [vmem:[#allocation3 + $0xa4] sm:$0x1]  ;;  %v6846_v43 = vrot.slane %v6844_v23, 4  ;;  %v13611_v40 = vrot.slane %v12349_v2, 5  ;;  %5555 = vrot.lane.b32.xlu0 %v5424_v11, %s9822_s23  ;;  %7669 = vrot.lane.b32.xlu1 %v7526_v20, %s9824_s17  ;;  %v7654_v28 = vpop.permute.xlu1 %7653 }
 0x426   : > { %v7228_v57 = vld [vmem:[#allocation3 + $0xac] sm:$0xf]  ;;  %v13612_v46 = vrot.slane %v12329_v29, 5  ;;  %v6847_v63 = vrot.slane %v12809_v49, 5  ;;  %v7914_v2 = vrot.slane %v7912_v47, 4  ;;  %v7530_v54 = vrot.slane %v7528_v21, 4  ;;  %v5845_v1 = vpop.permute.xlu0 %5844 }
 0x427   : > { %v7902_v32 = vsel %vm10435_vm1, %v7900_v18, %v13611_v40  ;;  %v6197_v29 = vld [vmem:[#allocation3 + $0x88] sm:$0xf]  ;;  %v12855_v19 = vld [vmem:[#allocation3 + $0x98] sm:$0x1]  ;;  %v7533_v3 = vrot.slane %v7531_v14, 5  ;;  %v6455_v59 = vshrl.u32 %v6196_v34, 16  ;;  %v6845_v49 = vsel %vm10435_vm1, %v9211_v41, %v6844_v23 }
 0x428   : > { %v7909_v35 = vsel %vm10435_vm1, %v7907_v31, %v13612_v46  ;;  %8006 = vst.msk [vmem:[#allocation5 + $0xbc] sm:$0xf] %vm4894_vm14, %v7902_v32  ;;  %v5034_v48 = vld [vmem:[#allocation3 + $0x88] sm:$0xf]  ;;  %v5114_v56 = vld [vmem:[#allocation3 + $0x9c] sm:$0xf]  ;;  %v7916_v52 = vsel %vm10435_vm1, %v7914_v2, %v7915_v50  ;;  %v6848_v60 = vsel %vm10435_vm1, %v6846_v43, %v6847_v63 }
 0x429   : > { %8008 = vst.msk [vmem:[#allocation5 + $0xd4] sm:$0xf] %vm4894_vm14, %v7909_v35  ;;  %v6458_v5 = vshll.u32 %v6196_v34, 16  ;;  %5066 = vst.msk [vmem:[#allocation5 + $0x114] sm:$0xf] %vm4894_vm14, %v5034_v48  ;;  %v9195_v44 = vrot.slane %v12811_v53, 9  ;;  %v7534_v53 = vor.u32 %v7533_v3, %v7530_v54  ;;  %6918 = vrot.lane.b32.xlu0 %v6845_v49, %s9822_s23  ;;  %v5847_v11 = vpop.permute.xlu1 %5846 }
 0x42a   : > { %7733 = vst.msk [vmem:[#allocation5 + $0xac] sm:$0xf] %vm6133_vm5, %v7652_v51  ;;  %v5818_v47 = vrot.slane %v12813_v7, 5  ;;  %v13613_v55 = vrot.slane %v12448_v25, 5  ;;  %v7537_v36 = vshll.u32 %v7228_v57, 16  ;;  %v6457_v22 = vrot.slane %v6455_v59, 4  ;;  %v7064_v35 = vpop.permute.xlu0 %7063 }
 0x42b   : > { %6967 = vst.msk [vmem:[#allocation5 + $0x10] sm:$0xf] %vm5603_vm7, %v6873_v45  ;;  %v6460_v6 = vrot.slane %v6458_v5, 5  ;;  %v6464_v16 = vshll.u32 %v6197_v29, 16  ;;  %v7936_v61 = vrot.slane %v12829_v10, 5  ;;  %v7929_v42 = vrot.slane %v12831_v27, 5 }
 0x42c   : > { %v7921_v33 = vrot.slane %v13613_v55, 4  ;;  %8010 = vst.msk [vmem:[#allocation5 + $0xec] sm:$0xf] %vm4894_vm14, %v7916_v52  ;;  %v7541_v8 = vshrl.u32 %v7228_v57, 16  ;;  %v13614_v50 = vrot.slane %v12450_v58, 5  ;;  %v6468_v18 = vshrl.u32 %v6197_v29, 16 }
 0x42d   : > { %v12881_v7 = vld [vmem:[#allocation3 + $0xb0] sm:$0x1]  ;;  %v5115_v21 = vld [vmem:[#allocation3 + $0xa0] sm:$0xf]  ;;  %v6461_v14 = vor.u32 %v6460_v6, %v6457_v22  ;;  %5941 = vst.msk [vmem:[#allocation5] sm:$0xf] %vm5940_vm4, %v5845_v1  ;;  %v5434_v58 = vsel %vm10148_vm9, %v5429_v62, %v5433_v39  ;;  %v5819_v41 = vsel %vm10435_vm1, %v9195_v44, %v5818_v47  ;;  %v7066_v22 = vpop.permute.xlu1 %7065 }
 0x42e   : > { %v7923_v25 = vsel %vm10435_vm1, %v7921_v33, %v13614_v50  ;;  %7734 = vst.msk [vmem:[#allocation5 + $0xb8] sm:$0xf] %vm6133_vm5, %v7654_v28  ;;  %v5821_v17 = vrot.slane %v12855_v19, 5  ;;  %v5436_v26 = vshrl.u32 %v5114_v56, 16  ;;  %v5439_v31 = vshll.u32 %v5114_v56, 16  ;;  %5557 = vrot.lane.b32.xlu1 %v5434_v58, %s9822_s23  ;;  %5892 = vrot.lane.b32.xlu0 %v5819_v41, %s9823_s15 }
 0x42f   : > { %8012 = vst.msk [vmem:[#allocation5 + $0x104] sm:$0xf] %vm4894_vm14, %v7923_v25  ;;  %v6198_v23 = vld [vmem:[#allocation3 + $0x8c] sm:$0x1]  ;;  %v12895_v34 = vrot.slane %v7537_v36, 5  ;;  %v6466_v57 = vrot.slane %v6464_v16, 5  ;;  %v6038_v36 = vpop.permute.xlu0 %6037 }
 0x430   : > { %v12897_v40 = vld [vmem:[#allocation3 + $0xc8] sm:$0x1]  ;;  %v7543_v39 = vrot.slane %v7541_v8, 4  ;;  %v5445_v62 = vshll.u32 %v5115_v21, 16  ;;  %v5449_v32 = vshrl.u32 %v5115_v21, 16  ;;  %v6462_v46 = vrot.slane %v6461_v14, 4 }
 0x431   : > { %v5820_v20 = vrot.slane %v5818_v47, 4  ;;  %v12899_v2 = vrot.slane %v7534_v53, 4  ;;  %v12901_v29 = vld [vmem:[#allocation3 + $0xa4] sm:$0x1]  ;;  %v6474_v43 = vshll.u32 %v6198_v23, 16  ;;  %v6470_v63 = vrot.slane %v6468_v18, 4 }
 0x432   : > { %7159 = vst.msk [vmem:[#allocation5 + $0x4] sm:$0xf] %vm5940_vm4, %v7064_v35  ;;  %5942 = vst.msk [vmem:[#allocation5 + $0xc] sm:$0xf] %vm5940_vm4, %v5847_v11  ;;  %v7547_v48 = vshll.u32 %v12881_v7, 16  ;;  %v12906_v51 = vrot.slane %v5436_v26, 4  ;;  %v6467_v54 = vsel %vm10148_vm9, %v6462_v46, %v6466_v57  ;;  %6920 = vrot.lane.b32.xlu1 %v6848_v60, %s9822_s23  ;;  %v7544_v52 = vor.u32 %v7543_v39, %v12895_v34  ;;  %v6040_v39 = vpop.permute.xlu1 %6039 }
 0x433   : > { %v12908_v45 = vrot.slane %v5439_v31, 5  ;;  %v12910_v19 = vld [vmem:[#allocation3 + $0xac] sm:$0xf]  ;;  %v7950_v3 = vrot.slane %v12897_v40, 5  ;;  %6650 = vst.msk [vmem:[#allocation5 + $0xf4] sm:$0xf] %vm4894_vm14, %v6467_v54  ;;  %v6471_v59 = vor.u32 %v6470_v63, %v6466_v57  ;;  %v5822_v6 = vsel %vm10435_vm1, %v5820_v20, %v5821_v17 }
 0x434   : > { %v6476_v56 = vrot.slane %v6474_v43, 5  ;;  %v5035_v5 = vld [vmem:[#allocation3 + $0x90] sm:$0xf]  ;;  %v5036_v44 = vld [vmem:[#allocation3 + $0x94] sm:$0xf]  ;;  %v12921_v55 = vrot.slane %v5445_v62, 5 }
 0x435   : > { %v12918_v47 = vld [vmem:[#allocation3 + $0xbc] sm:$0x1]  ;;  %v12923_v33 = vrot.slane %v5449_v32, 4  ;;  %5067 = vst.msk [vmem:[#allocation5 + $0x120] sm:$0xf] %vm4894_vm14, %v5035_v5  ;;  %v8051_v16 = vld [vmem:[#allocation5 + $0xa8] sm:$0xff]  ;;  %v5442_v53 = vor.u32 %v12908_v45, %v12906_v51 }
 0x436   : > { %5068 = vst.msk [vmem:[#allocation5 + $0x12c] sm:$0xf] %vm4894_vm14, %v5036_v44  ;;  %v8053_v8 = vld [vmem:[#allocation5 + $0xb4] sm:$0xff]  ;;  %v6472_v25 = vrot.slane %v6471_v59, 4  ;;  %v7928_v1 = vrot.slane %v7926_v13, 4  ;;  %v5455_v7 = vshll.u32 %v12901_v29, 16  ;;  %5894 = vrot.lane.b32.xlu1 %v5822_v6, %s9823_s15  ;;  %v7626_v59 = vpop.permute.xlu1 %7625 }
 0x437   : > { %v9698_v50 = vld [vmem:[#allocation5 + $0xac] ss:$12 sps:$4 sm:$0xff]   ;;  %6134 = vst.msk [vmem:[#allocation5] sm:$0xf] %vm6133_vm5, %v6038_v36  ;;  %v7023_v28 = vld [vmem:[#allocation3 + $0xa8] sm:$0xf]  ;;  %v9252_v49 = vcombine.low %v8051_v16, %v8053_v8  ;;  %v5452_v60 = vor.u32 %v12923_v33, %v12921_v55 }
 0x438   : > { %7160 = vst.msk [vmem:[#allocation5 + $0x10] sm:$0xf] %vm5940_vm4, %v7066_v22  ;;  %v12936_v21 = vld [vmem:[#allocation3 + $0xa8] sm:$0xe]  ;;  %v7935_v14 = vrot.slane %v7933_v0, 4  ;;  %v7943_v18 = vrot.slane %v12918_v47, 5  ;;  %7111 = vrot.lane.b32.xlu0 %v7023_v28, %s9823_s15  ;;  %v6477_v17 = vsel %vm10148_vm9, %v6472_v25, %v6476_v56  ;;  %v7930_v12 = vsel %vm10435_vm1, %v7928_v1, %v7929_v42  ;;  %8608 = vmatprep.mubr.bf16.mxu1 %v9698_v50  ;;  %v7624_v42 = vpop.permute.xlu0 %7623 }
 0x439   : > { %v6851_v24 = vrot.slane %v12910_v19, 5  ;;  %v12944_v13 = vld [vmem:[#allocation3 + $0xb0] sm:$0x1]  ;;  %v12946_v58 = vld [vmem:[#allocation3 + $0xa0] sm:$0xf]  ;;  %v12954_v23 = vrot.slane %v7544_v52, 4  ;;  %8609 = vmatmul.mubr.bf16.gmra.mxu1 %v9252_v49 }
 0x43a   : > { %v5037_v0 = vld [vmem:[#allocation3 + $0x9c] sm:$0xf]  ;;  %v7024_v26 = vld [vmem:[#allocation3 + $0xac] sm:$0xf]  ;;  %v7230_v57 = vld [vmem:[#allocation3 + $0xb4] sm:$0xf]  ;;  %v7937_v27 = vsel %vm10435_vm1, %v7935_v14, %v7936_v61  ;;  %v7540_v61 = vsel %vm10148_vm9, %v12899_v2, %v12895_v34 }
 0x43b   : > { %v5997_v31 = vld [vmem:[#allocation3 + $0x9c] sm:$0xf]  ;;  %6651 = vst.msk [vmem:[#allocation5 + $0x100] sm:$0xf] %vm4894_vm14, %v6477_v17  ;;  %8014 = vst.msk [vmem:[#allocation5 + $0x11c] sm:$0xf] %vm4894_vm14, %v7930_v12  ;;  %7113 = vrot.lane.b32.xlu1 %v7024_v26, %s9823_s15 }
 0x43c   : > { %v12958_v41 = vld [vmem:[#allocation3 + $0x9c] sm:$0xe]  ;;  %5069 = vst.msk [vmem:[#allocation5 + $0x138] sm:$0xf] %vm4894_vm14, %v5037_v0  ;;  %v12967_v62 = vrot.slane %v7547_v48, 5  ;;  %v9212_v32 = vrot.slane %v12936_v21, 9  ;;  %6085 = vrot.lane.b32.xlu0 %v5997_v31, %s9824_s17  ;;  %v5540_v56 = vpop.permute.xlu0 %5539 }
 0x43d   : > { %8016 = vst.msk [vmem:[#allocation5 + $0x134] sm:$0xf] %vm4894_vm14, %v7937_v27  ;;  %v7942_v46 = vrot.slane %v7940_v38, 4  ;;  %v7949_v10 = vrot.slane %v7947_v30, 4  ;;  %v5038_v35 = vld [vmem:[#allocation3 + $0xa0] sm:$0xf] }
 0x43e   : > { %7719 = vst.msk [vmem:[#allocation5 + $0x4] sm:$0xf] %vm6133_vm5, %v7624_v42  ;;  %6135 = vst.msk [vmem:[#allocation5 + $0xc] sm:$0xf] %vm6133_vm5, %v6040_v39  ;;  %v5443_v11 = vrot.slane %v5442_v53, 4  ;;  %v5825_v20 = vrot.slane %v12946_v58, 5  ;;  %v5542_v53 = vpop.permute.xlu1 %5541  ;;  %v7550_v12 = vsel %vm10148_vm9, %v12954_v23, %v12967_v62 }
 0x43f   : > { %v6199_v29 = vld [vmem:[#allocation3 + $0x90] sm:$0xf]  ;;  %v6200_v43 = vld [vmem:[#allocation3 + $0x94] sm:$0xf]  ;;  %5070 = vst.msk [vmem:[#allocation5 + $0x144] sm:$0xf] %vm4894_vm14, %v5038_v35  ;;  %v7944_v34 = vsel %vm10435_vm1, %v7942_v46, %v7943_v18  ;;  %v7951_v2 = vsel %vm10435_vm1, %v7949_v10, %v7950_v3 }
 0x440   : > { %v12985_v4 = vrot.slane %v5455_v7, 5  ;;  %v12989_v38 = vrot.slane %v6851_v24, 4  ;;  %v12991_v9 = vld [vmem:[#allocation3 + $0xa4] sm:$0x1]  ;;  %v12993_v30 = vld [vmem:[#allocation3 + $0xb8] sm:$0xf]  ;;  %7671 = vrot.lane.b32.xlu0 %v7540_v61, %s9824_s17  ;;  %v6903_v7 = vpop.permute.xlu0 %6902  ;;  %v5448_v0 = vsel %vm10148_vm9, %v5443_v11, %v12921_v55 }
 0x441   : > { %v5998_v63 = vld [vmem:[#allocation3 + $0xa0] sm:$0xf]  ;;  %v13001_v48 = vrot.slane %v5452_v60, 4  ;;  %v6854_v51 = vrot.slane %v12944_v13, 5  ;;  %v7552_v45 = vshrl.u32 %v7230_v57, 16  ;;  %v7555_v54 = vshll.u32 %v7230_v57, 16 }
 0x442   : > { %8018 = vst.msk [vmem:[#allocation5 + $0x14c] sm:$0xf] %vm4894_vm14, %v7944_v34  ;;  %8020 = vst.msk [vmem:[#allocation5 + $0x164] sm:$0xf] %vm4894_vm14, %v7951_v2  ;;  %v9196_v5 = vrot.slane %v12958_v41, 9  ;;  %v6479_v40 = vshrl.u32 %v6199_v29, 16  ;;  %6087 = vrot.lane.b32.xlu1 %v5998_v63, %s9824_s17  ;;  %v6852_v57 = vsel %vm10435_vm1, %v9212_v32, %v6851_v24  ;;  %v6905_v10 = vpop.permute.xlu1 %6904 }
 0x443   : > { %v13007_v44 = vld [vmem:[#allocation3 + $0xa8] sm:$0xf]  ;;  %v6482_v47 = vshll.u32 %v6199_v29, 16  ;;  %v6488_v3 = vshll.u32 %v6200_v43, 16  ;;  %5620 = vst.msk [vmem:[#allocation5 + $0xc0] sm:$0xf] %vm5603_vm7, %v5540_v56  ;;  %v5458_v19 = vsel %vm10148_vm9, %v13001_v48, %v12985_v4  ;;  %v6855_v24 = vsel %vm10435_vm1, %v12989_v38, %v6854_v51 }
 0x444   : > { %7720 = vst.msk [vmem:[#allocation5 + $0x10] sm:$0xf] %vm6133_vm5, %v7626_v59  ;;  %v13013_v52 = vrot.slane %v5825_v20, 4  ;;  %v5828_v33 = vrot.slane %v12991_v9, 5  ;;  %v7561_v36 = vshll.u32 %v12993_v30, 16  ;;  %v6492_v22 = vshrl.u32 %v6200_v43, 16  ;;  %5559 = vrot.lane.b32.xlu0 %v5448_v0, %s9822_s23  ;;  %v5877_v35 = vpop.permute.xlu0 %5876 }
 0x445   : > { %v6201_v6 = vld [vmem:[#allocation3 + $0x98] sm:$0x1]  ;;  %vm8471_vm11 = vcmask 261120   ;;  %v6481_v16 = vrot.slane %v6479_v40, 4  ;;  %v6484_v8 = vrot.slane %v6482_v47, 5  ;;  %v13019_v25 = vrot.slane %v7552_v45, 4 }
 0x446   : > { %v6202_v50 = vld [vmem:[#allocation3 + $0x9c] sm:$0xf]  ;;  %v13021_v1 = vrot.slane %v7555_v54, 5  ;;  %v7565_v28 = vshrl.u32 %v12993_v30, 16  ;;  %v6490_v49 = vrot.slane %v6488_v3, 5  ;;  %v5460_v14 = vshrl.u32 %v13007_v44, 16  ;;  %7673 = vrot.lane.b32.xlu1 %v7550_v12, %s9824_s17 }
 0x447   : > { %v6485_v18 = vor.u32 %v6484_v8, %v6481_v16  ;;  %v6494_v13 = vrot.slane %v6492_v22, 4  ;;  %v6498_v17 = vshll.u32 %v6201_v6, 16  ;;  %5621 = vst.msk [vmem:[#allocation5 + $0xcc] sm:$0xf] %vm5603_vm7, %v5542_v53  ;;  %6982 = vst.msk [vmem:[#allocation5 + $0xc4] sm:$0xf] %vm5603_vm7, %v6903_v7  ;;  %v5826_v32 = vsel %vm10435_vm1, %v9196_v5, %v5825_v20  ;;  %v5879_v5 = vpop.permute.xlu1 %5878 }
 0x448   : > { %v6503_v26 = vshrl.u32 %v6202_v50, 16  ;;  %v6506_v31 = vshll.u32 %v6202_v50, 16  ;;  %v6203_v60 = vld [vmem:[#allocation3 + $0xa0] sm:$0xf]  ;;  %v6204_v41 = vld [vmem:[#allocation3 + $0xa4] sm:$0x1]  ;;  %6922 = vrot.lane.b32.xlu0 %v6852_v57, %s9822_s23  ;;  %v7096_v40 = vpop.permute.xlu0 %7095 }
 0x449   : > { %v6495_v23 = vor.u32 %v6494_v13, %v6490_v49  ;;  %v6205_v27 = vld [vmem:[#allocation3 + $0xa8] sm:$0xf]  ;;  %v5463_v42 = vshll.u32 %v13007_v44, 16  ;;  %v6486_v55 = vrot.slane %v6485_v18, 4  ;;  %v6500_v39 = vrot.slane %v6498_v17, 5  ;;  %v9751_v16 = vld [vmem:[%s13569_s4 + $0x88] sm:$0xff]  }
 0x44a   : > { %v6505_v62 = vrot.slane %v6503_v26, 4  ;;  %v6206_v46 = vld [vmem:[#allocation3 + $0xac] sm:$0xf]  ;;  %v9700_v61 = vld [vmem:[#allocation5] ss:$12 sps:$4 sm:$0xff]   ;;  %v6508_v43 = vrot.slane %v6506_v31, 5  ;;  %5561 = vrot.lane.b32.xlu1 %v5458_v19, %s9822_s23  ;;  %v5829_v18 = vsel %vm10435_vm1, %v13013_v52, %v5828_v33  ;;  %v7558_v26 = vor.u32 %v13021_v1, %v13019_v25 }
 0x44b   : > { %v9702_v21 = vld [vmem:[#allocation5 + $0x4] ss:$12 sps:$4 sm:$0xff]   ;;  %v6496_v11 = vrot.slane %v6495_v23, 4  ;;  %6983 = vst.msk [vmem:[#allocation5 + $0xd0] sm:$0xf] %vm5603_vm7, %v6905_v10  ;;  %v6491_v29 = vsel %vm10148_vm9, %v6486_v55, %v6490_v49  ;;  %v6512_v4 = vshll.u32 %v6203_v60, 16  ;;  %v7098_v52 = vpop.permute.xlu1 %7097 }
 0x44c   : > { %5957 = vst.msk [vmem:[#allocation5 + $0xc0] sm:$0xf] %vm5940_vm4, %v5877_v35  ;;  %v6516_v34 = vshrl.u32 %v6203_v60, 16  ;;  %v6522_v20 = vshll.u32 %v6204_v41, 16  ;;  %v6527_v38 = vshrl.u32 %v6205_v27, 16  ;;  %v6530_v2 = vshll.u32 %v6205_v27, 16  ;;  %8552 = vmatprep.mubr.bf16.mxu0 %v9702_v21  ;;  %5896 = vrot.lane.b32.xlu0 %v5826_v32, %s9823_s15  ;;  %v6070_v33 = vpop.permute.xlu0 %6069 }
 0x44d   : > { %6652 = vst.msk [vmem:[#allocation5 + $0x10c] sm:$0xf] %vm4894_vm14, %v6491_v29  ;;  %v6501_v58 = vsel %vm10148_vm9, %v6496_v11, %v6500_v39  ;;  %v6207_v63 = vld [vmem:[#allocation3 + $0xb0] sm:$0x1]  ;;  %v9704_v48 = vld [vmem:[#allocation5 + $0x8] ss:$12 sps:$4 sm:$0xff]   ;;  %v6509_v45 = vor.u32 %v6508_v43, %v6505_v62  ;;  %8553 = vmatmul.mubr.bf16.vlgmr.msra.gmra.mxu0 %v9700_v61 }
 0x44e   : > { %v9705_v51 = vld [vmem:[%s13569_s4 + $0x80] sm:$0xff]   ;;  %6653 = vst.msk [vmem:[#allocation5 + $0x118] sm:$0xf] %vm4894_vm14, %v6501_v58  ;;  %v6514_v54 = vrot.slane %v6512_v4, 5  ;;  %v6518_v56 = vrot.slane %v6516_v34, 4  ;;  %v6536_v59 = vshll.u32 %v6206_v46, 16  ;;  %9542 = vmatpush3.bf16.msra.mxu0 %v9751_v16  ;;  %9545 = vmatprep.mubr.msk.bf16.mxu0 %vm8471_vm11, %v9704_v48 }
 0x44f   : > { %v6524_v47 = vrot.slane %v6522_v20, 5  ;;  %v6529_v3 = vrot.slane %v6527_v38, 4  ;;  %v6532_v22 = vrot.slane %v6530_v2, 5  ;;  %v6540_v6 = vshrl.u32 %v6206_v46, 16  ;;  %5958 = vst.msk [vmem:[#allocation5 + $0xcc] sm:$0xf] %vm5940_vm4, %v5879_v5  ;;  %6924 = vrot.lane.b32.xlu1 %v6855_v24, %s9822_s23  ;;  %9543 = vmatprep.subr.bf16.mxu0 %v9705_v51  ;;  %v6072_v61 = vpop.permute.xlu1 %6071 }
 0x450   : > { %7175 = vst.msk [vmem:[#allocation5 + $0xc4] sm:$0xf] %vm5940_vm4, %v7096_v40  ;;  %v5118_v8 = vld [vmem:[#allocation3 + $0xac] sm:$0xf]  ;;  %v6510_v50 = vrot.slane %v6509_v45, 4  ;;  %v6519_v49 = vor.u32 %v6518_v56, %v6514_v54  ;;  %v6538_v53 = vrot.slane %v6536_v59, 5  ;;  %v7656_v19 = vpop.permute.xlu0 %7655 }
 0x451   : > { %v6546_v7 = vshll.u32 %v6207_v63, 16  ;;  %v13082_v13 = vrot.slane %v7561_v36, 5  ;;  %v6533_v17 = vor.u32 %v6532_v22, %v6529_v3  ;;  %v6542_v12 = vrot.slane %v6540_v6, 4  ;;  %v5039_v0 = vld [vmem:[#allocation3 + $0xa8] sm:$0xf] }
 0x452   : > { %v7567_v31 = vrot.slane %v7565_v28, 4  ;;  %v6515_v9 = vsel %vm10148_vm9, %v6510_v50, %v6514_v54  ;;  %v6520_v60 = vrot.slane %v6519_v49, 4  ;;  %5071 = vst.msk [vmem:[#allocation5 + $0x150] sm:$0xf] %vm4894_vm14, %v5039_v0  ;;  %v5469_v36 = vshll.u32 %v5118_v8, 16  ;;  %9544 = vmatpush3.bf16.msra.mxu0 %v9705_v51 }
 0x453   : > { %v7232_v41 = vld [vmem:[#allocation3 + $0xbc] sm:$0x1]  ;;  %6654 = vst.msk [vmem:[#allocation5 + $0x124] sm:$0xf] %vm4894_vm14, %v6515_v9  ;;  %v6534_v57 = vrot.slane %v6533_v17, 4  ;;  %v6543_v23 = vor.u32 %v6542_v12, %v6538_v53  ;;  %v6548_v27 = vrot.slane %v6546_v7, 5  ;;  %5898 = vrot.lane.b32.xlu1 %v5829_v18, %s9823_s15  ;;  %v7658_v59 = vpop.permute.xlu1 %7657 }
 0x454   : > { %7176 = vst.msk [vmem:[#allocation5 + $0xd0] sm:$0xf] %vm5940_vm4, %v7098_v52  ;;  %v7025_v30 = vld [vmem:[#allocation3 + $0xb4] sm:$0xf]  ;;  %v5462_v25 = vrot.slane %v5460_v14, 4  ;;  %v5465_v1 = vrot.slane %v5463_v42, 5  ;;  %v6525_v55 = vsel %vm10148_vm9, %v6520_v60, %v6524_v47  ;;  %v7568_v44 = vor.u32 %v7567_v31, %v13082_v13  ;;  %v5544_v5 = vpop.permute.xlu0 %5543 }
 0x455   : > { %6150 = vst.msk [vmem:[#allocation5 + $0xc0] sm:$0xf] %vm6133_vm5, %v6070_v33  ;;  %v5473_v28 = vshrl.u32 %v5118_v8, 16  ;;  %7115 = vrot.lane.b32.xlu0 %v7025_v30, %s9823_s15  ;;  %v9706_v39 = vld [vmem:[#allocation5 + $0x20] ss:$12 sps:$4 sm:$0xff]   ;;  %v6539_v62 = vsel %vm10148_vm9, %v6534_v57, %v6538_v53  ;;  %v6544_v46 = vrot.slane %v6543_v23, 4 }
 0x456   : > { %6655 = vst.msk [vmem:[#allocation5 + $0x130] sm:$0xf] %vm4894_vm14, %v6525_v55  ;;  %v5040_v10 = vld [vmem:[#allocation3 + $0xac] sm:$0xf]  ;;  %v9707_v14 = vld [vmem:[#allocation5 + $0x38] ss:$12 sps:$4 sm:$0xff]   ;;  %9546 = vmatmul.mubr.msk.bf16.vlgmr.msra.gmra.mxu0 %vm8471_vm11, %v9706_v39  ;;  %v5466_v29 = vor.u32 %v5465_v1, %v5462_v25 }
 0x457   : > { %v5999_v35 = vld [vmem:[#allocation3 + $0xa8] sm:$0xf]  ;;  %v7571_v42 = vshll.u32 %v7232_v41, 16  ;;  %6656 = vst.msk [vmem:[#allocation5 + $0x13c] sm:$0xf] %vm4894_vm14, %v6539_v62  ;;  %v7559_v24 = vrot.slane %v7558_v26, 4  ;;  %v6549_v11 = vsel %vm10148_vm9, %v6544_v46, %v6548_v27  ;;  %9549 = vmatprep.mubr.msk.bf16.mxu0 %vm8471_vm11, %v9707_v14 }
 0x458   : > { %5072 = vst.msk [vmem:[#allocation5 + $0x15c] sm:$0xf] %vm4894_vm14, %v5040_v10  ;;  %v7026_v21 = vld [vmem:[#allocation3 + $0xb8] sm:$0xf]  ;;  %v5119_v32 = vld [vmem:[#allocation3 + $0xb0] sm:$0x1]  ;;  %v6907_v60 = vpop.permute.xlu0 %6906 }
 0x459   : > { %7735 = vst.msk [vmem:[#allocation5 + $0xc4] sm:$0xf] %vm6133_vm5, %v7656_v19  ;;  %6151 = vst.msk [vmem:[#allocation5 + $0xcc] sm:$0xf] %vm6133_vm5, %v6072_v61  ;;  %v5471_v43 = vrot.slane %v5469_v36, 5  ;;  %v5475_v4 = vrot.slane %v5473_v28, 4  ;;  %6089 = vrot.lane.b32.xlu0 %v5999_v35, %s9824_s17  ;;  %7117 = vrot.lane.b32.xlu1 %v7026_v21, %s9823_s15  ;;  %v7564_v6 = vsel %vm10148_vm9, %v7559_v24, %v13082_v13  ;;  %v5546_v13 = vpop.permute.xlu1 %5545 }
 0x45a   : > { %6657 = vst.msk [vmem:[#allocation5 + $0x148] sm:$0xf] %vm4894_vm14, %v6549_v11  ;;  %v6208_v34 = vld [vmem:[#allocation3 + $0xb4] sm:$0xf]  ;;  %v6209_v58 = vld [vmem:[#allocation3 + $0xb8] sm:$0xf] }
 0x45b   : > { %v6551_v20 = vshrl.u32 %v6208_v34, 16  ;;  %v6554_v38 = vshll.u32 %v6208_v34, 16  ;;  %v6560_v2 = vshll.u32 %v6209_v58, 16  ;;  %v6564_v63 = vshrl.u32 %v6209_v58, 16  ;;  %v6210_v48 = vld [vmem:[#allocation3 + $0xbc] sm:$0x1] }
 0x45c   : > { %v7569_v51 = vrot.slane %v7568_v44, 4  ;;  %v7573_v45 = vrot.slane %v7571_v42, 5  ;;  %v6705_v54 = vld [vmem:[#allocation3 + $0xb8] sm:$0xf]  ;;  %v6570_v56 = vshll.u32 %v6210_v48, 16  ;;  %v5467_v8 = vrot.slane %v5466_v29, 4  ;;  %v5881_v35 = vpop.permute.xlu0 %5880 }
 0x45d   : > { %v6553_v40 = vrot.slane %v6551_v20, 4  ;;  %v6556_v47 = vrot.slane %v6554_v38, 5  ;;  %v6562_v3 = vrot.slane %v6560_v2, 5  ;;  %v6566_v22 = vrot.slane %v6564_v63, 4  ;;  %7736 = vst.msk [vmem:[#allocation5 + $0xd0] sm:$0xf] %vm6133_vm5, %v7658_v59  ;;  %7675 = vrot.lane.b32.xlu0 %v7564_v6, %s9824_s17  ;;  %v6909_v14 = vpop.permute.xlu1 %6908 }
 0x45e   : > { %5622 = vst.msk [vmem:[#allocation5 + $0xd8] sm:$0xf] %vm5603_vm7, %v5544_v5  ;;  %v6000_v16 = vld [vmem:[#allocation3 + $0xac] sm:$0xf]  ;;  %v5476_v50 = vor.u32 %v5475_v4, %v5471_v43  ;;  %v5479_v49 = vshll.u32 %v5119_v32, 16  ;;  %v6858_v18 = vrot.slane %v6705_v54, 5  ;;  %v7574_v52 = vsel %vm10148_vm9, %v7569_v51, %v7573_v45 }
 0x45f   : > { %6091 = vrot.lane.b32.xlu1 %v6000_v16, %s9824_s17  ;;  %v9708_v53 = vld [vmem:[#allocation5 + $0x50] ss:$12 sps:$4 sm:$0xff]   ;;  %v6557_v17 = vor.u32 %v6556_v47, %v6553_v40  ;;  %v6572_v12 = vrot.slane %v6570_v56, 5  ;;  %v6567_v0 = vor.u32 %v6566_v22, %v6562_v3  ;;  %v9709_v26 = vld [vmem:[#allocation5 + $0x68] ss:$12 sps:$4 sm:$0xff]   ;;  %v5472_v57 = vsel %vm10148_vm9, %v5467_v8, %v5471_v43 }
 0x460   : > { %v6704_v7 = vld [vmem:[#allocation3 + $0xb4] sm:$0xe]  ;;  %v5678_v31 = vld [vmem:[#allocation3 + $0xa8] sm:$0xe]  ;;  %v7233_v9 = vld [vmem:[#allocation3 + $0xc0] sm:$0xf]  ;;  %9550 = vmatmul.mubr.msk.bf16.gmra.mxu0 %vm8471_vm11, %v9708_v53  ;;  %v7100_v51 = vpop.permute.xlu0 %7099 }
 0x461   : > { %v6706_v33 = vld [vmem:[#allocation3 + $0xbc] sm:$0x1]  ;;  %v6558_v36 = vrot.slane %v6557_v17, 4  ;;  %v6568_v41 = vrot.slane %v6567_v0, 4  ;;  %5623 = vst.msk [vmem:[#allocation5 + $0xe4] sm:$0xf] %vm5603_vm7, %v5546_v13  ;;  %9553 = vmatprep.mubr.msk.bf16.mxu0 %vm8471_vm11, %v9709_v26  ;;  %5563 = vrot.lane.b32.xlu0 %v5472_v57, %s9822_s23  ;;  %v5883_v58 = vpop.permute.xlu1 %5882 }
 0x462   : > { %6984 = vst.msk [vmem:[#allocation5 + $0xdc] sm:$0xf] %vm5603_vm7, %v6907_v60  ;;  %v5477_v23 = vrot.slane %v5476_v50, 4  ;;  %v5481_v27 = vrot.slane %v5479_v49, 5  ;;  %v9213_v30 = vrot.slane %v6704_v7, 9  ;;  %v6860_v1 = vrot.slane %v6858_v18, 4 }
 0x463   : > { %v5679_v25 = vld [vmem:[#allocation3 + $0xac] sm:$0xf]  ;;  %7677 = vrot.lane.b32.xlu1 %v7574_v52, %s9824_s17  ;;  %v6563_v28 = vsel %vm10148_vm9, %v6558_v36, %v6562_v3  ;;  %v6573_v55 = vsel %vm10148_vm9, %v6568_v41, %v6572_v12  ;;  %v6861_v39 = vrot.slane %v6706_v33, 5  ;;  %v9197_v62 = vrot.slane %v5678_v31, 9  ;;  %v9712_v42 = vld [vmem:[#allocation5 + $0xc0] ss:$12 sps:$4 sm:$0xff]  }
 0x464   : > { %v7576_v46 = vshrl.u32 %v7233_v9, 16  ;;  %v7579_v10 = vshll.u32 %v7233_v9, 16  ;;  %6658 = vst.msk [vmem:[#allocation5 + $0x154] sm:$0xf] %vm4894_vm14, %v6563_v28  ;;  %6659 = vst.msk [vmem:[#allocation5 + $0x160] sm:$0xf] %vm4894_vm14, %v6573_v55  ;;  %v5482_v61 = vsel %vm10148_vm9, %v5477_v23, %v5481_v27  ;;  %v6859_v21 = vsel %vm10435_vm1, %v9213_v30, %v6858_v18  ;;  %v6074_v16 = vpop.permute.xlu0 %6073 }
 0x465   : > { %v9710_v44 = vld [vmem:[#allocation5 + $0xc4] ss:$12 sps:$4 sm:$0xff]   ;;  %v5832_v19 = vrot.slane %v5679_v25, 5  ;;  %6985 = vst.msk [vmem:[#allocation5 + $0xe8] sm:$0xf] %vm5603_vm7, %v6909_v14  ;;  %6926 = vrot.lane.b32.xlu0 %v6859_v21, %s9822_s23  ;;  %v6862_v20 = vsel %vm10435_vm1, %v6860_v1, %v6861_v39  ;;  %v7102_v3 = vpop.permute.xlu1 %7101 }
 0x466   : > { %5959 = vst.msk [vmem:[#allocation5 + $0xd8] sm:$0xf] %vm5940_vm4, %v5881_v35  ;;  %v5680_v24 = vld [vmem:[#allocation3 + $0xb0] sm:$0x1]  ;;  %v9713_v32 = vld [vmem:[#allocation5 + $0x80] ss:$12 sps:$4 sm:$0xff]   ;;  %8616 = vmatprep.mubr.bf16.mxu1 %v9710_v44 }
 0x467   : > { %5565 = vrot.lane.b32.xlu1 %v5482_v61, %s9822_s23  ;;  %v7234_v11 = vld [vmem:[#allocation3 + $0xc4] sm:$0xf]  ;;  %v5120_v29 = vld [vmem:[#allocation3 + $0xb4] sm:$0xf]  ;;  %v9714_v43 = vld [vmem:[#allocation5 + $0x98] ss:$12 sps:$4 sm:$0xff]   ;;  %8617 = vmatmul.mubr.bf16.gmra.mxu1 %v9712_v42  ;;  %v5833_v38 = vsel %vm10435_vm1, %v9197_v62, %v5832_v19 }
 0x468   : > { %v7578_v4 = vrot.slane %v7576_v46, 4  ;;  %v7581_v34 = vrot.slane %v7579_v10, 5  ;;  %9554 = vmatmul.mubr.msk.bf16.gmra.mxu0 %vm8471_vm11, %v9713_v32  ;;  %v5834_v2 = vrot.slane %v5832_v19, 4  ;;  %v5835_v63 = vrot.slane %v5680_v24, 5  ;;  %v5121_v48 = vld [vmem:[#allocation3 + $0xb8] sm:$0xf]  ;;  %v7660_v41 = vpop.permute.xlu0 %7659 }
 0x469   : > { %5960 = vst.msk [vmem:[#allocation5 + $0xe4] sm:$0xf] %vm5940_vm4, %v5883_v58  ;;  %9557 = vmatprep.mubr.msk.bf16.mxu0 %vm8471_vm11, %v9714_v43  ;;  %v7585_v45 = vshll.u32 %v7234_v11, 16  ;;  %v7589_v54 = vshrl.u32 %v7234_v11, 16  ;;  %v5484_v56 = vshrl.u32 %v5120_v29, 16  ;;  %v5487_v59 = vshll.u32 %v5120_v29, 16  ;;  %5900 = vrot.lane.b32.xlu0 %v5833_v38, %s9823_s15  ;;  %v6076_v60 = vpop.permute.xlu1 %6075 }
 0x46a   : > { %7177 = vst.msk [vmem:[#allocation5 + $0xdc] sm:$0xf] %vm5940_vm4, %v7100_v51  ;;  %v7582_v5 = vor.u32 %v7581_v34, %v7578_v4  ;;  %v5493_v40 = vshll.u32 %v5121_v48, 16  ;;  %v5497_v47 = vshrl.u32 %v5121_v48, 16  ;;  %v5836_v22 = vsel %vm10435_vm1, %v5834_v2, %v5835_v63  ;;  %v7027_v6 = vld [vmem:[#allocation3 + $0xc0] sm:$0xf] }
 0x46b   : > { %6928 = vrot.lane.b32.xlu1 %v6862_v20, %s9822_s23  ;;  %7178 = vst.msk [vmem:[#allocation5 + $0xe8] sm:$0xf] %vm5940_vm4, %v7102_v3  ;;  %v7587_v8 = vrot.slane %v7585_v45, 5  ;;  %v7591_v50 = vrot.slane %v7589_v54, 4  ;;  %v5486_v49 = vrot.slane %v5484_v56, 4  ;;  %v5489_v53 = vrot.slane %v5487_v59, 5 }
 0x46c   : > { %v5041_v7 = vld [vmem:[#allocation3 + $0xb4] sm:$0xf]  ;;  %6152 = vst.msk [vmem:[#allocation5 + $0xd8] sm:$0xf] %vm6133_vm5, %v6074_v16  ;;  %v7235_v17 = vld [vmem:[#allocation3 + $0xc8] sm:$0x1]  ;;  %v5548_v32 = vpop.permute.xlu0 %5547 }
 0x46d   : > { %7119 = vrot.lane.b32.xlu0 %v7027_v6, %s9823_s15  ;;  %v9715_v18 = vld [vmem:[#allocation5 + $0xb0] ss:$12 sps:$4 sm:$0xff]   ;;  %5073 = vst.msk [vmem:[#allocation5 + $0x168] sm:$0xf] %vm4894_vm14, %v5041_v7  ;;  %v9716_v12 = vld [vmem:[#allocation5 + $0xc8] ss:$12 sps:$4 sm:$0xff]   ;;  %v7592_v57 = vor.u32 %v7591_v50, %v7587_v8  ;;  %v5490_v27 = vor.u32 %v5489_v53, %v5486_v49  ;;  %v7662_v44 = vpop.permute.xlu1 %7661 }
 0x46e   : > { %v7028_v0 = vld [vmem:[#allocation3 + $0xc4] sm:$0xf]  ;;  %v6001_v26 = vld [vmem:[#allocation3 + $0xb4] sm:$0xf]  ;;  %v7583_v31 = vrot.slane %v7582_v5, 4  ;;  %v13165_v9 = vrot.slane %v5493_v40, 5 }
 0x46f   : > { %5902 = vrot.lane.b32.xlu1 %v5836_v22, %s9823_s15  ;;  %v5499_v13 = vrot.slane %v5497_v47, 4  ;;  %v5122_v52 = vld [vmem:[#allocation3 + $0xbc] sm:$0x1]  ;;  %v13168_v33 = vld [vmem:[#allocation3 + $0xc4] sm:$0xf]  ;;  %v7595_v23 = vshll.u32 %v7235_v17, 16 }
 0x470   : > { %9558 = vmatmul.mubr.msk.bf16.gmra.mxu0 %vm8471_vm11, %v9715_v18  ;;  %v5042_v36 = vld [vmem:[#allocation3 + $0xb8] sm:$0xf]  ;;  %6153 = vst.msk [vmem:[#allocation5 + $0xe4] sm:$0xf] %vm6133_vm5, %v6076_v60  ;;  %v6211_v30 = vld [vmem:[#allocation3 + $0xc0] sm:$0xf]  ;;  %v7588_v46 = vsel %vm10148_vm9, %v7583_v31, %v7587_v8  ;;  %v6911_v3 = vpop.permute.xlu0 %6910 }
 0x471   : > { %9561 = vmatprep.mubr.msk.bf16.mxu0 %vm8471_vm11, %v9716_v12  ;;  %5074 = vst.msk [vmem:[#allocation5 + $0x174] sm:$0xf] %vm4894_vm14, %v5042_v36  ;;  %v6212_v25 = vld [vmem:[#allocation3 + $0xc4] sm:$0xf]  ;;  %6093 = vrot.lane.b32.xlu0 %v6001_v26, %s9824_s17  ;;  %v6575_v1 = vshrl.u32 %v6211_v30, 16  ;;  %v6578_v28 = vshll.u32 %v6211_v30, 16  ;;  %v5500_v10 = vor.u32 %v5499_v13, %v13165_v9  ;;  %v5550_v54 = vpop.permute.xlu1 %5549 }
 0x472   : > { %7737 = vst.msk [vmem:[#allocation5 + $0xdc] sm:$0xf] %vm6133_vm5, %v7660_v41  ;;  %v6584_v55 = vshll.u32 %v6212_v25, 16  ;;  %v6588_v39 = vshrl.u32 %v6212_v25, 16  ;;  %v6213_v62 = vld [vmem:[#allocation3 + $0xc8] sm:$0x1] }
 0x473   : > { %7121 = vrot.lane.b32.xlu1 %v7028_v0, %s9823_s15  ;;  %v5503_v14 = vshll.u32 %v5122_v52, 16  ;;  %v6594_v35 = vshll.u32 %v6213_v62, 16  ;;  %v6707_v42 = vld [vmem:[#allocation3 + $0xc0] sm:$0xe]  ;;  %v6577_v19 = vrot.slane %v6575_v1, 4  ;;  %v6580_v61 = vrot.slane %v6578_v28, 5 }
 0x474   : > { %v6586_v21 = vrot.slane %v6584_v55, 5  ;;  %v6590_v24 = vrot.slane %v6588_v39, 4  ;;  %7738 = vst.msk [vmem:[#allocation5 + $0xe8] sm:$0xf] %vm6133_vm5, %v7662_v44  ;;  %v6002_v11 = vld [vmem:[#allocation3 + $0xb8] sm:$0xf] }
 0x475   : > { %v7593_v29 = vrot.slane %v7592_v57, 4  ;;  %v7597_v43 = vrot.slane %v7595_v23, 5  ;;  %v5491_v4 = vrot.slane %v5490_v27, 4  ;;  %v6865_v34 = vrot.slane %v13168_v33, 5  ;;  %5624 = vst.msk [vmem:[#allocation5 + $0xf0] sm:$0xf] %vm5603_vm7, %v5548_v32  ;;  %7679 = vrot.lane.b32.xlu0 %v7588_v46, %s9824_s17  ;;  %v6913_v13 = vpop.permute.xlu1 %6912  ;;  %v5885_v57 = vpop.permute.xlu0 %5884 }
 0x476   : > { %v9717_v58 = vld [vmem:[#allocation5 + $0xe0] ss:$12 sps:$4 sm:$0xff]   ;;  %v7236_v20 = vld [vmem:[#allocation3 + $0xcc] sm:$0xf]  ;;  %v6581_v38 = vor.u32 %v6580_v61, %v6577_v19  ;;  %v6591_v2 = vor.u32 %v6590_v24, %v6586_v21  ;;  %v6596_v63 = vrot.slane %v6594_v35, 5  ;;  %v9214_v51 = vrot.slane %v6707_v42, 9 }
 0x477   : > { %6095 = vrot.lane.b32.xlu1 %v6002_v11, %s9824_s17  ;;  %v9718_v48 = vld [vmem:[#allocation5 + $0xf8] ss:$12 sps:$4 sm:$0xff]   ;;  %v13184_v45 = vld [vmem:[#allocation3 + $0xc8] sm:$0x1]  ;;  %v5501_v56 = vrot.slane %v5500_v10, 4  ;;  %v5505_v59 = vrot.slane %v5503_v14, 5  ;;  %v7598_v22 = vsel %vm10148_vm9, %v7593_v29, %v7597_v43  ;;  %v5496_v6 = vsel %vm10148_vm9, %v5491_v4, %v13165_v9 }
 0x478   : > { %9562 = vmatmul.mubr.msk.bf16.gmra.mxu0 %vm8471_vm11, %v9717_v58  ;;  %v5681_v5 = vld [vmem:[#allocation3 + $0xb4] sm:$0xe]  ;;  %v6582_v40 = vrot.slane %v6581_v38, 4  ;;  %v6592_v47 = vrot.slane %v6591_v2, 4  ;;  %5625 = vst.msk [vmem:[#allocation5 + $0xfc] sm:$0xf] %vm5603_vm7, %v5550_v54  ;;  %v6866_v52 = vsel %vm10435_vm1, %v9214_v51, %v6865_v34 }
 0x479   : > { %9565 = vmatprep.mubr.msk.bf16.mxu0 %vm8471_vm11, %v9718_v48  ;;  %v6867_v16 = vrot.slane %v6865_v34, 4  ;;  %v5682_v8 = vld [vmem:[#allocation3 + $0xb8] sm:$0xf]  ;;  %v7600_v50 = vshrl.u32 %v7236_v20, 16  ;;  %6986 = vst.msk [vmem:[#allocation5 + $0xf4] sm:$0xf] %vm5603_vm7, %v6911_v3  ;;  %5567 = vrot.lane.b32.xlu0 %v5496_v6, %s9822_s23  ;;  %v5506_v60 = vsel %vm10148_vm9, %v5501_v56, %v5505_v59  ;;  %v5887_v35 = vpop.permute.xlu1 %5886  ;;  %v7104_v44 = vpop.permute.xlu0 %7103 }
 0x47a   : > { %v6587_v49 = vsel %vm10148_vm9, %v6582_v40, %v6586_v21  ;;  %v6597_v53 = vsel %vm10148_vm9, %v6592_v47, %v6596_v63  ;;  %v7796_v7 = vld [vmem:[#allocation3 + $0xcc] sm:$0xe]  ;;  %v7797_v18 = vld [vmem:[#allocation3 + $0xd0] sm:$0xf]  ;;  %v7798_v17 = vld [vmem:[#allocation3 + $0xd4] sm:$0x1] }
 0x47b   : > { %7681 = vrot.lane.b32.xlu1 %v7598_v22, %s9824_s17  ;;  %v7237_v12 = vld [vmem:[#allocation3 + $0xd0] sm:$0xf]  ;;  %v7603_v0 = vshll.u32 %v7236_v20, 16  ;;  %6660 = vst.msk [vmem:[#allocation5 + $0x16c] sm:$0xf] %vm4894_vm14, %v6587_v49  ;;  %v9230_v26 = vrot.slane %v7796_v7, 9 }
 0x47c   : > { %6661 = vst.msk [vmem:[#allocation5 + $0x178] sm:$0xf] %vm4894_vm14, %v6597_v53  ;;  %v7954_v31 = vrot.slane %v7797_v18, 5  ;;  %v7957_v9 = vrot.slane %v7798_v17, 5  ;;  %v9719_v33 = vld [vmem:[#allocation5 + $0xdc] ss:$12 sps:$4 sm:$0xff]  }
 0x47d   : > { %v9721_v36 = vld [vmem:[#allocation5 + $0xd8] ss:$12 sps:$4 sm:$0xff]   ;;  %v6868_v41 = vrot.slane %v13184_v45, 5  ;;  %6987 = vst.msk [vmem:[#allocation5 + $0x100] sm:$0xf] %vm5603_vm7, %v6913_v13  ;;  %v9198_v23 = vrot.slane %v5681_v5, 9  ;;  %6930 = vrot.lane.b32.xlu0 %v6866_v52, %s9822_s23  ;;  %8624 = vmatprep.mubr.bf16.mxu1 %v9719_v33  ;;  %v7106_v43 = vpop.permute.xlu1 %7105  ;;  %v6078_v34 = vpop.permute.xlu0 %6077 }
 0x47e   : > { %v5839_v27 = vrot.slane %v5682_v8, 5  ;;  %v7955_v30 = vsel %vm10435_vm1, %v9230_v26, %v7954_v31  ;;  %v7956_v25 = vrot.slane %v7954_v31, 4  ;;  %5961 = vst.msk [vmem:[#allocation5 + $0xf0] sm:$0xf] %vm5940_vm4, %v5885_v57  ;;  %v9722_v1 = vld [vmem:[#allocation5 + $0x110] ss:$12 sps:$4 sm:$0xff]   ;;  %8625 = vmatmul.mubr.bf16.gmra.mxu1 %v9721_v36 }
 0x47f   : > { %5569 = vrot.lane.b32.xlu1 %v5506_v60, %s9822_s23  ;;  %v5683_v28 = vld [vmem:[#allocation3 + $0xbc] sm:$0x1]  ;;  %v7609_v55 = vshll.u32 %v7237_v12, 16  ;;  %8021 = vst.msk [vmem:[#allocation5 + $0x170] sm:$0xf] %vm4894_vm14, %v7955_v30  ;;  %v7602_v62 = vrot.slane %v7600_v50, 4  ;;  %v6869_v42 = vsel %vm10435_vm1, %v6867_v16, %v6868_v41 }
 0x480   : > { %v9723_v39 = vld [vmem:[#allocation5 + $0x128] ss:$12 sps:$4 sm:$0xff]   ;;  %v7605_v46 = vrot.slane %v7603_v0, 5  ;;  %v7613_v10 = vshrl.u32 %v7237_v12, 16  ;;  %v7958_v14 = vsel %vm10435_vm1, %v7956_v25, %v7957_v9  ;;  %9566 = vmatmul.mubr.msk.bf16.gmra.mxu0 %vm8471_vm11, %v9722_v1  ;;  %5962 = vst.msk [vmem:[#allocation5 + $0xfc] sm:$0xf] %vm5940_vm4, %v5887_v35  ;;  %v5840_v19 = vsel %vm10435_vm1, %v9198_v23, %v5839_v27 }
 0x481   : > { %8022 = vst.msk [vmem:[#allocation5 + $0x17c] sm:$0xf] %vm4894_vm14, %v7958_v14  ;;  %9569 = vmatprep.mubr.msk.bf16.mxu0 %vm8471_vm11, %v9723_v39  ;;  %v5841_v61 = vrot.slane %v5839_v27, 4  ;;  %v5842_v21 = vrot.slane %v5683_v28, 5  ;;  %5904 = vrot.lane.b32.xlu0 %v5840_v19, %s9823_s15  ;;  %v7029_v24 = vld [vmem:[#allocation3 + $0xcc] sm:$0xf]  ;;  %v6080_v45 = vpop.permute.xlu1 %6079  ;;  %v7664_v54 = vpop.permute.xlu0 %7663 }
 0x482   : > { %7179 = vst.msk [vmem:[#allocation5 + $0xf4] sm:$0xf] %vm5940_vm4, %v7104_v44  ;;  %v7606_v32 = vor.u32 %v7605_v46, %v7602_v62  ;;  %v7611_v11 = vrot.slane %v7609_v55, 5  ;;  %v7615_v29 = vrot.slane %v7613_v10, 4  ;;  %v7238_v4 = vld [vmem:[#allocation3 + $0xd4] sm:$0x1]  ;;  %v13280_v19 = vpop.f32.mrf.mxu1 }
 0x483   : > { %6932 = vrot.lane.b32.xlu1 %v6869_v42, %s9822_s23  ;;  %7180 = vst.msk [vmem:[#allocation5 + $0x100] sm:$0xf] %vm5940_vm4, %v7106_v43  ;;  %v5843_v58 = vsel %vm10435_vm1, %v5841_v61, %v5842_v21  ;;  %v9724_v20 = vld [vmem:[#allocation5 + $0x140] ss:$12 sps:$4 sm:$0xff]   ;;  %v7030_v38 = vld [vmem:[#allocation3 + $0xd0] sm:$0xf] }
 0x484   : > { %6154 = vst.msk [vmem:[#allocation5 + $0xf0] sm:$0xf] %vm6133_vm5, %v6078_v34  ;;  %v9725_v2 = vld [vmem:[#allocation5 + $0x158] ss:$12 sps:$4 sm:$0xff]   ;;  %v7607_v63 = vrot.slane %v7606_v32, 4  ;;  %v7616_v48 = vor.u32 %v7615_v29, %v7611_v11  ;;  %v7619_v51 = vshll.u32 %v7238_v4, 16 }
 0x485   : > { %7123 = vrot.lane.b32.xlu0 %v7029_v24, %s9823_s15  ;;  %6155 = vst.msk [vmem:[#allocation5 + $0xfc] sm:$0xf] %vm6133_vm5, %v6080_v45  ;;  %v6003_v37 = vld [vmem:[#allocation3 + $0xc0] sm:$0xf]  ;;  %7739 = vst.msk [vmem:[#allocation5 + $0xf4] sm:$0xf] %vm6133_vm5, %v7664_v54  ;;  %v7666_v40 = vpop.permute.xlu1 %7665  ;;  %v5552_v3 = vpop.permute.xlu0 %5551 }
 0x486   : > { %v7612_v56 = vsel %vm10148_vm9, %v7607_v63, %v7611_v11  ;;  %v7617_v59 = vrot.slane %v7616_v48, 4  ;;  %v7621_v5 = vrot.slane %v7619_v51, 5  ;;  %7740 = vst.msk [vmem:[#allocation5 + $0x100] sm:$0xf] %vm6133_vm5, %v7666_v40  ;;  %v6004_v22 = vld [vmem:[#allocation3 + $0xc4] sm:$0xf]  ;;  %v13284_v24 = vpop.f32.mrf.mxu1 }
 0x487   : > { %5906 = vrot.lane.b32.xlu1 %v5843_v58, %s9823_s15  ;;  %5626 = vst.msk [vmem:[#allocation5 + $0x108] sm:$0xf] %vm5603_vm7, %v5552_v3  ;;  %s9756_s23 = sshll.u32 %s9825_s16, 4  ;;  %s9757_s23 = int_to_ptr.vmem [resolvable:$false] %s9756_s23 }
 0x488   : > { %9570 = vmatmul.mubr.msk.bf16.gmra.mxu0 %vm8471_vm11, %v9724_v20  ;;  %v9741_v47 = vld [vmem:[#allocation5 + $0x170] ss:$12 sps:$4 sm:$0xff]   ;;  %v7622_v6 = vsel %vm10148_vm9, %v7617_v59, %v7621_v5  ;;  %v13288_v29 = vpop.f32.mrf.mxu1  ;;  %p9759_p1 = scmp.lt.s32.totalorder %s13518_s21, %s9757_s23 }
 0x489   : > { %9573 = vmatprep.mubr.msk.bf16.mxu0 %vm8471_vm11, %v9725_v2  ;;  %6097 = vrot.lane.b32.xlu0 %v6003_v37, %s9824_s17  ;;  %v5554_v16 = vpop.permute.xlu1 %5553  ;;  %v6915_v8 = vpop.permute.xlu0 %6914 }
 0x48a   : > { %5627 = vst.msk [vmem:[#allocation5 + $0x114] sm:$0xf] %vm5603_vm7, %v5554_v16  ;;  %6988 = vst.msk [vmem:[#allocation5 + $0x10c] sm:$0xf] %vm5603_vm7, %v6915_v8  ;;  %v13292_v34 = vpop.f32.mrf.mxu1 }
 0x48b   : > { %7125 = vrot.lane.b32.xlu1 %v7030_v38, %s9823_s15  ;;  %s9758_s15 = scalar_lea.vmem %s9757_s23, 8192 }
 0x48c   : > { %v9728_v53 = vld [vmem:[#allocation5 + $0xf0] ss:$12 sps:$4 sm:$0xff]   ;;  %v13295_v38 = vpop.f32.mrf.mxu1  ;;  %p9760_p2 = scmp.lt.s32.totalorder %s9758_s15, %s9752_s14 }
 0x48d   : > { %7683 = vrot.lane.b32.xlu0 %v7612_v56, %s9824_s17  ;;  %v6917_v50 = vpop.permute.xlu1 %6916  ;;  %v9726_v49 = vld [vmem:[#allocation5 + $0xf4] ss:$12 sps:$4 sm:$0xff]   ;;  %v5889_v7 = vpop.permute.xlu0 %5888 }
 0x48e   : > { %6989 = vst.msk [vmem:[#allocation5 + $0x118] sm:$0xf] %vm5603_vm7, %v6917_v50  ;;  %8632 = vmatprep.mubr.bf16.mxu1 %v9726_v49  ;;  %v13299_v45 = vpop.f32.mrf.mxu1  ;;  %p9761_p3 = por %p9760_p2, %p9759_p1 }
 0x48f   : > { %6099 = vrot.lane.b32.xlu1 %v6004_v22, %s9824_s17  ;;  %5963 = vst.msk [vmem:[#allocation5 + $0x108] sm:$0xf] %vm5940_vm4, %v5889_v7  ;;  %8633 = vmatmul.mubr.bf16.gmra.mxu1 %v9728_v53 }
 0x490   : > { %9574 = vmatmul.mubr.msk.bf16.gmra.mxu0 %vm8471_vm11, %v9741_v47  ;;  %v13303_v56 = vpop.f32.mrf.mxu1  ;;  %p9762_p4 = pnand %p9761_p3, %p9755_p0 }
 0x491   : > { %v5891_v15 = vpop.permute.xlu1 %5890  ;;  %v7108_v18 = vpop.permute.xlu0 %7107 }
 0x492   : > { %5964 = vst.msk [vmem:[#allocation5 + $0x114] sm:$0xf] %vm5940_vm4, %v5891_v15  ;;  %7181 = vst.msk [vmem:[#allocation5 + $0x10c] sm:$0xf] %vm5940_vm4, %v7108_v18  ;;  %v13307_v40 = vpop.f32.mrf.mxu1 }
 0x493   : > { %7685 = vrot.lane.b32.xlu1 %v7622_v6, %s9824_s17 }
 0x494   : > { %v13310_v47 = vpop.f32.mrf.mxu1 }
 0x495   : > { %v7110_v17 = vpop.permute.xlu1 %7109  ;;  %v6082_v12 = vpop.permute.xlu0 %6081 }
 0x496   : > { %7182 = vst.msk [vmem:[#allocation5 + $0x118] sm:$0xf] %vm5940_vm4, %v7110_v17  ;;  %v13314_v6 = vpop.f32.mrf.mxu1 }
 0x497   : > { %6156 = vst.msk [vmem:[#allocation5 + $0x108] sm:$0xf] %vm6133_vm5, %v6082_v12 }
 0x498   : > { %v13318_v50 = vpop.f32.mrf.mxu1 }
 0x499   : > { %v6084_v0 = vpop.permute.xlu1 %6083  ;;  %v7668_v26 = vpop.permute.xlu0 %7667 }
 0x49a   : > { %6157 = vst.msk [vmem:[#allocation5 + $0x114] sm:$0xf] %vm6133_vm5, %v6084_v0  ;;  %7741 = vst.msk [vmem:[#allocation5 + $0x10c] sm:$0xf] %vm6133_vm5, %v7668_v26  ;;  %v13322_v7 = vpop.f32.mrf.mxu1 }
 0x49c   : > { %v13325_v0 = vpop.f32.mrf.mxu1 }
 0x49d   : > { %v7670_v31 = vpop.permute.xlu1 %7669  ;;  %v5556_v9 = vpop.permute.xlu0 %5555 }
 0x49e   : > { %7742 = vst.msk [vmem:[#allocation5 + $0x118] sm:$0xf] %vm6133_vm5, %v7670_v31 }
 0x49f   : > { %5628 = vst.msk [vmem:[#allocation5 + $0x120] sm:$0xf] %vm5603_vm7, %v5556_v9  ;;  %v13329_v9 = vpop.f32.mrf.mxu1 }
 0x4a1   : > { %v5558_v13 = vpop.permute.xlu1 %5557  ;;  %v6919_v60 = vpop.permute.xlu0 %6918  ;;  %v9731_v36 = vld [vmem:[#allocation5 + $0x108] ss:$12 sps:$4 sm:$0xff]  }
 0x4a2   : > { %5629 = vst.msk [vmem:[#allocation5 + $0x12c] sm:$0xf] %vm5603_vm7, %v5558_v13  ;;  %6990 = vst.msk [vmem:[#allocation5 + $0x124] sm:$0xf] %vm5603_vm7, %v6919_v60 }
 0x4a5   : > { %v6921_v52 = vpop.permute.xlu1 %6920  ;;  %v9729_v33 = vld [vmem:[#allocation5 + $0x10c] ss:$12 sps:$4 sm:$0xff]   ;;  %v5893_v41 = vpop.permute.xlu0 %5892 }
 0x4a6   : > { %6991 = vst.msk [vmem:[#allocation5 + $0x130] sm:$0xf] %vm5603_vm7, %v6921_v52  ;;  %8640 = vmatprep.mubr.bf16.mxu1 %v9729_v33  ;;  %v13333_v52 = vpop.f32.mrf.mxu1 }
 0x4a7   : > { %5965 = vst.msk [vmem:[#allocation5 + $0x120] sm:$0xf] %vm5940_vm4, %v5893_v41  ;;  %8641 = vmatmul.mubr.bf16.gmra.mxu1 %v9731_v36 }
 0x4a8   : > { %v13337_v41 = vpop.f32.mrf.mxu1 }
 0x4a9   : > { %v5895_v57 = vpop.permute.xlu1 %5894 }
 0x4aa   : > { %5966 = vst.msk [vmem:[#allocation5 + $0x12c] sm:$0xf] %vm5940_vm4, %v5895_v57  ;;  %v7112_v23 = vpop.permute.xlu0 %7111 }
 0x4ab   : > { %7183 = vst.msk [vmem:[#allocation5 + $0x124] sm:$0xf] %vm5940_vm4, %v7112_v23 }
 0x4ad   : > { %v7114_v27 = vpop.permute.xlu1 %7113 }
 0x4ae   : > { %7184 = vst.msk [vmem:[#allocation5 + $0x130] sm:$0xf] %vm5940_vm4, %v7114_v27  ;;  %v6086_v30 = vpop.permute.xlu0 %6085 }
 0x4af   : > { %6158 = vst.msk [vmem:[#allocation5 + $0x120] sm:$0xf] %vm6133_vm5, %v6086_v30  ;;  %v9419_v57 = vpop.f32.mrf.mxu1 }
 0x4b1   : > { %v9420_v27 = vpop.f32.mrf.mxu1 }
 0x4b2   : > { %v7672_v1 = vpop.permute.xlu0 %7671 }
 0x4b3   : > { %7743 = vst.msk [vmem:[#allocation5 + $0x124] sm:$0xf] %vm6133_vm5, %v7672_v1  ;;  %v13341_v30 = vpop.f32.mrf.mxu1 }
 0x4b4   : > { %v6088_v25 = vpop.permute.xlu1 %6087 }
 0x4b5   : > { %6159 = vst.msk [vmem:[#allocation5 + $0x12c] sm:$0xf] %vm6133_vm5, %v6088_v25 }
 0x4b6   : > { %v5560_v55 = vpop.permute.xlu0 %5559 }
 0x4b7   : > { %5630 = vst.msk [vmem:[#allocation5 + $0x138] sm:$0xf] %vm5603_vm7, %v5560_v55 }
 0x4b8   : > { %v7674_v28 = vpop.permute.xlu1 %7673 }
 0x4b9   : > { %7744 = vst.msk [vmem:[#allocation5 + $0x130] sm:$0xf] %vm6133_vm5, %v7674_v28  ;;  %v13343_v28 = vpop.f32.mrf.mxu1 }
 0x4ba   : > { %v6923_v62 = vpop.permute.xlu0 %6922 }
 0x4bb   : > { %6992 = vst.msk [vmem:[#allocation5 + $0x13c] sm:$0xf] %vm5603_vm7, %v6923_v62 }
 0x4bc   : > { %v5562_v39 = vpop.permute.xlu1 %5561  ;;  %v9734_v14 = vld [vmem:[#allocation5 + $0x120] ss:$12 sps:$4 sm:$0xff]  }
 0x4bd   : > { %5631 = vst.msk [vmem:[#allocation5 + $0x144] sm:$0xf] %vm5603_vm7, %v5562_v39 }
 0x4be   : > { %v5897_v35 = vpop.permute.xlu0 %5896 }
 0x4bf   : > { %5967 = vst.msk [vmem:[#allocation5 + $0x138] sm:$0xf] %vm5940_vm4, %v5897_v35  ;;  %v9397_v35 = vadd.f32 %v13284_v24, %v13280_v19 }
 0x4c0   : > { %v9732_v10 = vld [vmem:[#allocation5 + $0x124] ss:$12 sps:$4 sm:$0xff]  }
 0x4c1   : > { %v6925_v46 = vpop.permute.xlu1 %6924  ;;  %8648 = vmatprep.mubr.bf16.mxu1 %v9732_v10 }
 0x4c2   : > { %6993 = vst.msk [vmem:[#allocation5 + $0x148] sm:$0xf] %vm5603_vm7, %v6925_v46  ;;  %8649 = vmatmul.mubr.bf16.gmra.mxu1 %v9734_v14 }
 0x4c5   : > { %v5899_v44 = vpop.permute.xlu1 %5898 }
 0x4c6   : > { %5968 = vst.msk [vmem:[#allocation5 + $0x144] sm:$0xf] %vm5940_vm4, %v5899_v44  ;;  %v13354_v44 = vld [vmem:[%s13570_s5] ss:$0 sm:$0xff] }
 0x4c7   : > { %v7116_v42 = vpop.permute.xlu0 %7115 }
 0x4c8   : > { %7185 = vst.msk [vmem:[#allocation5 + $0x13c] sm:$0xf] %vm5940_vm4, %v7116_v42 }
 0x4cb   : > { %v7118_v61 = vpop.permute.xlu1 %7117  ;;  %v6090_v21 = vpop.permute.xlu0 %6089 }
 0x4cc   : > { %7186 = vst.msk [vmem:[#allocation5 + $0x148] sm:$0xf] %vm5940_vm4, %v7118_v61  ;;  %v13345_v39 = vpop.f32.mrf.mxu1 }
 0x4cd   : > { %6160 = vst.msk [vmem:[#allocation5 + $0x138] sm:$0xf] %vm6133_vm5, %v6090_v21 }
 0x4ce   : > { %v13347_v10 = vpop.f32.mrf.mxu1 }
 0x4cf   : > { %v7676_v11 = vpop.permute.xlu0 %7675 }
 0x4d0   : > { %7745 = vst.msk [vmem:[#allocation5 + $0x13c] sm:$0xf] %vm6133_vm5, %v7676_v11  ;;  %v13361_v11 = vld [vmem:[%s13571_s6] ss:$0 sm:$0xff] }
 0x4d1   : > { %v6092_v32 = vpop.permute.xlu1 %6091 }
 0x4d2   : > { %6161 = vst.msk [vmem:[#allocation5 + $0x144] sm:$0xf] %vm6133_vm5, %v6092_v32  ;;  %v13356_v32 = vpop.f32.mrf.mxu1 }
 0x4d3   : > { %v5564_v4 = vpop.permute.xlu0 %5563 }
 0x4d4   : > { %5632 = vst.msk [vmem:[#allocation5 + $0x150] sm:$0xf] %vm5603_vm7, %v5564_v4  ;;  %v9400_v4 = vadd.f32 %v13292_v34, %v13288_v29 }
 0x4d5   : > { %v7678_v43 = vpop.permute.xlu1 %7677 }
 0x4d6   : > { %7746 = vst.msk [vmem:[#allocation5 + $0x148] sm:$0xf] %vm6133_vm5, %v7678_v43 }
 0x4d7   : > { %v6927_v20 = vpop.permute.xlu0 %6926 }
 0x4d8   : > { %6994 = vst.msk [vmem:[#allocation5 + $0x154] sm:$0xf] %vm5603_vm7, %v6927_v20 }
 0x4d9   : > { %v5566_v58 = vpop.permute.xlu1 %5565  ;;  %v9737_v48 = vld [vmem:[#allocation5 + $0x138] ss:$12 sps:$4 sm:$0xff]  }
 0x4da   : > { %5633 = vst.msk [vmem:[#allocation5 + $0x15c] sm:$0xf] %vm5603_vm7, %v5566_v58 }
 0x4db   : > { %v5901_v51 = vpop.permute.xlu0 %5900 }
 0x4dc   : > { %5969 = vst.msk [vmem:[#allocation5 + $0x150] sm:$0xf] %vm5940_vm4, %v5901_v51  ;;  %v9409_v51 = vadd.f32 %v13314_v6, %v13310_v47 }
 0x4dd   : > { %v6929_v2 = vpop.permute.xlu1 %6928  ;;  %v9735_v63 = vld [vmem:[#allocation5 + $0x13c] ss:$12 sps:$4 sm:$0xff]  }
 0x4de   : > { %6995 = vst.msk [vmem:[#allocation5 + $0x160] sm:$0xf] %vm5603_vm7, %v6929_v2  ;;  %8656 = vmatprep.mubr.bf16.mxu1 %v9735_v63 }
 0x4df   : > { %8657 = vmatmul.mubr.bf16.gmra.mxu1 %v9737_v48  ;;  %v7120_v37 = vpop.permute.xlu0 %7119 }
 0x4e0   : > { %7187 = vst.msk [vmem:[#allocation5 + $0x154] sm:$0xf] %vm5940_vm4, %v7120_v37 }
 0x4e1   : > { %v5903_v54 = vpop.permute.xlu1 %5902 }
 0x4e2   : > { %5970 = vst.msk [vmem:[#allocation5 + $0x15c] sm:$0xf] %vm5940_vm4, %v5903_v54  ;;  %v13370_v54 = vpop.f32.mrf.mxu1 }
 0x4e3   : > { %v6094_v5 = vpop.permute.xlu0 %6093 }
 0x4e4   : > { %6162 = vst.msk [vmem:[#allocation5 + $0x150] sm:$0xf] %vm6133_vm5, %v6094_v5 }
 0x4e5   : > { %v7122_v59 = vpop.permute.xlu1 %7121 }
 0x4e6   : > { %7188 = vst.msk [vmem:[#allocation5 + $0x160] sm:$0xf] %vm5940_vm4, %v7122_v59 }
 0x4e7   : > { %v7680_v22 = vpop.permute.xlu0 %7679 }
 0x4e8   : > { %7747 = vst.msk [vmem:[#allocation5 + $0x154] sm:$0xf] %vm6133_vm5, %v7680_v22 }
 0x4e9   : > { %v6096_v3 = vpop.permute.xlu1 %6095 }
 0x4ea   : > { %6163 = vst.msk [vmem:[#allocation5 + $0x15c] sm:$0xf] %vm6133_vm5, %v6096_v3  ;;  %v9403_v3 = vadd.f32 %v13299_v45, %v13295_v38 }
 0x4eb   : > { %v5568_v8 = vpop.permute.xlu0 %5567 }
 0x4ec   : > { %5634 = vst.msk [vmem:[#allocation5 + $0x168] sm:$0xf] %vm5603_vm7, %v5568_v8 }
 0x4ed   : > { %v7682_v16 = vpop.permute.xlu1 %7681 }
 0x4ee   : > { %7748 = vst.msk [vmem:[#allocation5 + $0x160] sm:$0xf] %vm6133_vm5, %v7682_v16 }
 0x4ef   : > { %v6931_v53 = vpop.permute.xlu0 %6930 }
 0x4f0   : > { %6996 = vst.msk [vmem:[#allocation5 + $0x16c] sm:$0xf] %vm5603_vm7, %v6931_v53  ;;  %v9412_v53 = vadd.f32 %v13322_v7, %v13318_v50 }
 0x4f1   : > { %v5570_v49 = vpop.permute.xlu1 %5569  ;;  %v9740_v17 = vld [vmem:[#allocation5 + $0x150] ss:$12 sps:$4 sm:$0xff]  }
 0x4f2   : > { %5635 = vst.msk [vmem:[#allocation5 + $0x174] sm:$0xf] %vm5603_vm7, %v5570_v49 }
 0x4f3   : > { %v5905_v12 = vpop.permute.xlu0 %5904 }
 0x4f4   : > { %5971 = vst.msk [vmem:[#allocation5 + $0x168] sm:$0xf] %vm5940_vm4, %v5905_v12  ;;  %v9406_v12 = vadd.f32 %v13307_v40, %v13303_v56 }
 0x4f5   : > { %v6933_v15 = vpop.permute.xlu1 %6932  ;;  %v9738_v18 = vld [vmem:[#allocation5 + $0x154] ss:$12 sps:$4 sm:$0xff]  }
 0x4f6   : > { %6997 = vst.msk [vmem:[#allocation5 + $0x178] sm:$0xf] %vm5603_vm7, %v6933_v15  ;;  %8664 = vmatprep.mubr.bf16.mxu1 %v9738_v18 }
 0x4f7   : > { %8665 = vmatmul.mubr.bf16.gmra.mxu1 %v9740_v17  ;;  %v7124_v31 = vpop.permute.xlu0 %7123 }
 0x4f8   : > { %7189 = vst.msk [vmem:[#allocation5 + $0x16c] sm:$0xf] %vm5940_vm4, %v7124_v31 }
 0x4f9   : > { %v5907_v26 = vpop.permute.xlu1 %5906  ;;  %v9431_v22 = vpop.f32.mrf.mxu1 }
 0x4fa   : > { %5972 = vst.msk [vmem:[#allocation5 + $0x174] sm:$0xf] %vm5940_vm4, %v5907_v26 }
 0x4fb   : > { %v6098_v60 = vpop.permute.xlu0 %6097  ;;  %v9432_v26 = vpop.f32.mrf.mxu1 }
 0x4fc   : > { %6164 = vst.msk [vmem:[#allocation5 + $0x168] sm:$0xf] %vm6133_vm5, %v6098_v60 }
 0x4fd   : > { %v7126_v13 = vpop.permute.xlu1 %7125 }
 0x4fe   : > { %7190 = vst.msk [vmem:[#allocation5 + $0x178] sm:$0xf] %vm5940_vm4, %v7126_v13 }
 0x4ff   : > { %v7684_v36 = vpop.permute.xlu0 %7683 }
 0x500   : > { %7749 = vst.msk [vmem:[#allocation5 + $0x16c] sm:$0xf] %vm6133_vm5, %v7684_v36 }
 0x501   : > { %v6100_v33 = vpop.permute.xlu1 %6099 }
 0x502   : > { %6165 = vst.msk [vmem:[#allocation5 + $0x174] sm:$0xf] %vm6133_vm5, %v6100_v33  ;;  %v9421_v33 = vadd.f32 %v9420_v27, %v9419_v57 }
 0x505   : > { %v7686_v23 = vpop.permute.xlu1 %7685 }
 0x506   : > { %7750 = vst.msk [vmem:[#allocation5 + $0x178] sm:$0xf] %vm6133_vm5, %v7686_v23 }
 0x509   : > { %v9744_v1 = vld [vmem:[#allocation5 + $0x168] ss:$12 sps:$4 sm:$0xff]  }
 0x50d   : > { %v9742_v25 = vld [vmem:[#allocation5 + $0x16c] ss:$12 sps:$4 sm:$0xff]   ;;  %v9389_v55 = vpop.f32.mrf.mxu0 }
 0x50e   : > { %8672 = vmatprep.mubr.bf16.mxu1 %v9742_v25 }
 0x50f   : > { %8673 = vmatmul.mubr.bf16.gmra.mxu1 %v9744_v1  ;;  %v9390_v62 = vpop.f32.mrf.mxu0  ;;  %v9434_v1 = vpop.f32.mrf.mxu1 }
 0x510   : > { %v9391_v61 = vadd.f32 %v9390_v62, %v9389_v55 }
 0x511   : > { %v9392_v46 = vpop.f32.mrf.mxu0 }
 0x513   : > { %v9393_v14 = vpop.f32.mrf.mxu0 }
 0x514   : > { %v9394_v20 = vadd.f32 %v9393_v14, %v9392_v46  ;;  %v9415_v14 = vadd.f32 %v13329_v9, %v13325_v0 }
 0x516   : > { %v9547_v42 = vpop.f32.mrf.mxu0 }
 0x517   : > { %v8724_v21 = vadd.f32 %v9547_v42, %v9397_v35  ;;  %v9424_v42 = vadd.f32 %v13343_v28, %v13341_v30 }
 0x518   : > { %v8715_v43 = vpop.f32.mrf.mxu0 }
 0x519   : > { %v8850_v19 = vmul.f32 %v13354_v44, %v8724_v21  ;;  %v8716_v24 = vadd.f32 %v9391_v61, %v8715_v43 }
 0x51a   : > { %v9548_v58 = vpop.f32.mrf.mxu0 }
 0x51b   : > { %v8888_v2 = vadd.f32 %v13361_v11, %v8850_v19  ;;  %v8848_v63 = vmul.f32 %v13354_v44, %v8716_v24  ;;  %v8727_v48 = vadd.f32 %v9548_v58, %v9400_v4  ;;  %v9435_v4 = vpop.f32.mrf.mxu1  ;;  %v9418_v58 = vadd.f32 %v13337_v41, %v13333_v52 }
 0x51c   : > { %v8718_v37 = vpop.f32.mrf.mxu0 }
 0x51d   : > { %v8920_v59 = vmax.f32 %v8888_v2, 0.0  ;;  %v8886_v29 = vadd.f32 %v13361_v11, %v8848_v63  ;;  %v8851_v34 = vmul.f32 %v13354_v44, %v8727_v48  ;;  %v8719_v5 = vadd.f32 %v9394_v20, %v8718_v37 }
 0x51e   : > { %v9433_v63 = vadd.f32 %v9432_v26, %v9431_v22 }
 0x51f   : > { %8952 = vst.msk [vmem:[%s9925_s20 + $0x10] sm:$0xff] %vm8471_vm11, %v8920_v59  ;;  %v8918_v8 = vmax.f32 %v8886_v29, 0.0  ;;  %v8889_v47 = vadd.f32 %v13361_v11, %v8851_v34  ;;  %v8849_v6 = vmul.f32 %v13354_v44, %v8719_v5  ;;  %v9427_v59 = vadd.f32 %v13347_v10, %v13345_v39 }
 0x520   : > { %v9551_v16 = vpop.f32.mrf.mxu0  ;;  %v9430_v39 = vadd.f32 %v13370_v54, %v13356_v32 }
 0x521   : > { %v8740_v49 = vadd.f32 %v9551_v16, %v9409_v51  ;;  %8950 = vst.msk [vmem:[%s9925_s20] sm:$0xff] %vm8471_vm11, %v8918_v8  ;;  %v8921_v18 = vmax.f32 %v8889_v47, 0.0  ;;  %v8887_v38 = vadd.f32 %v13361_v11, %v8849_v6 }
 0x522   : > { %v8731_v15 = vpop.f32.mrf.mxu0 }
 0x523   : > { %v8854_v45 = vmul.f32 %v13354_v44, %v8740_v49  ;;  %v8732_v17 = vadd.f32 %v9403_v3, %v8731_v15  ;;  %8953 = vst.msk [vmem:[%s9925_s20 + $0x18] sm:$0xff] %vm8471_vm11, %v8921_v18  ;;  %v8919_v13 = vmax.f32 %v8887_v38, 0.0  ;;  %v9436_v3 = vadd.f32 %v9435_v4, %v9434_v1 }
 0x524   : > { %v9552_v31 = vpop.f32.mrf.mxu0 }
 0x525   : > { %v8892_v50 = vadd.f32 %v13361_v11, %v8854_v45  ;;  %v8852_v7 = vmul.f32 %v13354_v44, %v8732_v17  ;;  %v8743_v60 = vadd.f32 %v9552_v31, %v9412_v53  ;;  %8951 = vst.msk [vmem:[%s9925_s20 + $0x8] sm:$0xff] %vm8471_vm11, %v8919_v13 }
 0x526   : > { %v8734_v36 = vpop.f32.mrf.mxu0 }
 0x527   : > { %v8924_v23 = vmax.f32 %v8892_v50, 0.0  ;;  %v8890_v25 = vadd.f32 %v13361_v11, %v8852_v7  ;;  %v8855_v56 = vmul.f32 %v13354_v44, %v8743_v60  ;;  %v8735_v40 = vadd.f32 %v9406_v12, %v8734_v36  ;;  %v9437_v28 = vpop.f32.mrf.mxu1 }
 0x528   : > { %v9555_v55 = vpop.f32.mrf.mxu0 }
 0x529   : > { %8956 = vst.msk [vmem:[%s9925_s20 + $0x30] sm:$0xff] %vm8471_vm11, %v8924_v23  ;;  %v8922_v62 = vmax.f32 %v8890_v25, 0.0  ;;  %v8893_v46 = vadd.f32 %v13361_v11, %v8855_v56  ;;  %v8853_v57 = vmul.f32 %v13354_v44, %v8735_v40  ;;  %v8756_v27 = vadd.f32 %v9555_v55, %v9421_v33  ;;  %v9438_v22 = vpop.f32.mrf.mxu1 }
 0x52a   : > { %v8747_v35 = vpop.f32.mrf.mxu0  ;;  %v9439_v50 = vadd.f32 %v9438_v22, %v9437_v28 }
 0x52b   : > { %8954 = vst.msk [vmem:[%s9925_s20 + $0x20] sm:$0xff] %vm8471_vm11, %v8922_v62  ;;  %v8925_v61 = vmax.f32 %v8893_v46, 0.0  ;;  %v8891_v21 = vadd.f32 %v13361_v11, %v8853_v57  ;;  %v8858_v43 = vmul.f32 %v13354_v44, %v8756_v27  ;;  %v8748_v19 = vadd.f32 %v9415_v14, %v8747_v35  ;;  %v9440_v17 = vpop.f32.mrf.mxu1 }
 0x52c   : > { %v9556_v24 = vpop.f32.mrf.mxu0 }
 0x52d   : > { %8957 = vst.msk [vmem:[%s9925_s20 + $0x38] sm:$0xff] %vm8471_vm11, %v8925_v61  ;;  %v8923_v0 = vmax.f32 %v8891_v21, 0.0  ;;  %v8896_v9 = vadd.f32 %v13361_v11, %v8858_v43  ;;  %v8759_v30 = vadd.f32 %v9556_v24, %v9424_v42  ;;  %v8856_v20 = vmul.f32 %v13354_v44, %v8748_v19  ;;  %v9441_v36 = vpop.f32.mrf.mxu1 }
 0x52e   : > { %v8750_v2 = vpop.f32.mrf.mxu0  ;;  %v9442_v55 = vadd.f32 %v9441_v36, %v9440_v17 }
 0x52f   : > { %8955 = vst.msk [vmem:[%s9925_s20 + $0x28] sm:$0xff] %vm8471_vm11, %v8923_v0  ;;  %v8928_v48 = vmax.f32 %v8896_v9, 0.0  ;;  %v8859_v51 = vmul.f32 %v13354_v44, %v8759_v30  ;;  %v8751_v37 = vadd.f32 %v9418_v58, %v8750_v2  ;;  %v8894_v52 = vadd.f32 %v13361_v11, %v8856_v20 }
 0x530   : > { %v9559_v41 = vpop.f32.mrf.mxu0 }
 0x531   : > { %8960 = vst.msk [vmem:[%s9925_s20 + $0x50] sm:$0xff] %vm8471_vm11, %v8928_v48  ;;  %v8897_v29 = vadd.f32 %v13361_v11, %v8859_v51  ;;  %v8857_v34 = vmul.f32 %v13354_v44, %v8751_v37  ;;  %v8772_v5 = vadd.f32 %v9559_v41, %v9433_v63  ;;  %v8926_v16 = vmax.f32 %v8894_v52, 0.0 }
 0x532   : > { %v8763_v8 = vpop.f32.mrf.mxu0 }
 0x533   : > { %v8929_v47 = vmax.f32 %v8897_v29, 0.0  ;;  %v8895_v6 = vadd.f32 %v13361_v11, %v8857_v34  ;;  %v8862_v49 = vmul.f32 %v13354_v44, %v8772_v5  ;;  %v8764_v53 = vadd.f32 %v9427_v59, %v8763_v8  ;;  %8958 = vst.msk [vmem:[%s9925_s20 + $0x40] sm:$0xff] %vm8471_vm11, %v8926_v16 }
 0x534   : > { %v9560_v10 = vpop.f32.mrf.mxu0 }
 0x535   : > { %8961 = vst.msk [vmem:[%s9925_s20 + $0x58] sm:$0xff] %vm8471_vm11, %v8929_v47  ;;  %v8927_v15 = vmax.f32 %v8895_v6, 0.0  ;;  %v8900_v18 = vadd.f32 %v13361_v11, %v8862_v49  ;;  %v8860_v38 = vmul.f32 %v13354_v44, %v8764_v53  ;;  %v8775_v45 = vadd.f32 %v9560_v10, %v9436_v3 }
 0x536   : > { %v8766_v12 = vpop.f32.mrf.mxu0 }
 0x537   : > { %8959 = vst.msk [vmem:[%s9925_s20 + $0x48] sm:$0xff] %vm8471_vm11, %v8927_v15  ;;  %v8932_v26 = vmax.f32 %v8900_v18, 0.0  ;;  %v8898_v32 = vadd.f32 %v13361_v11, %v8860_v38  ;;  %v8863_v54 = vmul.f32 %v13354_v44, %v8775_v45  ;;  %v8767_v31 = vadd.f32 %v9430_v39, %v8766_v12 }
 0x538   : > { %v9563_v13 = vpop.f32.mrf.mxu0 }
 0x539   : > { %8964 = vst.msk [vmem:[%s9925_s20 + $0x70] sm:$0xff] %vm8471_vm11, %v8932_v26  ;;  %v8930_v7 = vmax.f32 %v8898_v32, 0.0  ;;  %v8901_v60 = vadd.f32 %v13361_v11, %v8863_v54  ;;  %v8861_v33 = vmul.f32 %v13354_v44, %v8767_v31 }
 0x53a   : > { %v8779_v23 = vpop.f32.mrf.mxu0 }
 0x53b   : > { %8962 = vst.msk [vmem:[%s9925_s20 + $0x60] sm:$0xff] %vm8471_vm11, %v8930_v7  ;;  %v8933_v25 = vmax.f32 %v8901_v60, 0.0  ;;  %v8899_v56 = vadd.f32 %v13361_v11, %v8861_v33  ;;  %v8780_v40 = vadd.f32 %v9439_v50, %v8779_v23 }
 0x53c   : > { %v9564_v1 = vpop.f32.mrf.mxu0 }
 0x53d   : > { %8965 = vst.msk [vmem:[%s9925_s20 + $0x78] sm:$0xff] %vm8471_vm11, %v8933_v25  ;;  %v8931_v62 = vmax.f32 %v8899_v56, 0.0  ;;  %v8864_v46 = vmul.f32 %v13354_v44, %v8780_v40 }
 0x53e   : > { %v8782_v57 = vpop.f32.mrf.mxu0  ;;  %v9443_v35 = vpop.f32.mrf.mxu1 }
 0x53f   : > { %8963 = vst.msk [vmem:[%s9925_s20 + $0x68] sm:$0xff] %vm8471_vm11, %v8931_v62  ;;  %v8902_v27 = vadd.f32 %v13361_v11, %v8864_v46  ;;  %v8783_v14 = vadd.f32 %v9442_v55, %v8782_v57 }
 0x540   : > { %v9444_v21 = vpop.f32.mrf.mxu1  ;;  %v9567_v37 = vpop.f32.mrf.mxu0 }
 0x541   : > { %v8934_v42 = vmax.f32 %v8902_v27, 0.0  ;;  %v8865_v61 = vmul.f32 %v13354_v44, %v8783_v14  ;;  %v9445_v4 = vadd.f32 %v9444_v21, %v9443_v35 }
 0x542   : > { %v9446_v19 = vpop.f32.mrf.mxu1  ;;  %v8795_v52 = vpop.f32.mrf.mxu0 }
 0x543   : > { %8966 = vst.msk [vmem:[%s9925_s20 + $0x80] sm:$0xff] %vm8471_vm11, %v8934_v42  ;;  %v8903_v43 = vadd.f32 %v13361_v11, %v8865_v61  ;;  %v8788_v58 = vadd.f32 %v9563_v13, %v9445_v4 }
 0x544   : > { %v9447_v0 = vpop.f32.mrf.mxu1  ;;  %v9568_v34 = vpop.f32.mrf.mxu0 }
 0x545   : > { %v8935_v24 = vmax.f32 %v8903_v43, 0.0  ;;  %v8866_v9 = vmul.f32 %v13354_v44, %v8788_v58  ;;  %v9448_v30 = vadd.f32 %v9447_v0, %v9446_v19 }
 0x546   : > { %v8798_v47 = vpop.f32.mrf.mxu0 }
 0x547   : > { %8967 = vst.msk [vmem:[%s9925_s20 + $0x88] sm:$0xff] %vm8471_vm11, %v8935_v24  ;;  %v8904_v28 = vadd.f32 %v13361_v11, %v8866_v9  ;;  %v8791_v20 = vadd.f32 %v9564_v1, %v9448_v30 }
 0x548   : > { %v9571_v36 = vpop.f32.mrf.mxu0 }
 0x549   : > { %v8936_v2 = vmax.f32 %v8904_v28, 0.0  ;;  %v8867_v63 = vmul.f32 %v13354_v44, %v8791_v20 }
 0x54a   : > { %v8811_v23 = vpop.f32.mrf.mxu0 }
 0x54b   : > { %8968 = vst.msk [vmem:[%s9925_s20 + $0x90] sm:$0xff] %vm8471_vm11, %v8936_v2  ;;  %v8905_v48 = vadd.f32 %v13361_v11, %v8867_v63 }
 0x54c   : > { %v9572_v1 = vpop.f32.mrf.mxu0 }
 0x54d   : > { %v8937_v51 = vmax.f32 %v8905_v48, 0.0 }
 0x54e   : > { %v8814_v14 = vpop.f32.mrf.mxu0 }
 0x54f   : > { %8969 = vst.msk [vmem:[%s9925_s20 + $0x98] sm:$0xff] %vm8471_vm11, %v8937_v51  ;;  %v9449_v41 = vpop.f32.mrf.mxu1 }
 0x551   : > { %v9450_v59 = vpop.f32.mrf.mxu1 }
 0x552   : > { %v9451_v29 = vadd.f32 %v9450_v59, %v9449_v41  ;;  %v9575_v41 = vpop.f32.mrf.mxu0 }
 0x553   : > { %v9452_v5 = vpop.f32.mrf.mxu1 }
 0x554   : > { %v8796_v3 = vadd.f32 %v9451_v29, %v8795_v52  ;;  %v8827_v59 = vpop.f32.mrf.mxu0 }
 0x555   : > { %v9453_v22 = vpop.f32.mrf.mxu1 }
 0x556   : > { %v8868_v16 = vmul.f32 %v13354_v44, %v8796_v3  ;;  %v9454_v8 = vadd.f32 %v9453_v22, %v9452_v5  ;;  %v9576_v5 = vpop.f32.mrf.mxu0 }
 0x558   : > { %v8906_v6 = vadd.f32 %v13361_v11, %v8868_v16  ;;  %v8799_v49 = vadd.f32 %v9454_v8, %v8798_v47  ;;  %v8830_v47 = vpop.f32.mrf.mxu0 }
 0x55a   : > { %v8938_v53 = vmax.f32 %v8906_v6, 0.0  ;;  %v8869_v39 = vmul.f32 %v13354_v44, %v8799_v49 }
 0x55c   : > { %8970 = vst.msk [vmem:[%s9925_s20 + $0xa0] sm:$0xff] %vm8471_vm11, %v8938_v53  ;;  %v8907_v10 = vadd.f32 %v13361_v11, %v8869_v39 }
 0x55e   : > { %v8939_v15 = vmax.f32 %v8907_v10, 0.0 }
 0x560   : > { %8971 = vst.msk [vmem:[%s9925_s20 + $0xa8] sm:$0xff] %vm8471_vm11, %v8939_v15 }
 0x567   : > { %v9455_v18 = vpop.f32.mrf.mxu1 }
 0x569   : > { %v9456_v38 = vpop.f32.mrf.mxu1 }
 0x56a   : > { %v9457_v45 = vadd.f32 %v9456_v38, %v9455_v18 }
 0x56b   : > { %v9458_v17 = vpop.f32.mrf.mxu1 }
 0x56c   : > { %v8804_v12 = vadd.f32 %v9567_v37, %v9457_v45 }
 0x56d   : > { %v9459_v26 = vpop.f32.mrf.mxu1 }
 0x56e   : > { %v8870_v32 = vmul.f32 %v13354_v44, %v8804_v12  ;;  %v9460_v54 = vadd.f32 %v9459_v26, %v9458_v17 }
 0x570   : > { %v8908_v31 = vadd.f32 %v13361_v11, %v8870_v32  ;;  %v8807_v13 = vadd.f32 %v9568_v34, %v9460_v54 }
 0x572   : > { %v8940_v50 = vmax.f32 %v8908_v31, 0.0  ;;  %v8871_v7 = vmul.f32 %v13354_v44, %v8807_v13 }
 0x574   : > { %8972 = vst.msk [vmem:[%s9925_s20 + $0xb0] sm:$0xff] %vm8471_vm11, %v8940_v50  ;;  %v8909_v60 = vadd.f32 %v13361_v11, %v8871_v7 }
 0x576   : > { %v8941_v33 = vmax.f32 %v8909_v60, 0.0 }
 0x578   : > { %8973 = vst.msk [vmem:[%s9925_s20 + $0xb8] sm:$0xff] %vm8471_vm11, %v8941_v33 }
 0x582   : > { %v9461_v25 = vpop.f32.mrf.mxu1 }
 0x584   : > { %v9462_v56 = vpop.f32.mrf.mxu1 }
 0x585   : > { %v9463_v40 = vadd.f32 %v9462_v56, %v9461_v25 }
 0x586   : > { %v9464_v55 = vpop.f32.mrf.mxu1 }
 0x587   : > { %v8812_v62 = vadd.f32 %v9463_v40, %v8811_v23 }
 0x588   : > { %v9465_v46 = vpop.f32.mrf.mxu1 }
 0x589   : > { %v8872_v57 = vmul.f32 %v13354_v44, %v8812_v62  ;;  %v9466_v27 = vadd.f32 %v9465_v46, %v9464_v55 }
 0x58b   : > { %v8910_v35 = vadd.f32 %v13361_v11, %v8872_v57  ;;  %v8815_v42 = vadd.f32 %v9466_v27, %v8814_v14 }
 0x58d   : > { %v8942_v61 = vmax.f32 %v8910_v35, 0.0  ;;  %v8873_v21 = vmul.f32 %v13354_v44, %v8815_v42 }
 0x58f   : > { %8974 = vst.msk [vmem:[%s9925_s20 + $0xc0] sm:$0xff] %vm8471_vm11, %v8942_v61  ;;  %v8911_v43 = vadd.f32 %v13361_v11, %v8873_v21 }
 0x591   : > { %v8943_v4 = vmax.f32 %v8911_v43, 0.0 }
 0x593   : > { %8975 = vst.msk [vmem:[%s9925_s20 + $0xc8] sm:$0xff] %vm8471_vm11, %v8943_v4 }
 0x59f   : > { %v9467_v19 = vpop.f32.mrf.mxu1 }
 0x5a1   : > { %v9468_v24 = vpop.f32.mrf.mxu1 }
 0x5a2   : > { %v9469_v58 = vadd.f32 %v9468_v24, %v9467_v19 }
 0x5a3   : > { %v9470_v0 = vpop.f32.mrf.mxu1 }
 0x5a4   : > { %v8820_v9 = vadd.f32 %v9571_v36, %v9469_v58 }
 0x5a5   : > { %v9471_v30 = vpop.f32.mrf.mxu1 }
 0x5a6   : > { %v8874_v28 = vmul.f32 %v13354_v44, %v8820_v9  ;;  %v9472_v20 = vadd.f32 %v9471_v30, %v9470_v0 }
 0x5a8   : > { %v8912_v2 = vadd.f32 %v13361_v11, %v8874_v28  ;;  %v8823_v63 = vadd.f32 %v9572_v1, %v9472_v20 }
 0x5aa   : > { %v8944_v48 = vmax.f32 %v8912_v2, 0.0  ;;  %v8875_v51 = vmul.f32 %v13354_v44, %v8823_v63 }
 0x5ac   : > { %8976 = vst.msk [vmem:[%s9925_s20 + $0xd0] sm:$0xff] %vm8471_vm11, %v8944_v48  ;;  %v8913_v37 = vadd.f32 %v13361_v11, %v8875_v51 }
 0x5ae   : > { %v8945_v52 = vmax.f32 %v8913_v37, 0.0 }
 0x5b0   : > { %8977 = vst.msk [vmem:[%s9925_s20 + $0xd8] sm:$0xff] %vm8471_vm11, %v8945_v52 }
 0x5b7   : > { %v9473_v29 = vpop.f32.mrf.mxu1 }
 0x5b9   : > { %v9474_v34 = vpop.f32.mrf.mxu1 }
 0x5ba   : > { %v9475_v3 = vadd.f32 %v9474_v34, %v9473_v29 }
 0x5bb   : > { %v9476_v22 = vpop.f32.mrf.mxu1 }
 0x5bc   : > { %v8828_v16 = vadd.f32 %v9475_v3, %v8827_v59 }
 0x5bd   : > { %v9477_v8 = vpop.f32.mrf.mxu1 }
 0x5be   : > { %v8876_v6 = vmul.f32 %v13354_v44, %v8828_v16  ;;  %v9478_v49 = vadd.f32 %v9477_v8, %v9476_v22 }
 0x5c0   : > { %v8914_v53 = vadd.f32 %v13361_v11, %v8876_v6  ;;  %v8831_v39 = vadd.f32 %v9478_v49, %v8830_v47 }
 0x5c2   : > { %v8946_v10 = vmax.f32 %v8914_v53, 0.0  ;;  %v8877_v15 = vmul.f32 %v13354_v44, %v8831_v39 }
 0x5c4   : > { %8978 = vst.msk [vmem:[%s9925_s20 + $0xe0] sm:$0xff] %vm8471_vm11, %v8946_v10  ;;  %v8915_v18 = vadd.f32 %v13361_v11, %v8877_v15 }
 0x5c6   : > { %v8947_v38 = vmax.f32 %v8915_v18, 0.0 }
 0x5c8   : > { %8979 = vst.msk [vmem:[%s9925_s20 + $0xe8] sm:$0xff] %vm8471_vm11, %v8947_v38 }
 0x5cf   : > { %v9479_v45 = vpop.f32.mrf.mxu1 }
 0x5d1   : > { %v9480_v17 = vpop.f32.mrf.mxu1 }
 0x5d2   : > { %v9481_v12 = vadd.f32 %v9480_v17, %v9479_v45 }
 0x5d3   : > { %v9482_v26 = vpop.f32.mrf.mxu1 }
 0x5d4   : > { %v8836_v32 = vadd.f32 %v9575_v41, %v9481_v12 }
 0x5d5   : > { %v9483_v54 = vpop.f32.mrf.mxu1 }
 0x5d6   : > { %v8878_v31 = vmul.f32 %v13354_v44, %v8836_v32  ;;  %v9484_v13 = vadd.f32 %v9483_v54, %v9482_v26 }
 0x5d8   : > { %v8916_v50 = vadd.f32 %v13361_v11, %v8878_v31  ;;  %v8839_v7 = vadd.f32 %v9576_v5, %v9484_v13 }
 0x5da   : > { %v8948_v60 = vmax.f32 %v8916_v50, 0.0  ;;  %v8879_v33 = vmul.f32 %v13354_v44, %v8839_v7 }
 0x5dc   : > { %8980 = vst.msk [vmem:[%s9925_s20 + $0xf0] sm:$0xff] %vm8471_vm11, %v8948_v60  ;;  %v8917_v36 = vadd.f32 %v13361_v11, %v8879_v33 }
 0x5de   : > { %v8949_v23 = vmax.f32 %v8917_v36, 0.0 }
 0x5e0   : > { %8981 = vst.msk [vmem:[%s9925_s20 + $0xf8] sm:$0xff] %vm8471_vm11, %v8949_v23 }
 0x5e1   : > { %9765 = shalt.err (!%p9762_p4)
}
 0x5e2   : > { %s9766_s13 = scalar_lea.hbm %s13516_s9, 4096  ;;  %s9770_s18 = scalar_lea.hbm %s13572_s7, 8192 }
 0x5e3   : > { %p9767_p7 = scmp.ne.s32.totalorder %s13516_s9, %s9766_s13  ;;  %p9771_p10 = scmp.lt.s32.totalorder %s13516_s9, %s13572_s7 }
 0x5e4   : > { %p9772_p11 = scmp.lt.s32.totalorder %s9770_s18, %s9766_s13 }
 0x5e5   : > { %p9768_p8 = pnand %p9767_p7, %p9905_p5 }
 0x5e6   : > { %p9773_p12 = por %p9772_p11, %p9771_p10 }
 0x5e7   : > { %p9769_p9 = pneg %p9768_p8 }
 0x5e9   : > { %p9774_p13 = pnand %p9773_p12, %p9769_p9 }
 0x5eb   : > { %9777 = shalt.err (!%p9774_p13)
}
 0x5ec   : > { %s9826_s8 = smov 128  }
 0x5ed   : > { %9594 = dma.vmem_to_hbm [thread:$0]  (%p9905_p5), %s13518_s21, 4096, %s13516_s9, %s13524_s28, %s9826_s8, %s9826_s8, %s9816_s22  }
 0x5ee PF: > { %p9600_p0 = scmp.ge.s32.totalorder %s9812_s27, 2  ;;  %s9011_s14 = sand.u32 1, %s9800_s24  }
 0x5ef   : > { %s9012_s16 = scalar_lea.sflag [#allocation7], %s9011_s14 }
 0x5f0   : > { %p9597_p1 = pnand %p9600_p0, %p9909_p6 }
 0x5f2   : > { %p9598_p2 = pneg %p9597_p1 }
 0x5f4   : > { %9795 = dma.done.wait (%p9598_p2), %s9012_s16, 4096  }
 0x5f5   : > { %9797 = vsyncadd (%p9598_p2), %s9012_s16, 4294963200  ;;  %p17_p3 = scmp.ge.s32.totalorder %s9892_s30, 4   ;;  %s13615_s24 = smov %s9804_s25 }
 0x5f6   : > { %s13616_s25 = smov %s9808_s26  ;;  %s13617_s26 = smov %s9903_s10 }
 0x5f7   : > { %s13618_s27 = smov %s9892_s30  ;;  %19 = sbr.rel (!%p17_p3) target bundleno = 3 (0x3), region = 91 }
 0x5fc   :  { %9017 = vsyncpa [#allocation7], 1 }
 0x5fd   :  { %9019 = vsyncpa [#allocation7 + $0x1], 1 }

</bundles_post_ra>
